<compile_context>
chip_gen: v5e
topology: v5e:2x2
jax: 0.10.0
libtpu: 0.0.40
codegen_flags: <defaults>
</compile_context>

<pallas_src>
import functools

import numpy as np
import jax
import jax.numpy as jnp
from jax.experimental import pallas as pl
from jax.experimental.pallas import tpu as pltpu


# ----------------------------------------------------------------------------
# Glue: PyTorch-compatible bicubic interpolation matrix (align_corners=False).
# ----------------------------------------------------------------------------
def bicubic_matrix(in_size: int, out_size: int) -> np.ndarray:
    """Dense (out_size, in_size) matrix W s.t. y = W @ x matches
    torch.nn.functional.interpolate(mode='bicubic', align_corners=False)."""
    A = -0.75  # PyTorch's cubic coefficient

    def cc1(x):  # |x| <= 1
        return ((A + 2.0) * x - (A + 3.0)) * x * x + 1.0

    def cc2(x):  # 1 < |x| < 2
        return ((A * x - 5.0 * A) * x + 8.0 * A) * x - 4.0 * A

    scale = in_size / out_size
    W = np.zeros((out_size, in_size), dtype=np.float32)
    for i in range(out_size):
        src = (i + 0.5) * scale - 0.5
        i0 = int(np.floor(src))
        t = src - i0
        coeffs = [cc2(t + 1.0), cc1(t), cc1(1.0 - t), cc2(2.0 - t)]
        for tap, c in zip(range(i0 - 1, i0 + 3), coeffs):
            tap = min(max(tap, 0), in_size - 1)  # edge clamp (replication)
            W[i, tap] += c
    return W


# ----------------------------------------------------------------------------
# Pallas kernel: batched resize (padding folded in) + VPU conv + bias.
# ----------------------------------------------------------------------------
def _filtered_resize_kernel(x_ref, whe_ref, wwe_ref, w_ref, b_ref, o_ref,
                            *, NB, C, Hout, Wout, K, HP, WP):
    # x_ref:   (NB*C*Win, Hin)  VMEM  activations for this batch tile
    #                                 (row = (n*C + c)*Win + q, col = Hin)
    # whe_ref: (Hin, HP)        VMEM  circ.-extended H-interp matrix (transposed,
    #                                 zero-padded to HP = ceil((Hout+2P)/8)*8)
    # wwe_ref: (Win, WP)        VMEM  circ.-extended W-interp matrix (transposed)
    # w_ref:   (K*K*C*C,)       SMEM  conv weights, index ((ki*K+kj)*C+o)*C+c
    # b_ref:   (C,)             SMEM  conv bias
    # o_ref:   (NB, C, Hout, Wout)
    P = NB * C                       # number of (H, W) planes in this tile
    Win = wwe_ref.shape[0]

    x = x_ref[...]
    whe = whe_ref[...]
    wwe = wwe_ref[...]

    # --- separable bicubic resize as two batched MXU matmuls.  The circular
    #     padding the conv needs is already baked into whe / wwe, so the
    #     result r is the padded, resized image -- no pad/concat/roll here.
    t = jnp.dot(x, whe, preferred_element_type=jnp.float32)     # (P*Win, HP)
    t = t.reshape(P, Win, HP)                                    # free regroup
    t = jnp.swapaxes(t, 1, 2)                                    # (P, HP, Win)
    t = t.reshape(P * HP, Win)                                   # free (HP % 8 == 0)
    r = jnp.dot(t, wwe, preferred_element_type=jnp.float32)      # (P*HP, WP)
    r = r.reshape(P, HP, WP)          # (plane, Hout+2*PAD (+align pad), Wout+2*PAD)

    # --- K x K conv over C channels: scalar weights from SMEM, broadcast
    #     multiply-adds on the VPU.  Taps are static slices of the padded r.
    accs = [jnp.zeros((Hout, Wout), jnp.float32) for _ in range(P)]
    for kj in range(K):
        rw = r[:, :, kj:kj + Wout]                               # one lane shift / kj
        for ki in range(K):
            win = rw[:, ki:ki + Hout, :]                         # (P, Hout, Wout)
            for n in range(NB):
                for c in range(C):
                    patch = win[n * C + c]                       # (Hout, Wout)
                    for o in range(C):
                        wv = w_ref[((ki * K + kj) * C + o) * C + c]
                        accs[n * C + o] = accs[n * C + o] + wv * patch

    outs = [accs[n * C + o] + b_ref[o] for n in range(NB) for o in range(C)]
    out = jnp.stack(outs, axis=0).reshape(NB, C, Hout, Wout)
    o_ref[...] = out.astype(o_ref.dtype)


def filtered_resize(x, wh, ww, conv_w, conv_b):
    """x: (N, C, Hin, Win) f32; wh: (Hout, Hin); ww: (Wout, Win);
    conv_w: (C, C, K, K); conv_b: (C,).  Returns (N, C, Hout, Wout) f32."""
    N, C, Hin, Win = x.shape
    wh = np.asarray(wh, np.float32)
    ww = np.asarray(ww, np.float32)
    Hout = wh.shape[0]
    Wout = ww.shape[0]
    K = conv_w.shape[-1]
    PAD = (K - 1) // 2

    # Circularly-extended interpolation matrices (transposed so the
    # contraction dim comes first).  Extending their output rows/cols by PAD
    # (circular index) is exactly equivalent to circularly padding the resize
    # output, so the conv padding costs nothing inside the kernel.  The H
    # extension is zero-padded up to a multiple of 8 so the in-kernel
    # reshapes stay sublane-tile aligned.
    Hext = Hout + 2 * PAD
    HP = -(-Hext // 8) * 8
    WP = Wout + 2 * PAD
    whe = np.zeros((Hin, HP), np.float32)
    whe[:, :Hext] = wh[[(j - PAD) % Hout for j in range((Hext))], :].T
    wwe = np.ascontiguousarray(
        ww[[(j - PAD) % Wout for j in range(WP)], :].T).astype(np.float32)

    # HBM-side layout plumbing (free): planes with Hin innermost so the first
    # matmul contracts Hin; conv weights flattened tap-major for SMEM.
    x2 = jnp.transpose(x, (0, 1, 3, 2)).reshape(N * C * Win, Hin)
    w_flat = jnp.transpose(conv_w, (2, 3, 0, 1)).reshape(-1)  # ((ki*K+kj)*C+o)*C+c
    b_flat = conv_b.reshape(-1).astype(jnp.float32)

    # Two "parallel" batch tiles when possible so both v7x TensorCores get a
    # grid step; on single-TC v5e/v6e the extra step costs ~0.35us.
    num_tiles = 2 if (N >= 2 and N % 2 == 0) else 1
    NB = N // num_tiles

    kernel = functools.partial(_filtered_resize_kernel, NB=NB, C=C,
                               Hout=Hout, Wout=Wout, K=K, HP=HP, WP=WP)

    return pl.pallas_call(
        kernel,
        out_shape=jax.ShapeDtypeStruct((N, C, Hout, Wout), jnp.float32),
        grid=(num_tiles,),
        in_specs=[
            pl.BlockSpec((NB * C * Win, Hin), lambda i: (i, 0)),
            pl.BlockSpec((Hin, HP), lambda i: (0, 0)),
            pl.BlockSpec((Win, WP), lambda i: (0, 0)),
            pl.BlockSpec(memory_space=pltpu.MemorySpace.SMEM),
            pl.BlockSpec(memory_space=pltpu.MemorySpace.SMEM),
        ],
        out_specs=pl.BlockSpec((NB, C, Hout, Wout), lambda i: (i, 0, 0, 0)),
        compiler_params=pltpu.CompilerParams(
            dimension_semantics=("parallel",)),
    )(x2, jnp.asarray(whe), jnp.asarray(wwe), w_flat, b_flat)


# ----------------------------------------------------------------------------
# Pure-JAX reference (same math, outside Pallas) for a sanity check.
# ----------------------------------------------------------------------------
def reference(x, wh, wwt, conv_w, conv_b, pad):
    r = jnp.einsum('hp,ncpq,qw->nchw', wh, x, wwt)
    r_pad = jnp.pad(r, ((0, 0), (0, 0), (pad, pad), (pad, pad)), mode='wrap')
    out = jax.lax.conv_general_dilated(
        r_pad, conv_w, window_strides=(1, 1), padding='VALID',
        dimension_numbers=('NCHW', 'OIHW', 'NCHW'))
    return out + conv_b.reshape(1, -1, 1, 1)


if __name__ == "__main__":
    # Small, module-consistent shapes.
    N, C, Hin, Win = 2, 4, 16, 16
    output_size = (32, 32)
    K = 3
    PAD = (K - 1) // 2

    key = jax.random.PRNGKey(0)
    kx, kw, kb = jax.random.split(key, 3)

    x = jax.random.normal(kx, (N, C, Hin, Win), dtype=jnp.float32)

    # Deterministic parameter init (synthetic; mirrors the module's __init__):
    #   conv weight ~ nn.init.normal_ (mean=0, std=1), shape (C, C, K, K)
    #   conv bias   ~ PyTorch Conv2d default uniform(-1/sqrt(fan_in), +...)
    conv_w = jax.random.normal(kw, (C, C, K, K), dtype=jnp.float32)
    bound = 1.0 / np.sqrt(C * K * K)
    conv_b = jax.random.uniform(kb, (C,), dtype=jnp.float32,
                                minval=-bound, maxval=bound)

    # Separable bicubic interpolation matrices (PyTorch-compatible).
    wh = bicubic_matrix(Hin, output_size[0])   # (Hout, Hin)
    ww = bicubic_matrix(Win, output_size[1])   # (Wout, Win)

    out = filtered_resize(x, wh, ww, conv_w, conv_b)
    out = jax.block_until_ready(out)

    ref = reference(x, jnp.asarray(wh), jnp.asarray(ww.T), conv_w, conv_b, PAD)
    ref = jax.block_until_ready(ref)

    assert out.shape == (N, C, output_size[0], output_size[1]), out.shape
    np.testing.assert_allclose(np.asarray(out), np.asarray(ref),
                               rtol=5e-4, atol=1e-4)

    # TODO(synk): >4-D inputs would switch to trilinear resize in the PyTorch
    # module; only the 2-D-spatial (NCHW, circular padding) path is
    # implemented here.
    print("KERNEL_OK")
</pallas_src>

<mosaic_0001>
module attributes {stable_mosaic.version = 11 : i64} {
  func.func @_filtered_resize_kernel(%arg0: i32, %arg1: memref<64x16xf32, #tpu.memory_space<vmem>>, %arg2: memref<16x40xf32, #tpu.memory_space<vmem>>, %arg3: memref<16x34xf32, #tpu.memory_space<vmem>>, %arg4: memref<144xf32, #tpu.memory_space<smem>>, %arg5: memref<4xf32, #tpu.memory_space<smem>>, %arg6: memref<1x4x32x32xf32, #tpu.memory_space<vmem>>) attributes {dimension_semantics = [#tpu.dimension_semantics<parallel>], iteration_bounds = array<i64: 2>, scalar_prefetch = 0 : i64, scratch_operands = 0 : i64, tpu.core_type = #tpu.core_type<tc>, window_params = [{transform_indices = @transform_0, window_bounds = array<i64: 64, 16>}, {pipeline_mode = #tpu.pipeline_mode<synchronous>, transform_indices = @transform_1, window_bounds = array<i64: 16, 40>}, {pipeline_mode = #tpu.pipeline_mode<synchronous>, transform_indices = @transform_2, window_bounds = array<i64: 16, 34>}, {transform_indices = @transform_3, window_bounds = array<i64: 144>}, {transform_indices = @transform_4, window_bounds = array<i64: 4>}, {transform_indices = @transform_5, window_bounds = array<i64: 1, 4, 32, 32>}]} {
    %c0 = arith.constant 0 : index
    %c0_0 = arith.constant 0 : index
    %0 = vector.load %arg1[%c0, %c0_0] : memref<64x16xf32, #tpu.memory_space<vmem>>, vector<64x16xf32>
    %c0_1 = arith.constant 0 : index
    %c0_2 = arith.constant 0 : index
    %1 = vector.load %arg2[%c0_1, %c0_2] : memref<16x40xf32, #tpu.memory_space<vmem>>, vector<16x40xf32>
    %c0_3 = arith.constant 0 : index
    %c0_4 = arith.constant 0 : index
    %2 = vector.load %arg3[%c0_3, %c0_4] : memref<16x34xf32, #tpu.memory_space<vmem>>, vector<16x34xf32>
    %cst = arith.constant dense<0.000000e+00> : vector<64x40xf32>
    %3 = tpu.matmul %0, %1, %cst {dimension_numbers = #tpu.dot_dimension_numbers<[1], [0], [0], [1], [0, 0, 1, 1], [], []>} : vector<64x16xf32>, vector<16x40xf32>, vector<64x40xf32> -> vector<64x40xf32>
    %4 = vector.shape_cast %3 : vector<64x40xf32> to vector<4x16x40xf32>
    %5 = tpu.transpose %4, [0, 2, 1] : vector<4x16x40xf32> -> vector<4x40x16xf32>
    %6 = vector.shape_cast %5 : vector<4x40x16xf32> to vector<160x16xf32>
    %cst_5 = arith.constant dense<0.000000e+00> : vector<160x34xf32>
    %7 = tpu.matmul %6, %2, %cst_5 {dimension_numbers = #tpu.dot_dimension_numbers<[1], [0], [0], [1], [0, 0, 1, 1], [], []>} : vector<160x16xf32>, vector<16x34xf32>, vector<160x34xf32> -> vector<160x34xf32>
    %8 = vector.shape_cast %7 : vector<160x34xf32> to vector<4x40x34xf32>
    %cst_6 = arith.constant 0.000000e+00 : f32
    %9 = vector.broadcast %cst_6 : f32 to vector<32x32xf32>
    %cst_7 = arith.constant 0.000000e+00 : f32
    %10 = vector.broadcast %cst_7 : f32 to vector<32x32xf32>
    %cst_8 = arith.constant 0.000000e+00 : f32
    %11 = vector.broadcast %cst_8 : f32 to vector<32x32xf32>
    %cst_9 = arith.constant 0.000000e+00 : f32
    %12 = vector.broadcast %cst_9 : f32 to vector<32x32xf32>
    %13 = vector.extract_strided_slice %8 {offsets = [0, 0, 0], sizes = [4, 40, 32], strides = [1, 1, 1]} : vector<4x40x34xf32> to vector<4x40x32xf32>
    %14 = vector.extract_strided_slice %13 {offsets = [0, 0, 0], sizes = [4, 32, 32], strides = [1, 1, 1]} : vector<4x40x32xf32> to vector<4x32x32xf32>
    %15 = vector.extract_strided_slice %14 {offsets = [0, 0, 0], sizes = [1, 32, 32], strides = [1, 1, 1]} : vector<4x32x32xf32> to vector<1x32x32xf32>
    %16 = vector.shape_cast %15 : vector<1x32x32xf32> to vector<32x32xf32>
    %c0_10 = arith.constant 0 : index
    %17 = memref.load %arg4[%c0_10] : memref<144xf32, #tpu.memory_space<smem>>
    %18 = vector.broadcast %17 : f32 to vector<32x32xf32>
    %19 = arith.mulf %18, %16 : vector<32x32xf32>
    %20 = arith.addf %9, %19 : vector<32x32xf32>
    %c4 = arith.constant 4 : index
    %21 = memref.load %arg4[%c4] : memref<144xf32, #tpu.memory_space<smem>>
    %22 = vector.broadcast %21 : f32 to vector<32x32xf32>
    %23 = arith.mulf %22, %16 : vector<32x32xf32>
    %24 = arith.addf %10, %23 : vector<32x32xf32>
    %c8 = arith.constant 8 : index
    %25 = memref.load %arg4[%c8] : memref<144xf32, #tpu.memory_space<smem>>
    %26 = vector.broadcast %25 : f32 to vector<32x32xf32>
    %27 = arith.mulf %26, %16 : vector<32x32xf32>
    %28 = arith.addf %11, %27 : vector<32x32xf32>
    %c12 = arith.constant 12 : index
    %29 = memref.load %arg4[%c12] : memref<144xf32, #tpu.memory_space<smem>>
    %30 = vector.broadcast %29 : f32 to vector<32x32xf32>
    %31 = arith.mulf %30, %16 : vector<32x32xf32>
    %32 = arith.addf %12, %31 : vector<32x32xf32>
    %33 = vector.extract_strided_slice %14 {offsets = [1, 0, 0], sizes = [1, 32, 32], strides = [1, 1, 1]} : vector<4x32x32xf32> to vector<1x32x32xf32>
    %34 = vector.shape_cast %33 : vector<1x32x32xf32> to vector<32x32xf32>
    %c1 = arith.constant 1 : index
    %35 = memref.load %arg4[%c1] : memref<144xf32, #tpu.memory_space<smem>>
    %36 = vector.broadcast %35 : f32 to vector<32x32xf32>
    %37 = arith.mulf %36, %34 : vector<32x32xf32>
    %38 = arith.addf %20, %37 : vector<32x32xf32>
    %c5 = arith.constant 5 : index
    %39 = memref.load %arg4[%c5] : memref<144xf32, #tpu.memory_space<smem>>
    %40 = vector.broadcast %39 : f32 to vector<32x32xf32>
    %41 = arith.mulf %40, %34 : vector<32x32xf32>
    %42 = arith.addf %24, %41 : vector<32x32xf32>
    %c9 = arith.constant 9 : index
    %43 = memref.load %arg4[%c9] : memref<144xf32, #tpu.memory_space<smem>>
    %44 = vector.broadcast %43 : f32 to vector<32x32xf32>
    %45 = arith.mulf %44, %34 : vector<32x32xf32>
    %46 = arith.addf %28, %45 : vector<32x32xf32>
    %c13 = arith.constant 13 : index
    %47 = memref.load %arg4[%c13] : memref<144xf32, #tpu.memory_space<smem>>
    %48 = vector.broadcast %47 : f32 to vector<32x32xf32>
    %49 = arith.mulf %48, %34 : vector<32x32xf32>
    %50 = arith.addf %32, %49 : vector<32x32xf32>
    %51 = vector.extract_strided_slice %14 {offsets = [2, 0, 0], sizes = [1, 32, 32], strides = [1, 1, 1]} : vector<4x32x32xf32> to vector<1x32x32xf32>
    %52 = vector.shape_cast %51 : vector<1x32x32xf32> to vector<32x32xf32>
    %c2 = arith.constant 2 : index
    %53 = memref.load %arg4[%c2] : memref<144xf32, #tpu.memory_space<smem>>
    %54 = vector.broadcast %53 : f32 to vector<32x32xf32>
    %55 = arith.mulf %54, %52 : vector<32x32xf32>
    %56 = arith.addf %38, %55 : vector<32x32xf32>
    %c6 = arith.constant 6 : index
    %57 = memref.load %arg4[%c6] : memref<144xf32, #tpu.memory_space<smem>>
    %58 = vector.broadcast %57 : f32 to vector<32x32xf32>
    %59 = arith.mulf %58, %52 : vector<32x32xf32>
    %60 = arith.addf %42, %59 : vector<32x32xf32>
    %c10 = arith.constant 10 : index
    %61 = memref.load %arg4[%c10] : memref<144xf32, #tpu.memory_space<smem>>
    %62 = vector.broadcast %61 : f32 to vector<32x32xf32>
    %63 = arith.mulf %62, %52 : vector<32x32xf32>
    %64 = arith.addf %46, %63 : vector<32x32xf32>
    %c14 = arith.constant 14 : index
    %65 = memref.load %arg4[%c14] : memref<144xf32, #tpu.memory_space<smem>>
    %66 = vector.broadcast %65 : f32 to vector<32x32xf32>
    %67 = arith.mulf %66, %52 : vector<32x32xf32>
    %68 = arith.addf %50, %67 : vector<32x32xf32>
    %69 = vector.extract_strided_slice %14 {offsets = [3, 0, 0], sizes = [1, 32, 32], strides = [1, 1, 1]} : vector<4x32x32xf32> to vector<1x32x32xf32>
    %70 = vector.shape_cast %69 : vector<1x32x32xf32> to vector<32x32xf32>
    %c3 = arith.constant 3 : index
    %71 = memref.load %arg4[%c3] : memref<144xf32, #tpu.memory_space<smem>>
    %72 = vector.broadcast %71 : f32 to vector<32x32xf32>
    %73 = arith.mulf %72, %70 : vector<32x32xf32>
    %74 = arith.addf %56, %73 : vector<32x32xf32>
    %c7 = arith.constant 7 : index
    %75 = memref.load %arg4[%c7] : memref<144xf32, #tpu.memory_space<smem>>
    %76 = vector.broadcast %75 : f32 to vector<32x32xf32>
    %77 = arith.mulf %76, %70 : vector<32x32xf32>
    %78 = arith.addf %60, %77 : vector<32x32xf32>
    %c11 = arith.constant 11 : index
    %79 = memref.load %arg4[%c11] : memref<144xf32, #tpu.memory_space<smem>>
    %80 = vector.broadcast %79 : f32 to vector<32x32xf32>
    %81 = arith.mulf %80, %70 : vector<32x32xf32>
    %82 = arith.addf %64, %81 : vector<32x32xf32>
    %c15 = arith.constant 15 : index
    %83 = memref.load %arg4[%c15] : memref<144xf32, #tpu.memory_space<smem>>
    %84 = vector.broadcast %83 : f32 to vector<32x32xf32>
    %85 = arith.mulf %84, %70 : vector<32x32xf32>
    %86 = arith.addf %68, %85 : vector<32x32xf32>
    %87 = vector.extract_strided_slice %13 {offsets = [0, 1, 0], sizes = [4, 32, 32], strides = [1, 1, 1]} : vector<4x40x32xf32> to vector<4x32x32xf32>
    %88 = vector.extract_strided_slice %87 {offsets = [0, 0, 0], sizes = [1, 32, 32], strides = [1, 1, 1]} : vector<4x32x32xf32> to vector<1x32x32xf32>
    %89 = vector.shape_cast %88 : vector<1x32x32xf32> to vector<32x32xf32>
    %c48 = arith.constant 48 : index
    %90 = memref.load %arg4[%c48] : memref<144xf32, #tpu.memory_space<smem>>
    %91 = vector.broadcast %90 : f32 to vector<32x32xf32>
    %92 = arith.mulf %91, %89 : vector<32x32xf32>
    %93 = arith.addf %74, %92 : vector<32x32xf32>
    %c52 = arith.constant 52 : index
    %94 = memref.load %arg4[%c52] : memref<144xf32, #tpu.memory_space<smem>>
    %95 = vector.broadcast %94 : f32 to vector<32x32xf32>
    %96 = arith.mulf %95, %89 : vector<32x32xf32>
    %97 = arith.addf %78, %96 : vector<32x32xf32>
    %c56 = arith.constant 56 : index
    %98 = memref.load %arg4[%c56] : memref<144xf32, #tpu.memory_space<smem>>
    %99 = vector.broadcast %98 : f32 to vector<32x32xf32>
    %100 = arith.mulf %99, %89 : vector<32x32xf32>
    %101 = arith.addf %82, %100 : vector<32x32xf32>
    %c60 = arith.constant 60 : index
    %102 = memref.load %arg4[%c60] : memref<144xf32, #tpu.memory_space<smem>>
    %103 = vector.broadcast %102 : f32 to vector<32x32xf32>
    %104 = arith.mulf %103, %89 : vector<32x32xf32>
    %105 = arith.addf %86, %104 : vector<32x32xf32>
    %106 = vector.extract_strided_slice %87 {offsets = [1, 0, 0], sizes = [1, 32, 32], strides = [1, 1, 1]} : vector<4x32x32xf32> to vector<1x32x32xf32>
    %107 = vector.shape_cast %106 : vector<1x32x32xf32> to vector<32x32xf32>
    %c49 = arith.constant 49 : index
    %108 = memref.load %arg4[%c49] : memref<144xf32, #tpu.memory_space<smem>>
    %109 = vector.broadcast %108 : f32 to vector<32x32xf32>
    %110 = arith.mulf %109, %107 : vector<32x32xf32>
    %111 = arith.addf %93, %110 : vector<32x32xf32>
    %c53 = arith.constant 53 : index
    %112 = memref.load %arg4[%c53] : memref<144xf32, #tpu.memory_space<smem>>
    %113 = vector.broadcast %112 : f32 to vector<32x32xf32>
    %114 = arith.mulf %113, %107 : vector<32x32xf32>
    %115 = arith.addf %97, %114 : vector<32x32xf32>
    %c57 = arith.constant 57 : index
    %116 = memref.load %arg4[%c57] : memref<144xf32, #tpu.memory_space<smem>>
    %117 = vector.broadcast %116 : f32 to vector<32x32xf32>
    %118 = arith.mulf %117, %107 : vector<32x32xf32>
    %119 = arith.addf %101, %118 : vector<32x32xf32>
    %c61 = arith.constant 61 : index
    %120 = memref.load %arg4[%c61] : memref<144xf32, #tpu.memory_space<smem>>
    %121 = vector.broadcast %120 : f32 to vector<32x32xf32>
    %122 = arith.mulf %121, %107 : vector<32x32xf32>
    %123 = arith.addf %105, %122 : vector<32x32xf32>
    %124 = vector.extract_strided_slice %87 {offsets = [2, 0, 0], sizes = [1, 32, 32], strides = [1, 1, 1]} : vector<4x32x32xf32> to vector<1x32x32xf32>
    %125 = vector.shape_cast %124 : vector<1x32x32xf32> to vector<32x32xf32>
    %c50 = arith.constant 50 : index
    %126 = memref.load %arg4[%c50] : memref<144xf32, #tpu.memory_space<smem>>
    %127 = vector.broadcast %126 : f32 to vector<32x32xf32>
    %128 = arith.mulf %127, %125 : vector<32x32xf32>
    %129 = arith.addf %111, %128 : vector<32x32xf32>
    %c54 = arith.constant 54 : index
    %130 = memref.load %arg4[%c54] : memref<144xf32, #tpu.memory_space<smem>>
    %131 = vector.broadcast %130 : f32 to vector<32x32xf32>
    %132 = arith.mulf %131, %125 : vector<32x32xf32>
    %133 = arith.addf %115, %132 : vector<32x32xf32>
    %c58 = arith.constant 58 : index
    %134 = memref.load %arg4[%c58] : memref<144xf32, #tpu.memory_space<smem>>
    %135 = vector.broadcast %134 : f32 to vector<32x32xf32>
    %136 = arith.mulf %135, %125 : vector<32x32xf32>
    %137 = arith.addf %119, %136 : vector<32x32xf32>
    %c62 = arith.constant 62 : index
    %138 = memref.load %arg4[%c62] : memref<144xf32, #tpu.memory_space<smem>>
    %139 = vector.broadcast %138 : f32 to vector<32x32xf32>
    %140 = arith.mulf %139, %125 : vector<32x32xf32>
    %141 = arith.addf %123, %140 : vector<32x32xf32>
    %142 = vector.extract_strided_slice %87 {offsets = [3, 0, 0], sizes = [1, 32, 32], strides = [1, 1, 1]} : vector<4x32x32xf32> to vector<1x32x32xf32>
    %143 = vector.shape_cast %142 : vector<1x32x32xf32> to vector<32x32xf32>
    %c51 = arith.constant 51 : index
    %144 = memref.load %arg4[%c51] : memref<144xf32, #tpu.memory_space<smem>>
    %145 = vector.broadcast %144 : f32 to vector<32x32xf32>
    %146 = arith.mulf %145, %143 : vector<32x32xf32>
    %147 = arith.addf %129, %146 : vector<32x32xf32>
    %c55 = arith.constant 55 : index
    %148 = memref.load %arg4[%c55] : memref<144xf32, #tpu.memory_space<smem>>
    %149 = vector.broadcast %148 : f32 to vector<32x32xf32>
    %150 = arith.mulf %149, %143 : vector<32x32xf32>
    %151 = arith.addf %133, %150 : vector<32x32xf32>
    %c59 = arith.constant 59 : index
    %152 = memref.load %arg4[%c59] : memref<144xf32, #tpu.memory_space<smem>>
    %153 = vector.broadcast %152 : f32 to vector<32x32xf32>
    %154 = arith.mulf %153, %143 : vector<32x32xf32>
    %155 = arith.addf %137, %154 : vector<32x32xf32>
    %c63 = arith.constant 63 : index
    %156 = memref.load %arg4[%c63] : memref<144xf32, #tpu.memory_space<smem>>
    %157 = vector.broadcast %156 : f32 to vector<32x32xf32>
    %158 = arith.mulf %157, %143 : vector<32x32xf32>
    %159 = arith.addf %141, %158 : vector<32x32xf32>
    %160 = vector.extract_strided_slice %13 {offsets = [0, 2, 0], sizes = [4, 32, 32], strides = [1, 1, 1]} : vector<4x40x32xf32> to vector<4x32x32xf32>
    %161 = vector.extract_strided_slice %160 {offsets = [0, 0, 0], sizes = [1, 32, 32], strides = [1, 1, 1]} : vector<4x32x32xf32> to vector<1x32x32xf32>
    %162 = vector.shape_cast %161 : vector<1x32x32xf32> to vector<32x32xf32>
    %c96 = arith.constant 96 : index
    %163 = memref.load %arg4[%c96] : memref<144xf32, #tpu.memory_space<smem>>
    %164 = vector.broadcast %163 : f32 to vector<32x32xf32>
    %165 = arith.mulf %164, %162 : vector<32x32xf32>
    %166 = arith.addf %147, %165 : vector<32x32xf32>
    %c100 = arith.constant 100 : index
    %167 = memref.load %arg4[%c100] : memref<144xf32, #tpu.memory_space<smem>>
    %168 = vector.broadcast %167 : f32 to vector<32x32xf32>
    %169 = arith.mulf %168, %162 : vector<32x32xf32>
    %170 = arith.addf %151, %169 : vector<32x32xf32>
    %c104 = arith.constant 104 : index
    %171 = memref.load %arg4[%c104] : memref<144xf32, #tpu.memory_space<smem>>
    %172 = vector.broadcast %171 : f32 to vector<32x32xf32>
    %173 = arith.mulf %172, %162 : vector<32x32xf32>
    %174 = arith.addf %155, %173 : vector<32x32xf32>
    %c108 = arith.constant 108 : index
    %175 = memref.load %arg4[%c108] : memref<144xf32, #tpu.memory_space<smem>>
    %176 = vector.broadcast %175 : f32 to vector<32x32xf32>
    %177 = arith.mulf %176, %162 : vector<32x32xf32>
    %178 = arith.addf %159, %177 : vector<32x32xf32>
    %179 = vector.extract_strided_slice %160 {offsets = [1, 0, 0], sizes = [1, 32, 32], strides = [1, 1, 1]} : vector<4x32x32xf32> to vector<1x32x32xf32>
    %180 = vector.shape_cast %179 : vector<1x32x32xf32> to vector<32x32xf32>
    %c97 = arith.constant 97 : index
    %181 = memref.load %arg4[%c97] : memref<144xf32, #tpu.memory_space<smem>>
    %182 = vector.broadcast %181 : f32 to vector<32x32xf32>
    %183 = arith.mulf %182, %180 : vector<32x32xf32>
    %184 = arith.addf %166, %183 : vector<32x32xf32>
    %c101 = arith.constant 101 : index
    %185 = memref.load %arg4[%c101] : memref<144xf32, #tpu.memory_space<smem>>
    %186 = vector.broadcast %185 : f32 to vector<32x32xf32>
    %187 = arith.mulf %186, %180 : vector<32x32xf32>
    %188 = arith.addf %170, %187 : vector<32x32xf32>
    %c105 = arith.constant 105 : index
    %189 = memref.load %arg4[%c105] : memref<144xf32, #tpu.memory_space<smem>>
    %190 = vector.broadcast %189 : f32 to vector<32x32xf32>
    %191 = arith.mulf %190, %180 : vector<32x32xf32>
    %192 = arith.addf %174, %191 : vector<32x32xf32>
    %c109 = arith.constant 109 : index
    %193 = memref.load %arg4[%c109] : memref<144xf32, #tpu.memory_space<smem>>
    %194 = vector.broadcast %193 : f32 to vector<32x32xf32>
    %195 = arith.mulf %194, %180 : vector<32x32xf32>
    %196 = arith.addf %178, %195 : vector<32x32xf32>
    %197 = vector.extract_strided_slice %160 {offsets = [2, 0, 0], sizes = [1, 32, 32], strides = [1, 1, 1]} : vector<4x32x32xf32> to vector<1x32x32xf32>
    %198 = vector.shape_cast %197 : vector<1x32x32xf32> to vector<32x32xf32>
    %c98 = arith.constant 98 : index
    %199 = memref.load %arg4[%c98] : memref<144xf32, #tpu.memory_space<smem>>
    %200 = vector.broadcast %199 : f32 to vector<32x32xf32>
    %201 = arith.mulf %200, %198 : vector<32x32xf32>
    %202 = arith.addf %184, %201 : vector<32x32xf32>
    %c102 = arith.constant 102 : index
    %203 = memref.load %arg4[%c102] : memref<144xf32, #tpu.memory_space<smem>>
    %204 = vector.broadcast %203 : f32 to vector<32x32xf32>
    %205 = arith.mulf %204, %198 : vector<32x32xf32>
    %206 = arith.addf %188, %205 : vector<32x32xf32>
    %c106 = arith.constant 106 : index
    %207 = memref.load %arg4[%c106] : memref<144xf32, #tpu.memory_space<smem>>
    %208 = vector.broadcast %207 : f32 to vector<32x32xf32>
    %209 = arith.mulf %208, %198 : vector<32x32xf32>
    %210 = arith.addf %192, %209 : vector<32x32xf32>
    %c110 = arith.constant 110 : index
    %211 = memref.load %arg4[%c110] : memref<144xf32, #tpu.memory_space<smem>>
    %212 = vector.broadcast %211 : f32 to vector<32x32xf32>
    %213 = arith.mulf %212, %198 : vector<32x32xf32>
    %214 = arith.addf %196, %213 : vector<32x32xf32>
    %215 = vector.extract_strided_slice %160 {offsets = [3, 0, 0], sizes = [1, 32, 32], strides = [1, 1, 1]} : vector<4x32x32xf32> to vector<1x32x32xf32>
    %216 = vector.shape_cast %215 : vector<1x32x32xf32> to vector<32x32xf32>
    %c99 = arith.constant 99 : index
    %217 = memref.load %arg4[%c99] : memref<144xf32, #tpu.memory_space<smem>>
    %218 = vector.broadcast %217 : f32 to vector<32x32xf32>
    %219 = arith.mulf %218, %216 : vector<32x32xf32>
    %220 = arith.addf %202, %219 : vector<32x32xf32>
    %c103 = arith.constant 103 : index
    %221 = memref.load %arg4[%c103] : memref<144xf32, #tpu.memory_space<smem>>
    %222 = vector.broadcast %221 : f32 to vector<32x32xf32>
    %223 = arith.mulf %222, %216 : vector<32x32xf32>
    %224 = arith.addf %206, %223 : vector<32x32xf32>
    %c107 = arith.constant 107 : index
    %225 = memref.load %arg4[%c107] : memref<144xf32, #tpu.memory_space<smem>>
    %226 = vector.broadcast %225 : f32 to vector<32x32xf32>
    %227 = arith.mulf %226, %216 : vector<32x32xf32>
    %228 = arith.addf %210, %227 : vector<32x32xf32>
    %c111 = arith.constant 111 : index
    %229 = memref.load %arg4[%c111] : memref<144xf32, #tpu.memory_space<smem>>
    %230 = vector.broadcast %229 : f32 to vector<32x32xf32>
    %231 = arith.mulf %230, %216 : vector<32x32xf32>
    %232 = arith.addf %214, %231 : vector<32x32xf32>
    %233 = vector.extract_strided_slice %8 {offsets = [0, 0, 1], sizes = [4, 40, 32], strides = [1, 1, 1]} : vector<4x40x34xf32> to vector<4x40x32xf32>
    %234 = vector.extract_strided_slice %233 {offsets = [0, 0, 0], sizes = [4, 32, 32], strides = [1, 1, 1]} : vector<4x40x32xf32> to vector<4x32x32xf32>
    %235 = vector.extract_strided_slice %234 {offsets = [0, 0, 0], sizes = [1, 32, 32], strides = [1, 1, 1]} : vector<4x32x32xf32> to vector<1x32x32xf32>
    %236 = vector.shape_cast %235 : vector<1x32x32xf32> to vector<32x32xf32>
    %c16 = arith.constant 16 : index
    %237 = memref.load %arg4[%c16] : memref<144xf32, #tpu.memory_space<smem>>
    %238 = vector.broadcast %237 : f32 to vector<32x32xf32>
    %239 = arith.mulf %238, %236 : vector<32x32xf32>
    %240 = arith.addf %220, %239 : vector<32x32xf32>
    %c20 = arith.constant 20 : index
    %241 = memref.load %arg4[%c20] : memref<144xf32, #tpu.memory_space<smem>>
    %242 = vector.broadcast %241 : f32 to vector<32x32xf32>
    %243 = arith.mulf %242, %236 : vector<32x32xf32>
    %244 = arith.addf %224, %243 : vector<32x32xf32>
    %c24 = arith.constant 24 : index
    %245 = memref.load %arg4[%c24] : memref<144xf32, #tpu.memory_space<smem>>
    %246 = vector.broadcast %245 : f32 to vector<32x32xf32>
    %247 = arith.mulf %246, %236 : vector<32x32xf32>
    %248 = arith.addf %228, %247 : vector<32x32xf32>
    %c28 = arith.constant 28 : index
    %249 = memref.load %arg4[%c28] : memref<144xf32, #tpu.memory_space<smem>>
    %250 = vector.broadcast %249 : f32 to vector<32x32xf32>
    %251 = arith.mulf %250, %236 : vector<32x32xf32>
    %252 = arith.addf %232, %251 : vector<32x32xf32>
    %253 = vector.extract_strided_slice %234 {offsets = [1, 0, 0], sizes = [1, 32, 32], strides = [1, 1, 1]} : vector<4x32x32xf32> to vector<1x32x32xf32>
    %254 = vector.shape_cast %253 : vector<1x32x32xf32> to vector<32x32xf32>
    %c17 = arith.constant 17 : index
    %255 = memref.load %arg4[%c17] : memref<144xf32, #tpu.memory_space<smem>>
    %256 = vector.broadcast %255 : f32 to vector<32x32xf32>
    %257 = arith.mulf %256, %254 : vector<32x32xf32>
    %258 = arith.addf %240, %257 : vector<32x32xf32>
    %c21 = arith.constant 21 : index
    %259 = memref.load %arg4[%c21] : memref<144xf32, #tpu.memory_space<smem>>
    %260 = vector.broadcast %259 : f32 to vector<32x32xf32>
    %261 = arith.mulf %260, %254 : vector<32x32xf32>
    %262 = arith.addf %244, %261 : vector<32x32xf32>
    %c25 = arith.constant 25 : index
    %263 = memref.load %arg4[%c25] : memref<144xf32, #tpu.memory_space<smem>>
    %264 = vector.broadcast %263 : f32 to vector<32x32xf32>
    %265 = arith.mulf %264, %254 : vector<32x32xf32>
    %266 = arith.addf %248, %265 : vector<32x32xf32>
    %c29 = arith.constant 29 : index
    %267 = memref.load %arg4[%c29] : memref<144xf32, #tpu.memory_space<smem>>
    %268 = vector.broadcast %267 : f32 to vector<32x32xf32>
    %269 = arith.mulf %268, %254 : vector<32x32xf32>
    %270 = arith.addf %252, %269 : vector<32x32xf32>
    %271 = vector.extract_strided_slice %234 {offsets = [2, 0, 0], sizes = [1, 32, 32], strides = [1, 1, 1]} : vector<4x32x32xf32> to vector<1x32x32xf32>
    %272 = vector.shape_cast %271 : vector<1x32x32xf32> to vector<32x32xf32>
    %c18 = arith.constant 18 : index
    %273 = memref.load %arg4[%c18] : memref<144xf32, #tpu.memory_space<smem>>
    %274 = vector.broadcast %273 : f32 to vector<32x32xf32>
    %275 = arith.mulf %274, %272 : vector<32x32xf32>
    %276 = arith.addf %258, %275 : vector<32x32xf32>
    %c22 = arith.constant 22 : index
    %277 = memref.load %arg4[%c22] : memref<144xf32, #tpu.memory_space<smem>>
    %278 = vector.broadcast %277 : f32 to vector<32x32xf32>
    %279 = arith.mulf %278, %272 : vector<32x32xf32>
    %280 = arith.addf %262, %279 : vector<32x32xf32>
    %c26 = arith.constant 26 : index
    %281 = memref.load %arg4[%c26] : memref<144xf32, #tpu.memory_space<smem>>
    %282 = vector.broadcast %281 : f32 to vector<32x32xf32>
    %283 = arith.mulf %282, %272 : vector<32x32xf32>
    %284 = arith.addf %266, %283 : vector<32x32xf32>
    %c30 = arith.constant 30 : index
    %285 = memref.load %arg4[%c30] : memref<144xf32, #tpu.memory_space<smem>>
    %286 = vector.broadcast %285 : f32 to vector<32x32xf32>
    %287 = arith.mulf %286, %272 : vector<32x32xf32>
    %288 = arith.addf %270, %287 : vector<32x32xf32>
    %289 = vector.extract_strided_slice %234 {offsets = [3, 0, 0], sizes = [1, 32, 32], strides = [1, 1, 1]} : vector<4x32x32xf32> to vector<1x32x32xf32>
    %290 = vector.shape_cast %289 : vector<1x32x32xf32> to vector<32x32xf32>
    %c19 = arith.constant 19 : index
    %291 = memref.load %arg4[%c19] : memref<144xf32, #tpu.memory_space<smem>>
    %292 = vector.broadcast %291 : f32 to vector<32x32xf32>
    %293 = arith.mulf %292, %290 : vector<32x32xf32>
    %294 = arith.addf %276, %293 : vector<32x32xf32>
    %c23 = arith.constant 23 : index
    %295 = memref.load %arg4[%c23] : memref<144xf32, #tpu.memory_space<smem>>
    %296 = vector.broadcast %295 : f32 to vector<32x32xf32>
    %297 = arith.mulf %296, %290 : vector<32x32xf32>
    %298 = arith.addf %280, %297 : vector<32x32xf32>
    %c27 = arith.constant 27 : index
    %299 = memref.load %arg4[%c27] : memref<144xf32, #tpu.memory_space<smem>>
    %300 = vector.broadcast %299 : f32 to vector<32x32xf32>
    %301 = arith.mulf %300, %290 : vector<32x32xf32>
    %302 = arith.addf %284, %301 : vector<32x32xf32>
    %c31 = arith.constant 31 : index
    %303 = memref.load %arg4[%c31] : memref<144xf32, #tpu.memory_space<smem>>
    %304 = vector.broadcast %303 : f32 to vector<32x32xf32>
    %305 = arith.mulf %304, %290 : vector<32x32xf32>
    %306 = arith.addf %288, %305 : vector<32x32xf32>
    %307 = vector.extract_strided_slice %233 {offsets = [0, 1, 0], sizes = [4, 32, 32], strides = [1, 1, 1]} : vector<4x40x32xf32> to vector<4x32x32xf32>
    %308 = vector.extract_strided_slice %307 {offsets = [0, 0, 0], sizes = [1, 32, 32], strides = [1, 1, 1]} : vector<4x32x32xf32> to vector<1x32x32xf32>
    %309 = vector.shape_cast %308 : vector<1x32x32xf32> to vector<32x32xf32>
    %c64 = arith.constant 64 : index
    %310 = memref.load %arg4[%c64] : memref<144xf32, #tpu.memory_space<smem>>
    %311 = vector.broadcast %310 : f32 to vector<32x32xf32>
    %312 = arith.mulf %311, %309 : vector<32x32xf32>
    %313 = arith.addf %294, %312 : vector<32x32xf32>
    %c68 = arith.constant 68 : index
    %314 = memref.load %arg4[%c68] : memref<144xf32, #tpu.memory_space<smem>>
    %315 = vector.broadcast %314 : f32 to vector<32x32xf32>
    %316 = arith.mulf %315, %309 : vector<32x32xf32>
    %317 = arith.addf %298, %316 : vector<32x32xf32>
    %c72 = arith.constant 72 : index
    %318 = memref.load %arg4[%c72] : memref<144xf32, #tpu.memory_space<smem>>
    %319 = vector.broadcast %318 : f32 to vector<32x32xf32>
    %320 = arith.mulf %319, %309 : vector<32x32xf32>
    %321 = arith.addf %302, %320 : vector<32x32xf32>
    %c76 = arith.constant 76 : index
    %322 = memref.load %arg4[%c76] : memref<144xf32, #tpu.memory_space<smem>>
    %323 = vector.broadcast %322 : f32 to vector<32x32xf32>
    %324 = arith.mulf %323, %309 : vector<32x32xf32>
    %325 = arith.addf %306, %324 : vector<32x32xf32>
    %326 = vector.extract_strided_slice %307 {offsets = [1, 0, 0], sizes = [1, 32, 32], strides = [1, 1, 1]} : vector<4x32x32xf32> to vector<1x32x32xf32>
    %327 = vector.shape_cast %326 : vector<1x32x32xf32> to vector<32x32xf32>
    %c65 = arith.constant 65 : index
    %328 = memref.load %arg4[%c65] : memref<144xf32, #tpu.memory_space<smem>>
    %329 = vector.broadcast %328 : f32 to vector<32x32xf32>
    %330 = arith.mulf %329, %327 : vector<32x32xf32>
    %331 = arith.addf %313, %330 : vector<32x32xf32>
    %c69 = arith.constant 69 : index
    %332 = memref.load %arg4[%c69] : memref<144xf32, #tpu.memory_space<smem>>
    %333 = vector.broadcast %332 : f32 to vector<32x32xf32>
    %334 = arith.mulf %333, %327 : vector<32x32xf32>
    %335 = arith.addf %317, %334 : vector<32x32xf32>
    %c73 = arith.constant 73 : index
    %336 = memref.load %arg4[%c73] : memref<144xf32, #tpu.memory_space<smem>>
    %337 = vector.broadcast %336 : f32 to vector<32x32xf32>
    %338 = arith.mulf %337, %327 : vector<32x32xf32>
    %339 = arith.addf %321, %338 : vector<32x32xf32>
    %c77 = arith.constant 77 : index
    %340 = memref.load %arg4[%c77] : memref<144xf32, #tpu.memory_space<smem>>
    %341 = vector.broadcast %340 : f32 to vector<32x32xf32>
    %342 = arith.mulf %341, %327 : vector<32x32xf32>
    %343 = arith.addf %325, %342 : vector<32x32xf32>
    %344 = vector.extract_strided_slice %307 {offsets = [2, 0, 0], sizes = [1, 32, 32], strides = [1, 1, 1]} : vector<4x32x32xf32> to vector<1x32x32xf32>
    %345 = vector.shape_cast %344 : vector<1x32x32xf32> to vector<32x32xf32>
    %c66 = arith.constant 66 : index
    %346 = memref.load %arg4[%c66] : memref<144xf32, #tpu.memory_space<smem>>
    %347 = vector.broadcast %346 : f32 to vector<32x32xf32>
    %348 = arith.mulf %347, %345 : vector<32x32xf32>
    %349 = arith.addf %331, %348 : vector<32x32xf32>
    %c70 = arith.constant 70 : index
    %350 = memref.load %arg4[%c70] : memref<144xf32, #tpu.memory_space<smem>>
    %351 = vector.broadcast %350 : f32 to vector<32x32xf32>
    %352 = arith.mulf %351, %345 : vector<32x32xf32>
    %353 = arith.addf %335, %352 : vector<32x32xf32>
    %c74 = arith.constant 74 : index
    %354 = memref.load %arg4[%c74] : memref<144xf32, #tpu.memory_space<smem>>
    %355 = vector.broadcast %354 : f32 to vector<32x32xf32>
    %356 = arith.mulf %355, %345 : vector<32x32xf32>
    %357 = arith.addf %339, %356 : vector<32x32xf32>
    %c78 = arith.constant 78 : index
    %358 = memref.load %arg4[%c78] : memref<144xf32, #tpu.memory_space<smem>>
    %359 = vector.broadcast %358 : f32 to vector<32x32xf32>
    %360 = arith.mulf %359, %345 : vector<32x32xf32>
    %361 = arith.addf %343, %360 : vector<32x32xf32>
    %362 = vector.extract_strided_slice %307 {offsets = [3, 0, 0], sizes = [1, 32, 32], strides = [1, 1, 1]} : vector<4x32x32xf32> to vector<1x32x32xf32>
    %363 = vector.shape_cast %362 : vector<1x32x32xf32> to vector<32x32xf32>
    %c67 = arith.constant 67 : index
    %364 = memref.load %arg4[%c67] : memref<144xf32, #tpu.memory_space<smem>>
    %365 = vector.broadcast %364 : f32 to vector<32x32xf32>
    %366 = arith.mulf %365, %363 : vector<32x32xf32>
    %367 = arith.addf %349, %366 : vector<32x32xf32>
    %c71 = arith.constant 71 : index
    %368 = memref.load %arg4[%c71] : memref<144xf32, #tpu.memory_space<smem>>
    %369 = vector.broadcast %368 : f32 to vector<32x32xf32>
    %370 = arith.mulf %369, %363 : vector<32x32xf32>
    %371 = arith.addf %353, %370 : vector<32x32xf32>
    %c75 = arith.constant 75 : index
    %372 = memref.load %arg4[%c75] : memref<144xf32, #tpu.memory_space<smem>>
    %373 = vector.broadcast %372 : f32 to vector<32x32xf32>
    %374 = arith.mulf %373, %363 : vector<32x32xf32>
    %375 = arith.addf %357, %374 : vector<32x32xf32>
    %c79 = arith.constant 79 : index
    %376 = memref.load %arg4[%c79] : memref<144xf32, #tpu.memory_space<smem>>
    %377 = vector.broadcast %376 : f32 to vector<32x32xf32>
    %378 = arith.mulf %377, %363 : vector<32x32xf32>
    %379 = arith.addf %361, %378 : vector<32x32xf32>
    %380 = vector.extract_strided_slice %233 {offsets = [0, 2, 0], sizes = [4, 32, 32], strides = [1, 1, 1]} : vector<4x40x32xf32> to vector<4x32x32xf32>
    %381 = vector.extract_strided_slice %380 {offsets = [0, 0, 0], sizes = [1, 32, 32], strides = [1, 1, 1]} : vector<4x32x32xf32> to vector<1x32x32xf32>
    %382 = vector.shape_cast %381 : vector<1x32x32xf32> to vector<32x32xf32>
    %c112 = arith.constant 112 : index
    %383 = memref.load %arg4[%c112] : memref<144xf32, #tpu.memory_space<smem>>
    %384 = vector.broadcast %383 : f32 to vector<32x32xf32>
    %385 = arith.mulf %384, %382 : vector<32x32xf32>
    %386 = arith.addf %367, %385 : vector<32x32xf32>
    %c116 = arith.constant 116 : index
    %387 = memref.load %arg4[%c116] : memref<144xf32, #tpu.memory_space<smem>>
    %388 = vector.broadcast %387 : f32 to vector<32x32xf32>
    %389 = arith.mulf %388, %382 : vector<32x32xf32>
    %390 = arith.addf %371, %389 : vector<32x32xf32>
    %c120 = arith.constant 120 : index
    %391 = memref.load %arg4[%c120] : memref<144xf32, #tpu.memory_space<smem>>
    %392 = vector.broadcast %391 : f32 to vector<32x32xf32>
    %393 = arith.mulf %392, %382 : vector<32x32xf32>
    %394 = arith.addf %375, %393 : vector<32x32xf32>
    %c124 = arith.constant 124 : index
    %395 = memref.load %arg4[%c124] : memref<144xf32, #tpu.memory_space<smem>>
    %396 = vector.broadcast %395 : f32 to vector<32x32xf32>
    %397 = arith.mulf %396, %382 : vector<32x32xf32>
    %398 = arith.addf %379, %397 : vector<32x32xf32>
    %399 = vector.extract_strided_slice %380 {offsets = [1, 0, 0], sizes = [1, 32, 32], strides = [1, 1, 1]} : vector<4x32x32xf32> to vector<1x32x32xf32>
    %400 = vector.shape_cast %399 : vector<1x32x32xf32> to vector<32x32xf32>
    %c113 = arith.constant 113 : index
    %401 = memref.load %arg4[%c113] : memref<144xf32, #tpu.memory_space<smem>>
    %402 = vector.broadcast %401 : f32 to vector<32x32xf32>
    %403 = arith.mulf %402, %400 : vector<32x32xf32>
    %404 = arith.addf %386, %403 : vector<32x32xf32>
    %c117 = arith.constant 117 : index
    %405 = memref.load %arg4[%c117] : memref<144xf32, #tpu.memory_space<smem>>
    %406 = vector.broadcast %405 : f32 to vector<32x32xf32>
    %407 = arith.mulf %406, %400 : vector<32x32xf32>
    %408 = arith.addf %390, %407 : vector<32x32xf32>
    %c121 = arith.constant 121 : index
    %409 = memref.load %arg4[%c121] : memref<144xf32, #tpu.memory_space<smem>>
    %410 = vector.broadcast %409 : f32 to vector<32x32xf32>
    %411 = arith.mulf %410, %400 : vector<32x32xf32>
    %412 = arith.addf %394, %411 : vector<32x32xf32>
    %c125 = arith.constant 125 : index
    %413 = memref.load %arg4[%c125] : memref<144xf32, #tpu.memory_space<smem>>
    %414 = vector.broadcast %413 : f32 to vector<32x32xf32>
    %415 = arith.mulf %414, %400 : vector<32x32xf32>
    %416 = arith.addf %398, %415 : vector<32x32xf32>
    %417 = vector.extract_strided_slice %380 {offsets = [2, 0, 0], sizes = [1, 32, 32], strides = [1, 1, 1]} : vector<4x32x32xf32> to vector<1x32x32xf32>
    %418 = vector.shape_cast %417 : vector<1x32x32xf32> to vector<32x32xf32>
    %c114 = arith.constant 114 : index
    %419 = memref.load %arg4[%c114] : memref<144xf32, #tpu.memory_space<smem>>
    %420 = vector.broadcast %419 : f32 to vector<32x32xf32>
    %421 = arith.mulf %420, %418 : vector<32x32xf32>
    %422 = arith.addf %404, %421 : vector<32x32xf32>
    %c118 = arith.constant 118 : index
    %423 = memref.load %arg4[%c118] : memref<144xf32, #tpu.memory_space<smem>>
    %424 = vector.broadcast %423 : f32 to vector<32x32xf32>
    %425 = arith.mulf %424, %418 : vector<32x32xf32>
    %426 = arith.addf %408, %425 : vector<32x32xf32>
    %c122 = arith.constant 122 : index
    %427 = memref.load %arg4[%c122] : memref<144xf32, #tpu.memory_space<smem>>
    %428 = vector.broadcast %427 : f32 to vector<32x32xf32>
    %429 = arith.mulf %428, %418 : vector<32x32xf32>
    %430 = arith.addf %412, %429 : vector<32x32xf32>
    %c126 = arith.constant 126 : index
    %431 = memref.load %arg4[%c126] : memref<144xf32, #tpu.memory_space<smem>>
    %432 = vector.broadcast %431 : f32 to vector<32x32xf32>
    %433 = arith.mulf %432, %418 : vector<32x32xf32>
    %434 = arith.addf %416, %433 : vector<32x32xf32>
    %435 = vector.extract_strided_slice %380 {offsets = [3, 0, 0], sizes = [1, 32, 32], strides = [1, 1, 1]} : vector<4x32x32xf32> to vector<1x32x32xf32>
    %436 = vector.shape_cast %435 : vector<1x32x32xf32> to vector<32x32xf32>
    %c115 = arith.constant 115 : index
    %437 = memref.load %arg4[%c115] : memref<144xf32, #tpu.memory_space<smem>>
    %438 = vector.broadcast %437 : f32 to vector<32x32xf32>
    %439 = arith.mulf %438, %436 : vector<32x32xf32>
    %440 = arith.addf %422, %439 : vector<32x32xf32>
    %c119 = arith.constant 119 : index
    %441 = memref.load %arg4[%c119] : memref<144xf32, #tpu.memory_space<smem>>
    %442 = vector.broadcast %441 : f32 to vector<32x32xf32>
    %443 = arith.mulf %442, %436 : vector<32x32xf32>
    %444 = arith.addf %426, %443 : vector<32x32xf32>
    %c123 = arith.constant 123 : index
    %445 = memref.load %arg4[%c123] : memref<144xf32, #tpu.memory_space<smem>>
    %446 = vector.broadcast %445 : f32 to vector<32x32xf32>
    %447 = arith.mulf %446, %436 : vector<32x32xf32>
    %448 = arith.addf %430, %447 : vector<32x32xf32>
    %c127 = arith.constant 127 : index
    %449 = memref.load %arg4[%c127] : memref<144xf32, #tpu.memory_space<smem>>
    %450 = vector.broadcast %449 : f32 to vector<32x32xf32>
    %451 = arith.mulf %450, %436 : vector<32x32xf32>
    %452 = arith.addf %434, %451 : vector<32x32xf32>
    %453 = vector.extract_strided_slice %8 {offsets = [0, 0, 2], sizes = [4, 40, 32], strides = [1, 1, 1]} : vector<4x40x34xf32> to vector<4x40x32xf32>
    %454 = vector.extract_strided_slice %453 {offsets = [0, 0, 0], sizes = [4, 32, 32], strides = [1, 1, 1]} : vector<4x40x32xf32> to vector<4x32x32xf32>
    %455 = vector.extract_strided_slice %454 {offsets = [0, 0, 0], sizes = [1, 32, 32], strides = [1, 1, 1]} : vector<4x32x32xf32> to vector<1x32x32xf32>
    %456 = vector.shape_cast %455 : vector<1x32x32xf32> to vector<32x32xf32>
    %c32 = arith.constant 32 : index
    %457 = memref.load %arg4[%c32] : memref<144xf32, #tpu.memory_space<smem>>
    %458 = vector.broadcast %457 : f32 to vector<32x32xf32>
    %459 = arith.mulf %458, %456 : vector<32x32xf32>
    %460 = arith.addf %440, %459 : vector<32x32xf32>
    %c36 = arith.constant 36 : index
    %461 = memref.load %arg4[%c36] : memref<144xf32, #tpu.memory_space<smem>>
    %462 = vector.broadcast %461 : f32 to vector<32x32xf32>
    %463 = arith.mulf %462, %456 : vector<32x32xf32>
    %464 = arith.addf %444, %463 : vector<32x32xf32>
    %c40 = arith.constant 40 : index
    %465 = memref.load %arg4[%c40] : memref<144xf32, #tpu.memory_space<smem>>
    %466 = vector.broadcast %465 : f32 to vector<32x32xf32>
    %467 = arith.mulf %466, %456 : vector<32x32xf32>
    %468 = arith.addf %448, %467 : vector<32x32xf32>
    %c44 = arith.constant 44 : index
    %469 = memref.load %arg4[%c44] : memref<144xf32, #tpu.memory_space<smem>>
    %470 = vector.broadcast %469 : f32 to vector<32x32xf32>
    %471 = arith.mulf %470, %456 : vector<32x32xf32>
    %472 = arith.addf %452, %471 : vector<32x32xf32>
    %473 = vector.extract_strided_slice %454 {offsets = [1, 0, 0], sizes = [1, 32, 32], strides = [1, 1, 1]} : vector<4x32x32xf32> to vector<1x32x32xf32>
    %474 = vector.shape_cast %473 : vector<1x32x32xf32> to vector<32x32xf32>
    %c33 = arith.constant 33 : index
    %475 = memref.load %arg4[%c33] : memref<144xf32, #tpu.memory_space<smem>>
    %476 = vector.broadcast %475 : f32 to vector<32x32xf32>
    %477 = arith.mulf %476, %474 : vector<32x32xf32>
    %478 = arith.addf %460, %477 : vector<32x32xf32>
    %c37 = arith.constant 37 : index
    %479 = memref.load %arg4[%c37] : memref<144xf32, #tpu.memory_space<smem>>
    %480 = vector.broadcast %479 : f32 to vector<32x32xf32>
    %481 = arith.mulf %480, %474 : vector<32x32xf32>
    %482 = arith.addf %464, %481 : vector<32x32xf32>
    %c41 = arith.constant 41 : index
    %483 = memref.load %arg4[%c41] : memref<144xf32, #tpu.memory_space<smem>>
    %484 = vector.broadcast %483 : f32 to vector<32x32xf32>
    %485 = arith.mulf %484, %474 : vector<32x32xf32>
    %486 = arith.addf %468, %485 : vector<32x32xf32>
    %c45 = arith.constant 45 : index
    %487 = memref.load %arg4[%c45] : memref<144xf32, #tpu.memory_space<smem>>
    %488 = vector.broadcast %487 : f32 to vector<32x32xf32>
    %489 = arith.mulf %488, %474 : vector<32x32xf32>
    %490 = arith.addf %472, %489 : vector<32x32xf32>
    %491 = vector.extract_strided_slice %454 {offsets = [2, 0, 0], sizes = [1, 32, 32], strides = [1, 1, 1]} : vector<4x32x32xf32> to vector<1x32x32xf32>
    %492 = vector.shape_cast %491 : vector<1x32x32xf32> to vector<32x32xf32>
    %c34 = arith.constant 34 : index
    %493 = memref.load %arg4[%c34] : memref<144xf32, #tpu.memory_space<smem>>
    %494 = vector.broadcast %493 : f32 to vector<32x32xf32>
    %495 = arith.mulf %494, %492 : vector<32x32xf32>
    %496 = arith.addf %478, %495 : vector<32x32xf32>
    %c38 = arith.constant 38 : index
    %497 = memref.load %arg4[%c38] : memref<144xf32, #tpu.memory_space<smem>>
    %498 = vector.broadcast %497 : f32 to vector<32x32xf32>
    %499 = arith.mulf %498, %492 : vector<32x32xf32>
    %500 = arith.addf %482, %499 : vector<32x32xf32>
    %c42 = arith.constant 42 : index
    %501 = memref.load %arg4[%c42] : memref<144xf32, #tpu.memory_space<smem>>
    %502 = vector.broadcast %501 : f32 to vector<32x32xf32>
    %503 = arith.mulf %502, %492 : vector<32x32xf32>
    %504 = arith.addf %486, %503 : vector<32x32xf32>
    %c46 = arith.constant 46 : index
    %505 = memref.load %arg4[%c46] : memref<144xf32, #tpu.memory_space<smem>>
    %506 = vector.broadcast %505 : f32 to vector<32x32xf32>
    %507 = arith.mulf %506, %492 : vector<32x32xf32>
    %508 = arith.addf %490, %507 : vector<32x32xf32>
    %509 = vector.extract_strided_slice %454 {offsets = [3, 0, 0], sizes = [1, 32, 32], strides = [1, 1, 1]} : vector<4x32x32xf32> to vector<1x32x32xf32>
    %510 = vector.shape_cast %509 : vector<1x32x32xf32> to vector<32x32xf32>
    %c35 = arith.constant 35 : index
    %511 = memref.load %arg4[%c35] : memref<144xf32, #tpu.memory_space<smem>>
    %512 = vector.broadcast %511 : f32 to vector<32x32xf32>
    %513 = arith.mulf %512, %510 : vector<32x32xf32>
    %514 = arith.addf %496, %513 : vector<32x32xf32>
    %c39 = arith.constant 39 : index
    %515 = memref.load %arg4[%c39] : memref<144xf32, #tpu.memory_space<smem>>
    %516 = vector.broadcast %515 : f32 to vector<32x32xf32>
    %517 = arith.mulf %516, %510 : vector<32x32xf32>
    %518 = arith.addf %500, %517 : vector<32x32xf32>
    %c43 = arith.constant 43 : index
    %519 = memref.load %arg4[%c43] : memref<144xf32, #tpu.memory_space<smem>>
    %520 = vector.broadcast %519 : f32 to vector<32x32xf32>
    %521 = arith.mulf %520, %510 : vector<32x32xf32>
    %522 = arith.addf %504, %521 : vector<32x32xf32>
    %c47 = arith.constant 47 : index
    %523 = memref.load %arg4[%c47] : memref<144xf32, #tpu.memory_space<smem>>
    %524 = vector.broadcast %523 : f32 to vector<32x32xf32>
    %525 = arith.mulf %524, %510 : vector<32x32xf32>
    %526 = arith.addf %508, %525 : vector<32x32xf32>
    %527 = vector.extract_strided_slice %453 {offsets = [0, 1, 0], sizes = [4, 32, 32], strides = [1, 1, 1]} : vector<4x40x32xf32> to vector<4x32x32xf32>
    %528 = vector.extract_strided_slice %527 {offsets = [0, 0, 0], sizes = [1, 32, 32], strides = [1, 1, 1]} : vector<4x32x32xf32> to vector<1x32x32xf32>
    %529 = vector.shape_cast %528 : vector<1x32x32xf32> to vector<32x32xf32>
    %c80 = arith.constant 80 : index
    %530 = memref.load %arg4[%c80] : memref<144xf32, #tpu.memory_space<smem>>
    %531 = vector.broadcast %530 : f32 to vector<32x32xf32>
    %532 = arith.mulf %531, %529 : vector<32x32xf32>
    %533 = arith.addf %514, %532 : vector<32x32xf32>
    %c84 = arith.constant 84 : index
    %534 = memref.load %arg4[%c84] : memref<144xf32, #tpu.memory_space<smem>>
    %535 = vector.broadcast %534 : f32 to vector<32x32xf32>
    %536 = arith.mulf %535, %529 : vector<32x32xf32>
    %537 = arith.addf %518, %536 : vector<32x32xf32>
    %c88 = arith.constant 88 : index
    %538 = memref.load %arg4[%c88] : memref<144xf32, #tpu.memory_space<smem>>
    %539 = vector.broadcast %538 : f32 to vector<32x32xf32>
    %540 = arith.mulf %539, %529 : vector<32x32xf32>
    %541 = arith.addf %522, %540 : vector<32x32xf32>
    %c92 = arith.constant 92 : index
    %542 = memref.load %arg4[%c92] : memref<144xf32, #tpu.memory_space<smem>>
    %543 = vector.broadcast %542 : f32 to vector<32x32xf32>
    %544 = arith.mulf %543, %529 : vector<32x32xf32>
    %545 = arith.addf %526, %544 : vector<32x32xf32>
    %546 = vector.extract_strided_slice %527 {offsets = [1, 0, 0], sizes = [1, 32, 32], strides = [1, 1, 1]} : vector<4x32x32xf32> to vector<1x32x32xf32>
    %547 = vector.shape_cast %546 : vector<1x32x32xf32> to vector<32x32xf32>
    %c81 = arith.constant 81 : index
    %548 = memref.load %arg4[%c81] : memref<144xf32, #tpu.memory_space<smem>>
    %549 = vector.broadcast %548 : f32 to vector<32x32xf32>
    %550 = arith.mulf %549, %547 : vector<32x32xf32>
    %551 = arith.addf %533, %550 : vector<32x32xf32>
    %c85 = arith.constant 85 : index
    %552 = memref.load %arg4[%c85] : memref<144xf32, #tpu.memory_space<smem>>
    %553 = vector.broadcast %552 : f32 to vector<32x32xf32>
    %554 = arith.mulf %553, %547 : vector<32x32xf32>
    %555 = arith.addf %537, %554 : vector<32x32xf32>
    %c89 = arith.constant 89 : index
    %556 = memref.load %arg4[%c89] : memref<144xf32, #tpu.memory_space<smem>>
    %557 = vector.broadcast %556 : f32 to vector<32x32xf32>
    %558 = arith.mulf %557, %547 : vector<32x32xf32>
    %559 = arith.addf %541, %558 : vector<32x32xf32>
    %c93 = arith.constant 93 : index
    %560 = memref.load %arg4[%c93] : memref<144xf32, #tpu.memory_space<smem>>
    %561 = vector.broadcast %560 : f32 to vector<32x32xf32>
    %562 = arith.mulf %561, %547 : vector<32x32xf32>
    %563 = arith.addf %545, %562 : vector<32x32xf32>
    %564 = vector.extract_strided_slice %527 {offsets = [2, 0, 0], sizes = [1, 32, 32], strides = [1, 1, 1]} : vector<4x32x32xf32> to vector<1x32x32xf32>
    %565 = vector.shape_cast %564 : vector<1x32x32xf32> to vector<32x32xf32>
    %c82 = arith.constant 82 : index
    %566 = memref.load %arg4[%c82] : memref<144xf32, #tpu.memory_space<smem>>
    %567 = vector.broadcast %566 : f32 to vector<32x32xf32>
    %568 = arith.mulf %567, %565 : vector<32x32xf32>
    %569 = arith.addf %551, %568 : vector<32x32xf32>
    %c86 = arith.constant 86 : index
    %570 = memref.load %arg4[%c86] : memref<144xf32, #tpu.memory_space<smem>>
    %571 = vector.broadcast %570 : f32 to vector<32x32xf32>
    %572 = arith.mulf %571, %565 : vector<32x32xf32>
    %573 = arith.addf %555, %572 : vector<32x32xf32>
    %c90 = arith.constant 90 : index
    %574 = memref.load %arg4[%c90] : memref<144xf32, #tpu.memory_space<smem>>
    %575 = vector.broadcast %574 : f32 to vector<32x32xf32>
    %576 = arith.mulf %575, %565 : vector<32x32xf32>
    %577 = arith.addf %559, %576 : vector<32x32xf32>
    %c94 = arith.constant 94 : index
    %578 = memref.load %arg4[%c94] : memref<144xf32, #tpu.memory_space<smem>>
    %579 = vector.broadcast %578 : f32 to vector<32x32xf32>
    %580 = arith.mulf %579, %565 : vector<32x32xf32>
    %581 = arith.addf %563, %580 : vector<32x32xf32>
    %582 = vector.extract_strided_slice %527 {offsets = [3, 0, 0], sizes = [1, 32, 32], strides = [1, 1, 1]} : vector<4x32x32xf32> to vector<1x32x32xf32>
    %583 = vector.shape_cast %582 : vector<1x32x32xf32> to vector<32x32xf32>
    %c83 = arith.constant 83 : index
    %584 = memref.load %arg4[%c83] : memref<144xf32, #tpu.memory_space<smem>>
    %585 = vector.broadcast %584 : f32 to vector<32x32xf32>
    %586 = arith.mulf %585, %583 : vector<32x32xf32>
    %587 = arith.addf %569, %586 : vector<32x32xf32>
    %c87 = arith.constant 87 : index
    %588 = memref.load %arg4[%c87] : memref<144xf32, #tpu.memory_space<smem>>
    %589 = vector.broadcast %588 : f32 to vector<32x32xf32>
    %590 = arith.mulf %589, %583 : vector<32x32xf32>
    %591 = arith.addf %573, %590 : vector<32x32xf32>
    %c91 = arith.constant 91 : index
    %592 = memref.load %arg4[%c91] : memref<144xf32, #tpu.memory_space<smem>>
    %593 = vector.broadcast %592 : f32 to vector<32x32xf32>
    %594 = arith.mulf %593, %583 : vector<32x32xf32>
    %595 = arith.addf %577, %594 : vector<32x32xf32>
    %c95 = arith.constant 95 : index
    %596 = memref.load %arg4[%c95] : memref<144xf32, #tpu.memory_space<smem>>
    %597 = vector.broadcast %596 : f32 to vector<32x32xf32>
    %598 = arith.mulf %597, %583 : vector<32x32xf32>
    %599 = arith.addf %581, %598 : vector<32x32xf32>
    %600 = vector.extract_strided_slice %453 {offsets = [0, 2, 0], sizes = [4, 32, 32], strides = [1, 1, 1]} : vector<4x40x32xf32> to vector<4x32x32xf32>
    %601 = vector.extract_strided_slice %600 {offsets = [0, 0, 0], sizes = [1, 32, 32], strides = [1, 1, 1]} : vector<4x32x32xf32> to vector<1x32x32xf32>
    %602 = vector.shape_cast %601 : vector<1x32x32xf32> to vector<32x32xf32>
    %c128 = arith.constant 128 : index
    %603 = memref.load %arg4[%c128] : memref<144xf32, #tpu.memory_space<smem>>
    %604 = vector.broadcast %603 : f32 to vector<32x32xf32>
    %605 = arith.mulf %604, %602 : vector<32x32xf32>
    %606 = arith.addf %587, %605 : vector<32x32xf32>
    %c132 = arith.constant 132 : index
    %607 = memref.load %arg4[%c132] : memref<144xf32, #tpu.memory_space<smem>>
    %608 = vector.broadcast %607 : f32 to vector<32x32xf32>
    %609 = arith.mulf %608, %602 : vector<32x32xf32>
    %610 = arith.addf %591, %609 : vector<32x32xf32>
    %c136 = arith.constant 136 : index
    %611 = memref.load %arg4[%c136] : memref<144xf32, #tpu.memory_space<smem>>
    %612 = vector.broadcast %611 : f32 to vector<32x32xf32>
    %613 = arith.mulf %612, %602 : vector<32x32xf32>
    %614 = arith.addf %595, %613 : vector<32x32xf32>
    %c140 = arith.constant 140 : index
    %615 = memref.load %arg4[%c140] : memref<144xf32, #tpu.memory_space<smem>>
    %616 = vector.broadcast %615 : f32 to vector<32x32xf32>
    %617 = arith.mulf %616, %602 : vector<32x32xf32>
    %618 = arith.addf %599, %617 : vector<32x32xf32>
    %619 = vector.extract_strided_slice %600 {offsets = [1, 0, 0], sizes = [1, 32, 32], strides = [1, 1, 1]} : vector<4x32x32xf32> to vector<1x32x32xf32>
    %620 = vector.shape_cast %619 : vector<1x32x32xf32> to vector<32x32xf32>
    %c129 = arith.constant 129 : index
    %621 = memref.load %arg4[%c129] : memref<144xf32, #tpu.memory_space<smem>>
    %622 = vector.broadcast %621 : f32 to vector<32x32xf32>
    %623 = arith.mulf %622, %620 : vector<32x32xf32>
    %624 = arith.addf %606, %623 : vector<32x32xf32>
    %c133 = arith.constant 133 : index
    %625 = memref.load %arg4[%c133] : memref<144xf32, #tpu.memory_space<smem>>
    %626 = vector.broadcast %625 : f32 to vector<32x32xf32>
    %627 = arith.mulf %626, %620 : vector<32x32xf32>
    %628 = arith.addf %610, %627 : vector<32x32xf32>
    %c137 = arith.constant 137 : index
    %629 = memref.load %arg4[%c137] : memref<144xf32, #tpu.memory_space<smem>>
    %630 = vector.broadcast %629 : f32 to vector<32x32xf32>
    %631 = arith.mulf %630, %620 : vector<32x32xf32>
    %632 = arith.addf %614, %631 : vector<32x32xf32>
    %c141 = arith.constant 141 : index
    %633 = memref.load %arg4[%c141] : memref<144xf32, #tpu.memory_space<smem>>
    %634 = vector.broadcast %633 : f32 to vector<32x32xf32>
    %635 = arith.mulf %634, %620 : vector<32x32xf32>
    %636 = arith.addf %618, %635 : vector<32x32xf32>
    %637 = vector.extract_strided_slice %600 {offsets = [2, 0, 0], sizes = [1, 32, 32], strides = [1, 1, 1]} : vector<4x32x32xf32> to vector<1x32x32xf32>
    %638 = vector.shape_cast %637 : vector<1x32x32xf32> to vector<32x32xf32>
    %c130 = arith.constant 130 : index
    %639 = memref.load %arg4[%c130] : memref<144xf32, #tpu.memory_space<smem>>
    %640 = vector.broadcast %639 : f32 to vector<32x32xf32>
    %641 = arith.mulf %640, %638 : vector<32x32xf32>
    %642 = arith.addf %624, %641 : vector<32x32xf32>
    %c134 = arith.constant 134 : index
    %643 = memref.load %arg4[%c134] : memref<144xf32, #tpu.memory_space<smem>>
    %644 = vector.broadcast %643 : f32 to vector<32x32xf32>
    %645 = arith.mulf %644, %638 : vector<32x32xf32>
    %646 = arith.addf %628, %645 : vector<32x32xf32>
    %c138 = arith.constant 138 : index
    %647 = memref.load %arg4[%c138] : memref<144xf32, #tpu.memory_space<smem>>
    %648 = vector.broadcast %647 : f32 to vector<32x32xf32>
    %649 = arith.mulf %648, %638 : vector<32x32xf32>
    %650 = arith.addf %632, %649 : vector<32x32xf32>
    %c142 = arith.constant 142 : index
    %651 = memref.load %arg4[%c142] : memref<144xf32, #tpu.memory_space<smem>>
    %652 = vector.broadcast %651 : f32 to vector<32x32xf32>
    %653 = arith.mulf %652, %638 : vector<32x32xf32>
    %654 = arith.addf %636, %653 : vector<32x32xf32>
    %655 = vector.extract_strided_slice %600 {offsets = [3, 0, 0], sizes = [1, 32, 32], strides = [1, 1, 1]} : vector<4x32x32xf32> to vector<1x32x32xf32>
    %656 = vector.shape_cast %655 : vector<1x32x32xf32> to vector<32x32xf32>
    %c131 = arith.constant 131 : index
    %657 = memref.load %arg4[%c131] : memref<144xf32, #tpu.memory_space<smem>>
    %658 = vector.broadcast %657 : f32 to vector<32x32xf32>
    %659 = arith.mulf %658, %656 : vector<32x32xf32>
    %660 = arith.addf %642, %659 : vector<32x32xf32>
    %c135 = arith.constant 135 : index
    %661 = memref.load %arg4[%c135] : memref<144xf32, #tpu.memory_space<smem>>
    %662 = vector.broadcast %661 : f32 to vector<32x32xf32>
    %663 = arith.mulf %662, %656 : vector<32x32xf32>
    %664 = arith.addf %646, %663 : vector<32x32xf32>
    %c139 = arith.constant 139 : index
    %665 = memref.load %arg4[%c139] : memref<144xf32, #tpu.memory_space<smem>>
    %666 = vector.broadcast %665 : f32 to vector<32x32xf32>
    %667 = arith.mulf %666, %656 : vector<32x32xf32>
    %668 = arith.addf %650, %667 : vector<32x32xf32>
    %c143 = arith.constant 143 : index
    %669 = memref.load %arg4[%c143] : memref<144xf32, #tpu.memory_space<smem>>
    %670 = vector.broadcast %669 : f32 to vector<32x32xf32>
    %671 = arith.mulf %670, %656 : vector<32x32xf32>
    %672 = arith.addf %654, %671 : vector<32x32xf32>
    %c0_11 = arith.constant 0 : index
    %673 = memref.load %arg5[%c0_11] : memref<4xf32, #tpu.memory_space<smem>>
    %674 = vector.broadcast %673 : f32 to vector<32x32xf32>
    %675 = arith.addf %660, %674 : vector<32x32xf32>
    %c1_12 = arith.constant 1 : index
    %676 = memref.load %arg5[%c1_12] : memref<4xf32, #tpu.memory_space<smem>>
    %677 = vector.broadcast %676 : f32 to vector<32x32xf32>
    %678 = arith.addf %664, %677 : vector<32x32xf32>
    %c2_13 = arith.constant 2 : index
    %679 = memref.load %arg5[%c2_13] : memref<4xf32, #tpu.memory_space<smem>>
    %680 = vector.broadcast %679 : f32 to vector<32x32xf32>
    %681 = arith.addf %668, %680 : vector<32x32xf32>
    %c3_14 = arith.constant 3 : index
    %682 = memref.load %arg5[%c3_14] : memref<4xf32, #tpu.memory_space<smem>>
    %683 = vector.broadcast %682 : f32 to vector<32x32xf32>
    %684 = arith.addf %672, %683 : vector<32x32xf32>
    %685 = vector.shape_cast %675 : vector<32x32xf32> to vector<1x32x32xf32>
    %686 = vector.shape_cast %678 : vector<32x32xf32> to vector<1x32x32xf32>
    %687 = vector.shape_cast %681 : vector<32x32xf32> to vector<1x32x32xf32>
    %688 = vector.shape_cast %684 : vector<32x32xf32> to vector<1x32x32xf32>
    %689 = tpu.concatenate %685, %686, %687, %688 in 0 : vector<1x32x32xf32>, vector<1x32x32xf32>, vector<1x32x32xf32>, vector<1x32x32xf32> -> vector<4x32x32xf32>
    %690 = vector.shape_cast %689 : vector<4x32x32xf32> to vector<1x4x32x32xf32>
    %c0_15 = arith.constant 0 : index
    %c0_16 = arith.constant 0 : index
    %c0_17 = arith.constant 0 : index
    %c0_18 = arith.constant 0 : index
    %691 = vector.load %arg6[%c0_15, %c0_16, %c0_17, %c0_18] : memref<1x4x32x32xf32, #tpu.memory_space<vmem>>, vector<1x4x32x32xf32>
    tpu.vector_store %arg6[%c0_15, %c0_16, %c0_17, %c0_18], %690 {strides = array<i32>} : memref<1x4x32x32xf32, #tpu.memory_space<vmem>>, vector<1x4x32x32xf32>,
    return
  }
  func.func @transform_0(%arg0: i32) -> (i32, i32) {
    %c0_i32 = arith.constant 0 : i32
    %c0_i32_0 = arith.constant 0 : i32
    return %arg0, %c0_i32 : i32, i32
  }
  func.func @transform_1(%arg0: i32) -> (i32, i32) {
    %c0_i32 = arith.constant 0 : i32
    %c0_i32_0 = arith.constant 0 : i32
    %c0_i32_1 = arith.constant 0 : i32
    return %c0_i32, %c0_i32_0 : i32, i32
  }
  func.func @transform_2(%arg0: i32) -> (i32, i32) {
    %c0_i32 = arith.constant 0 : i32
    %c0_i32_0 = arith.constant 0 : i32
    %c0_i32_1 = arith.constant 0 : i32
    return %c0_i32, %c0_i32_0 : i32, i32
  }
  func.func @transform_3(%arg0: i32) -> i32 {
    %c0_i32 = arith.constant 0 : i32
    %c0_i32_0 = arith.constant 0 : i32
    return %c0_i32 : i32
  }
  func.func @transform_4(%arg0: i32) -> i32 {
    %c0_i32 = arith.constant 0 : i32
    %c0_i32_0 = arith.constant 0 : i32
    return %c0_i32 : i32
  }
  func.func @transform_5(%arg0: i32) -> (i32, i32, i32, i32) {
    %c0_i32 = arith.constant 0 : i32
    %c0_i32_0 = arith.constant 0 : i32
    %c0_i32_1 = arith.constant 0 : i32
    %c0_i32_2 = arith.constant 0 : i32
    return %arg0, %c0_i32, %c0_i32_0, %c0_i32_1 : i32, i32, i32, i32
  }
}

</mosaic_0001>

<bundles_post_ra>
// kernel: tpu_custom_call.1
= control target key start
LH: loop header
LB: loop body
LE: loop exit
PB: predicated region body
PF: predicated region fallthrough
CT: control target
= control target key end

     0   :  { %s11193_s0 = inlined_call_operand.vmem [shape: f32[128,16], index: 0, kind: input, shape index: {}]   ;;  %s11194_s1 = inlined_call_operand.vmem [shape: f32[16,40], index: 1, kind: input, shape index: {}]   ;;  %s11195_s2 = inlined_call_operand.vmem [shape: f32[16,34], index: 2, kind: input, shape index: {}]   ;;  %s11196_s3 = inlined_call_operand.vmem [shape: f32[144], index: 3, kind: input, shape index: {}]   ;;  %s11197_s4 = inlined_call_operand.vmem [shape: f32[4], index: 4, kind: input, shape index: {}]   ;;  %s11198_s5 = inlined_call_operand.hbm [shape: f32[2,4,32,32], index: 5, kind: output, shape index: {}]  }
   0x1   :  { %11531 = sst [smem:[#allocation309_spill]] %s11193_s0 }
   0x2   :  { %11532 = sst [smem:[#allocation310_spill]] %s11194_s1 }
   0x3   :  { %10 = vsyncpa [#allocation4], 0 }
   0x4   :  { %11 = vsyncpa [#allocation6], 0 }
   0x5   :  { %12 = vsyncpa [#allocation3], 0 }
   0x6   :  { %14 = vsyncpa [#allocation3 + $0x1], 0  ;;  %s5426_s18 = smov 0   ;;  %s5428_s19 = smov 0  }
   0x7   :  { %s5430_s20 = smov 0   ;;  %s5432_s21 = smov 0  }
   0x8 LB: > { %s5447_s22 = sadd.s32 4294967295, %s5388_s21   ;;  %s5026_s23 = sadd.s32 4294967294, %s5388_s21   ;;  %s5388_s21 = sphi %s5432_s21, %s12678_s21   ;;  %s5384_s20 = sphi %s5430_s20, %s12677_s20   ;;  %s5380_s19 = sphi %s5428_s19, %s12676_s19   ;;  %s5376_s18 = sphi %s5426_s18, %s12675_s18  }
   0x9   : > { %s5451_s24 = sadd.s32 1, %s5388_s21   ;;  %s137_s25 = sadd.s32 1, %s5384_s20 }
   0xa   : > { %s134_s26 = ssub.s32 %s5388_s21, %s5451_s24  ;;  %p147_p0 = scmp.ne.s32.totalorder %s5384_s20, %s5380_s19 }
   0xb   : > { %p135_p1 = scmp.eq.s32.totalorder %s134_s26, 0  ;;  %p148_p2 = scmp.eq.s32.totalorder %s5447_s22, 1 }
   0xc   : > { %p153_p3 = scmp.ne.s32.totalorder %s5380_s19, %s5376_s18  ;;  %p154_p4 = scmp.eq.s32.totalorder %s5026_s23, 1 }
   0xd   : > { %s5462_s27 = scalar_select %p135_p1, %s5384_s20, %s137_s25  }
   0xe   : > { %p5464_p5 = por %p148_p2, %p147_p0  ;;  %p5468_p6 = por %p154_p4, %p153_p3 }
   0xf   : > { %p5027_p7 = scmp.ge.s32.totalorder %s5388_s21, 1  ;;  %p161_p8 = scmp.lt.s32.totalorder %s5388_s21, 3 }
  0x10   : > { %p5244_p9 = scmp.eq.s32.totalorder %s5447_s22, 0  ;;  %s179_s7 = sshll.u32 %s11196_s3, 4  ;;  %s180_s7 = int_to_ptr.vmem [resolvable:$true] %s179_s7 }
  0x11   : > { %p162_p10 = pnand %p5027_p7, %p161_p8  ;;  %s189_s10 = sshll.u32 %s11197_s4, 4  ;;  %s190_s10 = int_to_ptr.vmem [resolvable:$true] %s189_s10 }
  0x12   : > { %s5390_s11 = smov [#allocation2]   ;;  %s5391_s12 = smov [#allocation5]  }
  0x13   : > { %p5233_p11 = pneg %p162_p10 }
  0x14   : > { %211 = sbr.rel (%p162_p10) target bundleno = 1694 (0x69e), region = 40 }
  0x15   : > { %p5234_p12 = pnand %p5244_p9, %p5233_p11 }
  0x17   : > { %5236 = dma.vmem_to_smem (!%p5234_p12), %s180_s7, 32, %s5390_s11, [#allocation4]  }
  0x18   : > { %5239 = dma.vmem_to_smem (!%p5234_p12), %s190_s10, 16, %s5391_s12, [#allocation6]  }
  0x19   : > { %5363 = dma.done.wait (%p5244_p9), [#allocation4], 32  }
  0x1a   : > { %5365 = vsyncadd (%p5244_p9), [#allocation4], 4294967264 }
  0x1b   : > { %5367 = dma.done.wait (%p5244_p9), [#allocation6], 16  }
  0x1c   : > { %5369 = vsyncadd (%p5244_p9), [#allocation6], 4294967280 }
  0x1d   : > { %223 = sfence }
  0x1e   : > { %s11535_s1 = sld [smem:[#allocation310_spill]]  ;;  %s5035_s17 = sshll.u32 %s5447_s22, 3  ;;  %vm264_vm0 = vcmask 130048   ;;  %v263_v14 = vld [vmem:[%s11195_s2 + $0x8] sm:$0xff]  ;;  %v262_v15 = vld [vmem:[%s11195_s2] sm:$0xff]  ;;  %vm767_vm1 = vcmask 1046528  }
  0x1f   : > { %p247_p13 = scmp.lt.s32.totalorder %s5035_s17, 15  ;;  %s11536_s0 = sld [smem:[#allocation309_spill]]  ;;  %532 = vmatpush.msra.mxu1 %v263_v14  ;;  %5219 = vmatpush.msra.mxu2 %v263_v14  ;;  %vm1232_vm2 = vcmask 1045504   ;;  %vm4909_vm3 = vcmask 261120  }
  0x20   : > { %s5112_s10 = sld [smem:[#allocation2 + $0x10]]  ;;  %s11264_s13 = smov 127  }
  0x21   : > { %s12680_s17 = smov (!%p247_p13, %s5035_s17), 15  ;;  %533 = vmatpush.msra.mxu1 %v262_v15  ;;  %5221 = vmatpush.msra.mxu2 %v262_v15  ;;  %s5129_s11 = sld [smem:[#allocation2 + $0x44]] }
  0x22   : > { %s5036_s23 = sshll.u32 %s12680_s17, 3  ;;  %s5113_s12 = sld [smem:[#allocation2 + $0x14]] }
  0x23   : > { %s5114_s14 = sld [smem:[#allocation2 + $0x18]] }
  0x24   : > { %v261_v0 = vld [vmem:[%s11535_s1 + $0x8] sm:$0xff]  ;;  %v260_v1 = vld [vmem:[%s11535_s1] sm:$0xff]  ;;  %s5128_s15 = sld [smem:[#allocation2 + $0x40]] }
  0x25   : > { %303 = vmatpush.msra.mxu0 %v261_v0  ;;  %5217 = vmatpush.msra.mxu3 %v261_v0  ;;  %s250_s30 = scalar_lea.vmem %s11536_s0, %s5036_s23  ;;  %s5115_s16 = sld [smem:[#allocation2 + $0x1c]] }
  0x26   : > { %v252_v2 = vld [vmem:[%s250_s30] sm:$0xff]  ;;  %v253_v3 = vld [vmem:[%s250_s30 + $0x8] sm:$0xff]  ;;  %v254_v4 = vld [vmem:[%s250_s30 + $0x10] sm:$0xff]  ;;  %v5535_v40 = vstv %s5112_s10  ;;  %s5131_s17 = sld [smem:[#allocation2 + $0x4c]] }
  0x27   : > { %304 = vmatpush.msra.mxu0 %v260_v1  ;;  %5218 = vmatpush.msra.mxu3 %v260_v1  ;;  %v259_v5 = vld [vmem:[%s250_s30 + $0x38] sm:$0xff]  ;;  %v256_v7 = vld [vmem:[%s250_s30 + $0x20] sm:$0xff]  ;;  %v257_v8 = vld [vmem:[%s250_s30 + $0x28] sm:$0xff]  ;;  %v5542_v43 = vstv %s5129_s11  ;;  %s5130_s23 = sld [smem:[#allocation2 + $0x48]] }
  0x28   : > { %5037 = vmatmul.msk.f32.vlgmr.msra.gmra.mxu0 %vm264_vm0, %v252_v2  ;;  %5044 = vmatmul.msk.f32.vlgmr.msra.gmra.mxu3 %vm264_vm0, %v259_v5  ;;  %v255_v6 = vld [vmem:[%s250_s30 + $0x18] sm:$0xff]  ;;  %v258_v9 = vld [vmem:[%s250_s30 + $0x30] sm:$0xff]  ;;  %v5544_v44 = vstv %s5113_s12  ;;  %s5118_s25 = sld [smem:[#allocation2 + $0x19]] }
  0x29   : > { %5220 = vmatpush.msrb.mxu3 %v263_v14  ;;  %v5565_v53 = vstv %s5114_s14  ;;  %s5117_s26 = sld [smem:[#allocation2 + $0x15]] }
  0x2a   : > { %v5575_v58 = vstv %s5128_s15  ;;  %s5116_s30 = sld [smem:[#allocation2 + $0x11]] }
  0x2b   : > { %5222 = vmatpush.msrb.mxu3 %v262_v15  ;;  %v5586_v61 = vstv %s5115_s16  ;;  %s5119_s6 = sld [smem:[#allocation2 + $0x1d]] }
  0x2c   : > { %s5133_s7 = sld [smem:[#allocation2 + $0x45]] }
  0x2d   : > { %s5132_s8 = sld [smem:[#allocation2 + $0x41]] }
  0x2e   : > { %s5134_s9 = sld [smem:[#allocation2 + $0x49]] }
  0x2f   : > { %s5135_s10 = sld [smem:[#allocation2 + $0x4d]] }
  0x30   : > { %5038 = vmatmul.msk.f32.gmra.mxu0 %vm264_vm0, %v253_v3  ;;  %s5120_s11 = sld [smem:[#allocation2 + $0x12]] }
  0x31   : > { %s5123_s12 = sld [smem:[#allocation2 + $0x1e]] }
  0x32   : > { %s5122_s14 = sld [smem:[#allocation2 + $0x1a]] }
  0x33   : > { %s5121_s15 = sld [smem:[#allocation2 + $0x16]] }
  0x34   : > { %s5126_s16 = sld [smem:[#allocation2 + $0x1b]] }
  0x35   : > { %s7387_s0 = sld [smem:[#allocation2 + $0x6c]] }
  0x36   : > { %s7394_s1 = sld [smem:[#allocation2 + $0x63]] }
  0x38   : > { %5039 = vmatmul.msk.f32.gmra.mxu0 %vm264_vm0, %v254_v4  ;;  %v5600_v4 = vstv %s5131_s17  ;;  %s5137_s17 = sld [smem:[#allocation2 + $0x46]] }
  0x40   : > { %5040 = vmatmul.msk.f32.gmra.mxu0 %vm264_vm0, %v255_v6 }
  0x48   : > { %5041 = vmatmul.msk.f32.gmra.mxu0 %vm264_vm0, %v256_v7 }
  0x50   : > { %5042 = vmatmul.msk.f32.gmra.mxu0 %vm264_vm0, %v257_v8 }
  0x58   : > { %5043 = vmatmul.msk.f32.gmra.mxu0 %vm264_vm0, %v258_v9 }
  0xa5   : > { %v306_v10 = vpop.f32.mrf.mxu0 }
  0xa6   : > { %330 = vxpose.xlu0.b32.start [1/2] (short) (narrow) %v306_v10, 40 }
  0xab   : > { %v327_v19 = vpop.f32.mrf.mxu3 }
  0xad   : > { %v309_v11 = vpop.f32.mrf.mxu0 }
  0xae   : > { %331 = vxpose.xlu0.b32.end [2/2] (short) (narrow) %v309_v11, 40  ;;  %v5614_v11 = vstv %s5130_s23  ;;  %s5136_s23 = sld [smem:[#allocation2 + $0x42]] }
  0xb5   : > { %v312_v12 = vpop.f32.mrf.mxu0 }
  0xb6   : > { %362 = vxpose.xlu1.b32.start [1/2] (short) (narrow) %v312_v12, 40 }
  0xbd   : > { %v315_v13 = vpop.f32.mrf.mxu0 }
  0xbe   : > { %363 = vxpose.xlu1.b32.end [2/2] (short) (narrow) %v315_v13, 40 }
  0xc5   : > { %v318_v16 = vpop.f32.mrf.mxu0 }
  0xc6   : > { %394 = vxpose.xlu2.b32.start [1/2] (short) (narrow) %v318_v16, 40 }
  0xcd   : > { %v321_v17 = vpop.f32.mrf.mxu0 }
  0xce   : > { %395 = vxpose.xlu2.b32.end [2/2] (short) (narrow) %v321_v17, 40 }
  0xd5   : > { %v324_v18 = vpop.f32.mrf.mxu0 }
  0xd6   : > { %426 = vxpose.xlu0.b32.start [1/2] (short) (narrow) %v324_v18, 40 }
  0xde   : > { %427 = vxpose.xlu0.b32.end [2/2] (short) (narrow) %v327_v19, 40 }
 0x14a   : > { %v346_v20 = vpop.trf.xlu0 }
 0x14b   : > { %5045 = vmatmul.msk.f32.vlgmr.msra.gmra.mxu1 %vm264_vm0, %v346_v20 }
 0x152   : > { %v347_v21 = vpop.trf.xlu0 }
 0x153   : > { %5046 = vmatmul.msk.f32.gmra.mxu1 %vm264_vm0, %v347_v21 }
 0x15a   : > { %v348_v22 = vpop.trf.xlu0  ;;  %v378_v23 = vpop.trf.xlu1 }
 0x15b   : > { %5047 = vmatmul.msk.f32.gmra.mxu1 %vm264_vm0, %v348_v22 }
 0x15f   : > { %v410_v24 = vpop.trf.xlu2 }
 0x162   : > { %v349_v25 = vpop.trf.xlu0  ;;  %v379_v26 = vpop.trf.xlu1 }
 0x163   : > { %5048 = vmatmul.msk.f32.gmra.mxu1 %vm264_vm0, %v349_v25 }
 0x167   : > { %v411_v27 = vpop.trf.xlu2 }
 0x16a   : > { %v350_v28 = vpop.trf.xlu0  ;;  %v380_v29 = vpop.trf.xlu1 }
 0x16b   : > { %5049 = vmatmul.msk.f32.gmra.mxu1 %vm264_vm0, %v350_v28  ;;  %5052 = vmatmul.msk.f32.vlgmr.msra.gmra.mxu2 %vm264_vm0, %v380_v29 }
 0x16f   : > { %v412_v30 = vpop.trf.xlu2 }
 0x172   : > { %v381_v31 = vpop.trf.xlu1 }
 0x173   : > { %5050 = vmatmul.msk.f32.gmra.mxu1 %vm264_vm0, %v378_v23  ;;  %5053 = vmatmul.msk.f32.gmra.mxu2 %vm264_vm0, %v381_v31 }
 0x177   : > { %v413_v32 = vpop.trf.xlu2 }
 0x17a   : > { %v382_v33 = vpop.trf.xlu1  ;;  %v442_v34 = vpop.trf.xlu0 }
 0x17b   : > { %5051 = vmatmul.msk.f32.gmra.mxu1 %vm264_vm0, %v379_v26  ;;  %5054 = vmatmul.msk.f32.gmra.mxu2 %vm264_vm0, %v382_v33 }
 0x17f   : > { %v414_v35 = vpop.trf.xlu2 }
 0x180   : > { %5059 = vmatmul.msk.f32.vlgmr.msrb.gmra.mxu3 %vm264_vm0, %v414_v35 }
 0x182   : > { %v443_v36 = vpop.trf.xlu0 }
 0x183   : > { %5055 = vmatmul.msk.f32.gmra.mxu2 %vm264_vm0, %v410_v24 }
 0x188   : > { %5060 = vmatmul.msk.f32.gmra.mxu3 %vm264_vm0, %v442_v34 }
 0x18a   : > { %v444_v37 = vpop.trf.xlu0 }
 0x18b   : > { %5056 = vmatmul.msk.f32.gmra.mxu2 %vm264_vm0, %v411_v27 }
 0x190   : > { %5061 = vmatmul.msk.f32.gmra.mxu3 %vm264_vm0, %v443_v36 }
 0x192   : > { %v445_v38 = vpop.trf.xlu0 }
 0x193   : > { %5057 = vmatmul.msk.f32.gmra.mxu2 %vm264_vm0, %v412_v30 }
 0x198   : > { %5062 = vmatmul.msk.f32.gmra.mxu3 %vm264_vm0, %v444_v37 }
 0x19a   : > { %v446_v39 = vpop.trf.xlu0 }
 0x19b   : > { %5058 = vmatmul.msk.f32.gmra.mxu2 %vm264_vm0, %v413_v32 }
 0x1a0   : > { %5063 = vmatmul.msk.f32.gmra.mxu3 %vm264_vm0, %v445_v38 }
 0x1a8   : > { %5064 = vmatmul.msk.f32.gmra.mxu3 %vm264_vm0, %v446_v39  ;;  %v5663_v39 = vstv %s5118_s25  ;;  %s5125_s25 = sld [smem:[#allocation2 + $0x17]] }
 0x1c8   : > { %v5537_v41 = vpop.f32.mrf.mxu1 }
 0x1c9   : > { %11537 = vst [vmem:[#allocation11_spill] sm:$0xff] %v5537_v41  ;;  %v1687_v42 = vmul.f32 %v5535_v40, %v5537_v41  ;;  %v2140_v45 = vmul.f32 %v5542_v43, %v5537_v41  ;;  %v1713_v47 = vmul.f32 %v5544_v44, %v5537_v41  ;;  %v1739_v56 = vmul.f32 %v5565_v53, %v5537_v41 }
 0x1ca   : > { %v1765_v0 = vmul.f32 %v5586_v61, %v5537_v41  ;;  %v2103_v3 = vmul.f32 %v5575_v58, %v5537_v41  ;;  %v2214_v16 = vmul.f32 %v5600_v4, %v5537_v41  ;;  %v2177_v17 = vmul.f32 %v5614_v11, %v5537_v41 }
 0x1cb   : > { %1695 = vrot.lane.b32.xlu1 %v1687_v42, %s11264_s13  ;;  %v2150_v50 = vrot.slane %v2140_v45, 1 }
 0x1cc   : > { %v2113_v8 = vrot.slane %v2103_v3, 1  ;;  %v2224_v22 = vrot.slane %v2214_v16, 1  ;;  %v2187_v23 = vrot.slane %v2177_v17, 1 }
 0x1d0   : > { %v5548_v46 = vpop.f32.mrf.mxu1 }
 0x1d1   : > { %11538 = vst [vmem:[#allocation12_spill] sm:$0xff] %v5548_v46  ;;  %v1688_v48 = vmul.f32 %v5535_v40, %v5548_v46  ;;  %v5556_v49 = vmul.f32 %v5542_v43, %v5548_v46  ;;  %v1714_v54 = vmul.f32 %v5544_v44, %v5548_v46  ;;  %v2104_v60 = vmul.f32 %v5575_v58, %v5548_v46 }
 0x1d2   : > { %v1740_v62 = vmul.f32 %v5565_v53, %v5548_v46  ;;  %v2215_v6 = vmul.f32 %v5600_v4, %v5548_v46  ;;  %v1766_v9 = vmul.f32 %v5586_v61, %v5548_v46  ;;  %v2178_v13 = vmul.f32 %v5614_v11, %v5548_v46 }
 0x1d3   : > { %1721 = vrot.lane.b32.xlu1 %v1713_v47, %s11264_s13  ;;  %1697 = vrot.lane.b32.xlu2 %v1688_v48, %s11264_s13  ;;  %v2151_v51 = vrot.slane %v5556_v49, 1  ;;  %v2114_v1 = vrot.slane %v2104_v60, 1  ;;  %v5676_v47 = vstv %s5117_s26  ;;  %s5124_s26 = sld [smem:[#allocation2 + $0x13]] }
 0x1d4   : > { %v2225_v14 = vrot.slane %v2215_v6, 1  ;;  %v2188_v20 = vrot.slane %v2178_v13, 1 }
 0x1d5   : > { %v2152_v52 = vsel %vm767_vm1, %v2150_v50, %v2151_v51  ;;  %v2115_v12 = vsel %vm767_vm1, %v2113_v8, %v2114_v1 }
 0x1d6   : > { %2159 = vrot.lane.b32.xlu0 %v2152_v52, %s11264_s13  ;;  %v2226_v26 = vsel %vm767_vm1, %v2224_v22, %v2225_v14  ;;  %v2189_v27 = vsel %vm767_vm1, %v2187_v23, %v2188_v20 }
 0x1d8   : > { %v5569_v55 = vpop.f32.mrf.mxu1 }
 0x1d9   : > { %11539 = vst [vmem:[#allocation13_spill] sm:$0xff] %v5569_v55  ;;  %v1689_v57 = vmul.f32 %v5535_v40, %v5569_v55  ;;  %v5581_v59 = vmul.f32 %v5575_v58, %v5569_v55  ;;  %v5604_v5 = vmul.f32 %v5600_v4, %v5569_v55  ;;  %v2179_v19 = vmul.f32 %v5614_v11, %v5569_v55 }
 0x1da   : > { %v2142_v28 = vmul.f32 %v5542_v43, %v5569_v55  ;;  %v1715_v33 = vmul.f32 %v5544_v44, %v5569_v55  ;;  %v1767_v49 = vmul.f32 %v5586_v61, %v5569_v55 }
 0x1db   : > { %1747 = vrot.lane.b32.xlu1 %v1739_v56, %s11264_s13  ;;  %1723 = vrot.lane.b32.xlu2 %v1714_v54, %s11264_s13  ;;  %v2116_v63 = vrot.slane %v5581_v59, 1  ;;  %v2227_v10 = vrot.slane %v5604_v5, 1  ;;  %v2190_v24 = vrot.slane %v2179_v19, 1  ;;  %v5719_v59 = vstv %s5119_s6  ;;  %s5138_s6 = sld [smem:[#allocation2 + $0x4a]] }
 0x1dc   : > { %v2153_v32 = vrot.slane %v2142_v28, 1  ;;  %v5748_v19 = vstv %s5132_s8  ;;  %s5140_s8 = sld [smem:[#allocation2 + $0x43]] }
 0x1dd   : > { %v2117_v2 = vsel %vm767_vm1, %v2114_v1, %v2116_v63  ;;  %v2228_v18 = vsel %vm767_vm1, %v2225_v14, %v2227_v10 }
 0x1de   : > { %1699 = vrot.lane.b32.xlu0 %v1689_v57, %s11264_s13  ;;  %v2154_v36 = vsel %vm767_vm1, %v2151_v51, %v2153_v32 }
 0x1e0   : > { %v5609_v7 = vpop.f32.mrf.mxu1 }
 0x1e1   : > { %11540 = vst [vmem:[#allocation14_spill] sm:$0xff] %v5609_v7  ;;  %v5623_v15 = vmul.f32 %v5614_v11, %v5609_v7  ;;  %v2143_v30 = vmul.f32 %v5542_v43, %v5609_v7  ;;  %v1716_v38 = vmul.f32 %v5544_v44, %v5609_v7  ;;  %v1742_v44 = vmul.f32 %v5565_v53, %v5609_v7 }
 0x1e2   : > { %v1768_v51 = vmul.f32 %v5586_v61, %v5609_v7  ;;  %v2106_v56 = vmul.f32 %v5575_v58, %v5609_v7  ;;  %v1690_v60 = vmul.f32 %v5535_v40, %v5609_v7  ;;  %v5701_v61 = vstv %s5116_s30  ;;  %s5127_s30 = sld [smem:[#allocation2 + $0x1f]] }
 0x1e3   : > { %1773 = vrot.lane.b32.xlu1 %v1765_v0, %s11264_s13  ;;  %1749 = vrot.lane.b32.xlu2 %v1740_v62, %s11264_s13  ;;  %v2192_v21 = vrot.slane %v5623_v15, 1  ;;  %v2155_v34 = vrot.slane %v2143_v30, 1  ;;  %v2217_v0 = vmul.f32 %v5600_v4, %v5609_v7 }
 0x1e4   : > { %v2118_v57 = vrot.slane %v2106_v56, 1 }
 0x1e5   : > { %v2193_v29 = vsel %vm767_vm1, %v2190_v24, %v2192_v21  ;;  %v2229_v40 = vrot.slane %v2217_v0, 1  ;;  %v2156_v3 = vsel %vm767_vm1, %v2153_v32, %v2155_v34 }
 0x1e6   : > { %2124 = vrot.lane.b32.xlu0 %v2117_v2, %s11264_s13  ;;  %v2119_v1 = vsel %vm767_vm1, %v2116_v63, %v2118_v57 }
 0x1e7   : > { %v2230_v6 = vsel %vm767_vm1, %v2227_v10, %v2229_v40 }
 0x1e8   : > { %v5636_v25 = vpop.f32.mrf.mxu1 }
 0x1e9   : > { %11541 = vst [vmem:[#allocation15_spill] sm:$0xff] %v5636_v25  ;;  %v2144_v31 = vmul.f32 %v5542_v43, %v5636_v25  ;;  %v1741_v43 = vmul.f32 %v5565_v53, %v5569_v55  ;;  %v2191_v53 = vsel %vm767_vm1, %v2188_v20, %v2190_v24  ;;  %v2107_v8 = vmul.f32 %v5575_v58, %v5636_v25 }
 0x1eb   : > { %2122 = vrot.lane.b32.xlu1 %v2115_v12, %s11264_s13  ;;  %1775 = vrot.lane.b32.xlu2 %v1766_v9, %s11264_s13  ;;  %v2157_v35 = vrot.slane %v2144_v31, 1  ;;  %v2181_v9 = vmul.f32 %v5614_v11, %v5636_v25  ;;  %v5727_v12 = vstv %s5133_s7  ;;  %v2120_v58 = vrot.slane %v2107_v8, 1  ;;  %s5139_s7 = sld [smem:[#allocation2 + $0x4e]] }
 0x1ed   : > { %v2158_v37 = vsel %vm767_vm1, %v2155_v34, %v2157_v35  ;;  %v2194_v13 = vrot.slane %v2181_v9, 1  ;;  %v2121_v16 = vsel %vm767_vm1, %v2118_v57, %v2120_v58 }
 0x1ee   : > { %2235 = vrot.lane.b32.xlu0 %v2228_v18, %s11264_s13  ;;  %v5665_v42 = vpop.f32.mrf.mxu2  ;;  %v2218_v18 = vmul.f32 %v5600_v4, %v5636_v25 }
 0x1ef   : > { %11542 = vst [vmem:[#allocation16_spill] sm:$0xff] %v5665_v42  ;;  %v1845_v45 = vmul.f32 %v5663_v39, %v5665_v42  ;;  %v5737_v10 = vmul.f32 %v5727_v12, %v5665_v42  ;;  %v2195_v17 = vsel %vm767_vm1, %v2192_v21, %v2194_v13  ;;  %v1793_v22 = vmul.f32 %v5701_v61, %v5665_v42 }
 0x1f0   : > { %v5678_v48 = vpop.f32.mrf.mxu1  ;;  %v2231_v4 = vrot.slane %v2218_v18, 1  ;;  %v1819_v31 = vmul.f32 %v5676_v47, %v5665_v42  ;;  %v1871_v32 = vmul.f32 %v5719_v59, %v5665_v42 }
 0x1f1   : > { %11543 = vst [vmem:[#allocation17_spill] sm:$0xff] %v5678_v48  ;;  %v1817_v50 = vmul.f32 %v5676_v47, %v5678_v48  ;;  %v2301_v14 = vrot.slane %v5737_v10, 1  ;;  %v2251_v15 = vmul.f32 %v5748_v19, %v5678_v48  ;;  %v1869_v56 = vmul.f32 %v5719_v59, %v5678_v48 }
 0x1f3   : > { %2233 = vrot.lane.b32.xlu1 %v2226_v26, %s11264_s13  ;;  %2196 = vrot.lane.b32.xlu2 %v2189_v27, %s11264_s13  ;;  %v2261_v23 = vrot.slane %v2251_v15, 1  ;;  %v2232_v26 = vsel %vm767_vm1, %v2229_v40, %v2231_v4  ;;  %v5770_v27 = vstv %s5134_s9  ;;  %s5141_s9 = sld [smem:[#allocation2 + $0x47]] }
 0x1f4   : > { %v2325_v10 = vmul.f32 %v5770_v27, %v5678_v48 }
 0x1f6   : > { %2200 = vrot.lane.b32.xlu0 %v2193_v29, %s11264_s13  ;;  %v5689_v52 = vpop.f32.mrf.mxu2  ;;  %v2327_v29 = vmul.f32 %v5770_v27, %v5665_v42 }
 0x1f7   : > { %11544 = vst [vmem:[#allocation18_spill] sm:$0xff] %v5689_v52  ;;  %v1820_v54 = vmul.f32 %v5676_v47, %v5689_v52  ;;  %v5733_v5 = vmul.f32 %v5727_v12, %v5689_v52  ;;  %v1846_v57 = vmul.f32 %v5663_v39, %v5689_v52  ;;  %v2254_v0 = vmul.f32 %v5748_v19, %v5689_v52 }
 0x1f8   : > { %v5703_v62 = vpop.f32.mrf.mxu1  ;;  %v1794_v58 = vmul.f32 %v5701_v61, %v5689_v52 }
 0x1f9   : > { %11545 = vst [vmem:[#allocation19_spill] sm:$0xff] %v5703_v62  ;;  %v1792_v2 = vmul.f32 %v5701_v61, %v5703_v62  ;;  %v1870_v63 = vmul.f32 %v5719_v59, %v5703_v62  ;;  %v2303_v11 = vrot.slane %v5733_v5, 1  ;;  %v5761_v21 = vmul.f32 %v5748_v19, %v5703_v62 }
 0x1fa   : > { %v5780_v30 = vmul.f32 %v5770_v27, %v5703_v62  ;;  %v2266_v40 = vrot.slane %v2254_v0, 1  ;;  %v1818_v13 = vmul.f32 %v5676_v47, %v5703_v62  ;;  %v2335_v5 = vrot.slane %v2325_v10, 1 }
 0x1fb   : > { %1725 = vrot.lane.b32.xlu1 %v1715_v33, %s11264_s13  ;;  %2161 = vrot.lane.b32.xlu2 %v2154_v36, %s11264_s13  ;;  %v2304_v20 = vsel %vm767_vm1, %v2301_v14, %v2303_v11  ;;  %v2262_v24 = vrot.slane %v5761_v21, 1  ;;  %v2338_v33 = vrot.slane %v2327_v29, 1  ;;  %v2288_v21 = vmul.f32 %v5727_v12, %v5678_v48 }
 0x1fc   : > { %v11200_v35 = vrot.slane %v5780_v30, 1  ;;  %v11586_v10 = vrot.slane %v5780_v30, 1 }
 0x1fd   : > { %v2263_v28 = vsel %vm767_vm1, %v2261_v23, %v2262_v24  ;;  %v5865_v23 = vmul.f32 %v5770_v27, %v5689_v52 }
 0x1fe   : > { %2165 = vrot.lane.b32.xlu0 %v2158_v37, %s11264_s13  ;;  %v2339_v36 = vsel %vm767_vm1, %v11200_v35, %v2338_v33  ;;  %v1791_v37 = vmul.f32 %v5701_v61, %v5678_v48 }
 0x203   : > { %1751 = vrot.lane.b32.xlu1 %v1741_v43, %s11264_s13  ;;  %1727 = vrot.lane.b32.xlu2 %v1716_v38, %s11264_s13  ;;  %v1843_v38 = vmul.f32 %v5663_v39, %v5678_v48  ;;  %v5799_v43 = vstv %s5135_s10  ;;  %s5142_s10 = sld [smem:[#allocation2 + $0x4b]] }
 0x206   : > { %1855 = vrot.lane.b32.xlu0 %v1845_v45, %s11264_s13  ;;  %v2362_v45 = vmul.f32 %v5799_v43, %v5678_v48 }
 0x20b   : > { %1777 = vrot.lane.b32.xlu1 %v1767_v49, %s11264_s13  ;;  %1753 = vrot.lane.b32.xlu2 %v1742_v44, %s11264_s13  ;;  %v5807_v44 = vmul.f32 %v5799_v43, %v5703_v62 }
 0x20e   : > { %1825 = vrot.lane.b32.xlu0 %v1817_v50, %s11264_s13  ;;  %v2372_v50 = vrot.slane %v2362_v45, 1  ;;  %v1844_v45 = vmul.f32 %v5663_v39, %v5703_v62 }
 0x213   : > { %2198 = vrot.lane.b32.xlu1 %v2191_v53, %s11264_s13  ;;  %1779 = vrot.lane.b32.xlu2 %v1768_v51, %s11264_s13  ;;  %v2373_v51 = vrot.slane %v5807_v44, 1 }
 0x216   : > { %1831 = vrot.lane.b32.xlu0 %v1820_v54, %s11264_s13  ;;  %v2374_v54 = vsel %vm767_vm1, %v2372_v50, %v2373_v51 }
 0x21b   : > { %1701 = vrot.lane.b32.xlu1 %v1690_v60, %s11264_s13  ;;  %2126 = vrot.lane.b32.xlu2 %v2119_v1, %s11264_s13  ;;  %v5824_v60 = vpop.f32.mrf.mxu2 }
 0x21c   : > { %11549 = vst [vmem:[#allocation23_spill] sm:$0xff] %v5824_v60  ;;  %v2255_v1 = vmul.f32 %v5748_v19, %v5824_v60  ;;  %v2366_v61 = vmul.f32 %v5799_v43, %v5824_v60 }
 0x21e   : > { %1801 = vrot.lane.b32.xlu0 %v1792_v2, %s11264_s13  ;;  %v2379_v4 = vrot.slane %v2366_v61, 1 }
 0x223   : > { %2163 = vrot.lane.b32.xlu1 %v2156_v3, %s11264_s13  ;;  %2237 = vrot.lane.b32.xlu2 %v2230_v6, %s11264_s13  ;;  %v2268_v3 = vrot.slane %v2255_v1, 1  ;;  %v5905_v1 = vstv %s5123_s12  ;;  %s5144_s12 = sld [smem:[#allocation2 + $0x70]] }
 0x226   : > { %1879 = vrot.lane.b32.xlu0 %v1870_v63, %s11264_s13  ;;  %v2269_v63 = vsel %vm767_vm1, %v2266_v40, %v2268_v3 }
 0x22b   : > { %2128 = vrot.lane.b32.xlu1 %v2121_v16, %s11264_s13  ;;  %2202 = vrot.lane.b32.xlu2 %v2195_v17, %s11264_s13  ;;  %v5850_v17 = vmul.f32 %v5799_v43, %v5689_v52 }
 0x22d   : > { %v5786_v34 = vpop.permute.xlu2 %1697  ;;  %v2377_v47 = vrot.slane %v5850_v17, 1 }
 0x22e   : > { %2311 = vrot.lane.b32.xlu0 %v2304_v20, %s11264_s13  ;;  %11546 = vst [vmem:[#allocation20_spill] sm:$0xff] %v5786_v34 }
 0x233   : > { %2239 = vrot.lane.b32.xlu1 %v2232_v26, %s11264_s13  ;;  %1803 = vrot.lane.b32.xlu2 %v1793_v22, %s11264_s13  ;;  %v1872_v22 = vmul.f32 %v5719_v59, %v5689_v52  ;;  %v2380_v26 = vsel %vm767_vm1, %v2377_v47, %v2379_v4 }
 0x235   : > { %v5809_v49 = vpop.permute.xlu2 %1723 }
 0x236   : > { %2270 = vrot.lane.b32.xlu0 %v2263_v28, %s11264_s13  ;;  %11547 = vst [vmem:[#allocation21_spill] sm:$0xff] %v5809_v49  ;;  %v11199_v28 = vrot.slane %v5865_v23, 1 }
 0x238   : > { %v2341_v29 = vsel %vm767_vm1, %v2338_v33, %v11199_v28 }
 0x23b   : > { %1829 = vrot.lane.b32.xlu1 %v1819_v31, %s11264_s13  ;;  %1881 = vrot.lane.b32.xlu2 %v1871_v32, %s11264_s13 }
 0x23d   : > { %v5812_v53 = vpop.permute.xlu1 %1695  ;;  %v5830_v2 = vpop.permute.xlu2 %1749 }
 0x23e   : > { %2346 = vrot.lane.b32.xlu0 %v2339_v36, %s11264_s13  ;;  %11548 = vst [vmem:[#allocation22_spill] sm:$0xff] %v5812_v53  ;;  %v5881_v36 = vpop.f32.mrf.mxu2 }
 0x23f   : > { %11550 = vst [vmem:[#allocation24_spill] sm:$0xff] %v5830_v2 }
 0x240   : > { %11561 = vst [vmem:[#allocation35_spill] sm:$0xff] %v5881_v36 }
 0x243   : > { %1799 = vrot.lane.b32.xlu1 %v1791_v37, %s11264_s13  ;;  %1851 = vrot.lane.b32.xlu2 %v1843_v38, %s11264_s13  ;;  %v5883_v37 = vstv %s5120_s11  ;;  %s5143_s11 = sld [smem:[#allocation2 + $0x4f]] }
 0x244   : > { %v1895_v38 = vmul.f32 %v5883_v37, %v5881_v36 }
 0x245   : > { %v5832_v6 = vpop.permute.xlu1 %1721  ;;  %v5836_v8 = vpop.permute.xlu2 %1775 }
 0x246   : > { %2381 = vrot.lane.b32.xlu0 %v2374_v54, %s11264_s13  ;;  %11551 = vst [vmem:[#allocation25_spill] sm:$0xff] %v5832_v6  ;;  %v2253_v54 = vmul.f32 %v5748_v19, %v5665_v42 }
 0x247   : > { %11552 = vst [vmem:[#allocation26_spill] sm:$0xff] %v5836_v8 }
 0x248   : > { %v5838_v9 = vpop.permute.xlu0 %2159 }
 0x249   : > { %11553 = vst [vmem:[#allocation27_spill] sm:$0xff] %v5838_v9 }
 0x24b   : > { %1877 = vrot.lane.b32.xlu1 %v1869_v56, %s11264_s13  ;;  %1857 = vrot.lane.b32.xlu2 %v1846_v57, %s11264_s13  ;;  %v2264_v56 = vrot.slane %v2253_v54, 1  ;;  %v5936_v54 = vstv %s5122_s14  ;;  %s5145_s14 = sld [smem:[#allocation2 + $0x74]] }
 0x24d   : > { %v5844_v16 = vpop.permute.xlu1 %1747  ;;  %v5852_v18 = vpop.permute.xlu2 %2196  ;;  %v2265_v0 = vsel %vm767_vm1, %v2262_v24, %v2264_v56  ;;  %v2289_v24 = vmul.f32 %v5727_v12, %v5703_v62 }
 0x24e   : > { %2276 = vrot.lane.b32.xlu0 %v2269_v63, %s11264_s13  ;;  %11554 = vst [vmem:[#allocation28_spill] sm:$0xff] %v5844_v16  ;;  %v1973_v63 = vmul.f32 %v5905_v1, %v5881_v36 }
 0x24f   : > { %11555 = vst [vmem:[#allocation29_spill] sm:$0xff] %v5852_v18  ;;  %v2299_v17 = vrot.slane %v2289_v24, 1  ;;  %v5947_v24 = vpop.f32.mrf.mxu3 }
 0x250   : > { %v5854_v20 = vpop.permute.xlu0 %1699  ;;  %11577 = vst [vmem:[#allocation51_spill] sm:$0xff] %v5947_v24 }
 0x251   : > { %11556 = vst [vmem:[#allocation30_spill] sm:$0xff] %v5854_v20 }
 0x253   : > { %1805 = vrot.lane.b32.xlu1 %v1794_v58, %s11264_s13  ;;  %1827 = vrot.lane.b32.xlu2 %v1818_v13, %s11264_s13  ;;  %v2267_v58 = vsel %vm767_vm1, %v2264_v56, %v2266_v40  ;;  %v2298_v13 = vrot.slane %v2288_v21, 1 }
 0x255   : > { %v5858_v15 = vpop.permute.xlu1 %1773  ;;  %v5875_v31 = vpop.permute.xlu2 %2161  ;;  %v2300_v61 = vsel %vm767_vm1, %v2298_v13, %v2299_v17 }
 0x256   : > { %11557 = vst [vmem:[#allocation31_spill] sm:$0xff] %v5858_v15  ;;  %2387 = vrot.lane.b32.xlu0 %v2380_v26, %s11264_s13 }
 0x257   : > { %11558 = vst [vmem:[#allocation32_spill] sm:$0xff] %v5875_v31 }
 0x258   : > { %v5877_v59 = vpop.permute.xlu0 %2124 }
 0x259   : > { %11559 = vst [vmem:[#allocation33_spill] sm:$0xff] %v5877_v59 }
 0x25b   : > { %1883 = vrot.lane.b32.xlu1 %v1872_v22, %s11264_s13  ;;  %2348 = vrot.lane.b32.xlu2 %v2341_v29, %s11264_s13 }
 0x25d   : > { %v5879_v32 = vpop.permute.xlu1 %2122  ;;  %v5889_v33 = vpop.permute.xlu2 %1727 }
 0x25e   : > { %11560 = vst [vmem:[#allocation34_spill] sm:$0xff] %v5879_v32  ;;  %1903 = vrot.lane.b32.xlu0 %v1895_v38, %s11264_s13  ;;  %v5932_v38 = vpop.f32.mrf.mxu2 }
 0x25f   : > { %11562 = vst [vmem:[#allocation36_spill] sm:$0xff] %v5889_v33  ;;  %v1948_v56 = vmul.f32 %v5936_v54, %v5932_v38 }
 0x260   : > { %v5891_v50 = vpop.permute.xlu0 %2235  ;;  %11573 = vst [vmem:[#allocation47_spill] sm:$0xff] %v5932_v38 }
 0x261   : > { %11563 = vst [vmem:[#allocation37_spill] sm:$0xff] %v5891_v50  ;;  %v2329_v50 = vmul.f32 %v5770_v27, %v5824_v60 }
 0x263   : > { %1853 = vrot.lane.b32.xlu1 %v1844_v45, %s11264_s13  ;;  %2272 = vrot.lane.b32.xlu2 %v2265_v0, %s11264_s13  ;;  %v2364_v0 = vmul.f32 %v5799_v43, %v5665_v42  ;;  %v5957_v43 = vstv %s5121_s15  ;;  %s5146_s15 = sld [smem:[#allocation2 + $0x78]] }
 0x264   : > { %v1922_v59 = vmul.f32 %v5957_v43, %v5932_v38 }
 0x265   : > { %v5897_v57 = vpop.permute.xlu1 %2233  ;;  %v5903_v39 = vpop.permute.xlu2 %1753 }
 0x266   : > { %11564 = vst [vmem:[#allocation38_spill] sm:$0xff] %v5897_v57  ;;  %1981 = vrot.lane.b32.xlu0 %v1973_v63, %s11264_s13  ;;  %v2375_v63 = vrot.slane %v2364_v0, 1  ;;  %v5978_v57 = vpop.f32.mrf.mxu3 }
 0x267   : > { %11565 = vst [vmem:[#allocation39_spill] sm:$0xff] %v5903_v39 }
 0x268   : > { %v5907_v3 = vpop.permute.xlu0 %2200  ;;  %v2378_v13 = vsel %vm767_vm1, %v2375_v63, %v2377_v47  ;;  %v2292_v47 = vmul.f32 %v5727_v12, %v5824_v60  ;;  %11583 = vst [vmem:[#allocation57_spill] sm:$0xff] %v5978_v57  ;;  %v5982_v12 = vstv %s5126_s16  ;;  %s5147_s16 = sld [smem:[#allocation2 + $0x7c]] }
 0x269   : > { %11566 = vst [vmem:[#allocation40_spill] sm:$0xff] %v5907_v3  ;;  %v2337_v3 = vsel %vm767_vm1, %v2335_v5, %v11586_v10  ;;  %v11590_v5 = vrot.slane %v5865_v23, 1  ;;  %v1947_v23 = vmul.f32 %v5936_v54, %v5881_v36 }
 0x26a   : > { %v2305_v44 = vrot.slane %v2292_v47, 1 }
 0x26b   : > { %2274 = vrot.lane.b32.xlu1 %v2267_v58, %s11264_s13  ;;  %2307 = vrot.lane.b32.xlu2 %v2300_v61, %s11264_s13  ;;  %v2376_v61 = vsel %vm767_vm1, %v2373_v51, %v2375_v63 }
 0x26d   : > { %v5909_v19 = vpop.permute.xlu1 %1725  ;;  %v5922_v4 = vpop.permute.xlu2 %1779 }
 0x26e   : > { %11567 = vst [vmem:[#allocation41_spill] sm:$0xff] %v5909_v19  ;;  %1957 = vrot.lane.b32.xlu0 %v1948_v56, %s11264_s13  ;;  %v5959_v56 = vpop.f32.mrf.mxu2 }
 0x26f   : > { %11568 = vst [vmem:[#allocation42_spill] sm:$0xff] %v5922_v4  ;;  %v1923_v0 = vmul.f32 %v5957_v43, %v5959_v56 }
 0x270   : > { %v5924_v22 = vpop.permute.xlu0 %2165  ;;  %11579 = vst [vmem:[#allocation53_spill] sm:$0xff] %v5959_v56 }
 0x271   : > { %11569 = vst [vmem:[#allocation43_spill] sm:$0xff] %v5924_v22 }
 0x273   : > { %2385 = vrot.lane.b32.xlu1 %v2378_v13, %s11264_s13  ;;  %2383 = vrot.lane.b32.xlu2 %v2376_v61, %s11264_s13  ;;  %v2302_v13 = vsel %vm767_vm1, %v2299_v17, %v2301_v14  ;;  %v2306_v61 = vsel %vm767_vm1, %v2303_v11, %v2305_v44  ;;  %v5988_v14 = vstv %s5137_s17  ;;  %v1921_v17 = vmul.f32 %v5957_v43, %v5881_v36  ;;  %s5148_s17 = sld [smem:[#allocation2 + $0x71]] }
 0x274   : > { %v2437_v11 = vmul.f32 %v5988_v14, %v5932_v38  ;;  %v5996_v47 = vmul.f32 %v5988_v14, %v5959_v56 }
 0x275   : > { %v5926_v40 = vpop.permute.xlu1 %1751  ;;  %v5928_v26 = vpop.permute.xlu2 %2126 }
 0x276   : > { %11570 = vst [vmem:[#allocation44_spill] sm:$0xff] %v5926_v40  ;;  %1933 = vrot.lane.b32.xlu0 %v1923_v0, %s11264_s13  ;;  %v2051_v0 = vmul.f32 %v5982_v12, %v5978_v57  ;;  %v11201_v22 = vrot.slane %v5996_v47, 1 }
 0x277   : > { %11571 = vst [vmem:[#allocation45_spill] sm:$0xff] %v5928_v26  ;;  %v1896_v26 = vmul.f32 %v5883_v37, %v5932_v38 }
 0x278   : > { %v5930_v29 = vpop.permute.xlu0 %1855 }
 0x279   : > { %11572 = vst [vmem:[#allocation46_spill] sm:$0xff] %v5930_v29  ;;  %v6378_v29 = vstv %s5144_s12  ;;  %s5159_s12 = sld [smem:[#allocation2 + $0x7f]] }
 0x27b   : > { %2309 = vrot.lane.b32.xlu1 %v2302_v13, %s11264_s13  ;;  %2313 = vrot.lane.b32.xlu2 %v2306_v61, %s11264_s13  ;;  %v2447_v61 = vrot.slane %v2437_v11, 1  ;;  %v2342_v11 = vrot.slane %v2329_v50, 1  ;;  %v6030_v50 = vpop.f32.mrf.mxu2 }
 0x27c   : > { %11592 = vst [vmem:[#allocation64_spill] sm:$0xff] %v6030_v50  ;;  %v1898_v10 = vmul.f32 %v5883_v37, %v6030_v50 }
 0x27d   : > { %v5934_v45 = vpop.permute.xlu1 %1777  ;;  %v5943_v58 = vpop.permute.xlu2 %2237 }
 0x27e   : > { %11574 = vst [vmem:[#allocation48_spill] sm:$0xff] %v5934_v45  ;;  %2059 = vrot.lane.b32.xlu0 %v2051_v0, %s11264_s13  ;;  %v2450_v0 = vsel %vm767_vm1, %v2447_v61, %v11201_v22 }
 0x27f   : > { %11575 = vst [vmem:[#allocation49_spill] sm:$0xff] %v5943_v58  ;;  %v6061_v58 = vstv %s5125_s25  ;;  %s5150_s25 = sld [smem:[#allocation2 + $0x79]] }
 0x280   : > { %v5945_v21 = vpop.permute.xlu0 %1825 }
 0x281   : > { %11576 = vst [vmem:[#allocation50_spill] sm:$0xff] %v5945_v21 }
 0x283   : > { %2344 = vrot.lane.b32.xlu1 %v2337_v3, %s11264_s13  ;;  %1929 = vrot.lane.b32.xlu2 %v1921_v17, %s11264_s13  ;;  %v2343_v3 = vsel %vm767_vm1, %v11590_v5, %v2342_v11  ;;  %v1974_v11 = vmul.f32 %v5905_v1, %v5932_v38 }
 0x285   : > { %v5953_v28 = vpop.permute.xlu1 %2198  ;;  %v5966_v51 = vpop.permute.xlu2 %2202 }
 0x286   : > { %11578 = vst [vmem:[#allocation52_spill] sm:$0xff] %v5953_v28  ;;  %2457 = vrot.lane.b32.xlu0 %v2450_v0, %s11264_s13  ;;  %v6034_v0 = vstv %s5136_s23  ;;  %s5149_s23 = sld [smem:[#allocation2 + $0x75]] }
 0x287   : > { %11580 = vst [vmem:[#allocation54_spill] sm:$0xff] %v5966_v51 }
 0x288   : > { %v5968_v63 = vpop.permute.xlu0 %1831 }
 0x289   : > { %11581 = vst [vmem:[#allocation55_spill] sm:$0xff] %v5968_v63 }
 0x28b   : > { %2350 = vrot.lane.b32.xlu1 %v2343_v3, %s11264_s13  ;;  %1905 = vrot.lane.b32.xlu2 %v1896_v26, %s11264_s13  ;;  %v2399_v26 = vmul.f32 %v6034_v0, %v5881_v36  ;;  %v6047_v3 = vmul.f32 %v6034_v0, %v5932_v38 }
 0x28d   : > { %v5976_v35 = vpop.permute.xlu1 %1701  ;;  %v5999_v44 = vpop.permute.xlu2 %1803  ;;  %v11202_v31 = vrot.slane %v6047_v3, 1 }
 0x28e   : > { %11582 = vst [vmem:[#allocation56_spill] sm:$0xff] %v5976_v35  ;;  %1909 = vrot.lane.b32.xlu0 %v1898_v10, %s11264_s13  ;;  %v1976_v10 = vmul.f32 %v5905_v1, %v6030_v50 }
 0x28f   : > { %11584 = vst [vmem:[#allocation58_spill] sm:$0xff] %v5999_v44 }
 0x290   : > { %v6001_v13 = vpop.permute.xlu0 %1801 }
 0x291   : > { %11585 = vst [vmem:[#allocation59_spill] sm:$0xff] %v6001_v13 }
 0x293   : > { %1955 = vrot.lane.b32.xlu1 %v1947_v23, %s11264_s13  ;;  %1983 = vrot.lane.b32.xlu2 %v1974_v11, %s11264_s13  ;;  %v2436_v11 = vmul.f32 %v5988_v14, %v5881_v36 }
 0x295   : > { %v6009_v28 = vpop.permute.xlu1 %2163  ;;  %v6019_v30 = vpop.permute.xlu2 %1881  ;;  %v2446_v51 = vrot.slane %v2436_v11, 1 }
 0x296   : > { %11587 = vst [vmem:[#allocation60_spill] sm:$0xff] %v6009_v28  ;;  %v2409_v28 = vrot.slane %v2399_v26, 1  ;;  %1987 = vrot.lane.b32.xlu0 %v1976_v10, %s11264_s13 }
 0x297   : > { %11588 = vst [vmem:[#allocation61_spill] sm:$0xff] %v6019_v30  ;;  %v2448_v18 = vsel %vm767_vm1, %v2446_v51, %v2447_v61 }
 0x298   : > { %v6021_v27 = vpop.permute.xlu0 %1879  ;;  %v2411_v23 = vsel %vm767_vm1, %v2409_v28, %v11202_v31  ;;  %v6080_v28 = vmul.f32 %v6034_v0, %v6030_v50 }
 0x299   : > { %11589 = vst [vmem:[#allocation62_spill] sm:$0xff] %v6021_v27 }
 0x29a   : > { %v2414_v11 = vrot.slane %v6080_v28, 1 }
 0x29b   : > { %1931 = vrot.lane.b32.xlu1 %v1922_v59, %s11264_s13  ;;  %2418 = vrot.lane.b32.xlu2 %v2411_v23, %s11264_s13  ;;  %v1949_v59 = vmul.f32 %v5936_v54, %v5959_v56  ;;  %v2401_v23 = vmul.f32 %v6034_v0, %v5959_v56 }
 0x29d   : > { %v6028_v17 = vpop.permute.xlu1 %2128  ;;  %v6041_v5 = vpop.permute.xlu2 %1851  ;;  %v2412_v9 = vrot.slane %v2401_v23, 1 }
 0x29e   : > { %11591 = vst [vmem:[#allocation63_spill] sm:$0xff] %v6028_v17 }
 0x29f   : > { %11593 = vst [vmem:[#allocation65_spill] sm:$0xff] %v6041_v5 }
 0x2a0   : > { %v6049_v22 = vpop.permute.xlu0 %2311 }
 0x2a1   : > { %11594 = vst [vmem:[#allocation66_spill] sm:$0xff] %v6049_v22  ;;  %v6068_v22 = vpop.f32.mrf.mxu3 }
 0x2a2   : > { %11596 = vst [vmem:[#allocation68_spill] sm:$0xff] %v6068_v22  ;;  %v2026_v10 = vmul.f32 %v6061_v58, %v6068_v22 }
 0x2a3   : > { %2455 = vrot.lane.b32.xlu1 %v2448_v18, %s11264_s13  ;;  %1959 = vrot.lane.b32.xlu2 %v1949_v59, %s11264_s13  ;;  %v1897_v18 = vmul.f32 %v5883_v37, %v5959_v56  ;;  %v6113_v59 = vstv %s5127_s30  ;;  %v1975_v37 = vmul.f32 %v5905_v1, %v5959_v56  ;;  %v1924_v1 = vmul.f32 %v5957_v43, %v6030_v50  ;;  %s5152_s30 = sld [smem:[#allocation2 + $0x72]] }
 0x2a4   : > { %2035 = vrot.lane.b32.xlu0 %v2026_v10, %s11264_s13  ;;  %v2052_v43 = vmul.f32 %v5982_v12, %v6068_v22 }
 0x2a5   : > { %v6055_v17 = vpop.permute.xlu1 %2239  ;;  %v6072_v26 = vpop.permute.xlu2 %1857 }
 0x2a6   : > { %11595 = vst [vmem:[#allocation67_spill] sm:$0xff] %v6055_v17 }
 0x2a7   : > { %11597 = vst [vmem:[#allocation69_spill] sm:$0xff] %v6072_v26 }
 0x2a8   : > { %v6076_v17 = vpop.permute.xlu0 %2270 }
 0x2a9   : > { %11598 = vst [vmem:[#allocation70_spill] sm:$0xff] %v6076_v17  ;;  %v6093_v17 = vstv %s5124_s26  ;;  %v6107_v61 = vpop.f32.mrf.mxu3  ;;  %s5151_s26 = sld [smem:[#allocation2 + $0x7d]] }
 0x2aa   : > { %v1999_v26 = vmul.f32 %v6093_v17, %v5978_v57  ;;  %v2001_v28 = vmul.f32 %v6093_v17, %v6107_v61 }
 0x2ab   : > { %1907 = vrot.lane.b32.xlu1 %v1897_v18, %s11264_s13  ;;  %v2079_v18 = vmul.f32 %v6113_v59, %v6107_v61 }
 0x2ac   : > { %2007 = vrot.lane.b32.xlu2 %v1999_v26, %s11264_s13 }
 0x2ad   : > { %v6082_v31 = vpop.permute.xlu1 %1829  ;;  %v6095_v32 = vpop.permute.xlu2 %1827 }
 0x2ae   : > { %11599 = vst [vmem:[#allocation71_spill] sm:$0xff] %v6082_v31  ;;  %v2415_v31 = vsel %vm767_vm1, %v2412_v9, %v2414_v11 }
 0x2af   : > { %11600 = vst [vmem:[#allocation72_spill] sm:$0xff] %v6095_v32  ;;  %2422 = vrot.lane.b32.xlu0 %v2415_v31, %s11264_s13 }
 0x2b0   : > { %v6097_v10 = vpop.permute.xlu0 %2346 }
 0x2b1   : > { %11601 = vst [vmem:[#allocation73_spill] sm:$0xff] %v6097_v10  ;;  %v2077_v10 = vmul.f32 %v6113_v59, %v5978_v57 }
 0x2b3   : > { %1985 = vrot.lane.b32.xlu1 %v1975_v37, %s11264_s13  ;;  %v6139_v37 = vpop.f32.mrf.mxu3 }
 0x2b4   : > { %2085 = vrot.lane.b32.xlu2 %v2077_v10, %s11264_s13  ;;  %11608 = vst [vmem:[#allocation80_spill] sm:$0xff] %v6139_v37  ;;  %v2054_v10 = vmul.f32 %v5982_v12, %v6139_v37 }
 0x2b5   : > { %v6105_v51 = vpop.permute.xlu1 %1799  ;;  %v6115_v23 = vpop.permute.xlu2 %2348 }
 0x2b6   : > { %11602 = vst [vmem:[#allocation74_spill] sm:$0xff] %v6105_v51  ;;  %v2403_v51 = vmul.f32 %v6034_v0, %v5947_v24 }
 0x2b7   : > { %11603 = vst [vmem:[#allocation75_spill] sm:$0xff] %v6115_v23  ;;  %2011 = vrot.lane.b32.xlu0 %v2001_v28, %s11264_s13  ;;  %v2025_v28 = vmul.f32 %v6061_v58, %v5978_v57 }
 0x2b8   : > { %v6118_v31 = vpop.permute.xlu0 %2381  ;;  %v2416_v35 = vrot.slane %v2403_v51, 1 }
 0x2b9   : > { %11604 = vst [vmem:[#allocation76_spill] sm:$0xff] %v6118_v31 }
 0x2ba   : > { %v2417_v51 = vsel %vm767_vm1, %v2414_v11, %v2416_v35 }
 0x2bb   : > { %2033 = vrot.lane.b32.xlu1 %v2025_v28, %s11264_s13  ;;  %v11610_v28 = vrot.slane %v6047_v3, 1 }
 0x2bc   : > { %1935 = vrot.lane.b32.xlu2 %v1924_v1, %s11264_s13 }
 0x2bd   : > { %v6126_v26 = vpop.permute.xlu1 %1877  ;;  %v6135_v31 = vpop.permute.xlu2 %2272  ;;  %v2413_v1 = vsel %vm767_vm1, %v11610_v28, %v2412_v9 }
 0x2be   : > { %11605 = vst [vmem:[#allocation77_spill] sm:$0xff] %v6126_v26 }
 0x2bf   : > { %2089 = vrot.lane.b32.xlu0 %v2079_v18, %s11264_s13  ;;  %11606 = vst [vmem:[#allocation78_spill] sm:$0xff] %v6135_v31  ;;  %v6145_v18 = vstv %s5138_s6  ;;  %s5153_s6 = sld [smem:[#allocation2 + $0x76]] }
 0x2c0   : > { %v6137_v23 = vpop.permute.xlu0 %2276  ;;  %v2473_v31 = vmul.f32 %v6145_v18, %v5881_v36  ;;  %v2477_v0 = vmul.f32 %v6145_v18, %v5947_v24 }
 0x2c1   : > { %11607 = vst [vmem:[#allocation79_spill] sm:$0xff] %v6137_v23  ;;  %v6155_v23 = vmul.f32 %v6145_v18, %v5932_v38 }
 0x2c2   : > { %v2483_v32 = vrot.slane %v2473_v31, 1  ;;  %v1950_v31 = vmul.f32 %v5936_v54, %v6030_v50 }
 0x2c3   : > { %2420 = vrot.lane.b32.xlu1 %v2413_v1, %s11264_s13  ;;  %v11203_v5 = vrot.slane %v6155_v23, 1 }
 0x2c4   : > { %2061 = vrot.lane.b32.xlu2 %v2052_v43, %s11264_s13  ;;  %v6187_v43 = vmul.f32 %v5988_v14, %v6030_v50 }
 0x2c5   : > { %v6147_v26 = vpop.permute.xlu1 %1805  ;;  %v2485_v9 = vsel %vm767_vm1, %v2483_v32, %v11203_v5  ;;  %v2490_v32 = vrot.slane %v2477_v0, 1  ;;  %v6197_v5 = vstv %s5139_s7  ;;  %v2000_v0 = vmul.f32 %v6093_v17, %v6068_v22  ;;  %s5154_s7 = sld [smem:[#allocation2 + $0x7a]] }
 0x2c6   : > { %11609 = vst [vmem:[#allocation81_spill] sm:$0xff] %v6147_v26  ;;  %v6165_v26 = vpop.permute.xlu2 %2307  ;;  %v6204_v11 = vmul.f32 %v6197_v5, %v6030_v50 }
 0x2c7   : > { %2065 = vrot.lane.b32.xlu0 %v2054_v10, %s11264_s13  ;;  %11611 = vst [vmem:[#allocation82_spill] sm:$0xff] %v6165_v26  ;;  %v6182_v10 = vmul.f32 %v6145_v18, %v6030_v50  ;;  %v6226_v26 = vstv %s5140_s8  ;;  %s5155_s8 = sld [smem:[#allocation2 + $0x7e]] }
 0x2c8   : > { %v6168_v30 = vpop.permute.xlu0 %2387 }
 0x2c9   : > { %11612 = vst [vmem:[#allocation83_spill] sm:$0xff] %v6168_v30  ;;  %v11204_v1 = vrot.slane %v6182_v10, 1 }
 0x2cb   : > { %1961 = vrot.lane.b32.xlu1 %v1950_v31, %s11264_s13  ;;  %v2491_v35 = vsel %vm767_vm1, %v11204_v1, %v2490_v32 }
 0x2cc   : > { %2424 = vrot.lane.b32.xlu2 %v2417_v51, %s11264_s13  ;;  %v6213_v51 = vmul.f32 %v6197_v5, %v5959_v56 }
 0x2cd   : > { %v6173_v3 = vpop.permute.xlu1 %1883 }
 0x2ce   : > { %11613 = vst [vmem:[#allocation84_spill] sm:$0xff] %v6173_v3  ;;  %v6191_v28 = vpop.permute.xlu2 %2383  ;;  %v11207_v30 = vrot.slane %v6213_v51, 1 }
 0x2cf   : > { %2492 = vrot.lane.b32.xlu0 %v2485_v9, %s11264_s13  ;;  %11614 = vst [vmem:[#allocation85_spill] sm:$0xff] %v6191_v28  ;;  %v11205_v9 = vrot.slane %v6187_v43, 1  ;;  %v11617_v28 = vrot.slane %v5996_v47, 1 }
 0x2d0   : > { %v6194_v54 = vpop.permute.xlu0 %1903 }
 0x2d1   : > { %11615 = vst [vmem:[#allocation86_spill] sm:$0xff] %v6194_v54  ;;  %v2452_v32 = vsel %vm767_vm1, %v11617_v28, %v11205_v9  ;;  %v2027_v28 = vmul.f32 %v6061_v58, %v6107_v61  ;;  %v2078_v9 = vmul.f32 %v6113_v59, %v6068_v22 }
 0x2d3   : > { %2009 = vrot.lane.b32.xlu1 %v2000_v0, %s11264_s13  ;;  %v6237_v0 = vmul.f32 %v6226_v26, %v6107_v61 }
 0x2d4   : > { %2459 = vrot.lane.b32.xlu2 %v2452_v32, %s11264_s13 }
 0x2d5   : > { %v6209_v31 = vpop.permute.xlu1 %1853 }
 0x2d6   : > { %11616 = vst [vmem:[#allocation87_spill] sm:$0xff] %v6209_v31  ;;  %v6223_v1 = vpop.permute.xlu2 %2313  ;;  %v6253_v31 = vstv %s5141_s9  ;;  %s5156_s9 = sld [smem:[#allocation2 + $0x73]] }
 0x2d7   : > { %2498 = vrot.lane.b32.xlu0 %v2491_v35, %s11264_s13  ;;  %v11206_v35 = vrot.slane %v6204_v11, 1  ;;  %11618 = vst [vmem:[#allocation88_spill] sm:$0xff] %v6223_v1  ;;  %v6246_v1 = vmul.f32 %v6226_v26, %v6068_v22 }
 0x2d8   : > { %v6240_v32 = vpop.permute.xlu0 %1981 }
 0x2d9   : > { %v2526_v47 = vsel %vm767_vm1, %v11207_v30, %v11206_v35  ;;  %11619 = vst [vmem:[#allocation89_spill] sm:$0xff] %v6240_v32  ;;  %v11208_v30 = vrot.slane %v6237_v0, 1  ;;  %v11209_v32 = vrot.slane %v6246_v1, 1 }
 0x2db   : > { %2087 = vrot.lane.b32.xlu1 %v2078_v9, %s11264_s13  ;;  %v2561_v54 = vsel %vm767_vm1, %v11209_v32, %v11208_v30  ;;  %v2002_v9 = vmul.f32 %v6093_v17, %v6139_v37  ;;  %v6279_v32 = vpop.f32.mrf.mxu3 }
 0x2dc   : > { %2037 = vrot.lane.b32.xlu2 %v2027_v28, %s11264_s13  ;;  %v2584_v28 = vmul.f32 %v6253_v31, %v5978_v57  ;;  %11623 = vst [vmem:[#allocation93_spill] sm:$0xff] %v6279_v32 }
 0x2dd   : > { %v6250_v35 = vpop.permute.xlu1 %2274 }
 0x2de   : > { %11620 = vst [vmem:[#allocation90_spill] sm:$0xff] %v6250_v35  ;;  %v6269_v35 = vmul.f32 %v6253_v31, %v6068_v22  ;;  %v2594_v30 = vrot.slane %v2584_v28, 1  ;;  %v6296_v28 = vmul.f32 %v6253_v31, %v6139_v37 }
 0x2df   : > { %2533 = vrot.lane.b32.xlu0 %v2526_v47, %s11264_s13  ;;  %v6255_v47 = vpop.permute.xlu2 %1929 }
 0x2e0   : > { %11621 = vst [vmem:[#allocation91_spill] sm:$0xff] %v6255_v47  ;;  %v2053_v47 = vmul.f32 %v5982_v12, %v6107_v61  ;;  %v6274_v3 = vpop.permute.xlu0 %1957  ;;  %v11210_v17 = vrot.slane %v6269_v35, 1 }
 0x2e1   : > { %11622 = vst [vmem:[#allocation92_spill] sm:$0xff] %v6274_v3  ;;  %v2440_v3 = vmul.f32 %v5988_v14, %v5947_v24  ;;  %v6315_v14 = vstv %s5142_s10  ;;  %s5157_s10 = sld [smem:[#allocation2 + $0x77]] }
 0x2e2   : > { %v2596_v12 = vsel %vm767_vm1, %v2594_v30, %v11210_v17  ;;  %v2475_v30 = vmul.f32 %v6145_v18, %v5959_v56  ;;  %v6319_v18 = vmul.f32 %v6315_v14, %v6139_v37 }
 0x2e3   : > { %2063 = vrot.lane.b32.xlu1 %v2053_v47, %s11264_s13  ;;  %v2028_v47 = vmul.f32 %v6061_v58, %v6139_v37  ;;  %v11211_v58 = vrot.slane %v6296_v28, 1 }
 0x2e4   : > { %2013 = vrot.lane.b32.xlu2 %v2002_v9, %s11264_s13  ;;  %v2080_v9 = vmul.f32 %v6113_v59, %v6139_v37 }
 0x2e5   : > { %v6281_v27 = vpop.permute.xlu1 %2385 }
 0x2e6   : > { %11624 = vst [vmem:[#allocation94_spill] sm:$0xff] %v6281_v27 }
 0x2e7   : > { %2568 = vrot.lane.b32.xlu0 %v2561_v54, %s11264_s13  ;;  %v6283_v13 = vpop.permute.xlu2 %1905  ;;  %v2588_v54 = vmul.f32 %v6253_v31, %v6279_v32 }
 0x2e8   : > { %11625 = vst [vmem:[#allocation95_spill] sm:$0xff] %v6283_v13  ;;  %v6299_v13 = vpop.permute.xlu0 %1933 }
 0x2e9   : > { %v2601_v27 = vrot.slane %v2588_v54, 1  ;;  %11626 = vst [vmem:[#allocation96_spill] sm:$0xff] %v6299_v13  ;;  %v2486_v13 = vrot.slane %v2475_v30, 1 }
 0x2eb   : > { %2039 = vrot.lane.b32.xlu1 %v2028_v47, %s11264_s13  ;;  %v2602_v54 = vsel %vm767_vm1, %v11211_v58, %v2601_v27  ;;  %v6324_v47 = vmul.f32 %v6315_v14, %v6107_v61  ;;  %v2510_v58 = vmul.f32 %v6197_v5, %v5881_v36 }
 0x2ec   : > { %2091 = vrot.lane.b32.xlu2 %v2080_v9, %s11264_s13 }
 0x2ed   : > { %v6308_v59 = vpop.permute.xlu1 %2309 }
 0x2ee   : > { %11627 = vst [vmem:[#allocation97_spill] sm:$0xff] %v6308_v59  ;;  %v11630_v59 = vrot.slane %v6187_v43, 1 }
 0x2ef   : > { %2603 = vrot.lane.b32.xlu0 %v2596_v12, %s11264_s13  ;;  %v6310_v17 = vpop.permute.xlu2 %1983  ;;  %v2453_v12 = vrot.slane %v2440_v3, 1  ;;  %v11631_v3 = vrot.slane %v6155_v23, 1  ;;  %v11212_v23 = vrot.slane %v6324_v47, 1 }
 0x2f0   : > { %11628 = vst [vmem:[#allocation98_spill] sm:$0xff] %v6310_v17  ;;  %v6326_v9 = vpop.permute.xlu0 %2059 }
 0x2f1   : > { %11629 = vst [vmem:[#allocation99_spill] sm:$0xff] %v6326_v9  ;;  %v2454_v27 = vsel %vm767_vm1, %v11630_v59, %v2453_v12  ;;  %v2487_v30 = vsel %vm767_vm1, %v11631_v3, %v2486_v13  ;;  %v11213_v9 = vrot.slane %v6319_v18, 1  ;;  %v2520_v59 = vrot.slane %v2510_v58, 1 }
 0x2f2   : > { %v6346_v3 = vstv %s5143_s11  ;;  %s5158_s11 = sld [smem:[#allocation2 + $0x7b]] }
 0x2f3   : > { %2461 = vrot.lane.b32.xlu1 %v2454_v27, %s11264_s13  ;;  %v2637_v27 = vsel %vm767_vm1, %v11212_v23, %v11213_v9  ;;  %v2514_v23 = vmul.f32 %v6197_v5, %v5947_v24 }
 0x2f4   : > { %2494 = vrot.lane.b32.xlu2 %v2487_v30, %s11264_s13  ;;  %v6355_v30 = vmul.f32 %v6346_v3, %v6107_v61 }
 0x2f5   : > { %v6341_v17 = vpop.permute.xlu1 %2344 }
 0x2f6   : > { %11632 = vst [vmem:[#allocation100_spill] sm:$0xff] %v6341_v17 }
 0x2f7   : > { %2609 = vrot.lane.b32.xlu0 %v2602_v54, %s11264_s13  ;;  %v2511_v54 = vmul.f32 %v6197_v5, %v5932_v38  ;;  %v6343_v43 = vpop.permute.xlu2 %2418  ;;  %v2695_v5 = vmul.f32 %v6378_v29, %v5537_v41 }
 0x2f8   : > { %11633 = vst [vmem:[#allocation101_spill] sm:$0xff] %v6343_v43  ;;  %v6360_v43 = vmul.f32 %v6346_v3, %v6068_v22  ;;  %v6362_v58 = vpop.permute.xlu0 %2457 }
 0x2f9   : > { %v2521_v12 = vrot.slane %v2511_v54, 1  ;;  %11634 = vst [vmem:[#allocation102_spill] sm:$0xff] %v6362_v58  ;;  %v11635_v54 = vrot.slane %v6182_v10, 1  ;;  %v2527_v10 = vrot.slane %v2514_v23, 1  ;;  %v11639_v23 = vrot.slane %v6213_v51, 1 }
 0x2fa   : > { %v11214_v58 = vrot.slane %v6360_v43, 1 }
 0x2fb   : > { %v2489_v17 = vsel %vm767_vm1, %v2486_v13, %v11635_v54  ;;  %v2522_v44 = vsel %vm767_vm1, %v2520_v59, %v2521_v12  ;;  %v2524_v59 = vsel %vm767_vm1, %v2521_v12, %v11639_v23  ;;  %v11640_v54 = vrot.slane %v6204_v11, 1 }
 0x2fc   : > { %2496 = vrot.lane.b32.xlu1 %v2489_v17, %s11264_s13  ;;  %2529 = vrot.lane.b32.xlu2 %v2522_v44, %s11264_s13  ;;  %v6387_v44 = vmul.f32 %v6378_v29, %v5548_v46  ;;  %v2705_v11 = vrot.slane %v2695_v5, 2  ;;  %v11644_v5 = vrot.slane %v6246_v1, 1 }
 0x2fd   : > { %v6373_v9 = vpop.permute.xlu1 %2350 }
 0x2fe   : > { %11636 = vst [vmem:[#allocation103_spill] sm:$0xff] %v6373_v9  ;;  %v2528_v9 = vsel %vm767_vm1, %v11640_v54, %v2527_v10 }
 0x2ff   : > { %2644 = vrot.lane.b32.xlu0 %v2637_v27, %s11264_s13  ;;  %v11215_v27 = vrot.slane %v6355_v30, 1  ;;  %v6375_v45 = vpop.permute.xlu2 %1959 }
 0x300   : > { %11637 = vst [vmem:[#allocation104_spill] sm:$0xff] %v6375_v45  ;;  %v6392_v17 = vpop.permute.xlu0 %1909  ;;  %v6504_v45 = vstv %s5147_s16  ;;  %s5080_s16 = sld [smem:[#allocation2 + $0x30]] }
 0x301   : > { %v2672_v13 = vsel %vm767_vm1, %v11214_v58, %v11215_v27  ;;  %11638 = vst [vmem:[#allocation105_spill] sm:$0xff] %v6392_v17  ;;  %v2547_v58 = vmul.f32 %v6226_v26, %v5978_v57  ;;  %v2550_v27 = vmul.f32 %v6226_v26, %v6139_v37 }
 0x303   : > { %v2557_v23 = vrot.slane %v2547_v58, 1  ;;  %v2562_v10 = vrot.slane %v2550_v27, 1  ;;  %v11645_v27 = vrot.slane %v6237_v0, 1 }
 0x304   : > { %2531 = vrot.lane.b32.xlu1 %v2524_v59, %s11264_s13  ;;  %2535 = vrot.lane.b32.xlu2 %v2528_v9, %s11264_s13  ;;  %v2699_v59 = vmul.f32 %v6378_v29, %v5636_v25  ;;  %v6419_v9 = vmul.f32 %v6378_v29, %v5609_v7 }
 0x305   : > { %v6407_v51 = vpop.permute.xlu1 %1955  ;;  %v2559_v58 = vsel %vm767_vm1, %v2557_v23, %v11644_v5 }
 0x306   : > { %11641 = vst [vmem:[#allocation106_spill] sm:$0xff] %v6407_v51  ;;  %v11217_v23 = vrot.slane %v6419_v9, 2 }
 0x307   : > { %2679 = vrot.lane.b32.xlu0 %v2672_v13, %s11264_s13  ;;  %v11216_v13 = vrot.slane %v6387_v44, 2  ;;  %v6409_v12 = vpop.permute.xlu2 %2007 }
 0x308   : > { %11642 = vst [vmem:[#allocation107_spill] sm:$0xff] %v6409_v12  ;;  %v6421_v17 = vpop.permute.xlu0 %1987  ;;  %v2563_v12 = vsel %vm767_vm1, %v11645_v27, %v2562_v10  ;;  %v6440_v27 = vstv %s5145_s14  ;;  %s5160_s14 = sld [smem:[#allocation2 + $0x20]] }
 0x309   : > { %v2707_v54 = vsel %vm1232_vm2, %v2705_v11, %v11216_v13  ;;  %11643 = vst [vmem:[#allocation108_spill] sm:$0xff] %v6421_v17  ;;  %v2586_v11 = vmul.f32 %v6253_v31, %v6107_v61  ;;  %v2712_v13 = vrot.slane %v2699_v59, 2  ;;  %v6447_v31 = vmul.f32 %v6440_v27, %v5609_v7 }
 0x30b   : > { %v2597_v0 = vrot.slane %v2586_v11, 1 }
 0x30c   : > { %2566 = vrot.lane.b32.xlu1 %v2559_v58, %s11264_s13  ;;  %2570 = vrot.lane.b32.xlu2 %v2563_v12, %s11264_s13  ;;  %v6452_v12 = vmul.f32 %v6440_v27, %v5569_v55  ;;  %v11649_v58 = vrot.slane %v6269_v35, 1 }
 0x30d   : > { %v6435_v17 = vpop.permute.xlu1 %1931 }
 0x30e   : > { %11646 = vst [vmem:[#allocation109_spill] sm:$0xff] %v6435_v17  ;;  %v2598_v11 = vsel %vm767_vm1, %v11649_v58, %v2597_v0  ;;  %v11218_v35 = vrot.slane %v6452_v12, 2 }
 0x30f   : > { %2714 = vrot.lane.b32.xlu0 %v2707_v54, %s11264_s13  ;;  %v2551_v54 = vmul.f32 %v6226_v26, %v6279_v32  ;;  %v6437_v1 = vpop.permute.xlu2 %2085  ;;  %v2713_v26 = vsel %vm1232_vm2, %v11217_v23, %v2712_v13  ;;  %v2621_v13 = vmul.f32 %v6315_v14, %v5978_v57  ;;  %v2622_v23 = vmul.f32 %v6315_v14, %v6068_v22 }
 0x310   : > { %11647 = vst [vmem:[#allocation110_spill] sm:$0xff] %v6437_v1 }
 0x311   : > { %v2564_v5 = vrot.slane %v2551_v54, 1  ;;  %v2631_v58 = vrot.slane %v2621_v13, 1 }
 0x313   : > { %v2565_v54 = vsel %vm767_vm1, %v2562_v10, %v2564_v5  ;;  %v2632_v10 = vrot.slane %v2622_v23, 1  ;;  %v6472_v5 = vstv %s5146_s15  ;;  %s7084_s15 = sld [smem:[#allocation2]] }
 0x314   : > { %2605 = vrot.lane.b32.xlu2 %v2598_v11, %s11264_s13  ;;  %2572 = vrot.lane.b32.xlu1 %v2565_v54, %s11264_s13  ;;  %v6481_v54 = vmul.f32 %v6472_v5, %v5569_v55 }
 0x315   : > { %v6467_v1 = vpop.permute.xlu1 %2455  ;;  %v2633_v13 = vsel %vm767_vm1, %v2631_v58, %v2632_v10 }
 0x316   : > { %v6454_v59 = vpop.permute.xlu0 %2035  ;;  %11650 = vst [vmem:[#allocation112_spill] sm:$0xff] %v6467_v1  ;;  %v6486_v1 = vmul.f32 %v6472_v5, %v5548_v46 }
 0x317   : > { %2720 = vrot.lane.b32.xlu0 %v2713_v26, %s11264_s13  ;;  %11648 = vst [vmem:[#allocation111_spill] sm:$0xff] %v6454_v59  ;;  %v11219_v26 = vrot.slane %v6447_v31, 2  ;;  %v6469_v59 = vpop.permute.xlu2 %1935 }
 0x318   : > { %11651 = vst [vmem:[#allocation113_spill] sm:$0xff] %v6469_v59  ;;  %v11653_v59 = vrot.slane %v6296_v28, 1 }
 0x319   : > { %v2748_v11 = vsel %vm1232_vm2, %v11218_v35, %v11219_v26  ;;  %v2625_v35 = vmul.f32 %v6315_v14, %v6279_v32  ;;  %v6513_v14 = vmul.f32 %v6504_v45, %v5548_v46 }
 0x31a   : > { %v2600_v17 = vsel %vm767_vm1, %v2597_v0, %v11653_v59  ;;  %v11657_v59 = vrot.slane %v6319_v18, 1 }
 0x31b   : > { %v2638_v58 = vrot.slane %v2625_v35, 1 }
 0x31c   : > { %2640 = vrot.lane.b32.xlu2 %v2633_v13, %s11264_s13  ;;  %2607 = vrot.lane.b32.xlu1 %v2600_v17, %s11264_s13  ;;  %v2806_v17 = vmul.f32 %v6504_v45, %v5537_v41  ;;  %v11658_v13 = vrot.slane %v6324_v47, 1 }
 0x31d   : > { %v6499_v26 = vpop.permute.xlu1 %1907  ;;  %v2639_v35 = vsel %vm767_vm1, %v11657_v59, %v2638_v58 }
 0x31e   : > { %11654 = vst [vmem:[#allocation115_spill] sm:$0xff] %v6499_v26  ;;  %v2816_v58 = vrot.slane %v2806_v17, 2  ;;  %v11662_v17 = vrot.slane %v6355_v30, 1 }
 0x31f   : > { %2755 = vrot.lane.b32.xlu0 %v2748_v11, %s11264_s13  ;;  %v11221_v11 = vrot.slane %v6481_v54, 2  ;;  %v6501_v51 = vpop.permute.xlu2 %2061 }
 0x320   : > { %11655 = vst [vmem:[#allocation116_spill] sm:$0xff] %v6501_v51  ;;  %v2635_v51 = vsel %vm767_vm1, %v2632_v10, %v11658_v13  ;;  %v2810_v13 = vmul.f32 %v6504_v45, %v5636_v25 }
 0x321   : > { %v6488_v23 = vpop.permute.xlu0 %2422 }
 0x322   : > { %11652 = vst [vmem:[#allocation114_spill] sm:$0xff] %v6488_v23  ;;  %v11220_v23 = vrot.slane %v6486_v1, 2 }
 0x324   : > { %v2783_v28 = vsel %vm1232_vm2, %v11220_v23, %v11221_v11  ;;  %v2661_v23 = vmul.f32 %v6346_v3, %v6139_v37  ;;  %v2658_v11 = vmul.f32 %v6346_v3, %v5978_v57  ;;  %2646 = vrot.lane.b32.xlu2 %v2639_v35, %s11264_s13  ;;  %2642 = vrot.lane.b32.xlu1 %v2635_v51, %s11264_s13 }
 0x325   : > { %v6545_v51 = vmul.f32 %v6504_v45, %v5609_v7 }
 0x326   : > { %v2673_v47 = vrot.slane %v2661_v23, 1  ;;  %v2668_v59 = vrot.slane %v2658_v11, 1  ;;  %v11663_v11 = vrot.slane %v6360_v43, 1 }
 0x327   : > { %2790 = vrot.lane.b32.xlu0 %v2783_v28, %s11264_s13  ;;  %v11222_v28 = vrot.slane %v6513_v14, 2  ;;  %v6535_v18 = vpop.permute.xlu2 %2424 }
 0x328   : > { %11660 = vst [vmem:[#allocation119_spill] sm:$0xff] %v6535_v18  ;;  %v2674_v23 = vsel %vm767_vm1, %v11662_v17, %v2673_v47  ;;  %v2670_v18 = vsel %vm767_vm1, %v2668_v59, %v11663_v11  ;;  %v11223_v17 = vrot.slane %v6545_v51, 2  ;;  %v6566_v59 = vstv %s5148_s17  ;;  %s5161_s17 = sld [smem:[#allocation2 + $0x24]] }
 0x329   : > { %v6518_v0 = vpop.permute.xlu0 %2011  ;;  %v2818_v10 = vsel %vm1232_vm2, %v2816_v58, %v11222_v28  ;;  %v2697_v58 = vmul.f32 %v6378_v29, %v5569_v55  ;;  %v2823_v28 = vrot.slane %v2810_v13, 2 }
 0x32a   : > { %11656 = vst [vmem:[#allocation117_spill] sm:$0xff] %v6518_v0  ;;  %v6533_v0 = vpop.permute.xlu1 %1985 }
 0x32b   : > { %11659 = vst [vmem:[#allocation118_spill] sm:$0xff] %v6533_v0  ;;  %v2708_v43 = vrot.slane %v2697_v58, 2  ;;  %v2824_v29 = vsel %vm1232_vm2, %v11223_v17, %v2823_v28  ;;  %v2733_v28 = vmul.f32 %v6440_v27, %v5548_v46 }
 0x32c   : > { %2681 = vrot.lane.b32.xlu2 %v2674_v23, %s11264_s13  ;;  %2677 = vrot.lane.b32.xlu1 %v2670_v18, %s11264_s13  ;;  %v6578_v18 = vmul.f32 %v6566_v59, %v5665_v42  ;;  %v11667_v23 = vrot.slane %v6387_v44, 2 }
 0x32e   : > { %v2709_v11 = vsel %vm1232_vm2, %v11667_v23, %v2708_v43  ;;  %v11224_v23 = vrot.slane %v6578_v18, 2 }
 0x32f   : > { %2825 = vrot.lane.b32.xlu0 %v2818_v10, %s11264_s13  ;;  %v2662_v10 = vmul.f32 %v6346_v3, %v6279_v32  ;;  %v6563_v30 = vpop.permute.xlu2 %2459  ;;  %v6573_v3 = vmul.f32 %v6566_v59, %v5689_v52 }
 0x330   : > { %11665 = vst [vmem:[#allocation122_spill] sm:$0xff] %v6563_v30 }
 0x331   : > { %v6547_v35 = vpop.permute.xlu0 %2089  ;;  %v2675_v26 = vrot.slane %v2662_v10, 1  ;;  %v11225_v10 = vrot.slane %v6573_v3, 2 }
 0x332   : > { %11661 = vst [vmem:[#allocation120_spill] sm:$0xff] %v6547_v35  ;;  %v6561_v35 = vpop.permute.xlu1 %2033 }
 0x333   : > { %11664 = vst [vmem:[#allocation121_spill] sm:$0xff] %v6561_v35  ;;  %v2676_v58 = vsel %vm767_vm1, %v2673_v47, %v2675_v26  ;;  %v2743_v26 = vrot.slane %v2733_v28, 2  ;;  %v6598_v47 = vstv %s5149_s23  ;;  %s5096_s23 = sld [smem:[#allocation2 + $0x60]] }
 0x334   : > { %2716 = vrot.lane.b32.xlu2 %v2709_v11, %s11264_s13  ;;  %2683 = vrot.lane.b32.xlu1 %v2676_v58, %s11264_s13  ;;  %v2859_v11 = vsel %vm1232_vm2, %v11224_v23, %v11225_v10  ;;  %v6607_v58 = vmul.f32 %v6598_v47, %v5665_v42  ;;  %v2736_v23 = vmul.f32 %v6440_v27, %v5636_v25 }
 0x337   : > { %2831 = vrot.lane.b32.xlu0 %v2824_v29, %s11264_s13  ;;  %v2732_v29 = vmul.f32 %v6440_v27, %v5537_v41  ;;  %v6595_v44 = vpop.permute.xlu2 %2037 }
 0x338   : > { %11669 = vst [vmem:[#allocation125_spill] sm:$0xff] %v6595_v44 }
 0x339   : > { %v6580_v13 = vpop.permute.xlu0 %2065  ;;  %v2742_v30 = vrot.slane %v2732_v29, 2  ;;  %v11227_v29 = vrot.slane %v6607_v58, 2 }
 0x33a   : > { %11666 = vst [vmem:[#allocation123_spill] sm:$0xff] %v6580_v13  ;;  %v6593_v17 = vpop.permute.xlu1 %2420  ;;  %v11671_v13 = vrot.slane %v6419_v9, 2  ;;  %v2749_v9 = vrot.slane %v2736_v23, 2 }
 0x33b   : > { %11668 = vst [vmem:[#allocation124_spill] sm:$0xff] %v6593_v17  ;;  %v6612_v17 = vmul.f32 %v6598_v47, %v5703_v62  ;;  %v2744_v44 = vsel %vm1232_vm2, %v2742_v30, %v2743_v26 }
 0x33c   : > { %v2711_v35 = vsel %vm1232_vm2, %v2708_v43, %v11671_v13  ;;  %2751 = vrot.lane.b32.xlu2 %v2744_v44, %s11264_s13  ;;  %v11675_v44 = vrot.slane %v6447_v31, 2 }
 0x33d   : > { %2718 = vrot.lane.b32.xlu1 %v2711_v35, %s11264_s13  ;;  %v11226_v30 = vrot.slane %v6612_v17, 2 }
 0x33e   : > { %v2750_v23 = vsel %vm1232_vm2, %v11675_v44, %v2749_v9 }
 0x33f   : > { %2866 = vrot.lane.b32.xlu0 %v2859_v11, %s11264_s13  ;;  %v6625_v11 = vstv %s5150_s25  ;;  %v2894_v27 = vsel %vm1232_vm2, %v11226_v30, %v11227_v29  ;;  %v2772_v30 = vmul.f32 %v6472_v5, %v5609_v7  ;;  %s7096_s25 = sld [smem:[#allocation2 + $0x4]] }
 0x340   : > { %v2917_v35 = vmul.f32 %v6625_v11, %v5678_v48  ;;  %v6641_v43 = vmul.f32 %v6625_v11, %v5703_v62 }
 0x341   : > { %v6614_v28 = vpop.permute.xlu0 %2492 }
 0x342   : > { %11670 = vst [vmem:[#allocation126_spill] sm:$0xff] %v6614_v28  ;;  %v6627_v10 = vpop.permute.xlu1 %1961  ;;  %v6629_v28 = vpop.permute.xlu2 %2013  ;;  %v2927_v29 = vrot.slane %v2917_v35, 2  ;;  %v6671_v35 = vmul.f32 %v6625_v11, %v5689_v52 }
 0x343   : > { %11672 = vst [vmem:[#allocation127_spill] sm:$0xff] %v6627_v10 }
 0x344   : > { %11673 = vst [vmem:[#allocation128_spill] sm:$0xff] %v6629_v28  ;;  %v11676_v28 = vrot.slane %v6452_v12, 2  ;;  %2757 = vrot.lane.b32.xlu2 %v2750_v23, %s11264_s13  ;;  %v2784_v12 = vrot.slane %v2772_v30, 2  ;;  %v11680_v23 = vrot.slane %v6481_v54, 2 }
 0x346   : > { %v2746_v0 = vsel %vm1232_vm2, %v2743_v26, %v11676_v28  ;;  %v2921_v28 = vmul.f32 %v6625_v11, %v5824_v60  ;;  %v2785_v30 = vsel %vm1232_vm2, %v11680_v23, %v2784_v12  ;;  %v11229_v23 = vrot.slane %v6671_v35, 2 }
 0x347   : > { %2901 = vrot.lane.b32.xlu0 %v2894_v27, %s11264_s13  ;;  %2753 = vrot.lane.b32.xlu1 %v2746_v0, %s11264_s13  ;;  %v11228_v27 = vrot.slane %v6641_v43, 2 }
 0x349   : > { %v6644_v13 = vpop.permute.xlu0 %2498  ;;  %v2929_v26 = vsel %vm1232_vm2, %v2927_v29, %v11228_v27  ;;  %v2808_v27 = vmul.f32 %v6504_v45, %v5569_v55 }
 0x34a   : > { %11674 = vst [vmem:[#allocation129_spill] sm:$0xff] %v6644_v13  ;;  %v2769_v13 = vmul.f32 %v6472_v5, %v5537_v41  ;;  %v6659_v31 = vpop.permute.xlu1 %2009  ;;  %v6661_v9 = vpop.permute.xlu2 %2091 }
 0x34b   : > { %11677 = vst [vmem:[#allocation130_spill] sm:$0xff] %v6659_v31  ;;  %v11681_v31 = vrot.slane %v6486_v1, 2  ;;  %v2819_v1 = vrot.slane %v2808_v27, 2  ;;  %v11685_v27 = vrot.slane %v6513_v14, 2 }
 0x34c   : > { %11678 = vst [vmem:[#allocation131_spill] sm:$0xff] %v6661_v9  ;;  %v2779_v0 = vrot.slane %v2769_v13, 2  ;;  %v2773_v13 = vmul.f32 %v6472_v5, %v5636_v25  ;;  %2792 = vrot.lane.b32.xlu2 %v2785_v30, %s11264_s13 }
 0x34d   : > { %v2820_v30 = vsel %vm1232_vm2, %v11685_v27, %v2819_v1 }
 0x34e   : > { %v2781_v29 = vsel %vm1232_vm2, %v2779_v0, %v11681_v31  ;;  %v2786_v9 = vrot.slane %v2773_v13, 2  ;;  %v6692_v31 = vstv %s5151_s26  ;;  %v2843_v13 = vmul.f32 %v6566_v59, %v5678_v48  ;;  %s5081_s26 = sld [smem:[#allocation2 + $0x34]] }
 0x34f   : > { %2936 = vrot.lane.b32.xlu0 %v2929_v26, %s11264_s13  ;;  %2788 = vrot.lane.b32.xlu1 %v2781_v29, %s11264_s13  ;;  %v2934_v26 = vrot.slane %v2921_v28, 2  ;;  %v6699_v5 = vmul.f32 %v6692_v31, %v5689_v52  ;;  %v6704_v28 = vmul.f32 %v6692_v31, %v5665_v42 }
 0x350   : > { %v2787_v29 = vsel %vm1232_vm2, %v2784_v12, %v2786_v9  ;;  %v2853_v9 = vrot.slane %v2843_v13, 2 }
 0x351   : > { %v6673_v44 = vpop.permute.xlu0 %2533  ;;  %v2935_v45 = vsel %vm1232_vm2, %v11229_v23, %v2934_v26  ;;  %v2844_v26 = vmul.f32 %v6566_v59, %v5703_v62  ;;  %v11230_v27 = vrot.slane %v6704_v28, 2 }
 0x352   : > { %11679 = vst [vmem:[#allocation132_spill] sm:$0xff] %v6673_v44  ;;  %v6687_v44 = vpop.permute.xlu1 %2087  ;;  %v6689_v54 = vpop.permute.xlu2 %2494 }
 0x353   : > { %11682 = vst [vmem:[#allocation133_spill] sm:$0xff] %v6687_v44  ;;  %v2854_v12 = vrot.slane %v2844_v26, 2 }
 0x354   : > { %11683 = vst [vmem:[#allocation134_spill] sm:$0xff] %v6689_v54  ;;  %2827 = vrot.lane.b32.xlu2 %v2820_v30, %s11264_s13  ;;  %v6724_v54 = vstv %s5152_s30  ;;  %s11268_s30 = smov 126  }
 0x355   : > { %v2855_v26 = vsel %vm1232_vm2, %v2853_v9, %v2854_v12 }
 0x357   : > { %2942 = vrot.lane.b32.xlu0 %v2935_v45, %s11264_s13  ;;  %2794 = vrot.lane.b32.xlu1 %v2787_v29, %s11264_s13  ;;  %v11231_v45 = vrot.slane %v6699_v5, 2  ;;  %v6733_v29 = vmul.f32 %v6724_v54, %v5959_v56 }
 0x359   : > { %v6706_v0 = vpop.permute.xlu0 %2568  ;;  %v2970_v30 = vsel %vm1232_vm2, %v11230_v27, %v11231_v45  ;;  %v2847_v27 = vmul.f32 %v6566_v59, %v5824_v60  ;;  %v6751_v45 = vstv %s5153_s6  ;;  %s5097_s6 = sld [smem:[#allocation2 + $0x64]] }
 0x35a   : > { %11684 = vst [vmem:[#allocation135_spill] sm:$0xff] %v6706_v0  ;;  %v6719_v23 = vpop.permute.xlu1 %2063  ;;  %v6721_v14 = vpop.permute.xlu2 %2529  ;;  %v11689_v0 = vrot.slane %v6545_v51, 2 }
 0x35b   : > { %11686 = vst [vmem:[#allocation136_spill] sm:$0xff] %v6719_v23  ;;  %v2860_v51 = vrot.slane %v2847_v27, 2 }
 0x35c   : > { %11687 = vst [vmem:[#allocation137_spill] sm:$0xff] %v6721_v14  ;;  %v6738_v14 = vmul.f32 %v6724_v54, %v5932_v38  ;;  %v2822_v23 = vsel %vm1232_vm2, %v2819_v1, %v11689_v0  ;;  %2862 = vrot.lane.b32.xlu2 %v2855_v26, %s11264_s13  ;;  %v6767_v1 = vmul.f32 %v6751_v45, %v5932_v38  ;;  %v11693_v26 = vrot.slane %v6573_v3, 2 }
 0x35e   : > { %v11232_v9 = vrot.slane %v6738_v14, 2  ;;  %v2861_v27 = vsel %vm1232_vm2, %v11693_v26, %v2860_v51 }
 0x35f   : > { %2977 = vrot.lane.b32.xlu0 %v2970_v30, %s11264_s13  ;;  %2829 = vrot.lane.b32.xlu1 %v2822_v23, %s11264_s13  ;;  %v11233_v30 = vrot.slane %v6733_v29, 2  ;;  %v3028_v23 = vmul.f32 %v6751_v45, %v5881_v36 }
 0x361   : > { %v6740_v13 = vpop.permute.xlu0 %2603  ;;  %v3005_v59 = vsel %vm1232_vm2, %v11232_v9, %v11233_v30  ;;  %v2883_v9 = vmul.f32 %v6598_v47, %v5689_v52  ;;  %v2880_v30 = vmul.f32 %v6598_v47, %v5678_v48 }
 0x362   : > { %11688 = vst [vmem:[#allocation138_spill] sm:$0xff] %v6740_v13  ;;  %v6753_v44 = vpop.permute.xlu1 %2039  ;;  %v6755_v13 = vpop.permute.xlu2 %2535 }
 0x363   : > { %11690 = vst [vmem:[#allocation139_spill] sm:$0xff] %v6753_v44  ;;  %v11694_v44 = vrot.slane %v6578_v18, 2  ;;  %v2895_v18 = vrot.slane %v2883_v9, 2  ;;  %v2890_v26 = vrot.slane %v2880_v30, 2  ;;  %v11699_v9 = vrot.slane %v6612_v17, 2 }
 0x364   : > { %11691 = vst [vmem:[#allocation140_spill] sm:$0xff] %v6755_v13  ;;  %2868 = vrot.lane.b32.xlu2 %v2861_v27, %s11264_s13  ;;  %v11698_v27 = vrot.slane %v6607_v58, 2 }
 0x365   : > { %v2857_v13 = vsel %vm1232_vm2, %v2854_v12, %v11694_v44  ;;  %v3032_v12 = vmul.f32 %v6751_v45, %v5947_v24 }
 0x366   : > { %v2896_v30 = vsel %vm1232_vm2, %v11698_v27, %v2895_v18 }
 0x367   : > { %3012 = vrot.lane.b32.xlu0 %v3005_v59, %s11264_s13  ;;  %2864 = vrot.lane.b32.xlu1 %v2857_v13, %s11264_s13  ;;  %v3038_v59 = vrot.slane %v3028_v23, 2  ;;  %v6797_v13 = vmul.f32 %v6751_v45, %v6030_v50 }
 0x369   : > { %v6770_v0 = vpop.permute.xlu0 %2609  ;;  %v11235_v27 = vrot.slane %v6797_v13, 2 }
 0x36a   : > { %11692 = vst [vmem:[#allocation141_spill] sm:$0xff] %v6770_v0  ;;  %v11234_v0 = vrot.slane %v6767_v1, 2  ;;  %v6785_v3 = vpop.permute.xlu1 %2461  ;;  %v6787_v51 = vpop.permute.xlu2 %2570 }
 0x36b   : > { %11695 = vst [vmem:[#allocation142_spill] sm:$0xff] %v6785_v3  ;;  %v2892_v3 = vsel %vm1232_vm2, %v2890_v26, %v11699_v9  ;;  %v6818_v26 = vstv %s5154_s7  ;;  %s7099_s7 = sld [smem:[#allocation2 + $0x8]] }
 0x36c   : > { %11696 = vst [vmem:[#allocation143_spill] sm:$0xff] %v6787_v51  ;;  %v3040_v44 = vsel %vm1232_vm2, %v3038_v59, %v11234_v0  ;;  %v2919_v59 = vmul.f32 %v6625_v11, %v5665_v42  ;;  %2903 = vrot.lane.b32.xlu2 %v2896_v30, %s11264_s13  ;;  %v3045_v0 = vrot.slane %v3032_v12, 2  ;;  %v6825_v11 = vmul.f32 %v6818_v26, %v6030_v50 }
 0x36d   : > { %v11703_v30 = vrot.slane %v6641_v43, 2 }
 0x36e   : > { %v2930_v17 = vrot.slane %v2919_v59, 2 }
 0x36f   : > { %3047 = vrot.lane.b32.xlu0 %v3040_v44, %s11264_s13  ;;  %v2884_v44 = vmul.f32 %v6598_v47, %v5824_v60  ;;  %2899 = vrot.lane.b32.xlu1 %v2892_v3, %s11264_s13  ;;  %v3046_v47 = vsel %vm1232_vm2, %v11235_v27, %v3045_v0  ;;  %v6830_v3 = vmul.f32 %v6818_v26, %v5959_v56 }
 0x370   : > { %v2931_v9 = vsel %vm1232_vm2, %v11703_v30, %v2930_v17  ;;  %v2954_v0 = vmul.f32 %v6692_v31, %v5678_v48 }
 0x371   : > { %v6799_v23 = vpop.permute.xlu0 %2644  ;;  %v2897_v51 = vrot.slane %v2884_v44, 2  ;;  %v2955_v44 = vmul.f32 %v6692_v31, %v5703_v62  ;;  %v11236_v30 = vrot.slane %v6830_v3, 2 }
 0x372   : > { %11697 = vst [vmem:[#allocation144_spill] sm:$0xff] %v6799_v23  ;;  %v6813_v23 = vpop.permute.xlu1 %2496  ;;  %v6815_v58 = vpop.permute.xlu2 %2605 }
 0x373   : > { %11700 = vst [vmem:[#allocation145_spill] sm:$0xff] %v6813_v23  ;;  %v2898_v59 = vsel %vm1232_vm2, %v2895_v18, %v2897_v51  ;;  %v2964_v51 = vrot.slane %v2954_v0, 2  ;;  %v2965_v18 = vrot.slane %v2955_v44, 2 }
 0x374   : > { %11701 = vst [vmem:[#allocation146_spill] sm:$0xff] %v6815_v58  ;;  %2938 = vrot.lane.b32.xlu2 %v2931_v9, %s11264_s13 }
 0x375   : > { %v2966_v44 = vsel %vm1232_vm2, %v2964_v51, %v2965_v18 }
 0x377   : > { %3053 = vrot.lane.b32.xlu0 %v3046_v47, %s11264_s13  ;;  %2905 = vrot.lane.b32.xlu1 %v2898_v59, %s11264_s13  ;;  %v11237_v47 = vrot.slane %v6825_v11, 2 }
 0x379   : > { %v6832_v12 = vpop.permute.xlu0 %2679  ;;  %v3081_v9 = vsel %vm1232_vm2, %v11236_v30, %v11237_v47  ;;  %v2958_v30 = vmul.f32 %v6692_v31, %v5824_v60  ;;  %v6877_v47 = vstv %s5156_s9  ;;  %s7111_s9 = sld [smem:[#allocation2 + $0x38]] }
 0x37a   : > { %11702 = vst [vmem:[#allocation147_spill] sm:$0xff] %v6832_v12  ;;  %v6845_v27 = vpop.permute.xlu1 %2531  ;;  %v6847_v43 = vpop.permute.xlu2 %2640  ;;  %v6850_v12 = vstv %s5155_s8  ;;  %s5162_s8 = sld [smem:[#allocation2 + $0x28]] }
 0x37b   : > { %11704 = vst [vmem:[#allocation148_spill] sm:$0xff] %v6845_v27  ;;  %v6859_v59 = vmul.f32 %v6850_v12, %v5959_v56  ;;  %v6864_v23 = vmul.f32 %v6850_v12, %v5932_v38 }
 0x37c   : > { %11705 = vst [vmem:[#allocation149_spill] sm:$0xff] %v6847_v43  ;;  %v11707_v43 = vrot.slane %v6671_v35, 2  ;;  %2973 = vrot.lane.b32.xlu2 %v2966_v44, %s11264_s13  ;;  %v2971_v35 = vrot.slane %v2958_v30, 2  ;;  %v11711_v44 = vrot.slane %v6699_v5, 2 }
 0x37d   : > { %v11238_v51 = vrot.slane %v6864_v23, 2 }
 0x37e   : > { %v2933_v27 = vsel %vm1232_vm2, %v2930_v17, %v11707_v43  ;;  %v6893_v17 = vmul.f32 %v6877_v47, %v6068_v22  ;;  %v2972_v30 = vsel %vm1232_vm2, %v11711_v44, %v2971_v35 }
 0x37f   : > { %3088 = vrot.lane.b32.xlu0 %v3081_v9, %s11264_s13  ;;  %2940 = vrot.lane.b32.xlu1 %v2933_v27, %s11264_s13  ;;  %v11239_v9 = vrot.slane %v6859_v59, 2  ;;  %v3139_v27 = vmul.f32 %v6877_v47, %v5978_v57 }
 0x381   : > { %v6866_v0 = vpop.permute.xlu0 %2714  ;;  %v3116_v31 = vsel %vm1232_vm2, %v11238_v51, %v11239_v9  ;;  %v2994_v51 = vmul.f32 %v6724_v54, %v6030_v50  ;;  %v2991_v9 = vmul.f32 %v6724_v54, %v5881_v36 }
 0x382   : > { %11706 = vst [vmem:[#allocation150_spill] sm:$0xff] %v6866_v0  ;;  %v6879_v58 = vpop.permute.xlu1 %2566  ;;  %v6881_v0 = vpop.permute.xlu2 %2646 }
 0x383   : > { %11708 = vst [vmem:[#allocation151_spill] sm:$0xff] %v6879_v58  ;;  %v3001_v44 = vrot.slane %v2991_v9, 2 }
 0x384   : > { %11709 = vst [vmem:[#allocation152_spill] sm:$0xff] %v6881_v0  ;;  %v11712_v0 = vrot.slane %v6704_v28, 2  ;;  %2979 = vrot.lane.b32.xlu2 %v2972_v30, %s11264_s13  ;;  %v3006_v28 = vrot.slane %v2994_v51, 2  ;;  %v11716_v30 = vrot.slane %v6733_v29, 2  ;;  %v11717_v51 = vrot.slane %v6738_v14, 2 }
 0x386   : > { %v2968_v58 = vsel %vm1232_vm2, %v2965_v18, %v11712_v0  ;;  %v3143_v0 = vmul.f32 %v6877_v47, %v6279_v32  ;;  %v3007_v9 = vsel %vm1232_vm2, %v11716_v30, %v3006_v28 }
 0x387   : > { %3123 = vrot.lane.b32.xlu0 %v3116_v31, %s11264_s13  ;;  %2975 = vrot.lane.b32.xlu1 %v2968_v58, %s11264_s13  ;;  %v3149_v31 = vrot.slane %v3139_v27, 2  ;;  %v6923_v58 = vmul.f32 %v6877_v47, %v6139_v37 }
 0x389   : > { %v6896_v43 = vpop.permute.xlu0 %2720  ;;  %v11241_v30 = vrot.slane %v6923_v58, 2 }
 0x38a   : > { %11710 = vst [vmem:[#allocation153_spill] sm:$0xff] %v6896_v43  ;;  %v11240_v43 = vrot.slane %v6893_v17, 2  ;;  %v6911_v5 = vpop.permute.xlu2 %2681  ;;  %v6913_v35 = vpop.permute.xlu1 %2572 }
 0x38b   : > { %11713 = vst [vmem:[#allocation154_spill] sm:$0xff] %v6911_v5 }
 0x38c   : > { %11714 = vst [vmem:[#allocation155_spill] sm:$0xff] %v6913_v35  ;;  %v3151_v18 = vsel %vm1232_vm2, %v3149_v31, %v11240_v43  ;;  %v3003_v35 = vsel %vm1232_vm2, %v3001_v44, %v11717_v51  ;;  %v3030_v31 = vmul.f32 %v6751_v45, %v5959_v56  ;;  %3014 = vrot.lane.b32.xlu2 %v3007_v9, %s11264_s13  ;;  %v3156_v43 = vrot.slane %v3143_v0, 2 }
 0x38d   : > { %v6944_v44 = vstv %s5157_s10  ;;  %v11721_v9 = vrot.slane %v6767_v1, 2  ;;  %s7113_s10 = sld [smem:[#allocation2 + $0x68]] }
 0x38e   : > { %v3041_v14 = vrot.slane %v3030_v31, 2  ;;  %v6951_v45 = vmul.f32 %v6944_v44, %v6139_v37 }
 0x38f   : > { %3158 = vrot.lane.b32.xlu0 %v3151_v18, %s11264_s13  ;;  %v2995_v18 = vmul.f32 %v6724_v54, %v5947_v24  ;;  %3010 = vrot.lane.b32.xlu1 %v3003_v35, %s11264_s13  ;;  %v3157_v54 = vsel %vm1232_vm2, %v11241_v30, %v3156_v43  ;;  %v6956_v35 = vmul.f32 %v6944_v44, %v6107_v61 }
 0x390   : > { %v3042_v51 = vsel %vm1232_vm2, %v11721_v9, %v3041_v14  ;;  %v3065_v43 = vmul.f32 %v6818_v26, %v5881_v36 }
 0x391   : > { %v6925_v27 = vpop.permute.xlu0 %2755  ;;  %v3008_v5 = vrot.slane %v2995_v18, 2  ;;  %v3066_v18 = vmul.f32 %v6818_v26, %v5932_v38  ;;  %v11242_v9 = vrot.slane %v6956_v35, 2 }
 0x392   : > { %11715 = vst [vmem:[#allocation156_spill] sm:$0xff] %v6925_v27  ;;  %v6939_v27 = vpop.permute.xlu2 %2716  ;;  %v6941_v29 = vpop.permute.xlu1 %2607 }
 0x393   : > { %11718 = vst [vmem:[#allocation157_spill] sm:$0xff] %v6939_v27  ;;  %v3009_v31 = vsel %vm1232_vm2, %v3006_v28, %v3008_v5  ;;  %v3075_v5 = vrot.slane %v3065_v43, 2  ;;  %v3076_v28 = vrot.slane %v3066_v18, 2 }
 0x394   : > { %11719 = vst [vmem:[#allocation158_spill] sm:$0xff] %v6941_v29  ;;  %3049 = vrot.lane.b32.xlu2 %v3042_v51, %s11264_s13  ;;  %v11725_v29 = vrot.slane %v6797_v13, 2 }
 0x395   : > { %v3077_v18 = vsel %vm1232_vm2, %v3075_v5, %v3076_v28 }
 0x397   : > { %3164 = vrot.lane.b32.xlu0 %v3157_v54, %s11264_s13  ;;  %3016 = vrot.lane.b32.xlu1 %v3009_v31, %s11264_s13  ;;  %v11243_v54 = vrot.slane %v6951_v45, 2 }
 0x399   : > { %v6958_v0 = vpop.permute.xlu0 %2790  ;;  %v3192_v51 = vsel %vm1232_vm2, %v11242_v9, %v11243_v54  ;;  %v3069_v9 = vmul.f32 %v6818_v26, %v5947_v24  ;;  %v7003_v54 = vstv %s5159_s12  ;;  %s7133_s12 = sld [smem:[#allocation2 + $0x1]] }
 0x39a   : > { %11720 = vst [vmem:[#allocation159_spill] sm:$0xff] %v6958_v0  ;;  %v6971_v30 = vpop.permute.xlu2 %2751  ;;  %v6973_v1 = vpop.permute.xlu1 %2642  ;;  %v6976_v0 = vstv %s5158_s11  ;;  %s7123_s11 = sld [smem:[#allocation2 + $0xc]]  ;;  %v7261_v25 = vmul.f32 %v7003_v54, %v6107_v61 }
 0x39b   : > { %11722 = vst [vmem:[#allocation160_spill] sm:$0xff] %v6971_v30  ;;  %v6985_v31 = vmul.f32 %v6976_v0, %v6107_v61  ;;  %v3044_v30 = vsel %vm1232_vm2, %v3041_v14, %v11725_v29  ;;  %v3082_v13 = vrot.slane %v3069_v9, 2  ;;  %v3250_v29 = vmul.f32 %v7003_v54, %v5978_v57 }
 0x39c   : > { %11723 = vst [vmem:[#allocation161_spill] sm:$0xff] %v6973_v1  ;;  %v6990_v1 = vmul.f32 %v6976_v0, %v6068_v22  ;;  %3084 = vrot.lane.b32.xlu2 %v3077_v18, %s11264_s13  ;;  %v11729_v18 = vrot.slane %v6825_v11, 2  ;;  %v3217_v8 = vmul.f32 %v6976_v0, %v6279_v32  ;;  %v11820_v2 = vrot.slane %v7261_v25, 2 }
 0x39d   : > { %v11767_v21 = vrot.slane %v6985_v31, 2 }
 0x39e   : > { %v11244_v5 = vrot.slane %v6990_v1, 2  ;;  %v3083_v9 = vsel %vm1232_vm2, %v11729_v18, %v3082_v13 }
 0x39f   : > { %3199 = vrot.lane.b32.xlu0 %v3192_v51, %s11264_s13  ;;  %3051 = vrot.lane.b32.xlu1 %v3044_v30, %s11264_s13  ;;  %v11245_v51 = vrot.slane %v6985_v31, 2  ;;  %v7019_v30 = vmul.f32 %v7003_v54, %v6068_v22 }
 0x3a0   : > { %v7217_v39 = vstv %s7123_s11  ;;  %s7308_s11 = sld [smem:[#allocation2 + $0x35]] }
 0x3a1   : > { %v6992_v43 = vpop.permute.xlu0 %2825  ;;  %v3227_v26 = vsel %vm1232_vm2, %v11244_v5, %v11245_v51  ;;  %v3105_v5 = vmul.f32 %v6850_v12, %v6030_v50  ;;  %v3102_v51 = vmul.f32 %v6850_v12, %v5881_v36  ;;  %11760 = vst [vmem:[#allocation189_spill] sm:$0xff] %v7217_v39 }
 0x3a2   : > { %11724 = vst [vmem:[#allocation162_spill] sm:$0xff] %v6992_v43  ;;  %v7005_v27 = vpop.permute.xlu2 %2757  ;;  %v7007_v43 = vpop.permute.xlu1 %2677 }
 0x3a3   : > { %11726 = vst [vmem:[#allocation163_spill] sm:$0xff] %v7005_v27  ;;  %v3112_v18 = vrot.slane %v3102_v51, 2  ;;  %v11735_v51 = vrot.slane %v6864_v23, 2 }
 0x3a4   : > { %11727 = vst [vmem:[#allocation164_spill] sm:$0xff] %v7007_v43  ;;  %v11730_v43 = vrot.slane %v6830_v3, 2  ;;  %3090 = vrot.lane.b32.xlu2 %v3083_v9, %s11264_s13  ;;  %v3117_v3 = vrot.slane %v3105_v5, 2  ;;  %v11734_v9 = vrot.slane %v6859_v59, 2 }
 0x3a6   : > { %v3079_v27 = vsel %vm1232_vm2, %v3076_v28, %v11730_v43  ;;  %v3254_v43 = vmul.f32 %v7003_v54, %v6279_v32  ;;  %v3118_v5 = vsel %vm1232_vm2, %v11734_v9, %v3117_v3 }
 0x3a7   : > { %3234 = vrot.lane.b32.xlu0 %v3227_v26, %s11264_s13  ;;  %3086 = vrot.lane.b32.xlu1 %v3079_v27, %s11264_s13  ;;  %v3260_v26 = vrot.slane %v3250_v29, 2  ;;  %v7049_v27 = vmul.f32 %v7003_v54, %v6139_v37 }
 0x3a9   : > { %v7022_v14 = vpop.permute.xlu0 %2831  ;;  %v11247_v9 = vrot.slane %v7049_v27, 2 }
 0x3aa   : > { %11728 = vst [vmem:[#allocation165_spill] sm:$0xff] %v7022_v14  ;;  %v11246_v14 = vrot.slane %v7019_v30, 2  ;;  %v7037_v11 = vpop.permute.xlu2 %2792  ;;  %v7039_v13 = vpop.permute.xlu1 %2683 }
 0x3ab   : > { %11731 = vst [vmem:[#allocation166_spill] sm:$0xff] %v7037_v11  ;;  %v3114_v11 = vsel %vm1232_vm2, %v3112_v18, %v11735_v51  ;;  %v3176_v51 = vmul.f32 %v6944_v44, %v5978_v57 }
 0x3ac   : > { %11732 = vst [vmem:[#allocation167_spill] sm:$0xff] %v7039_v13  ;;  %v3262_v28 = vsel %vm1232_vm2, %v3260_v26, %v11246_v14  ;;  %v3141_v26 = vmul.f32 %v6877_v47, %v6107_v61  ;;  %3125 = vrot.lane.b32.xlu2 %v3118_v5, %s11264_s13  ;;  %v3267_v14 = vrot.slane %v3254_v43, 2 }
 0x3ae   : > { %v3152_v23 = vrot.slane %v3141_v26, 2  ;;  %v3268_v47 = vsel %vm1232_vm2, %v11247_v9, %v3267_v14  ;;  %v3177_v26 = vmul.f32 %v6944_v44, %v6068_v22 }
 0x3af   : > { %3269 = vrot.lane.b32.xlu0 %v3262_v28, %s11264_s13  ;;  %v3106_v28 = vmul.f32 %v6850_v12, %v5947_v24  ;;  %3121 = vrot.lane.b32.xlu1 %v3114_v11, %s11264_s13  ;;  %v11739_v11 = vrot.slane %v6893_v17, 2  ;;  %v11768_v24 = vrot.slane %v6990_v1, 2 }
 0x3b1   : > { %v7051_v29 = vpop.permute.xlu0 %2866  ;;  %v3119_v18 = vrot.slane %v3106_v28, 2  ;;  %v3153_v43 = vsel %vm1232_vm2, %v11739_v11, %v3152_v23  ;;  %v7092_v28 = vstv %s5160_s14  ;;  %s7139_s14 = sld [smem:[#allocation2 + $0x5]] }
 0x3b2   : > { %11733 = vst [vmem:[#allocation168_spill] sm:$0xff] %v7051_v29  ;;  %v7065_v29 = vpop.permute.xlu2 %2827  ;;  %v7067_v59 = vpop.permute.xlu1 %2718 }
 0x3b3   : > { %11736 = vst [vmem:[#allocation169_spill] sm:$0xff] %v7065_v29  ;;  %v3120_v5 = vsel %vm1232_vm2, %v3117_v3, %v3119_v18  ;;  %v3289_v3 = vmul.f32 %v7092_v28, %v5569_v55  ;;  %v3186_v18 = vrot.slane %v3176_v51, 2  ;;  %v3180_v51 = vmul.f32 %v6944_v44, %v6279_v32 }
 0x3b4   : > { %11737 = vst [vmem:[#allocation170_spill] sm:$0xff] %v7067_v59  ;;  %3160 = vrot.lane.b32.xlu2 %v3153_v43, %s11264_s13  ;;  %v11753_v29 = vrot.slane %v6956_v35, 2 }
 0x3b5   : > { %v3193_v44 = vrot.slane %v3180_v51, 2  ;;  %v11752_v51 = vrot.slane %v6951_v45, 2 }
 0x3b7   : > { %3275 = vrot.lane.b32.xlu0 %v3268_v47, %s11264_s13  ;;  %3127 = vrot.lane.b32.xlu1 %v3120_v5, %s11264_s13  ;;  %v3187_v47 = vrot.slane %v3177_v26, 2  ;;  %v11743_v5 = vrot.slane %v6923_v58, 2  ;;  %v7119_v58 = vstv %s5161_s17  ;;  %s7182_s17 = sld [smem:[#allocation2 + $0x2]] }
 0x3b9   : > { %v7074_v12 = vpop.permute.xlu0 %2901  ;;  %v3188_v43 = vsel %vm1232_vm2, %v3186_v18, %v3187_v47  ;;  %v3155_v9 = vsel %vm1232_vm2, %v3152_v23, %v11743_v5  ;;  %v3314_v23 = vmul.f32 %v7119_v58, %v5548_v46  ;;  %v7125_v18 = vstv %s5080_s16  ;;  %s7180_s16 = sld [smem:[#allocation2 + $0x3c]] }
 0x3ba   : > { %11738 = vst [vmem:[#allocation171_spill] sm:$0xff] %v7074_v12  ;;  %v7088_v14 = vpop.permute.xlu2 %2862  ;;  %v7090_v17 = vpop.permute.xlu1 %2753  ;;  %v7135_v5 = vstv %s5081_s26  ;;  %v3213_v12 = vmul.f32 %v6976_v0, %v5978_v57  ;;  %v7160_v45 = vmul.f32 %v7125_v18, %v5537_v41  ;;  %s7223_s26 = sld [smem:[#allocation2 + $0x31]] }
 0x3bb   : > { %11740 = vst [vmem:[#allocation172_spill] sm:$0xff] %v7088_v14  ;;  %v7245_v20 = vmul.f32 %v7135_v5, %v5569_v55  ;;  %v788_v54 = vmul.f32 %v7135_v5, %v5548_v46 }
 0x3bc   : > { %11741 = vst [vmem:[#allocation173_spill] sm:$0xff] %v7090_v17  ;;  %3195 = vrot.lane.b32.xlu2 %v3188_v43, %s11264_s13  ;;  %v7131_v43 = vstv %s7084_s15  ;;  %v7156_v17 = vstv %s7096_s25  ;;  %s7166_s15 = sld [smem:[#allocation2 + $0x9]]  ;;  %v3223_v4 = vrot.slane %v3213_v12, 2 }
 0x3bd   : > { %11746 = vst [vmem:[#allocation177_spill] sm:$0xff] %v7125_v18  ;;  %v7205_v10 = vmul.f32 %v7156_v17, %v5537_v41  ;;  %s7210_s25 = sld [smem:[#allocation2 + $0x3]]  ;;  %v7221_v40 = vmul.f32 %v7131_v43, %v5548_v46 }
 0x3be   : > { %11748 = vst [vmem:[#allocation179_spill] sm:$0xff] %v7131_v43  ;;  %v3225_v60 = vsel %vm1232_vm2, %v3223_v4, %v11768_v24 }
 0x3bf   : > { %3299 = vrot.lane.b32.xlu0 %v3289_v3, %s11268_s30  ;;  %3162 = vrot.lane.b32.xlu1 %v3155_v9, %s11264_s13  ;;  %v7127_v9 = vstv %s5096_s23  ;;  %11749 = vst [vmem:[#allocation180_spill] sm:$0xff] %v7135_v5  ;;  %s7201_s23 = sld [smem:[#allocation2 + $0x6]] }
 0x3c0   : > { %11747 = vst [vmem:[#allocation178_spill] sm:$0xff] %v7127_v9  ;;  %v7164_v35 = vmul.f32 %v7127_v9, %v5537_v41  ;;  %v1223_v12 = vmul.f32 %v7127_v9, %v5548_v46  ;;  %v7239_v15 = vmul.f32 %v7127_v9, %v5569_v55  ;;  %v798_v9 = vrot.slane %v788_v54, 1 }
 0x3c1   : > { %v7101_v11 = vpop.permute.xlu0 %2936  ;;  %11754 = vst [vmem:[#allocation183_spill] sm:$0xff] %v7156_v17 }
 0x3c2   : > { %11742 = vst [vmem:[#allocation174_spill] sm:$0xff] %v7101_v11  ;;  %v7115_v26 = vpop.permute.xlu2 %2868  ;;  %v7117_v3 = vpop.permute.xlu1 %2788  ;;  %v3194_v11 = vsel %vm1232_vm2, %v11752_v51, %v3193_v44  ;;  %v7189_v51 = vstv %s7099_s7  ;;  %v1233_v19 = vrot.slane %v7164_v35, 2  ;;  %v7235_v35 = vmul.f32 %v7125_v18, %v5569_v55  ;;  %s7247_s7 = sld [smem:[#allocation2 + $0x32]] }
 0x3c3   : > { %11744 = vst [vmem:[#allocation175_spill] sm:$0xff] %v7115_v26  ;;  %v7137_v26 = vstv %s5097_s6  ;;  %s7241_s6 = sld [smem:[#allocation2 + $0x7]]  ;;  %v1234_v24 = vrot.slane %v1223_v12, 2 }
 0x3c4   : > { %11745 = vst [vmem:[#allocation176_spill] sm:$0xff] %v7117_v3  ;;  %v7151_v3 = vmul.f32 %v6976_v0, %v6139_v37  ;;  %3201 = vrot.lane.b32.xlu2 %v3194_v11, %s11264_s13  ;;  %v7178_v44 = vmul.f32 %v7137_v26, %v5537_v41  ;;  %v7186_v11 = vmul.f32 %v7131_v43, %v5537_v41 }
 0x3c5   : > { %11750 = vst [vmem:[#allocation181_spill] sm:$0xff] %v7137_v26  ;;  %v7285_v0 = vmul.f32 %v7156_v17, %v5548_v46  ;;  %v1253_v1 = vmul.f32 %v7137_v26, %v5548_v46  ;;  %v7337_v54 = vsel %vm1232_vm2, %v1233_v19, %v1234_v24  ;;  %v11779_v17 = vrot.slane %v7239_v15, 2 }
 0x3c6   : > { %11755 = vst [vmem:[#allocation184_spill] sm:$0xff] %v7189_v51 }
 0x3c7   : > { %3323 = vrot.lane.b32.xlu0 %v3314_v23, %s11268_s30  ;;  %v3190_v23 = vsel %vm1232_vm2, %v3187_v47, %v11753_v29  ;;  %v7170_v29 = vstv %s5162_s8  ;;  %v7174_v47 = vmul.f32 %v7135_v5, %v5537_v41  ;;  %11762 = vst [vmem:[#allocation191_spill] sm:$0xff] %v7235_v35  ;;  %s7269_s8 = sld [smem:[#allocation2 + $0xa]]  ;;  %v7316_v5 = vstv %s7139_s14 }
 0x3c8   : > { %3197 = vrot.lane.b32.xlu1 %v3190_v23, %s11264_s13  ;;  %v7192_v23 = vstv %s7111_s9  ;;  %v3339_v63 = vmul.f32 %v7170_v29, %v5537_v41  ;;  %11763 = vst [vmem:[#allocation192_spill] sm:$0xff] %v7239_v15  ;;  %s7281_s9 = sld [smem:[#allocation2 + $0x33]]  ;;  %v1263_v32 = vrot.slane %v1253_v1, 2  ;;  %v7346_v31 = vsel %vm1232_vm2, %v1234_v24, %v11779_v17 }
 0x3c9   : > { %v7141_v14 = vpop.permute.xlu0 %2942  ;;  %11756 = vst [vmem:[#allocation185_spill] sm:$0xff] %v7192_v23  ;;  %s7341_s14 = sld [smem:[#allocation2 + $0xd]]  ;;  %v11785_v15 = vrot.slane %v7151_v3, 2 }
 0x3ca   : > { %11751 = vst [vmem:[#allocation182_spill] sm:$0xff] %v7141_v14  ;;  %v7195_v14 = vstv %s7113_s10  ;;  %v7197_v59 = vpop.permute.xlu2 %2903  ;;  %v7199_v13 = vpop.permute.xlu1 %2794  ;;  %s7305_s10 = sld [smem:[#allocation2 + $0x2c]] }
 0x3cb   : > { %11757 = vst [vmem:[#allocation186_spill] sm:$0xff] %v7195_v14  ;;  %v7277_v4 = vmul.f32 %v7195_v14, %v5569_v55 }
 0x3cc   : > { %11758 = vst [vmem:[#allocation187_spill] sm:$0xff] %v7197_v59  ;;  %v758_v59 = vmul.f32 %v7125_v18, %v5548_v46  ;;  %v7460_v18 = vstv %s7241_s6  ;;  %s7477_s6 = sld [smem:[#allocation2 + $0x37]] }
 0x3cd   : > { %11759 = vst [vmem:[#allocation188_spill] sm:$0xff] %v7199_v13  ;;  %v768_v13 = vrot.slane %v7160_v45, 1  ;;  %v7231_v45 = vstv %s7133_s12  ;;  %s7313_s12 = sld [smem:[#allocation2 + $0x61]] }
 0x3ce   : > { %11761 = vst [vmem:[#allocation190_spill] sm:$0xff] %v7231_v45  ;;  %v769_v6 = vrot.slane %v758_v59, 1  ;;  %v7299_v59 = vmul.f32 %v7195_v14, %v5548_v46  ;;  %v7466_v14 = vstv %s7269_s8  ;;  %v638_v43 = vmul.f32 %v7231_v45, %v5703_v62  ;;  %s7512_s8 = sld [smem:[#allocation2 + $0x25]] }
 0x3cf   : > { %3347 = vrot.lane.b32.xlu0 %v3339_v63, %s11268_s30  ;;  %11764 = vst [vmem:[#allocation193_spill] sm:$0xff] %v7245_v20  ;;  %v11766_v63 = vrot.slane %v7151_v3, 2  ;;  %v11792_v3 = vrot.slane %v7277_v4, 2 }
 0x3d0   : > { %11771 = vst [vmem:[#allocation197_spill] sm:$0xff] %v7277_v4  ;;  %3232 = vrot.lane.b32.xlu1 %v3225_v60, %s11264_s13  ;;  %v7295_v60 = vmul.f32 %v7192_v23, %v5548_v46  ;;  %v7324_v37 = vsel %vm767_vm1, %v768_v13, %v769_v6  ;;  %v11784_v13 = vrot.slane %v7019_v30, 2 }
 0x3d1   : > { %v7249_v33 = vpop.permute.xlu0 %2977  ;;  %v3229_v16 = vsel %vm1232_vm2, %v11767_v21, %v11766_v63  ;;  %v7273_v21 = vmul.f32 %v7192_v23, %v5569_v55  ;;  %11773 = vst [vmem:[#allocation199_spill] sm:$0xff] %v7299_v59  ;;  %v7475_v23 = vstv %s7308_s11  ;;  %s7742_s11 = sld [smem:[#allocation2 + $0x29]] }
 0x3d2   : > { %11765 = vst [vmem:[#allocation194_spill] sm:$0xff] %v7249_v33  ;;  %v7267_v33 = vmul.f32 %v7137_v26, %v5569_v55  ;;  %3236 = vrot.lane.b32.xlu2 %v3229_v16, %s11264_s13  ;;  %v7301_v12 = vpop.permute.xlu2 %2938  ;;  %v7303_v63 = vpop.permute.xlu1 %2829  ;;  %v3342_v16 = vmul.f32 %v7170_v29, %v5609_v7  ;;  %v3230_v26 = vrot.slane %v3217_v8, 2  ;;  %s7321_s13 = sld [smem:[#allocation2 + $0x36]]  ;;  %v7328_v8 = vmul.f32 %v7189_v51, %v5548_v46 }
 0x3d3   : > { %11770 = vst [vmem:[#allocation196_spill] sm:$0xff] %v7273_v21  ;;  %v7579_v50 = vstv %s7477_s6  ;;  %s8064_s6 = sld [smem:[#allocation2 + $0x6d]] }
 0x3d4   : > { %11769 = vst [vmem:[#allocation195_spill] sm:$0xff] %v7267_v33  ;;  %v3231_v17 = vsel %vm1232_vm2, %v11785_v15, %v3230_v26  ;;  %v11786_v24 = vrot.slane %v7267_v33, 2  ;;  %v7392_v26 = vstv %s7223_s26  ;;  %s7425_s26 = sld [smem:[#allocation2 + $0x21]]  ;;  %v7454_v33 = vmul.f32 %v7217_v39, %v5548_v46 }
 0x3d5   : > { %11772 = vst [vmem:[#allocation198_spill] sm:$0xff] %v7295_v60  ;;  %v11819_v39 = vrot.slane %v7049_v27, 2 }
 0x3d6   : > { %11774 = vst [vmem:[#allocation200_spill] sm:$0xff] %v7301_v12  ;;  %v11777_v12 = vrot.slane %v7235_v35, 1  ;;  %v11790_v35 = vrot.slane %v7295_v60, 1 }
 0x3d7   : > { %11775 = vst [vmem:[#allocation201_spill] sm:$0xff] %v7303_v63  ;;  %3353 = vrot.lane.b32.xlu0 %v3342_v16, %s11268_s30  ;;  %s7348_s30 = sld [smem:[#allocation2 + $0x62]]  ;;  %v3266_v53 = vsel %vm1232_vm2, %v11820_v2, %v11819_v39  ;;  %v7518_v2 = vmul.f32 %v7475_v23, %v5703_v62  ;;  %v7522_v39 = vmul.f32 %v7475_v23, %v5665_v42 }
 0x3d8   : > { %11776 = vst [vmem:[#allocation202_spill] sm:$0xff] %v7316_v5  ;;  %v7334_v63 = vsel %vm767_vm1, %v769_v6, %v11777_v12  ;;  %v11781_v6 = vrot.slane %v7245_v20, 1  ;;  %v11783_v12 = vrot.slane %v7261_v25, 2  ;;  %v7368_v20 = vsel %vm1232_vm2, %v1263_v32, %v11786_v24 }
 0x3d9   : > { %11778 = vst [vmem:[#allocation203_spill] sm:$0xff] %v7337_v54  ;;  %v7355_v19 = vpop.permute.xlu0 %3012  ;;  %v11799_v24 = vrot.slane %v7178_v44, 2  ;;  %v7431_v44 = vstv %s7201_s23  ;;  %s7468_s23 = sld [smem:[#allocation2 + $0xb]]  ;;  %v7502_v49 = vstv %s7321_s13  ;;  %v648_v25 = vmul.f32 %v7316_v5, %v5703_v62 }
 0x3da   : > { %11780 = vst [vmem:[#allocation204_spill] sm:$0xff] %v7346_v31  ;;  %v7353_v16 = vsel %vm767_vm1, %v798_v9, %v11781_v6  ;;  %v3264_v1 = vsel %vm1232_vm2, %v11784_v13, %v11783_v12  ;;  %v7371_v6 = vstv %s7166_s15  ;;  %v11793_v13 = vrot.slane %v7299_v59, 2  ;;  %s11795_s15 = smov 127   ;;  %v7420_v4 = vpop.permute.xlu1 %2864  ;;  %s7539_s13 = sld [smem:[#allocation2 + $0x66]] }
 0x3db   : > { %11782 = vst [vmem:[#allocation205_spill] sm:$0xff] %v7355_v19  ;;  %v11789_v19 = vrot.slane %v7273_v21, 1  ;;  %3271 = vrot.lane.b32.xlu2 %v3264_v1, %s11795_s15  ;;  %3238 = vrot.lane.b32.xlu1 %v3231_v17, %s11795_s15  ;;  %v7409_v1 = vstv %s7182_s17  ;;  %v7413_v17 = vmul.f32 %v7392_v26, %v5665_v42  ;;  %s7433_s17 = sld [smem:[#allocation2 + $0x39]]  ;;  %v647_v21 = vmul.f32 %v7316_v5, %v5678_v48 }
 0x3dc   : > { %11787 = vst [vmem:[#allocation206_spill] sm:$0xff] %v7368_v20  ;;  %v7385_v15 = vsel %vm1232_vm2, %v11793_v13, %v11792_v3  ;;  %v7406_v3 = vsel %vm1232_vm2, %v11799_v24, %v1263_v32  ;;  %v7416_v13 = vstv %s7180_s16  ;;  %v7428_v32 = vstv %s7210_s25  ;;  %s7448_s16 = sld [smem:[#allocation2 + $0x65]]  ;;  %s11814_s25 = smov 126  }
 0x3dd   : > { %11788 = vst [vmem:[#allocation207_spill] sm:$0xff] %v7371_v6  ;;  %v7378_v30 = vsel %vm767_vm1, %v11790_v35, %v11789_v19  ;;  %v637_v35 = vmul.f32 %v7231_v45, %v5678_v48  ;;  %v11797_v19 = vrot.slane %v7174_v47, 1  ;;  %v7418_v47 = vpop.permute.xlu2 %2973  ;;  %v7457_v59 = vstv %s7247_s7  ;;  %s7488_s7 = sld [smem:[#allocation2 + $0x3a]] }
 0x3de   : > { %11791 = vst [vmem:[#allocation208_spill] sm:$0xff] %v7378_v30  ;;  %v11826_v27 = vrot.slane %v7413_v17, 1  ;;  %v7546_v5 = vstv %s7425_s26  ;;  %s8018_s26 = sld [smem:[#allocation2 + $0x3d]] }
 0x3df   : > { %11794 = vst [vmem:[#allocation209_spill] sm:$0xff] %v7385_v15  ;;  %v7401_v12 = vsel %vm767_vm1, %v11797_v19, %v798_v9  ;;  %v7423_v9 = vstv %s7305_s10  ;;  %v7437_v19 = vmul.f32 %v7416_v13, %v5548_v46  ;;  %v7463_v60 = vadd.f32 %v637_v35, %v7186_v11  ;;  %s7655_s10 = sld [smem:[#allocation2 + $0x6b]] }
 0x3e0   : > { %11796 = vst [vmem:[#allocation210_spill] sm:$0xff] %v7392_v26  ;;  %v3367_v24 = vmul.f32 %v7423_v9, %v5569_v55  ;;  %v3287_v11 = vmul.f32 %v7092_v28, %v5537_v41  ;;  %v7482_v35 = vstv %s7281_s9  ;;  %s7554_s9 = sld [smem:[#allocation2 + $0x69]] }
 0x3e1   : > { %11798 = vst [vmem:[#allocation211_spill] sm:$0xff] %v7401_v12  ;;  %v7493_v45 = vpop.permute.xlu0 %3047  ;;  %v677_v12 = vmul.f32 %v7409_v1, %v5881_v36  ;;  %v7711_v30 = vmul.f32 %v7482_v35, %v5978_v57 }
 0x3e2   : > { %11800 = vst [vmem:[#allocation212_spill] sm:$0xff] %v7406_v3  ;;  %3377 = vrot.lane.b32.xlu0 %v3367_v24, %s11814_s25  ;;  %v7491_v24 = vstv %s7341_s14  ;;  %s7875_s14 = sld [smem:[#allocation2 + $0x22]] }
 0x3e3   : > { %11801 = vst [vmem:[#allocation213_spill] sm:$0xff] %v7409_v1  ;;  %3295 = vrot.lane.b32.xlu2 %v3287_v11, %s11814_s25  ;;  %3273 = vrot.lane.b32.xlu1 %v3266_v53, %s11795_s15  ;;  %v7529_v53 = vadd.f32 %v638_v43, %v7221_v40  ;;  %v658_v40 = vmul.f32 %v7371_v6, %v5703_v62  ;;  %v7552_v43 = vstv %s7433_s17  ;;  %s7904_s15 = sld [smem:[#allocation2 + $0xe]] }
 0x3e4   : > { %11802 = vst [vmem:[#allocation214_spill] sm:$0xff] %v7413_v17  ;;  %v7566_v17 = vstv %s7448_s16  ;;  %v7573_v6 = vadd.f32 %v648_v25, %v7285_v0  ;;  %v7583_v15 = vmul.f32 %v7552_v43, %v5703_v62  ;;  %v3288_v0 = vmul.f32 %v7092_v28, %v5548_v46  ;;  %s8025_s17 = sld [smem:[#allocation2 + $0x3e]] }
 0x3e5   : > { %11803 = vst [vmem:[#allocation215_spill] sm:$0xff] %v7416_v13  ;;  %v7508_v13 = vstv %s7387_s0  ;;  %s7526_s0 = sld [smem:[#allocation2 + $0x3b]]  ;;  %v7541_v11 = vpop.permute.xlu2 %2979  ;;  %v7591_v25 = vmul.f32 %v7566_v17, %v5703_v62 }
 0x3e6   : > { %11804 = vst [vmem:[#allocation216_spill] sm:$0xff] %v7418_v47  ;;  %v7443_v47 = vmul.f32 %v7392_v26, %v5703_v62  ;;  %s8040_s16 = sld [smem:[#allocation2 + $0xf]] }
 0x3e7   : > { %11805 = vst [vmem:[#allocation217_spill] sm:$0xff] %v7420_v4  ;;  %v7446_v4 = vstv %s7313_s12  ;;  %s7822_s12 = sld [smem:[#allocation2 + $0x2d]] }
 0x3e8   : > { %11806 = vst [vmem:[#allocation218_spill] sm:$0xff] %v7428_v32  ;;  %v7486_v51 = vmul.f32 %v7446_v4, %v5703_v62  ;;  %v885_v3 = vrot.slane %v7443_v47, 1  ;;  %v7537_v47 = vstv %s7348_s30  ;;  %s7568_s30 = sld [smem:[#allocation2 + $0x67]] }
 0x3e9   : > { %11807 = vst [vmem:[#allocation219_spill] sm:$0xff] %v7431_v44 }
 0x3ea   : > { %11808 = vst [vmem:[#allocation220_spill] sm:$0xff] %v7437_v19 }
 0x3eb   : > { %11809 = vst [vmem:[#allocation221_spill] sm:$0xff] %v7446_v4  ;;  %3297 = vrot.lane.b32.xlu1 %v3288_v0, %s11814_s25  ;;  %v7633_v0 = vstv %s7539_s13  ;;  %s8149_s13 = sld [smem:[#allocation2 + $0x6f]] }
 0x3ec   : > { %11810 = vst [vmem:[#allocation222_spill] sm:$0xff] %v7454_v33  ;;  %v7505_v33 = vadd.f32 %v647_v21, %v7205_v10  ;;  %v874_v10 = vmul.f32 %v7392_v26, %v5678_v48  ;;  %v7534_v21 = vsel %vm767_vm1, %v885_v3, %v11826_v27  ;;  %v1350_v26 = vrot.slane %v7486_v51, 2 }
 0x3ed   : > { %11811 = vst [vmem:[#allocation223_spill] sm:$0xff] %v7457_v59  ;;  %v3392_v27 = vmul.f32 %v7546_v5, %v5703_v62  ;;  %v1339_v51 = vmul.f32 %v7446_v4, %v5678_v48 }
 0x3ee   : > { %11812 = vst [vmem:[#allocation224_spill] sm:$0xff] %v7460_v18  ;;  %v884_v34 = vrot.slane %v874_v10, 1  ;;  %v7594_v10 = vadd.f32 %v658_v40, %v7328_v8  ;;  %v7614_v8 = vstv %s7512_s8  ;;  %v11840_v40 = vrot.slane %v7522_v39, 1  ;;  %s8106_s8 = sld [smem:[#allocation2 + $0x3f]] }
 0x3ef   : > { %11813 = vst [vmem:[#allocation225_spill] sm:$0xff] %v7466_v14  ;;  %3401 = vrot.lane.b32.xlu0 %v3392_v27, %s11814_s25  ;;  %v7597_v27 = vstv %s7468_s23  ;;  %v3417_v20 = vmul.f32 %v7614_v8, %v5678_v48  ;;  %s8051_s23 = sld [smem:[#allocation2 + $0x26]] }
 0x3f0   : > { %11815 = vst [vmem:[#allocation226_spill] sm:$0xff] %v7475_v23 }
 0x3f1   : > { %11816 = vst [vmem:[#allocation227_spill] sm:$0xff] %v7482_v35 }
 0x3f2   : > { %11817 = vst [vmem:[#allocation228_spill] sm:$0xff] %v7491_v24  ;;  %v7604_v24 = vpop.permute.xlu0 %3053 }
 0x3f3   : > { %11818 = vst [vmem:[#allocation229_spill] sm:$0xff] %v7493_v45  ;;  %v7543_v45 = vpop.permute.xlu1 %2899 }
 0x3f4   : > { %11821 = vst [vmem:[#allocation230_spill] sm:$0xff] %v7502_v49 }
 0x3f5   : > { %11822 = vst [vmem:[#allocation231_spill] sm:$0xff] %v7505_v33  ;;  %v11841_v33 = vrot.slane %v7518_v2, 1 }
 0x3f6   : > { %11823 = vst [vmem:[#allocation232_spill] sm:$0xff] %v7508_v13  ;;  %v7600_v13 = vstv %s7488_s7  ;;  %s8092_s7 = sld [smem:[#allocation2 + $0x6e]] }
 0x3f7   : > { %11824 = vst [vmem:[#allocation233_spill] sm:$0xff] %v7518_v2  ;;  %v7653_v2 = vstv %s7554_s9  ;;  %3425 = vrot.lane.b32.xlu0 %v3417_v20, %s11814_s25  ;;  %s8203_s9 = sld [smem:[#allocation2 + $0x2e]] }
 0x3f8   : > { %11825 = vst [vmem:[#allocation234_spill] sm:$0xff] %v7522_v39  ;;  %v7637_v39 = vmul.f32 %v7457_v59, %v5881_v36 }
 0x3f9   : > { %11827 = vst [vmem:[#allocation235_spill] sm:$0xff] %v7537_v47 }
 0x3fa   : > { %11828 = vst [vmem:[#allocation236_spill] sm:$0xff] %v7541_v11  ;;  %v7560_v11 = vmul.f32 %v7446_v4, %v5665_v42  ;;  %v3290_v4 = vmul.f32 %v7092_v28, %v5609_v7  ;;  %v1349_v28 = vrot.slane %v1339_v51, 2  ;;  %v7624_v51 = vsel %vm767_vm1, %v884_v34, %v885_v3  ;;  %v7643_v34 = vpop.permute.xlu2 %3014 }
 0x3fb   : > { %11829 = vst [vmem:[#allocation237_spill] sm:$0xff] %v7543_v45  ;;  %v7563_v45 = vstv %s7394_s1  ;;  %s7602_s1 = sld [smem:[#allocation2 + $0x6a]]  ;;  %v7645_v3 = vpop.permute.xlu1 %2905 }
 0x3fc   : > { %11830 = vst [vmem:[#allocation238_spill] sm:$0xff] %v7546_v5  ;;  %v7609_v5 = vmul.f32 %v7475_v23, %v5678_v48  ;;  %3301 = vrot.lane.b32.xlu2 %v3290_v4, %s11814_s25  ;;  %v7630_v4 = vmul.f32 %v7552_v43, %v5665_v42  ;;  %v7666_v23 = vmul.f32 %v7566_v17, %v5665_v42 }
 0x3fd   : > { %11831 = vst [vmem:[#allocation239_spill] sm:$0xff] %v7552_v43  ;;  %v7650_v43 = vmul.f32 %v7537_v47, %v5881_v36  ;;  %v678_v36 = vmul.f32 %v7409_v1, %v5932_v38  ;;  %v681_v48 = vadd.f32 %v677_v12, %v7463_v60  ;;  %v7692_v60 = vmul.f32 %v7457_v59, %v5932_v38 }
 0x3fe   : > { %11832 = vst [vmem:[#allocation240_spill] sm:$0xff] %v7560_v11  ;;  %v718_v12 = vmul.f32 %v7428_v32, %v6068_v22  ;;  %v7704_v1 = vmul.f32 %v7537_v47, %v5932_v38 }
 0x3ff   : > { %11833 = vst [vmem:[#allocation241_spill] sm:$0xff] %v7563_v45  ;;  %v1465_v20 = vrot.slane %v7650_v43, 2  ;;  %v682_v43 = vadd.f32 %v678_v36, %v7529_v53  ;;  %v11856_v36 = vrot.slane %v7583_v15, 1 }
 0x400   : > { %11834 = vst [vmem:[#allocation242_spill] sm:$0xff] %v7566_v17  ;;  %v1000_v17 = vrot.slane %v7637_v39, 1 }
 0x401   : > { %11835 = vst [vmem:[#allocation243_spill] sm:$0xff] %v7579_v50  ;;  %v7698_v39 = vstv %s7602_s1  ;;  %s8453_s1 = sld [smem:[#allocation2 + $0x27]] }
 0x402   : > { %11836 = vst [vmem:[#allocation244_spill] sm:$0xff] %v7583_v15  ;;  %v7738_v31 = vpop.permute.xlu2 %3049 }
 0x403   : > { %11837 = vst [vmem:[#allocation245_spill] sm:$0xff] %v7597_v27  ;;  %v7740_v19 = vpop.permute.xlu1 %2940 }
 0x404   : > { %11838 = vst [vmem:[#allocation246_spill] sm:$0xff] %v7600_v13 }
 0x405   : > { %11839 = vst [vmem:[#allocation247_spill] sm:$0xff] %v7604_v24  ;;  %v7621_v24 = vsel %vm767_vm1, %v11841_v33, %v11840_v40  ;;  %v7641_v40 = vstv %s7526_s0  ;;  %v11848_v33 = vrot.slane %v7560_v11, 2  ;;  %v717_v11 = vmul.f32 %v7428_v32, %v5978_v57  ;;  %s8139_s0 = sld [smem:[#allocation2 + $0x2a]] }
 0x406   : > { %11842 = vst [vmem:[#allocation248_spill] sm:$0xff] %v7630_v4  ;;  %v7722_v32 = vmul.f32 %v7633_v0, %v5932_v38 }
 0x407   : > { %11843 = vst [vmem:[#allocation249_spill] sm:$0xff] %v7633_v0  ;;  %v7662_v54 = vsel %vm1232_vm2, %v1350_v26, %v11848_v33  ;;  %v7700_v33 = vpop.permute.xlu0 %3088 }
 0x408   : > { %11844 = vst [vmem:[#allocation250_spill] sm:$0xff] %v7641_v40 }
 0x409   : > { %11845 = vst [vmem:[#allocation251_spill] sm:$0xff] %v7643_v34  ;;  %v7672_v34 = vsel %vm1232_vm2, %v1349_v28, %v1350_v26  ;;  %v3315_v26 = vmul.f32 %v7119_v58, %v5569_v55  ;;  %v3313_v28 = vmul.f32 %v7119_v58, %v5537_v41 }
 0x40a   : > { %11846 = vst [vmem:[#allocation252_spill] sm:$0xff] %v7645_v3  ;;  %v7669_v3 = vstv %s7568_s30  ;;  %v7815_v15 = vpop.permute.xlu2 %3084  ;;  %s8382_s30 = sld [smem:[#allocation2 + $0x23]] }
 0x40b   : > { %11847 = vst [vmem:[#allocation253_spill] sm:$0xff] %v7653_v2  ;;  %3325 = vrot.lane.b32.xlu2 %v3315_v26, %s11814_s25  ;;  %3321 = vrot.lane.b32.xlu1 %v3313_v28, %s11814_s25  ;;  %v11855_v26 = vrot.slane %v7630_v4, 1  ;;  %v3420_v4 = vmul.f32 %v7614_v8, %v5689_v52 }
 0x40c   : > { %11849 = vst [vmem:[#allocation254_spill] sm:$0xff] %v7662_v54  ;;  %v7684_v54 = vmul.f32 %v7653_v2, %v5703_v62  ;;  %v721_v2 = vadd.f32 %v717_v11, %v681_v48  ;;  %v1001_v48 = vrot.slane %v7692_v60, 1  ;;  %v722_v11 = vadd.f32 %v718_v12, %v682_v43 }
 0x40d   : > { %11850 = vst [vmem:[#allocation255_spill] sm:$0xff] %v7666_v23  ;;  %v7735_v53 = vsel %vm767_vm1, %v11856_v36, %v11855_v26  ;;  %v7752_v26 = vmul.f32 %v7457_v59, %v5959_v56  ;;  %v11338_v36 = vrot.slane %v7704_v1, 2  ;;  %v11861_v60 = vrot.slane %v7666_v23, 2  ;;  %3431 = vrot.lane.b32.xlu0 %v3420_v4, %s11814_s25 }
 0x40e   : > { %11851 = vst [vmem:[#allocation256_spill] sm:$0xff] %v7669_v3  ;;  %v11862_v12 = vrot.slane %v7591_v25, 2  ;;  %v781_v59 = vadd.f32 %v7324_v37, %v721_v2  ;;  %v1002_v37 = vsel %vm767_vm1, %v1000_v17, %v1001_v48  ;;  %v7798_v17 = vmul.f32 %v7537_v47, %v5959_v56 }
 0x40f   : > { %11852 = vst [vmem:[#allocation257_spill] sm:$0xff] %v7672_v34  ;;  %v688_v34 = vmul.f32 %v7431_v44, %v5932_v38  ;;  %v7728_v44 = vmul.f32 %v7563_v45, %v5978_v57  ;;  %v7783_v4 = vpop.permute.xlu0 %3123  ;;  %v7806_v2 = vmul.f32 %v7579_v50, %v6068_v22  ;;  %v698_v47 = vmul.f32 %v7466_v14, %v5932_v38 }
 0x410   : > { %11853 = vst [vmem:[#allocation258_spill] sm:$0xff] %v7698_v39  ;;  %v728_v39 = vmul.f32 %v7460_v18, %v6068_v22  ;;  %v7746_v18 = vstv %s7655_s10  ;;  %v7763_v43 = vsel %vm1232_vm2, %v11862_v12, %v11861_v60  ;;  %v782_v60 = vadd.f32 %v7334_v63, %v722_v11  ;;  %s8497_s10 = sld [smem:[#allocation2 + $0x2b]] }
 0x411   : > { %11854 = vst [vmem:[#allocation259_spill] sm:$0xff] %v7700_v33  ;;  %v7718_v33 = vmul.f32 %v7502_v49, %v5932_v38  ;;  %v692_v28 = vadd.f32 %v688_v34, %v7573_v6  ;;  %v7770_v6 = vmul.f32 %v7482_v35, %v6107_v61  ;;  %v3340_v34 = vmul.f32 %v7170_v29, %v5548_v46 }
 0x412   : > { %11857 = vst [vmem:[#allocation260_spill] sm:$0xff] %v7738_v31  ;;  %v3316_v31 = vmul.f32 %v7119_v58, %v5609_v7  ;;  %v7779_v12 = vmul.f32 %v7502_v49, %v5959_v56  ;;  %v7791_v58 = vsel %vm1232_vm2, %v1465_v20, %v11338_v36  ;;  %v7802_v11 = vmul.f32 %v7563_v45, %v6068_v22  ;;  %v7817_v36 = vpop.permute.xlu1 %2975 }
 0x413   : > { %11858 = vst [vmem:[#allocation261_spill] sm:$0xff] %v7740_v19  ;;  %v1116_v19 = vrot.slane %v7711_v30, 1  ;;  %v732_v30 = vadd.f32 %v728_v39, %v692_v28  ;;  %v1107_v28 = vmul.f32 %v7482_v35, %v6068_v22  ;;  %3349 = vrot.lane.b32.xlu2 %v3340_v34, %s11814_s25  ;;  %v7810_v20 = vmul.f32 %v7579_v50, %v6107_v61 }
 0x414   : > { %11859 = vst [vmem:[#allocation262_spill] sm:$0xff] %v7746_v18  ;;  %3327 = vrot.lane.b32.xlu1 %v3316_v31, %s11814_s25  ;;  %v897_v63 = vadd.f32 %v7624_v51, %v781_v59  ;;  %v7820_v39 = vstv %s7742_s11  ;;  %v11870_v59 = vrot.slane %v7752_v26, 1  ;;  %v7835_v34 = vmul.f32 %v7633_v0, %v5959_v56  ;;  %s8646_s11 = sld [smem:[#allocation2 + $0x2f]] }
 0x415   : > { %11860 = vst [vmem:[#allocation263_spill] sm:$0xff] %v7752_v26  ;;  %v811_v31 = vadd.f32 %v7353_v16, %v732_v30  ;;  %v3445_v16 = vmul.f32 %v7820_v39, %v5665_v42  ;;  %v1117_v30 = vrot.slane %v1107_v28, 1  ;;  %v3365_v26 = vmul.f32 %v7423_v9, %v5537_v41 }
 0x416   : > { %11863 = vst [vmem:[#allocation264_spill] sm:$0xff] %v7770_v6  ;;  %v1004_v51 = vsel %vm767_vm1, %v1001_v48, %v11870_v59  ;;  %v11872_v48 = vrot.slane %v7770_v6, 1  ;;  %v11874_v35 = vrot.slane %v7718_v33, 1  ;;  %v702_v6 = vadd.f32 %v698_v47, %v7594_v10 }
 0x417   : > { %11864 = vst [vmem:[#allocation265_spill] sm:$0xff] %v7779_v12  ;;  %3455 = vrot.lane.b32.xlu0 %v3445_v16, %s11814_s25  ;;  %v927_v59 = vadd.f32 %v7621_v24, %v811_v31  ;;  %v1013_v16 = vadd.f32 %v1002_v37, %v897_v63  ;;  %v7861_v14 = vpop.permute.xlu0 %3158  ;;  %v7865_v24 = vmul.f32 %v7563_v45, %v6107_v61  ;;  %v1582_v31 = vrot.slane %v7802_v11, 2 }
 0x418   : > { %11865 = vst [vmem:[#allocation266_spill] sm:$0xff] %v7783_v4  ;;  %v898_v4 = vadd.f32 %v7534_v21, %v782_v60  ;;  %v7839_v21 = vmul.f32 %v7669_v3, %v6068_v22  ;;  %v1120_v28 = vsel %vm767_vm1, %v1117_v30, %v11872_v48  ;;  %v3341_v60 = vmul.f32 %v7170_v29, %v5569_v55 }
 0x419   : > { %11866 = vst [vmem:[#allocation267_spill] sm:$0xff] %v7798_v17  ;;  %v7870_v29 = vmul.f32 %v7669_v3, %v6107_v61  ;;  %v11878_v47 = vrot.slane %v7810_v20, 1  ;;  %v11879_v10 = vrot.slane %v7806_v2, 1  ;;  %v7884_v37 = vmul.f32 %v7600_v13, %v5959_v56 }
 0x41a   : > { %11867 = vst [vmem:[#allocation268_spill] sm:$0xff] %v7810_v20  ;;  %v1014_v23 = vadd.f32 %v1004_v51, %v898_v4  ;;  %v1118_v4 = vsel %vm767_vm1, %v1116_v19, %v1117_v30  ;;  %v7888_v51 = vpop.permute.xlu2 %3090  ;;  %v7890_v30 = vpop.permute.xlu1 %3010  ;;  %v11884_v48 = vrot.slane %v7704_v1, 2  ;;  %v11886_v1 = vld [vmem:[#allocation220_spill] sm:$0xff] }
 0x41b   : > { %11868 = vst [vmem:[#allocation269_spill] sm:$0xff] %v7815_v15  ;;  %v738_v15 = vmul.f32 %v7597_v27, %v6068_v22  ;;  %3373 = vrot.lane.b32.xlu2 %v3365_v26, %s11814_s25  ;;  %v11888_v19 = vld [vmem:[#allocation208_spill] sm:$0xff]  ;;  %v3368_v26 = vmul.f32 %v7423_v9, %v5609_v7  ;;  %v11905_v20 = vrot.slane %v7884_v37, 1 }
 0x41c   : > { %11869 = vst [vmem:[#allocation270_spill] sm:$0xff] %v7817_v36  ;;  %v11873_v36 = vrot.slane %v7779_v12, 1  ;;  %3351 = vrot.lane.b32.xlu1 %v3341_v60, %s11814_s25  ;;  %v11883_v60 = vrot.slane %v7798_v17, 2  ;;  %v11897_v17 = vld [vmem:[#allocation206_spill] sm:$0xff] }
 0x41d   : > { %11871 = vst [vmem:[#allocation271_spill] sm:$0xff] %v7835_v34  ;;  %v742_v63 = vadd.f32 %v738_v15, %v702_v6  ;;  %v7902_v15 = vmul.f32 %v7600_v13, %v5932_v38  ;;  %v11891_v6 = vld [vmem:[#allocation219_spill] sm:$0xff] }
 0x41e   : > { %v1033_v27 = vsel %vm767_vm1, %v11874_v35, %v11873_v36  ;;  %11875 = vst [vmem:[#allocation272_spill] sm:$0xff] %v7861_v14  ;;  %v1130_v35 = vadd.f32 %v1120_v28, %v1014_v23  ;;  %v1149_v36 = vsel %vm767_vm1, %v11879_v10, %v11878_v47  ;;  %v7893_v23 = vstv %s7822_s12  ;;  %s8657_s12 = sld [smem:[#allocation2 + $0x50]] }
 0x41f   : > { %11876 = vst [vmem:[#allocation273_spill] sm:$0xff] %v7865_v24  ;;  %v1043_v11 = vadd.f32 %v1033_v27, %v927_v59  ;;  %v1469_v28 = vsel %vm1232_vm2, %v11884_v48, %v11883_v60  ;;  %v1129_v47 = vadd.f32 %v1118_v4, %v1013_v16  ;;  %v3470_v27 = vmul.f32 %v7893_v23, %v5703_v62  ;;  %v11887_v60 = vld [vmem:[#allocation204_spill] sm:$0xff]  ;;  %v7941_v12 = vpop.permute.xlu0 %3164 }
 0x420   : > { %11877 = vst [vmem:[#allocation274_spill] sm:$0xff] %v7870_v29  ;;  %v7911_v10 = vmul.f32 %v7641_v40, %v6107_v61  ;;  %v1247_v16 = vadd.f32 %v11887_v60, %v1130_v35  ;;  %v840_v14 = vadd.f32 %v11888_v19, %v742_v63  ;;  %v3366_v35 = vmul.f32 %v7423_v9, %v5548_v46  ;;  %v11904_v9 = vld [vmem:[#allocation254_spill] sm:$0xff] }
 0x421   : > { %11880 = vst [vmem:[#allocation275_spill] sm:$0xff] %v7884_v37  ;;  %v1159_v59 = vadd.f32 %v1149_v36, %v1043_v11  ;;  %3479 = vrot.lane.b32.xlu0 %v3470_v27, %s11814_s25  ;;  %v7921_v36 = vmul.f32 %v7641_v40, %v6068_v22  ;;  %v11890_v11 = vld [vmem:[#allocation35_spill] sm:$0xff]  ;;  %v11892_v60 = vrot.slane %v7835_v34, 2  ;;  %v11893_v63 = vrot.slane %v7722_v32, 2  ;;  %v11898_v34 = vld [vmem:[#allocation224_spill] sm:$0xff] }
 0x422   : > { %11881 = vst [vmem:[#allocation276_spill] sm:$0xff] %v7888_v51  ;;  %v11894_v27 = vld [vmem:[#allocation203_spill] sm:$0xff]  ;;  %v11895_v4 = vrot.slane %v7728_v44, 2  ;;  %v727_v45 = vmul.f32 %v11898_v34, %v5978_v57  ;;  %v7950_v44 = vstv %s7875_s14  ;;  %v7973_v34 = vpop.permute.xlu2 %3125  ;;  %s8727_s14 = sld [smem:[#allocation2 + $0x54]] }
 0x423   : > { %11882 = vst [vmem:[#allocation277_spill] sm:$0xff] %v7890_v30  ;;  %v687_v30 = vmul.f32 %v11891_v6, %v11890_v11  ;;  %v1498_v19 = vsel %vm1232_vm2, %v11893_v63, %v11892_v60  ;;  %v1246_v48 = vadd.f32 %v11894_v27, %v1129_v47  ;;  %v1276_v6 = vadd.f32 %v11897_v17, %v1159_v59  ;;  %v11902_v63 = vld [vmem:[#allocation253_spill] sm:$0xff] }
 0x424   : > { %11885 = vst [vmem:[#allocation278_spill] sm:$0xff] %v7911_v10  ;;  %v7938_v51 = vsel %vm1232_vm2, %v11895_v4, %v1582_v31  ;;  %3379 = vrot.lane.b32.xlu2 %v3368_v26, %s11814_s25  ;;  %3375 = vrot.lane.b32.xlu1 %v3366_v35, %s11814_s25  ;;  %v11899_v47 = vrot.slane %v7865_v24, 2  ;;  %v11900_v60 = vrot.slane %v7870_v29, 2  ;;  %v11901_v17 = vrot.slane %v7839_v21, 2  ;;  %v11907_v29 = vld [vmem:[#allocation231_spill] sm:$0xff] }
 0x425   : > { %11889 = vst [vmem:[#allocation220_spill] sm:$0xff] %v7921_v36  ;;  %v7962_v27 = vmul.f32 %v11902_v63, %v5665_v42  ;;  %v956_v26 = vadd.f32 %v7735_v53, %v840_v14  ;;  %v1363_v35 = vadd.f32 %v11904_v9, %v1247_v16  ;;  %v691_v24 = vadd.f32 %v687_v30, %v11907_v29  ;;  %v11911_v14 = vld [vmem:[#allocation258_spill] sm:$0xff] }
 0x426   : > { %11896 = vst [vmem:[#allocation204_spill] sm:$0xff] %v7941_v12  ;;  %v1585_v4 = vsel %vm1232_vm2, %v1582_v31, %v11899_v47  ;;  %v1614_v59 = vsel %vm1232_vm2, %v11901_v17, %v11900_v60  ;;  %v11906_v12 = vrot.slane %v7902_v15, 1  ;;  %v11359_v47 = vrot.slane %v7921_v36, 1  ;;  %v7975_v60 = vpop.permute.xlu1 %3016  ;;  %v11910_v17 = vld [vmem:[#allocation257_spill] sm:$0xff] }
 0x427   : > { %11903 = vst [vmem:[#allocation208_spill] sm:$0xff] %v7962_v27  ;;  %v1362_v63 = vadd.f32 %v11910_v17, %v1246_v48  ;;  %v7980_v53 = vmul.f32 %v11911_v14, %v5932_v38  ;;  %v7983_v16 = vstv %s7904_s15  ;;  %v3495_v9 = vmul.f32 %v7950_v44, %v11890_v11  ;;  %v11919_v17 = vld [vmem:[#allocation242_spill] sm:$0xff]  ;;  %s8866_s15 = sld [smem:[#allocation2 + $0x58]] }
 0x428   : > { %v1062_v31 = vsel %vm767_vm1, %v11906_v12, %v11905_v20  ;;  %11908 = vst [vmem:[#allocation203_spill] sm:$0xff] %v7973_v34  ;;  %v1392_v12 = vadd.f32 %v7763_v43, %v1276_v6  ;;  %v7990_v20 = vmul.f32 %v11911_v14, %v5959_v56  ;;  %v11914_v29 = vrot.slane %v7911_v10, 1  ;;  %v11921_v14 = vld [vmem:[#allocation211_spill] sm:$0xff] }
 0x429   : > { %11909 = vst [vmem:[#allocation206_spill] sm:$0xff] %v7975_v60  ;;  %v731_v48 = vadd.f32 %v727_v45, %v691_v24  ;;  %v1072_v60 = vadd.f32 %v1062_v31, %v956_v26  ;;  %v8000_v34 = vmul.f32 %v7746_v18, %v6107_v61  ;;  %v1019_v43 = vmul.f32 %v7502_v49, %v11890_v11  ;;  %v11918_v24 = vld [vmem:[#allocation17_spill] sm:$0xff] }
 0x42a   : > { %11912 = vst [vmem:[#allocation254_spill] sm:$0xff] %v7983_v16  ;;  %v1178_v30 = vsel %vm767_vm1, %v11359_v47, %v11914_v29  ;;  %3503 = vrot.lane.b32.xlu0 %v3495_v9, %s11814_s25  ;;  %v1479_v6 = vadd.f32 %v1469_v28, %v1363_v35  ;;  %v8007_v10 = vmul.f32 %v7746_v18, %v6068_v22  ;;  %v11917_v29 = vld [vmem:[#allocation238_spill] sm:$0xff]  ;;  %v8020_v28 = vpop.permute.xlu0 %3199  ;;  %v11926_v49 = vrot.slane %v7609_v5, 1  ;;  %v11929_v5 = vld [vmem:[#allocation209_spill] sm:$0xff] }
 0x42b   : > { %11913 = vst [vmem:[#allocation231_spill] sm:$0xff] %v7990_v20  ;;  %v3393_v45 = vmul.f32 %v11917_v29, %v5665_v42  ;;  %v3391_v26 = vmul.f32 %v11917_v29, %v11918_v24  ;;  %v1478_v31 = vadd.f32 %v7791_v58, %v1362_v63  ;;  %v1188_v47 = vadd.f32 %v1178_v30, %v1072_v60 }
 0x42c   : > { %11915 = vst [vmem:[#allocation257_spill] sm:$0xff] %v8000_v34  ;;  %v1368_v37 = vmul.f32 %v11919_v17, %v11918_v24  ;;  %v1135_v9 = vmul.f32 %v7579_v50, %v5978_v57  ;;  %v1508_v35 = vadd.f32 %v1498_v19, %v1392_v12  ;;  %v810_v36 = vadd.f32 %v11921_v14, %v731_v48  ;;  %v11924_v12 = vld [vmem:[#allocation233_spill] sm:$0xff] }
 0x42d   : > { %11916 = vst [vmem:[#allocation279_spill] sm:$0xff] %v8007_v10  ;;  %3403 = vrot.lane.b32.xlu2 %v3393_v45, %s11814_s25  ;;  %3399 = vrot.lane.b32.xlu1 %v3391_v26, %s11814_s25  ;;  %v11922_v58 = vrot.slane %v7962_v27, 2  ;;  %v11923_v63 = vrot.slane %v7684_v54, 2  ;;  %v11925_v30 = vrot.slane %v11924_v12, 1  ;;  %v1029_v48 = vrot.slane %v1019_v43, 1 }
 0x42e   : > { %11920 = vst [vmem:[#allocation238_spill] sm:$0xff] %v8020_v28  ;;  %v1595_v45 = vadd.f32 %v1585_v4, %v1479_v6  ;;  %v1484_v18 = vmul.f32 %v7633_v0, %v11890_v11  ;;  %v8049_v19 = vpop.permute.xlu1 %3051  ;;  %v1378_v43 = vrot.slane %v1368_v37, 2  ;;  %v1145_v12 = vrot.slane %v1135_v9, 1 }
 0x42f   : > { %v1411_v60 = vsel %vm1232_vm2, %v11923_v63, %v11922_v58  ;;  %v915_v14 = vsel %vm767_vm1, %v11926_v49, %v11925_v30  ;;  %v1600_v58 = vmul.f32 %v7669_v3, %v5978_v57  ;;  %v8047_v63 = vpop.permute.xlu2 %3160  ;;  %11928 = vst [vmem:[#allocation233_spill] sm:$0xff] %v8049_v19  ;;  %v1305_v49 = vadd.f32 %v11929_v5, %v1188_v47  ;;  %v11930_v30 = vld [vmem:[#allocation64_spill] sm:$0xff] }
 0x430   : > { %11927 = vst [vmem:[#allocation211_spill] sm:$0xff] %v8047_v63  ;;  %v3498_v4 = vmul.f32 %v7950_v44, %v11930_v30  ;;  %v1624_v6 = vadd.f32 %v1614_v59, %v1508_v35  ;;  %v8057_v26 = vadd.f32 %v7938_v51, %v1478_v31  ;;  %v11931_v28 = vrot.slane %v7990_v20, 2  ;;  %v11933_v3 = vld [vmem:[#allocation20_spill] sm:$0xff] }
 0x431   : > { %v11932_v27 = vrot.slane %v7980_v53, 2  ;;  %v926_v19 = vadd.f32 %v915_v14, %v810_v36  ;;  %v8067_v47 = vadd.f32 %v11933_v3, %v1595_v45  ;;  %v11935_v37 = vrot.slane %v8000_v34, 2  ;;  %v11938_v35 = vld [vmem:[#allocation228_spill] sm:$0xff] }
 0x432   : > { %v11936_v9 = vrot.slane %v8007_v10, 2  ;;  %v11937_v51 = vrot.slane %v7718_v33, 1  ;;  %v668_v36 = vmul.f32 %v11938_v35, %v5703_v62  ;;  %3509 = vrot.lane.b32.xlu0 %v3498_v4, %s11814_s25  ;;  %v1610_v3 = vrot.slane %v1600_v58, 2  ;;  %v8094_v58 = vpop.permute.xlu0 %3234 }
 0x433   : > { %v1527_v63 = vsel %vm1232_vm2, %v11932_v27, %v11931_v28  ;;  %11934 = vst [vmem:[#allocation209_spill] sm:$0xff] %v8067_v47  ;;  %v1494_v27 = vrot.slane %v1484_v18, 2  ;;  %v3418_v28 = vmul.f32 %v7614_v8, %v5703_v62  ;;  %v3394_v14 = vmul.f32 %v11917_v29, %v5689_v52 }
 0x434   : > { %v1643_v59 = vsel %vm1232_vm2, %v11936_v9, %v11935_v37  ;;  %v1031_v31 = vsel %vm767_vm1, %v1029_v48, %v11937_v51  ;;  %v1421_v45 = vadd.f32 %v1411_v60, %v1305_v49  ;;  %v11939_v33 = vrot.slane %v7591_v25, 2  ;;  %11941 = vst [vmem:[#allocation20_spill] sm:$0xff] %v8094_v58  ;;  %v11942_v9 = vld [vmem:[#allocation215_spill] sm:$0xff] }
 0x435   : > { %v11940_v5 = vrot.slane %v7806_v2, 1  ;;  %v708_v18 = vmul.f32 %v7983_v16, %v5932_v38  ;;  %v1042_v4 = vadd.f32 %v1031_v31, %v926_v19  ;;  %v8098_v29 = vmul.f32 %v11942_v9, %v5569_v55  ;;  %3427 = vrot.lane.b32.xlu2 %v3418_v28, %s11814_s25  ;;  %3405 = vrot.lane.b32.xlu1 %v3394_v14, %s11814_s25  ;;  %v11946_v2 = vld [vmem:[#allocation222_spill] sm:$0xff] }
 0x436   : > { %v1380_v48 = vsel %vm1232_vm2, %v1378_v43, %v11939_v33  ;;  %v8101_v25 = vstv %s8018_s26  ;;  %v8104_v60 = vstv %s8025_s17  ;;  %v672_v49 = vadd.f32 %v668_v36, %v11946_v2  ;;  %s8958_s26 = sld [smem:[#allocation2 + $0x5c]] }
 0x437   : > { %v1147_v37 = vsel %vm767_vm1, %v1145_v12, %v11940_v5  ;;  %11943 = vst [vmem:[#allocation215_spill] sm:$0xff] %v8098_v29  ;;  %v8112_v43 = vstv %s8040_s16  ;;  %v8116_v19 = vmul.f32 %v8101_v25, %v5665_v42  ;;  %v8120_v12 = vmul.f32 %v8104_v60, %v5959_v56  ;;  %v8132_v33 = vpop.permute.xlu2 %3195  ;;  %v8134_v5 = vpop.permute.xlu1 %3086  ;;  %s9019_s17 = sld [smem:[#allocation2 + $0x51]] }
 0x438   : > { %11944 = vst [vmem:[#allocation280_spill] sm:$0xff] %v8101_v25  ;;  %v1158_v51 = vadd.f32 %v1147_v37, %v1042_v4  ;;  %v11950_v31 = vrot.slane %v7722_v32, 2  ;;  %v11951_v14 = vrot.slane %v7839_v21, 2  ;;  %v8137_v2 = vstv %s8051_s23  ;;  %s9196_s16 = sld [smem:[#allocation2 + $0x55]] }
 0x439   : > { %11945 = vst [vmem:[#allocation281_spill] sm:$0xff] %v8104_v60  ;;  %v1537_v58 = vadd.f32 %v1527_v63, %v1421_v45  ;;  %v8143_v32 = vmul.f32 %v8101_v25, %v5703_v62  ;;  %v3523_v21 = vmul.f32 %v8137_v2, %v5959_v56  ;;  %v712_v4 = vadd.f32 %v708_v18, %v672_v49  ;;  %s9270_s23 = sld [smem:[#allocation2 + $0x59]] }
 0x43a   : > { %11947 = vst [vmem:[#allocation222_spill] sm:$0xff] %v8112_v43  ;;  %v8125_v28 = vsel %vm1232_vm2, %v1494_v27, %v11950_v31  ;;  %v8130_v36 = vsel %vm1232_vm2, %v1610_v3, %v11951_v14  ;;  %v8147_v27 = vmul.f32 %v8104_v60, %v5932_v38  ;;  %v11955_v3 = vld [vmem:[#allocation21_spill] sm:$0xff]  ;;  %v8158_v45 = vstv %s8064_s6  ;;  %s9326_s6 = sld [smem:[#allocation2 + $0x5d]] }
 0x43b   : > { %11948 = vst [vmem:[#allocation282_spill] sm:$0xff] %v8116_v19  ;;  %v8154_v37 = vadd.f32 %v11955_v3, %v1624_v6  ;;  %3533 = vrot.lane.b32.xlu0 %v3523_v21, %s11814_s25  ;;  %v11961_v6 = vld [vmem:[#allocation212_spill] sm:$0xff]  ;;  %v748_v49 = vmul.f32 %v8112_v43, %v6068_v22  ;;  %v3443_v3 = vmul.f32 %v7820_v39, %v11918_v24  ;;  %v11378_v31 = vrot.slane %v8143_v32, 1 }
 0x43c   : > { %11949 = vst [vmem:[#allocation283_spill] sm:$0xff] %v8120_v12  ;;  %v1275_v18 = vadd.f32 %v11961_v6, %v1158_v51  ;;  %v3419_v14 = vmul.f32 %v7614_v8, %v5665_v42  ;;  %v8185_v21 = vstv %s8092_s7  ;;  %v8187_v51 = vpop.permute.xlu0 %3269  ;;  %v1653_v6 = vadd.f32 %v1643_v59, %v1537_v58  ;;  %s9476_s7 = sld [smem:[#allocation2 + $0x52]] }
 0x43d   : > { %11952 = vst [vmem:[#allocation284_spill] sm:$0xff] %v8132_v33  ;;  %v11965_v34 = vrot.slane %v8098_v29, 1  ;;  %v11966_v20 = vrot.slane %v11886_v1, 1  ;;  %v8199_v63 = vmul.f32 %v8158_v45, %v5665_v42  ;;  %3451 = vrot.lane.b32.xlu2 %v3443_v3, %s11814_s25  ;;  %v11969_v59 = vrot.slane %v8116_v19, 1 }
 0x43e   : > { %11953 = vst [vmem:[#allocation285_spill] sm:$0xff] %v8134_v5  ;;  %v11958_v5 = vld [vmem:[#allocation232_spill] sm:$0xff]  ;;  %3429 = vrot.lane.b32.xlu1 %v3419_v14, %s11814_s25  ;;  %v1391_v14 = vadd.f32 %v1380_v48, %v1275_v18  ;;  %v8221_v0 = vmul.f32 %v8185_v21, %v5932_v38  ;;  %v752_v19 = vadd.f32 %v748_v49, %v712_v4  ;;  %v11977_v18 = vld [vmem:[#allocation22_spill] sm:$0xff] }
 0x43f   : > { %11954 = vst [vmem:[#allocation286_spill] sm:$0xff] %v8147_v27  ;;  %v8164_v33 = vmul.f32 %v11958_v5, %v5548_v46  ;;  %v8168_v47 = vmul.f32 %v11958_v5, %v5569_v55  ;;  %v859_v8 = vsel %vm767_vm1, %v11966_v20, %v11965_v34  ;;  %v8195_v46 = vstv %s8106_s8  ;;  %v8223_v17 = vpop.permute.xlu2 %3201  ;;  %v11979_v4 = vld [vmem:[#allocation24_spill] sm:$0xff]  ;;  %s9541_s8 = sld [smem:[#allocation2 + $0x56]] }
 0x440   : > { %11956 = vst [vmem:[#allocation21_spill] sm:$0xff] %v8154_v37  ;;  %v8182_v37 = vmul.f32 %v8158_v45, %v5703_v62  ;;  %v975_v58 = vsel %vm767_vm1, %v11378_v31, %v11969_v59  ;;  %v11970_v34 = vrot.slane %v8120_v12, 1  ;;  %v11971_v20 = vrot.slane %v8147_v27, 1  ;;  %v8225_v59 = vpop.permute.xlu1 %3121  ;;  %v12012_v27 = vld [vmem:[#allocation210_spill] sm:$0xff] }
 0x441   : > { %11957 = vst [vmem:[#allocation287_spill] sm:$0xff] %v8158_v45  ;;  %v8228_v31 = vstv %s8139_s0  ;;  %v8240_v3 = vadd.f32 %v11977_v18, %v8057_v26  ;;  %v8243_v49 = vadd.f32 %v11979_v4, %v1653_v6  ;;  %v8248_v12 = vmul.f32 %v8185_v21, %v5959_v56  ;;  %v11984_v26 = vld [vmem:[#allocation184_spill] sm:$0xff]  ;;  %v11985_v6 = vld [vmem:[#allocation225_spill] sm:$0xff]  ;;  %s9587_s0 = sld [smem:[#allocation2 + $0x5a]] }
 0x442   : > { %11959 = vst [vmem:[#allocation288_spill] sm:$0xff] %v8164_v33  ;;  %v3548_v48 = vmul.f32 %v8228_v31, %v5932_v38  ;;  %v617_v18 = vmul.f32 %v11984_v26, %v5537_v41  ;;  %v697_v4 = vmul.f32 %v11985_v6, %v11890_v11  ;;  %v3444_v50 = vmul.f32 %v7820_v39, %v5703_v62 }
 0x443   : > { %11960 = vst [vmem:[#allocation289_spill] sm:$0xff] %v8168_v47  ;;  %v11986_v26 = vrot.slane %v8168_v47, 2  ;;  %v11987_v6 = vrot.slane %v8164_v33, 2  ;;  %v11993_v62 = vrot.slane %v8199_v63, 2  ;;  %v12011_v33 = vld [vmem:[#allocation253_spill] sm:$0xff]  ;;  %v8358_v45 = vmul.f32 %v12012_v27, %v5689_v52 }
 0x444   : > { %11962 = vst [vmem:[#allocation212_spill] sm:$0xff] %v8182_v37  ;;  %3557 = vrot.lane.b32.xlu0 %v3548_v48, %s11814_s25  ;;  %v8281_v10 = vpop.permute.xlu0 %3275 }
 0x445   : > { %11963 = vst [vmem:[#allocation290_spill] sm:$0xff] %v8185_v21  ;;  %v8277_v21 = vsel %vm1232_vm2, %v11987_v6, %v11986_v26  ;;  %v11997_v6 = vld [vmem:[#allocation179_spill] sm:$0xff] }
 0x446   : > { %11964 = vst [vmem:[#allocation291_spill] sm:$0xff] %v8187_v51  ;;  %v8215_v51 = vsel %vm767_vm1, %v11971_v20, %v11970_v34  ;;  %v8232_v34 = vstv %s8149_s13  ;;  %v11976_v20 = vld [vmem:[#allocation207_spill] sm:$0xff]  ;;  %3453 = vrot.lane.b32.xlu1 %v3444_v50, %s11814_s25  ;;  %v1048_v50 = vmul.f32 %v7600_v13, %v11890_v11  ;;  %s9724_s13 = sld [smem:[#allocation2 + $0x5e]] }
 0x447   : > { %11967 = vst [vmem:[#allocation292_spill] sm:$0xff] %v8195_v46  ;;  %v657_v29 = vmul.f32 %v11976_v20, %v11918_v24  ;;  %v8256_v20 = vmul.f32 %v8195_v46, %v6107_v61  ;;  %v8285_v5 = vmul.f32 %v8232_v34, %v6107_v61 }
 0x448   : > { %11968 = vst [vmem:[#allocation293_spill] sm:$0xff] %v8199_v63  ;;  %v8310_v26 = vpop.permute.xlu1 %3127 }
 0x449   : > { %11972 = vst [vmem:[#allocation294_spill] sm:$0xff] %v8223_v17  ;;  %v8252_v17 = vmul.f32 %v8195_v46, %v6068_v22 }
 0x44a   : > { %11973 = vst [vmem:[#allocation295_spill] sm:$0xff] %v8225_v59  ;;  %v869_v59 = vadd.f32 %v859_v8, %v752_v19  ;;  %v661_v19 = vadd.f32 %v657_v29, %v617_v18  ;;  %v11988_v8 = vld [vmem:[#allocation245_spill] sm:$0xff]  ;;  %v8294_v29 = vstv %s8203_s9  ;;  %s9809_s9 = sld [smem:[#allocation2 + $0x53]] }
 0x44b   : > { %11974 = vst [vmem:[#allocation296_spill] sm:$0xff] %v8228_v31  ;;  %v1507_v31 = vadd.f32 %v8125_v28, %v1391_v14  ;;  %v737_v48 = vmul.f32 %v11988_v8, %v5978_v57  ;;  %v11992_v14 = vld [vmem:[#allocation239_spill] sm:$0xff]  ;;  %v11994_v8 = vrot.slane %v8182_v37, 2 }
 0x44c   : > { %11975 = vst [vmem:[#allocation297_spill] sm:$0xff] %v8232_v34  ;;  %v932_v47 = vmul.f32 %v11992_v14, %v11918_v24  ;;  %v985_v14 = vadd.f32 %v975_v58, %v869_v59 }
 0x44d   : > { %11978 = vst [vmem:[#allocation22_spill] sm:$0xff] %v8240_v3  ;;  %v3446_v3 = vmul.f32 %v7820_v39, %v5689_v52  ;;  %v11991_v39 = vld [vmem:[#allocation185_spill] sm:$0xff] }
 0x44e   : > { %11980 = vst [vmem:[#allocation24_spill] sm:$0xff] %v8243_v49  ;;  %v8265_v49 = vmul.f32 %v8232_v34, %v6068_v22  ;;  %v816_v28 = vmul.f32 %v11991_v39, %v5537_v41  ;;  %v8304_v39 = vsel %vm1232_vm2, %v11994_v8, %v11993_v62  ;;  %v8308_v34 = vpop.permute.xlu2 %3236  ;;  %v3573_v62 = vmul.f32 %v8294_v29, %v11890_v11 }
 0x44f   : > { %11981 = vst [vmem:[#allocation298_spill] sm:$0xff] %v8248_v12  ;;  %3457 = vrot.lane.b32.xlu2 %v3446_v3, %s11814_s25  ;;  %v942_v8 = vrot.slane %v932_v47, 1  ;;  %v11999_v3 = vrot.slane %v8256_v20, 1  ;;  %v12003_v47 = vld [vmem:[#allocation198_spill] sm:$0xff] }
 0x450   : > { %11982 = vst [vmem:[#allocation299_spill] sm:$0xff] %v8252_v17  ;;  %v826_v59 = vrot.slane %v816_v28, 1  ;;  %3581 = vrot.lane.b32.xlu0 %v3573_v62, %s11814_s25  ;;  %v12004_v28 = vrot.slane %v12003_v47, 1  ;;  %v12007_v62 = vld [vmem:[#allocation218_spill] sm:$0xff]  ;;  %v8347_v47 = vpop.permute.xlu0 %3299 }
 0x451   : > { %11983 = vst [vmem:[#allocation300_spill] sm:$0xff] %v8256_v20  ;;  %v12005_v20 = vld [vmem:[#allocation177_spill] sm:$0xff]  ;;  %v719_v37 = vmul.f32 %v12007_v62, %v6107_v61 }
 0x452   : > { %11989 = vst [vmem:[#allocation301_spill] sm:$0xff] %v8281_v10  ;;  %v701_v10 = vadd.f32 %v697_v4, %v661_v19  ;;  %v599_v4 = vmul.f32 %v11997_v6, %v5569_v55  ;;  %v11998_v19 = vld [vmem:[#allocation190_spill] sm:$0xff]  ;;  %v12002_v6 = vld [vmem:[#allocation213_spill] sm:$0xff]  ;;  %v828_v13 = vsel %vm767_vm1, %v826_v59, %v12004_v28  ;;  %v8338_v55 = vmul.f32 %v12005_v20, %v5609_v7  ;;  %v12009_v59 = vld [vmem:[#allocation244_spill] sm:$0xff] }
 0x453   : > { %11990 = vst [vmem:[#allocation302_spill] sm:$0xff] %v8285_v5  ;;  %v639_v63 = vmul.f32 %v11998_v19, %v5665_v42  ;;  %v1164_v19 = vmul.f32 %v7641_v40, %v5978_v57  ;;  %v679_v58 = vmul.f32 %v12002_v6, %v5959_v56  ;;  %v1101_v40 = vadd.f32 %v8215_v51, %v985_v14 }
 0x454   : > { %11995 = vst [vmem:[#allocation303_spill] sm:$0xff] %v8308_v34  ;;  %v741_v18 = vadd.f32 %v737_v48, %v701_v10  ;;  %v12000_v10 = vrot.slane %v8252_v17, 1  ;;  %v12001_v34 = vld [vmem:[#allocation186_spill] sm:$0xff]  ;;  %v12010_v28 = vrot.slane %v12009_v59, 1  ;;  %v8354_v17 = vmul.f32 %v12011_v33, %v11918_v24 }
 0x455   : > { %11996 = vst [vmem:[#allocation304_spill] sm:$0xff] %v8310_v26  ;;  %v1281_v26 = vmul.f32 %v12001_v34, %v5537_v41  ;;  %v643_v6 = vadd.f32 %v639_v63, %v599_v4  ;;  %v1174_v51 = vrot.slane %v1164_v19, 1  ;;  %v12015_v4 = vrot.slane %v8221_v0, 2 }
 0x456   : > { %v1207_v48 = vsel %vm767_vm1, %v12000_v10, %v11999_v3  ;;  %12006 = vst [vmem:[#allocation198_spill] sm:$0xff] %v8338_v55  ;;  %v3471_v3 = vmul.f32 %v7893_v23, %v5665_v42  ;;  %v3469_v10 = vmul.f32 %v7893_v23, %v11918_v24  ;;  %v839_v34 = vadd.f32 %v828_v13, %v741_v18 }
 0x457   : > { %12008 = vst [vmem:[#allocation305_spill] sm:$0xff] %v8347_v47  ;;  %v944_v20 = vsel %vm767_vm1, %v942_v8, %v12010_v28  ;;  %v1058_v42 = vrot.slane %v1048_v50, 1  ;;  %v8363_v13 = vadd.f32 %v8130_v36, %v1507_v31  ;;  %v1217_v63 = vadd.f32 %v1207_v48, %v1101_v40  ;;  %v8378_v31 = vpop.permute.xlu2 %3271  ;;  %v8380_v40 = vpop.permute.xlu1 %3162  ;;  %v12025_v36 = vld [vmem:[#allocation189_spill] sm:$0xff]  ;;  %v12029_v47 = vld [vmem:[#allocation80_spill] sm:$0xff] }
 0x458   : > { %12013 = vst [vmem:[#allocation244_spill] sm:$0xff] %v8358_v45  ;;  %3481 = vrot.lane.b32.xlu2 %v3471_v3, %s11814_s25  ;;  %3477 = vrot.lane.b32.xlu1 %v3469_v10, %s11814_s25  ;;  %v683_v14 = vadd.f32 %v679_v58, %v643_v6  ;;  %v12014_v18 = vrot.slane %v8248_v12, 2  ;;  %v12016_v8 = vrot.slane %v8285_v5, 2  ;;  %v12017_v59 = vrot.slane %v8265_v49, 2  ;;  %v8421_v12 = vpop.permute.xlu0 %3323 }
 0x459   : > { %v1291_v10 = vrot.slane %v1281_v26, 2  ;;  %12018 = vst [vmem:[#allocation253_spill] sm:$0xff] %v8378_v31  ;;  %v955_v6 = vadd.f32 %v944_v20, %v839_v34  ;;  %v667_v58 = vmul.f32 %v11938_v35, %v11918_v24  ;;  %v3576_v48 = vmul.f32 %v8294_v29, %v11930_v30  ;;  %v12023_v34 = vld [vmem:[#allocation220_spill] sm:$0xff] }
 0x45a   : > { %v1556_v50 = vsel %vm1232_vm2, %v12015_v4, %v12014_v18  ;;  %v8375_v3 = vsel %vm1232_vm2, %v12017_v59, %v12016_v8  ;;  %12019 = vst [vmem:[#allocation306_spill] sm:$0xff] %v8380_v40  ;;  %v723_v19 = vadd.f32 %v719_v37, %v683_v14  ;;  %v1407_v28 = vrot.slane %v8354_v17, 2  ;;  %v12021_v8 = vld [vmem:[#allocation223_spill] sm:$0xff] }
 0x45b   : > { %v12020_v26 = vrot.slane %v7902_v15, 1  ;;  %v8395_v59 = vmul.f32 %v12021_v8, %v11930_v30  ;;  %v1334_v37 = vadd.f32 %v8277_v21, %v1217_v63  ;;  %v12024_v20 = vrot.slane %v12023_v34, 1  ;;  %3587 = vrot.lane.b32.xlu0 %v3576_v48, %s11814_s25  ;;  %v12027_v17 = vld [vmem:[#allocation191_spill] sm:$0xff]  ;;  %12032 = vst [vmem:[#allocation189_spill] sm:$0xff] %v8421_v12  ;;  %v12039_v12 = vld [vmem:[#allocation178_spill] sm:$0xff] }
 0x45c   : > { %v627_v31 = vmul.f32 %v12025_v36, %v5537_v41  ;;  %v707_v15 = vmul.f32 %v7983_v16, %v11890_v11  ;;  %v12030_v21 = vld [vmem:[#allocation227_spill] sm:$0xff]  ;;  %v3472_v34 = vmul.f32 %v7893_v23, %v5689_v52  ;;  %v747_v48 = vmul.f32 %v8112_v43, %v5978_v57  ;;  %v12100_v43 = vld [vmem:[#allocation230_spill] sm:$0xff] }
 0x45d   : > { %v1060_v18 = vsel %vm767_vm1, %v1058_v42, %v12020_v26  ;;  %12022 = vst [vmem:[#allocation307_spill] sm:$0xff] %v8395_v59  ;;  %v1176_v14 = vsel %vm767_vm1, %v1174_v51, %v12024_v20  ;;  %v12026_v42 = vrot.slane %v8338_v55, 1  ;;  %v12028_v26 = vrot.slane %v12027_v17, 1  ;;  %v12034_v17 = vld [vmem:[#allocation214_spill] sm:$0xff] }
 0x45e   : > { %v8413_v63 = vmul.f32 %v12030_v21, %v12029_v47  ;;  %v3496_v51 = vmul.f32 %v7950_v44, %v5932_v38  ;;  %v1071_v20 = vadd.f32 %v1060_v18, %v955_v6  ;;  %v671_v5 = vadd.f32 %v667_v58, %v627_v31 }
 0x45f   : > { %v774_v4 = vsel %vm767_vm1, %v12028_v26, %v12026_v42  ;;  %v12033_v42 = vrot.slane %v8358_v45, 1  ;;  %v12035_v26 = vrot.slane %v12034_v17, 1  ;;  %v845_v23 = vmul.f32 %v11942_v9, %v5537_v41 }
 0x460   : > { %12031 = vst [vmem:[#allocation220_spill] sm:$0xff] %v8413_v63  ;;  %v783_v40 = vadd.f32 %v774_v4, %v723_v19  ;;  %v961_v31 = vmul.f32 %v8101_v25, %v11918_v24  ;;  %3505 = vrot.lane.b32.xlu2 %v3496_v51, %s11814_s25  ;;  %3483 = vrot.lane.b32.xlu1 %v3472_v34, %s11814_s25  ;;  %v12036_v19 = vld [vmem:[#allocation199_spill] sm:$0xff]  ;;  %v12038_v4 = vld [vmem:[#allocation258_spill] sm:$0xff]  ;;  %v8446_v51 = vpop.permute.xlu2 %3295  ;;  %v8448_v34 = vpop.permute.xlu1 %3197 }
 0x461   : > { %v890_v21 = vsel %vm767_vm1, %v12035_v26, %v12033_v42  ;;  %v1450_v6 = vadd.f32 %v8304_v39, %v1334_v37  ;;  %v12037_v58 = vrot.slane %v12036_v19, 2  ;;  %v1513_v42 = vmul.f32 %v12038_v4, %v11890_v11  ;;  %12041 = vst [vmem:[#allocation214_spill] sm:$0xff] %v8446_v51  ;;  %v12043_v37 = vld [vmem:[#allocation221_spill] sm:$0xff] }
 0x462   : > { %v711_v17 = vadd.f32 %v707_v15, %v671_v5  ;;  %v1187_v26 = vadd.f32 %v1176_v14, %v1071_v20  ;;  %v8444_v45 = vmul.f32 %v12039_v12, %v5609_v7  ;;  %12042 = vst [vmem:[#allocation199_spill] sm:$0xff] %v8448_v34  ;;  %v8451_v39 = vstv %s8382_s30  ;;  %v12046_v20 = vld [vmem:[#allocation263_spill] sm:$0xff]  ;;  %s9817_s30 = sld [smem:[#allocation2 + $0x57]] }
 0x463   : > { %v1293_v18 = vsel %vm1232_vm2, %v1291_v10, %v12037_v58  ;;  %v899_v10 = vadd.f32 %v890_v21, %v783_v40  ;;  %v8457_v19 = vmul.f32 %v12043_v37, %v5689_v52  ;;  %v3601_v14 = vmul.f32 %v8451_v39, %v6107_v61  ;;  %v12048_v37 = vld [vmem:[#allocation262_spill] sm:$0xff] }
 0x464   : > { %12040 = vst [vmem:[#allocation191_spill] sm:$0xff] %v8444_v45  ;;  %v751_v5 = vadd.f32 %v747_v48, %v711_v17  ;;  %v12045_v15 = vrot.slane %v8395_v59, 1  ;;  %v12047_v58 = vrot.slane %v12046_v20, 1  ;;  %v855_v51 = vrot.slane %v845_v23, 1  ;;  %v12050_v20 = vld [vmem:[#allocation264_spill] sm:$0xff] }
 0x465   : > { %12044 = vst [vmem:[#allocation258_spill] sm:$0xff] %v8457_v19  ;;  %v971_v34 = vrot.slane %v961_v31, 1  ;;  %v1077_v12 = vmul.f32 %v8104_v60, %v11890_v11  ;;  %v1566_v40 = vadd.f32 %v1556_v50, %v1450_v6  ;;  %v1523_v21 = vrot.slane %v1513_v42, 2  ;;  %3611 = vrot.lane.b32.xlu0 %v3601_v14, %s11814_s25  ;;  %v12142_v60 = vld [vmem:[#allocation245_spill] sm:$0xff] }
 0x466   : > { %v1006_v55 = vsel %vm767_vm1, %v12047_v58, %v12045_v15  ;;  %v1629_v8 = vmul.f32 %v12048_v37, %v5978_v57  ;;  %v1193_v48 = vmul.f32 %v8195_v46, %v5978_v57  ;;  %v12049_v17 = vrot.slane %v8413_v63, 1  ;;  %v8486_v63 = vpop.permute.xlu0 %3347 }
 0x467   : > { %v12051_v59 = vrot.slane %v12050_v20, 1  ;;  %v12052_v31 = vrot.slane %v11886_v1, 1  ;;  %v3521_v50 = vmul.f32 %v8137_v2, %v11890_v11  ;;  %v3497_v6 = vmul.f32 %v7950_v44, %v5959_v56  ;;  %12053 = vst [vmem:[#allocation263_spill] sm:$0xff] %v8486_v63 }
 0x468   : > { %v1304_v42 = vadd.f32 %v1293_v18, %v1187_v26  ;;  %v1015_v58 = vadd.f32 %v1006_v55, %v899_v10  ;;  %v11415_v14 = vrot.slane %v8444_v45, 2  ;;  %v12054_v20 = vrot.slane %v7684_v54, 2  ;;  %v12056_v55 = vld [vmem:[#allocation25_spill] sm:$0xff]  ;;  %v12083_v45 = vld [vmem:[#allocation219_spill] sm:$0xff] }
 0x469   : > { %v1122_v23 = vsel %vm767_vm1, %v12051_v59, %v12049_v17  ;;  %v857_v15 = vsel %vm767_vm1, %v855_v51, %v12052_v31  ;;  %v11416_v1 = vrot.slane %v8457_v19, 2  ;;  %v12055_v51 = vrot.slane %v8143_v32, 1  ;;  %3529 = vrot.lane.b32.xlu2 %v3521_v50, %s11814_s25  ;;  %3507 = vrot.lane.b32.xlu1 %v3497_v6, %s11814_s25  ;;  %v12082_v19 = vld [vmem:[#allocation290_spill] sm:$0xff] }
 0x46a   : > { %v868_v27 = vadd.f32 %v857_v15, %v751_v5  ;;  %v1409_v59 = vsel %vm1232_vm2, %v1407_v28, %v12054_v20  ;;  %v1087_v31 = vrot.slane %v1077_v12, 1  ;;  %v8501_v44 = vadd.f32 %v12056_v55, %v8363_v13  ;;  %v12058_v28 = vld [vmem:[#allocation235_spill] sm:$0xff]  ;;  %v8511_v5 = vpop.permute.xlu2 %3301  ;;  %v8513_v15 = vpop.permute.xlu1 %3232 }
 0x46b   : > { %v973_v17 = vsel %vm767_vm1, %v971_v34, %v12055_v51  ;;  %v1131_v54 = vadd.f32 %v1122_v23, %v1015_v58  ;;  %v8505_v18 = vmul.f32 %v12058_v28, %v11930_v30  ;;  %v1203_v26 = vrot.slane %v1193_v48, 1  ;;  %12061 = vst [vmem:[#allocation25_spill] sm:$0xff] %v8511_v5  ;;  %v12063_v23 = vld [vmem:[#allocation192_spill] sm:$0xff]  ;;  %v12070_v51 = vld [vmem:[#allocation286_spill] sm:$0xff] }
 0x46c   : > { %12057 = vst [vmem:[#allocation262_spill] sm:$0xff] %v8501_v44  ;;  %v1682_v32 = vadd.f32 %v8375_v3, %v1566_v40  ;;  %v12060_v12 = vrot.slane %v7980_v53, 2  ;;  %v1639_v10 = vrot.slane %v1629_v8, 2  ;;  %v8516_v50 = vstv %s8453_s1  ;;  %v12065_v3 = vld [vmem:[#allocation240_spill] sm:$0xff]  ;;  %s9980_s1 = sld [smem:[#allocation2 + $0x5b]] }
 0x46d   : > { %12059 = vst [vmem:[#allocation264_spill] sm:$0xff] %v8505_v18  ;;  %v1420_v13 = vadd.f32 %v1409_v59, %v1304_v42  ;;  %v12064_v6 = vrot.slane %v12063_v23, 2  ;;  %v984_v58 = vadd.f32 %v973_v17, %v868_v27  ;;  %v3626_v53 = vmul.f32 %v8516_v50, %v6068_v22  ;;  %v12069_v42 = vld [vmem:[#allocation287_spill] sm:$0xff]  ;;  %v12072_v23 = vld [vmem:[#allocation232_spill] sm:$0xff] }
 0x46e   : > { %v1525_v34 = vsel %vm1232_vm2, %v1523_v21, %v12060_v12  ;;  %12062 = vst [vmem:[#allocation308_spill] sm:$0xff] %v8513_v15  ;;  %v12066_v8 = vrot.slane %v12065_v3, 2  ;;  %v12067_v21 = vld [vmem:[#allocation241_spill] sm:$0xff]  ;;  %v1426_v59 = vmul.f32 %v12069_v42, %v11918_v24  ;;  %v12071_v55 = vrot.slane %v12070_v51, 1  ;;  %v12073_v3 = vld [vmem:[#allocation299_spill] sm:$0xff]  ;;  %v12076_v51 = vld [vmem:[#allocation202_spill] sm:$0xff]  ;;  %v8560_v15 = vpop.permute.xlu0 %3353 }
 0x46f   : > { %v1239_v48 = vsel %vm1232_vm2, %v12064_v6, %v11415_v14  ;;  %v8532_v20 = vmul.f32 %v12067_v21, %v12029_v47  ;;  %v1310_v6 = vmul.f32 %v12072_v23, %v5537_v41  ;;  %v12074_v14 = vrot.slane %v12073_v3, 1  ;;  %3635 = vrot.lane.b32.xlu0 %v3626_v53, %s11814_s25  ;;  %12081 = vst [vmem:[#allocation286_spill] sm:$0xff] %v8560_v15 }
 0x470   : > { %v1355_v40 = vsel %vm1232_vm2, %v12066_v8, %v11416_v1  ;;  %v1089_v27 = vsel %vm767_vm1, %v1087_v31, %v12071_v55  ;;  %v1248_v17 = vadd.f32 %v1239_v48, %v1131_v54  ;;  %v12075_v1 = vld [vmem:[#allocation183_spill] sm:$0xff]  ;;  %v650_v63 = vmul.f32 %v12076_v51, %v5689_v52  ;;  %v12077_v48 = vld [vmem:[#allocation26_spill] sm:$0xff] }
 0x471   : > { %12068 = vst [vmem:[#allocation192_spill] sm:$0xff] %v8532_v20  ;;  %v1205_v8 = vsel %vm767_vm1, %v1203_v26, %v12074_v14  ;;  %v610_v5 = vmul.f32 %v12075_v1, %v5609_v7  ;;  %v3524_v31 = vmul.f32 %v8137_v2, %v11930_v30  ;;  %v3522_v54 = vmul.f32 %v8137_v2, %v5932_v38  ;;  %v12079_v14 = vld [vmem:[#allocation279_spill] sm:$0xff] }
 0x472   : > { %v8555_v55 = vadd.f32 %v12077_v48, %v1682_v32  ;;  %v1536_v3 = vadd.f32 %v1525_v34, %v1420_v13  ;;  %v12080_v26 = vrot.slane %v12079_v14, 2  ;;  %v1100_v12 = vadd.f32 %v1089_v27, %v984_v58  ;;  %v12086_v58 = vld [vmem:[#allocation180_spill] sm:$0xff]  ;;  %v12088_v48 = vld [vmem:[#allocation267_spill] sm:$0xff]  ;;  %v8581_v62 = vpop.permute.xlu2 %3325 }
 0x473   : > { %v1436_v44 = vrot.slane %v1426_v59, 2  ;;  %v1542_v21 = vmul.f32 %v12082_v19, %v11890_v11  ;;  %v690_v28 = vmul.f32 %v12083_v45, %v11930_v30  ;;  %3535 = vrot.lane.b32.xlu2 %v3524_v31, %s11814_s25  ;;  %3531 = vrot.lane.b32.xlu1 %v3522_v54, %s11814_s25  ;;  %v8569_v2 = vstv %s8497_s10  ;;  %v12090_v31 = vld [vmem:[#allocation224_spill] sm:$0xff]  ;;  %12091 = vst [vmem:[#allocation183_spill] sm:$0xff] %v8581_v62  ;;  %s10055_s10 = sld [smem:[#allocation2 + $0x5f]] }
 0x474   : > { %12078 = vst [vmem:[#allocation240_spill] sm:$0xff] %v8555_v55  ;;  %v1641_v53 = vsel %vm1232_vm2, %v1639_v10, %v12080_v26  ;;  %v1364_v32 = vadd.f32 %v1355_v40, %v1248_v17  ;;  %v1320_v34 = vrot.slane %v1310_v6, 2  ;;  %v1216_v13 = vadd.f32 %v1205_v8, %v1100_v12  ;;  %v12085_v10 = vld [vmem:[#allocation15_spill] sm:$0xff]  ;;  %v8583_v40 = vpop.permute.xlu1 %3238  ;;  %v12093_v17 = vld [vmem:[#allocation288_spill] sm:$0xff] }
 0x475   : > { %12084 = vst [vmem:[#allocation299_spill] sm:$0xff] %v8569_v2  ;;  %v791_v27 = vmul.f32 %v12086_v58, %v12085_v10  ;;  %v12087_v59 = vrot.slane %v8505_v18, 2  ;;  %v12089_v14 = vrot.slane %v12088_v48, 2  ;;  %v654_v55 = vadd.f32 %v650_v63, %v610_v5  ;;  %v12095_v48 = vld [vmem:[#allocation23_spill] sm:$0xff]  ;;  %v12097_v5 = vld [vmem:[#allocation212_spill] sm:$0xff] }
 0x476   : > { %v730_v54 = vmul.f32 %v12090_v31, %v12029_v47  ;;  %12092 = vst [vmem:[#allocation202_spill] sm:$0xff] %v8583_v40  ;;  %v12094_v12 = vrot.slane %v12093_v17, 2  ;;  %v8590_v8 = vmul.f32 %v12086_v58, %v5609_v7  ;;  %v3651_v63 = vmul.f32 %v8569_v2, %v5978_v57  ;;  %v12099_v40 = vld [vmem:[#allocation297_spill] sm:$0xff] }
 0x477   : > { %v1471_v26 = vsel %vm1232_vm2, %v12089_v14, %v12087_v59  ;;  %v12096_v59 = vld [vmem:[#allocation226_spill] sm:$0xff]  ;;  %v12098_v15 = vrot.slane %v12097_v5, 2  ;;  %v1552_v18 = vrot.slane %v1542_v21, 2  ;;  %v1658_v17 = vmul.f32 %v12099_v40, %v5978_v57  ;;  %v12107_v40 = vld [vmem:[#allocation181_spill] sm:$0xff] }
 0x478   : > { %v1322_v6 = vsel %vm1232_vm2, %v1320_v34, %v12094_v12  ;;  %v907_v14 = vmul.f32 %v12096_v59, %v12095_v48  ;;  %v694_v24 = vadd.f32 %v690_v28, %v654_v55  ;;  %v1480_v34 = vadd.f32 %v1471_v26, %v1364_v32  ;;  %3659 = vrot.lane.b32.xlu0 %v3651_v63, %s11814_s25  ;;  %v12103_v55 = vld [vmem:[#allocation273_spill] sm:$0xff]  ;;  %v8622_v63 = vpop.permute.xlu0 %3377 }
 0x479   : > { %v1438_v62 = vsel %vm1232_vm2, %v1436_v44, %v12098_v15  ;;  %v1333_v12 = vadd.f32 %v1322_v6, %v1216_v13  ;;  %v804_v46 = vrot.slane %v791_v27, 1  ;;  %v8603_v58 = vmul.f32 %v12096_v59, %v5689_v52  ;;  %v12101_v44 = vld [vmem:[#allocation296_spill] sm:$0xff]  ;;  %v12105_v6 = vld [vmem:[#allocation51_spill] sm:$0xff]  ;;  %12106 = vst [vmem:[#allocation26_spill] sm:$0xff] %v8622_v63 }
 0x47a   : > { %v8608_v19 = vmul.f32 %v12100_v43, %v11930_v30  ;;  %v734_v5 = vadd.f32 %v730_v54, %v694_v24  ;;  %v3549_v15 = vmul.f32 %v12101_v44, %v5959_v56  ;;  %v3547_v28 = vmul.f32 %v12101_v44, %v11890_v11 }
 0x47b   : > { %v12102_v21 = vrot.slane %v8532_v20, 2  ;;  %v12104_v32 = vrot.slane %v12103_v55, 2  ;;  %v11428_v27 = vrot.slane %v8590_v8, 1  ;;  %v920_v26 = vrot.slane %v907_v14, 1  ;;  %v8642_v20 = vpop.permute.xlu2 %3349 }
 0x47c   : > { %v1023_v59 = vmul.f32 %v12100_v43, %v12105_v6  ;;  %v1652_v24 = vadd.f32 %v1641_v53, %v1536_v3  ;;  %v1668_v54 = vrot.slane %v1658_v17, 2  ;;  %v8626_v42 = vmul.f32 %v12107_v40, %v5609_v7  ;;  %3559 = vrot.lane.b32.xlu2 %v3549_v15, %s11814_s25  ;;  %3555 = vrot.lane.b32.xlu1 %v3547_v28, %s11814_s25  ;;  %v12108_v3 = vld [vmem:[#allocation93_spill] sm:$0xff]  ;;  %v12109_v53 = vld [vmem:[#allocation243_spill] sm:$0xff]  ;;  %v12113_v28 = vld [vmem:[#allocation242_spill] sm:$0xff] }
 0x47d   : > { %v1587_v13 = vsel %vm1232_vm2, %v12104_v32, %v12102_v21  ;;  %v1256_v11 = vmul.f32 %v12107_v40, %v12085_v10  ;;  %v1449_v21 = vadd.f32 %v1438_v62, %v1333_v12  ;;  %v805_v43 = vsel %vm767_vm1, %v11428_v27, %v804_v46  ;;  %12111 = vst [vmem:[#allocation279_spill] sm:$0xff] %v8642_v20  ;;  %v8644_v62 = vpop.permute.xlu1 %3273 }
 0x47e   : > { %v11427_v14 = vrot.slane %v8603_v58, 1  ;;  %v1139_v17 = vmul.f32 %v12109_v53, %v12108_v3  ;;  %v1596_v55 = vadd.f32 %v1587_v13, %v1480_v34  ;;  %v12110_v32 = vrot.slane %v8221_v0, 2  ;;  %12112 = vst [vmem:[#allocation219_spill] sm:$0xff] %v8644_v62  ;;  %v12121_v62 = vld [vmem:[#allocation30_spill] sm:$0xff] }
 0x47f   : > { %v813_v15 = vadd.f32 %v805_v43, %v734_v5  ;;  %v1036_v12 = vrot.slane %v1023_v59, 1  ;;  %v8653_v34 = vmul.f32 %v12109_v53, %v12029_v47  ;;  %v3654_v0 = vmul.f32 %v8569_v2, %v12029_v47  ;;  %v12114_v43 = vld [vmem:[#allocation249_spill] sm:$0xff] }
 0x480   : > { %v1554_v63 = vsel %vm1232_vm2, %v1552_v18, %v12110_v32  ;;  %v921_v46 = vsel %vm767_vm1, %v11427_v14, %v920_v26  ;;  %v1269_v5 = vrot.slane %v1256_v11, 2  ;;  %v8662_v13 = vmul.f32 %v12113_v28, %v5689_v52  ;;  %v12115_v11 = vld [vmem:[#allocation256_spill] sm:$0xff] }
 0x481   : > { %v1372_v26 = vmul.f32 %v12113_v28, %v12095_v48  ;;  %v1565_v59 = vadd.f32 %v1554_v63, %v1449_v21  ;;  %v8668_v53 = vmul.f32 %v12114_v43, %v11930_v30  ;;  %v1488_v32 = vmul.f32 %v12114_v43, %v12105_v6  ;;  %3665 = vrot.lane.b32.xlu0 %v3654_v0, %s11814_s25  ;;  %v12116_v21 = vld [vmem:[#allocation28_spill] sm:$0xff]  ;;  %v8691_v43 = vpop.permute.xlu0 %3401 }
 0x482   : > { %v1152_v14 = vrot.slane %v1139_v17, 1  ;;  %v929_v27 = vadd.f32 %v921_v46, %v813_v15  ;;  %v8675_v18 = vmul.f32 %v12115_v11, %v12029_v47  ;;  %v3574_v40 = vmul.f32 %v8294_v29, %v5932_v38  ;;  %12120 = vst [vmem:[#allocation267_spill] sm:$0xff] %v8691_v43 }
 0x483   : > { %v3550_v63 = vmul.f32 %v12101_v44, %v11930_v30  ;;  %v8682_v28 = vadd.f32 %v12116_v21, %v1652_v24  ;;  %v12118_v20 = vrot.slane %v8265_v49, 2  ;;  %v12119_v0 = vrot.slane %v8608_v19, 1 }
 0x484   : > { %v11431_v46 = vrot.slane %v8653_v34, 1  ;;  %v8694_v38 = vadd.f32 %v12121_v62, %v1596_v55  ;;  %v12123_v44 = vrot.slane %v8626_v42, 2  ;;  %3583 = vrot.lane.b32.xlu2 %v3574_v40, %s11814_s25  ;;  %v1501_v21 = vrot.slane %v1488_v32, 2  ;;  %v12129_v32 = vld [vmem:[#allocation207_spill] sm:$0xff] }
 0x485   : > { %12117 = vst [vmem:[#allocation180_spill] sm:$0xff] %v8682_v28  ;;  %v1670_v17 = vsel %vm1232_vm2, %v1668_v54, %v12118_v20  ;;  %v1037_v15 = vsel %vm767_vm1, %v12119_v0, %v1036_v12  ;;  %v1604_v20 = vmul.f32 %v12115_v11, %v12108_v3  ;;  %3561 = vrot.lane.b32.xlu1 %v3550_v63, %s11814_s25  ;;  %v1385_v54 = vrot.slane %v1372_v26, 2  ;;  %v8713_v11 = vpop.permute.xlu1 %3297  ;;  %v12128_v26 = vld [vmem:[#allocation184_spill] sm:$0xff]  ;;  %v12132_v0 = vld [vmem:[#allocation13_spill] sm:$0xff]  ;;  %v12135_v28 = vld [vmem:[#allocation239_spill] sm:$0xff] }
 0x486   : > { %12122 = vst [vmem:[#allocation224_spill] sm:$0xff] %v8694_v38  ;;  %v1270_v24 = vsel %vm1232_vm2, %v12123_v44, %v1269_v5  ;;  %v1153_v55 = vsel %vm767_vm1, %v11431_v46, %v1152_v14  ;;  %v8708_v62 = vadd.f32 %v1670_v17, %v1565_v59  ;;  %v1045_v5 = vadd.f32 %v1037_v15, %v929_v27  ;;  %v8711_v44 = vpop.permute.xlu2 %3373  ;;  %v12131_v15 = vld [vmem:[#allocation185_spill] sm:$0xff] }
 0x487   : > { %12125 = vst [vmem:[#allocation226_spill] sm:$0xff] %v8711_v44  ;;  %v8716_v40 = vstv %s8646_s11  ;;  %v620_v63 = vmul.f32 %v12128_v26, %v5609_v7  ;;  %v660_v12 = vmul.f32 %v12129_v32, %v5689_v52  ;;  %v8725_v59 = vstv %s8657_s12  ;;  %v12134_v44 = vld [vmem:[#allocation225_spill] sm:$0xff]  ;;  %s10097_s11 = sld [smem:[#allocation2 + $0x80]] }
 0x488   : > { %12124 = vst [vmem:[#allocation288_spill] sm:$0xff] %v8708_v62  ;;  %v3679_v14 = vmul.f32 %v8716_v40, %v6107_v61  ;;  %v1161_v27 = vadd.f32 %v1153_v55, %v1045_v5  ;;  %v1617_v17 = vrot.slane %v1604_v20, 2  ;;  %v820_v46 = vmul.f32 %v12131_v15, %v12085_v10  ;;  %v12137_v55 = vld [vmem:[#allocation246_spill] sm:$0xff]  ;;  %s5193_s12 = sld [smem:[#allocation2 + $0x84]] }
 0x489   : > { %12126 = vst [vmem:[#allocation212_spill] sm:$0xff] %v8713_v11  ;;  %v8733_v49 = vmul.f32 %v8725_v59, %v12132_v0  ;;  %v700_v43 = vmul.f32 %v12134_v44, %v11930_v30  ;;  %v8739_v11 = vmul.f32 %v12131_v15, %v5609_v7  ;;  %v8743_v38 = vmul.f32 %v12135_v28, %v5689_v52  ;;  %v12138_v44 = vld [vmem:[#allocation12_spill] sm:$0xff]  ;;  %v8768_v16 = vpop.permute.xlu0 %3425 }
 0x48a   : > { %12127 = vst [vmem:[#allocation230_spill] sm:$0xff] %v8716_v40  ;;  %v936_v20 = vmul.f32 %v12135_v28, %v12095_v48  ;;  %3689 = vrot.lane.b32.xlu0 %v3679_v14, %s11814_s25  ;;  %v8750_v5 = vmul.f32 %v12137_v55, %v11930_v30  ;;  %v3599_v62 = vmul.f32 %v8451_v39, %v5978_v57  ;;  %v12140_v26 = vrot.slane %v8662_v13, 2 }
 0x48b   : > { %12130 = vst [vmem:[#allocation296_spill] sm:$0xff] %v8725_v59  ;;  %v3575_v15 = vmul.f32 %v8294_v29, %v5959_v56  ;;  %v8758_v32 = vmul.f32 %v8725_v59, %v12138_v44  ;;  %v12141_v14 = vrot.slane %v8668_v53, 2  ;;  %v664_v23 = vadd.f32 %v660_v12, %v620_v63 }
 0x48c   : > { %12133 = vst [vmem:[#allocation273_spill] sm:$0xff] %v8733_v49  ;;  %v1386_v28 = vsel %vm1232_vm2, %v12140_v26, %v1385_v54  ;;  %v740_v2 = vmul.f32 %v12142_v60, %v12029_v47  ;;  %v1278_v35 = vadd.f32 %v1270_v24, %v1161_v27  ;;  %v12144_v29 = vrot.slane %v8675_v18, 2  ;;  %3607 = vrot.lane.b32.xlu2 %v3599_v62, %s11814_s25  ;;  %v12145_v24 = vld [vmem:[#allocation186_spill] sm:$0xff] }
 0x48d   : > { %12136 = vst [vmem:[#allocation51_spill] sm:$0xff] %v8743_v38  ;;  %v1502_v40 = vsel %vm1232_vm2, %v12141_v14, %v1501_v21  ;;  %v833_v25 = vrot.slane %v820_v46, 1  ;;  %3585 = vrot.lane.b32.xlu1 %v3575_v15, %s11814_s25  ;;  %v11447_v54 = vrot.slane %v8733_v49, 1  ;;  %v704_v12 = vadd.f32 %v700_v43, %v664_v23  ;;  %v8789_v15 = vpop.permute.xlu1 %3321 }
 0x48e   : > { %12139 = vst [vmem:[#allocation181_spill] sm:$0xff] %v8758_v32  ;;  %v8773_v59 = vsel %vm1232_vm2, %v12144_v29, %v1617_v17  ;;  %v949_v21 = vrot.slane %v936_v20, 1  ;;  %v1052_v26 = vmul.f32 %v12137_v55, %v12105_v6  ;;  %v8782_v63 = vmul.f32 %v12145_v24, %v5609_v7  ;;  %v8787_v17 = vpop.permute.xlu2 %3379 }
 0x48f   : > { %12143 = vst [vmem:[#allocation243_spill] sm:$0xff] %v8768_v16  ;;  %v11445_v27 = vrot.slane %v8739_v11, 1  ;;  %v11446_v23 = vrot.slane %v8758_v32, 1  ;;  %v1285_v43 = vmul.f32 %v12145_v24, %v12085_v10  ;;  %v8796_v20 = vmul.f32 %v12011_v33, %v5689_v52 }
 0x490   : > { %12146 = vst [vmem:[#allocation242_spill] sm:$0xff] %v8787_v17  ;;  %v744_v55 = vadd.f32 %v740_v2, %v704_v12  ;;  %v8799_v14 = vstv %s8727_s14  ;;  %v1394_v29 = vadd.f32 %v1386_v28, %v1278_v35  ;;  %v12148_v16 = vrot.slane %v8743_v38, 1  ;;  %v12149_v28 = vld [vmem:[#allocation250_spill] sm:$0xff]  ;;  %s5194_s14 = sld [smem:[#allocation2 + $0x88]] }
 0x491   : > { %12147 = vst [vmem:[#allocation249_spill] sm:$0xff] %v8789_v15  ;;  %v834_v62 = vsel %vm767_vm1, %v11445_v27, %v833_v25  ;;  %v3717_v46 = vsel %vm767_vm1, %v11446_v23, %v11447_v54  ;;  %v8811_v24 = vmul.f32 %v8799_v14, %v12138_v44  ;;  %v1065_v12 = vrot.slane %v1052_v26, 1  ;;  %v12153_v26 = vld [vmem:[#allocation16_spill] sm:$0xff] }
 0x492   : > { %v950_v2 = vsel %vm767_vm1, %v12148_v16, %v949_v21  ;;  %v1401_v25 = vmul.f32 %v12011_v33, %v12095_v48  ;;  %3724 = vrot.lane.b32.xlu0 %v3717_v46, %s11814_s25  ;;  %v1168_v27 = vmul.f32 %v12149_v28, %v12108_v3  ;;  %v3602_v23 = vmul.f32 %v8451_v39, %v12029_v47  ;;  %v8831_v46 = vpop.permute.xlu0 %3431 }
 0x493   : > { %v3600_v54 = vmul.f32 %v8451_v39, %v6068_v22  ;;  %v3740_v16 = vmul.f32 %v8799_v14, %v5537_v41  ;;  %v1298_v21 = vrot.slane %v1285_v43, 2  ;;  %v1517_v33 = vmul.f32 %v12038_v4, %v12105_v6  ;;  %12150 = vst [vmem:[#allocation256_spill] sm:$0xff] %v8831_v46 }
 0x494   : > { %v842_v35 = vadd.f32 %v834_v62, %v744_v55  ;;  %v8835_v15 = vmul.f32 %v12038_v4, %v11930_v30  ;;  %v8839_v17 = vmul.f32 %v12149_v28, %v12029_v47  ;;  %v1633_v39 = vmul.f32 %v12048_v37, %v12108_v3  ;;  %3613 = vrot.lane.b32.xlu2 %v3602_v23, %s11814_s25 }
 0x495   : > { %3609 = vrot.lane.b32.xlu1 %v3600_v54, %s11814_s25  ;;  %v1510_v62 = vadd.f32 %v1502_v40, %v1394_v29  ;;  %v8848_v55 = vmul.f32 %v12048_v37, %v12029_v47  ;;  %v609_v4 = vmul.f32 %v12075_v1, %v12132_v0  ;;  %v649_v28 = vmul.f32 %v12076_v51, %v12153_v26  ;;  %v8859_v43 = vpop.permute.xlu1 %3327 }
 0x496   : > { %12151 = vst [vmem:[#allocation28_spill] sm:$0xff] %v8835_v15  ;;  %v12154_v46 = vrot.slane %v8750_v5, 1  ;;  %v1414_v23 = vrot.slane %v1401_v25, 2  ;;  %v1181_v49 = vrot.slane %v1168_v27, 1  ;;  %v8857_v54 = vpop.permute.xlu2 %3403  ;;  %v3750_v40 = vrot.slane %v3740_v16, 1 }
 0x497   : > { %12152 = vst [vmem:[#allocation30_spill] sm:$0xff] %v8848_v55  ;;  %v12157_v37 = vrot.slane %v8782_v63, 2  ;;  %v1530_v38 = vrot.slane %v1517_v33, 2  ;;  %v958_v1 = vadd.f32 %v950_v2, %v842_v35  ;;  %v689_v51 = vmul.f32 %v12083_v45, %v5959_v56 }
 0x498   : > { %v1066_v32 = vsel %vm767_vm1, %v12154_v46, %v1065_v12  ;;  %12155 = vst [vmem:[#allocation185_spill] sm:$0xff] %v8857_v54  ;;  %v11451_v12 = vrot.slane %v8839_v17, 1  ;;  %v1646_v25 = vrot.slane %v1633_v39, 2  ;;  %v12158_v27 = vrot.slane %v8811_v24, 1 }
 0x499   : > { %12156 = vst [vmem:[#allocation239_spill] sm:$0xff] %v8859_v43  ;;  %v1299_v29 = vsel %vm1232_vm2, %v12157_v37, %v1298_v21  ;;  %v3744_v16 = vmul.f32 %v8799_v14, %v12085_v10  ;;  %v11453_v43 = vrot.slane %v8835_v15, 2  ;;  %v11452_v21 = vrot.slane %v8848_v55, 2  ;;  %v12225_v15 = vld [vmem:[#allocation19_spill] sm:$0xff] }
 0x49a   : > { %v3752_v46 = vsel %vm767_vm1, %v3750_v40, %v12158_v27  ;;  %v653_v2 = vadd.f32 %v649_v28, %v609_v4  ;;  %v729_v45 = vmul.f32 %v12090_v31, %v6107_v61  ;;  %v1182_v35 = vsel %vm767_vm1, %v11451_v12, %v1181_v49  ;;  %v8896_v49 = vpop.permute.xlu0 %3455 }
 0x49b   : > { %3759 = vrot.lane.b32.xlu0 %v3752_v46, %s11814_s25  ;;  %v3627_v33 = vmul.f32 %v8516_v50, %v6107_v61  ;;  %v3625_v39 = vmul.f32 %v8516_v50, %v5978_v57  ;;  %v8888_v40 = vmul.f32 %v8799_v14, %v5609_v7  ;;  %v8891_v4 = vadd.f32 %v8773_v59, %v1510_v62  ;;  %v12165_v62 = vld [vmem:[#allocation193_spill] sm:$0xff] }
 0x49c   : > { %v12160_v31 = vrot.slane %v8796_v20, 2  ;;  %v1074_v37 = vadd.f32 %v1066_v32, %v958_v1  ;;  %v693_v27 = vadd.f32 %v689_v51, %v653_v2  ;;  %12161 = vst [vmem:[#allocation245_spill] sm:$0xff] %v8896_v49  ;;  %v8901_v46 = vsel %vm1232_vm2, %v11453_v43, %v1530_v38  ;;  %v12168_v51 = vld [vmem:[#allocation234_spill] sm:$0xff] }
 0x49d   : > { %12159 = vst [vmem:[#allocation246_spill] sm:$0xff] %v8891_v4  ;;  %v8906_v12 = vsel %vm1232_vm2, %v11452_v21, %v1646_v25  ;;  %v12164_v59 = vrot.slane %v8590_v8, 1  ;;  %v12166_v54 = vrot.slane %v12165_v62, 1  ;;  %3637 = vrot.lane.b32.xlu2 %v3627_v33, %s11814_s25  ;;  %3633 = vrot.lane.b32.xlu1 %v3625_v39, %s11814_s25  ;;  %v3757_v32 = vrot.slane %v3744_v16, 1  ;;  %v12171_v8 = vld [vmem:[#allocation195_spill] sm:$0xff] }
 0x49e   : > { %v1415_v28 = vsel %vm1232_vm2, %v12160_v31, %v1414_v23  ;;  %12162 = vst [vmem:[#allocation186_spill] sm:$0xff] %v8901_v46  ;;  %v1190_v1 = vadd.f32 %v1182_v35, %v1074_v37  ;;  %v12167_v38 = vrot.slane %v8603_v58, 1  ;;  %v12169_v2 = vrot.slane %v12168_v51, 1  ;;  %v12177_v35 = vld [vmem:[#allocation265_spill] sm:$0xff]  ;;  %v8941_v51 = vpop.permute.xlu2 %3427 }
 0x49f   : > { %12163 = vst [vmem:[#allocation250_spill] sm:$0xff] %v8906_v12  ;;  %v803_v23 = vsel %vm767_vm1, %v12166_v54, %v12164_v59  ;;  %v12170_v31 = vrot.slane %v8626_v42, 2  ;;  %v12172_v21 = vrot.slane %v12171_v8, 2  ;;  %v733_v54 = vadd.f32 %v729_v45, %v693_v27  ;;  %v12174_v59 = vld [vmem:[#allocation255_spill] sm:$0xff]  ;;  %v12182_v27 = vld [vmem:[#allocation268_spill] sm:$0xff] }
 0x4a0   : > { %v919_v25 = vsel %vm767_vm1, %v12169_v2, %v12167_v38  ;;  %v12173_v33 = vrot.slane %v8662_v13, 2  ;;  %v12175_v39 = vrot.slane %v12174_v59, 2  ;;  %v12176_v58 = vrot.slane %v8608_v19, 1  ;;  %12179 = vst [vmem:[#allocation193_spill] sm:$0xff] %v8941_v51  ;;  %v12184_v8 = vld [vmem:[#allocation280_spill] sm:$0xff] }
 0x4a1   : > { %v8925_v62 = vsel %vm1232_vm2, %v12172_v21, %v12170_v31  ;;  %v12178_v37 = vrot.slane %v12177_v35, 1  ;;  %v849_v42 = vmul.f32 %v11942_v9, %v12085_v10  ;;  %v8943_v21 = vpop.permute.xlu1 %3351  ;;  %v11454_v13 = vrot.slane %v8888_v40, 1 }
 0x4a2   : > { %v8932_v16 = vsel %vm1232_vm2, %v12175_v39, %v12173_v33  ;;  %12180 = vst [vmem:[#allocation234_spill] sm:$0xff] %v8943_v21  ;;  %v12181_v45 = vrot.slane %v8653_v34, 1  ;;  %v12183_v2 = vrot.slane %v12182_v27, 1  ;;  %v630_v19 = vmul.f32 %v12025_v36, %v5609_v7  ;;  %v12185_v39 = vld [vmem:[#allocation228_spill] sm:$0xff]  ;;  %v12188_v21 = vld [vmem:[#allocation299_spill] sm:$0xff]  ;;  %v9006_v46 = vpop.permute.xlu0 %3479 }
 0x4a3   : > { %v1035_v38 = vsel %vm767_vm1, %v12178_v37, %v12176_v58  ;;  %v965_v33 = vmul.f32 %v12184_v8, %v12095_v48  ;;  %v8956_v59 = vstv %s8866_s15  ;;  %v670_v58 = vmul.f32 %v12185_v39, %v5689_v52  ;;  %12199 = vst [vmem:[#allocation280_spill] sm:$0xff] %v9006_v46  ;;  %s5195_s15 = sld [smem:[#allocation2 + $0x8c]] }
 0x4a4   : > { %v1151_v31 = vsel %vm767_vm1, %v12183_v2, %v12181_v45  ;;  %v8964_v34 = vmul.f32 %v11942_v9, %v5609_v7  ;;  %v3758_v35 = vsel %vm767_vm1, %v11454_v13, %v3757_v32  ;;  %v8971_v37 = vmul.f32 %v8956_v59, %v5609_v7  ;;  %v12187_v2 = vld [vmem:[#allocation254_spill] sm:$0xff] }
 0x4a5   : > { %v1307_v45 = vadd.f32 %v1299_v29, %v1190_v1  ;;  %v812_v27 = vadd.f32 %v803_v23, %v733_v54  ;;  %v710_v43 = vmul.f32 %v12187_v2, %v11930_v30  ;;  %v8977_v49 = vmul.f32 %v12184_v8, %v5689_v52  ;;  %3765 = vrot.lane.b32.xlu0 %v3758_v35, %s11814_s25  ;;  %v12191_v1 = vld [vmem:[#allocation271_spill] sm:$0xff] }
 0x4a6   : > { %12186 = vst [vmem:[#allocation195_spill] sm:$0xff] %v8971_v37  ;;  %v862_v9 = vrot.slane %v849_v42, 1  ;;  %v3652_v51 = vmul.f32 %v12188_v21, %v6068_v22  ;;  %v3628_v32 = vmul.f32 %v8516_v50, %v12029_v47  ;;  %v8986_v29 = vmul.f32 %v8956_v59, %v12132_v0  ;;  %v12195_v42 = vld [vmem:[#allocation274_spill] sm:$0xff]  ;;  %v12198_v50 = vld [vmem:[#allocation281_spill] sm:$0xff] }
 0x4a7   : > { %v12190_v23 = vrot.slane %v8668_v53, 2  ;;  %v12192_v54 = vrot.slane %v12191_v1, 2  ;;  %v12194_v35 = vrot.slane %v8675_v18, 2  ;;  %v12196_v13 = vrot.slane %v12195_v42, 2 }
 0x4a8   : > { %12189 = vst [vmem:[#allocation255_spill] sm:$0xff] %v8986_v29  ;;  %v978_v12 = vrot.slane %v965_v33, 1  ;;  %v9004_v55 = vmul.f32 %v12198_v50, %v11930_v30  ;;  %v674_v53 = vadd.f32 %v670_v58, %v630_v19  ;;  %v11456_v1 = vrot.slane %v8964_v34, 1  ;;  %3661 = vrot.lane.b32.xlu2 %v3652_v51, %s11814_s25  ;;  %3639 = vrot.lane.b32.xlu1 %v3628_v32, %s11814_s25  ;;  %v12201_v19 = vld [vmem:[#allocation287_spill] sm:$0xff]  ;;  %v9028_v32 = vpop.permute.xlu2 %3451 }
 0x4a9   : > { %v8993_v8 = vsel %vm1232_vm2, %v12192_v54, %v12190_v23  ;;  %v9000_v4 = vsel %vm1232_vm2, %v12196_v13, %v12194_v35  ;;  %v1081_v23 = vmul.f32 %v12198_v50, %v12105_v6  ;;  %v928_v13 = vadd.f32 %v919_v25, %v812_v27  ;;  %v12200_v54 = vld [vmem:[#allocation232_spill] sm:$0xff]  ;;  %12203 = vst [vmem:[#allocation254_spill] sm:$0xff] %v9028_v32  ;;  %v9030_v25 = vpop.permute.xlu1 %3375  ;;  %v12210_v32 = vld [vmem:[#allocation230_spill] sm:$0xff] }
 0x4aa   : > { %12193 = vst [vmem:[#allocation265_spill] sm:$0xff] %v8993_v8  ;;  %v11457_v33 = vrot.slane %v8977_v49, 1  ;;  %v1314_v35 = vmul.f32 %v12200_v54, %v12085_v10  ;;  %v1430_v58 = vmul.f32 %v12201_v19, %v12095_v48  ;;  %v9021_v42 = vadd.f32 %v1415_v28, %v1307_v45 }
 0x4ab   : > { %12197 = vst [vmem:[#allocation268_spill] sm:$0xff] %v9000_v4  ;;  %v714_v50 = vadd.f32 %v710_v43, %v674_v53  ;;  %v9026_v51 = vsel %vm767_vm1, %v11456_v1, %v862_v9  ;;  %v11458_v27 = vrot.slane %v8986_v29, 1  ;;  %v9041_v43 = vmul.f32 %v12200_v54, %v5609_v7  ;;  %v9079_v29 = vpop.permute.xlu0 %3503 }
 0x4ac   : > { %12202 = vst [vmem:[#allocation228_spill] sm:$0xff] %v9021_v42  ;;  %v9036_v18 = vsel %vm767_vm1, %v11457_v33, %v978_v12  ;;  %v9044_v45 = vstv %s8958_s26  ;;  %v1094_v9 = vrot.slane %v1081_v23, 1  ;;  %v9048_v53 = vmul.f32 %v12201_v19, %v5689_v52  ;;  %s5196_s26 = sld [smem:[#allocation2 + $0x81]] }
 0x4ad   : > { %12204 = vst [vmem:[#allocation299_spill] sm:$0xff] %v9030_v25  ;;  %v12207_v1 = vrot.slane %v8971_v37, 1  ;;  %v9057_v33 = vmul.f32 %v9044_v45, %v12132_v0  ;;  %v1044_v28 = vadd.f32 %v1035_v38, %v928_v13  ;;  %v1327_v54 = vrot.slane %v1314_v35, 2  ;;  %v12209_v25 = vld [vmem:[#allocation290_spill] sm:$0xff] }
 0x4ae   : > { %12205 = vst [vmem:[#allocation271_spill] sm:$0xff] %v9044_v45  ;;  %v1443_v46 = vrot.slane %v1430_v58, 2  ;;  %v9061_v23 = vmul.f32 %v12209_v25, %v11930_v30  ;;  %v1546_v19 = vmul.f32 %v12209_v25, %v12105_v6  ;;  %v3677_v4 = vmul.f32 %v12210_v32, %v5978_v57  ;;  %v12212_v58 = vld [vmem:[#allocation184_spill] sm:$0xff] }
 0x4af   : > { %12206 = vst [vmem:[#allocation274_spill] sm:$0xff] %v9048_v53  ;;  %v3793_v12 = vsel %vm767_vm1, %v11458_v27, %v12207_v1  ;;  %v3653_v1 = vmul.f32 %v12188_v21, %v6107_v61  ;;  %v9072_v38 = vmul.f32 %v9044_v45, %v12138_v44  ;;  %v1160_v13 = vadd.f32 %v1151_v31, %v1044_v28  ;;  %v12213_v27 = vld [vmem:[#allocation207_spill] sm:$0xff]  ;;  %v12216_v45 = vld [vmem:[#allocation222_spill] sm:$0xff]  ;;  %v12220_v28 = vld [vmem:[#allocation292_spill] sm:$0xff] }
 0x4b0   : > { %12208 = vst [vmem:[#allocation281_spill] sm:$0xff] %v9057_v33  ;;  %3800 = vrot.lane.b32.xlu0 %v3793_v12, %s11814_s25  ;;  %v11465_v35 = vrot.slane %v9041_v43, 2  ;;  %v619_v12 = vmul.f32 %v12212_v58, %v12132_v0  ;;  %v659_v25 = vmul.f32 %v12213_v27, %v12153_v26  ;;  %v12215_v57 = vrot.slane %v9004_v55, 1  ;;  %3685 = vrot.lane.b32.xlu2 %v3677_v4, %s11814_s25  ;;  %v9112_v42 = vpop.permute.xlu2 %3457 }
 0x4b1   : > { %12211 = vst [vmem:[#allocation232_spill] sm:$0xff] %v9072_v38  ;;  %v750_v31 = vmul.f32 %v12216_v45, %v12029_v47  ;;  %3663 = vrot.lane.b32.xlu1 %v3653_v1, %s11814_s25  ;;  %v9101_v37 = vstv %s9019_s17  ;;  %v1559_v1 = vrot.slane %v1546_v19, 2  ;;  %v9110_v8 = vmul.f32 %v12220_v28, %v12029_v47  ;;  %s5197_s17 = sld [smem:[#allocation2 + $0x85]] }
 0x4b2   : > { %12214 = vst [vmem:[#allocation287_spill] sm:$0xff] %v9079_v29  ;;  %v9084_v21 = vsel %vm767_vm1, %v12215_v57, %v1094_v9  ;;  %v9095_v27 = vsel %vm1232_vm2, %v11465_v35, %v1327_v54  ;;  %v12217_v57 = vld [vmem:[#allocation225_spill] sm:$0xff]  ;;  %v12218_v29 = vrot.slane %v9048_v53, 2  ;;  %v9114_v54 = vpop.permute.xlu1 %3399  ;;  %v11468_v35 = vrot.slane %v9072_v38, 1 }
 0x4b3   : > { %v699_v9 = vmul.f32 %v12217_v57, %v5959_v56  ;;  %12221 = vst [vmem:[#allocation230_spill] sm:$0xff] %v9112_v42  ;;  %v1277_v57 = vadd.f32 %v8925_v62, %v1160_v13  ;;  %v9120_v58 = vmul.f32 %v12220_v28, %v12108_v3  ;;  %v663_v53 = vadd.f32 %v659_v25, %v619_v12  ;;  %v12226_v13 = vld [vmem:[#allocation297_spill] sm:$0xff] }
 0x4b4   : > { %v9106_v4 = vsel %vm1232_vm2, %v12218_v29, %v1443_v46  ;;  %12222 = vst [vmem:[#allocation184_spill] sm:$0xff] %v9114_v54  ;;  %v739_v46 = vmul.f32 %v12142_v60, %v6107_v61  ;;  %v754_v29 = vadd.f32 %v750_v31, %v714_v50  ;;  %v12223_v19 = vrot.slane %v9057_v33, 1  ;;  %v12224_v54 = vld [vmem:[#allocation17_spill] sm:$0xff]  ;;  %v12232_v33 = vld [vmem:[#allocation190_spill] sm:$0xff] }
 0x4b5   : > { %12219 = vst [vmem:[#allocation290_spill] sm:$0xff] %v9106_v4  ;;  %v3851_v4 = vmul.f32 %v9101_v37, %v12224_v54  ;;  %v9133_v62 = vmul.f32 %v9101_v37, %v12225_v15  ;;  %v9137_v12 = vmul.f32 %v12226_v13, %v12029_v47  ;;  %v703_v25 = vadd.f32 %v699_v9, %v663_v53 }
 0x4b6   : > { %v3828_v42 = vsel %vm767_vm1, %v11468_v35, %v12223_v19  ;;  %v629_v60 = vmul.f32 %v12025_v36, %v12132_v0  ;;  %v669_v50 = vmul.f32 %v12185_v39, %v12153_v26  ;;  %v12227_v31 = vrot.slane %v9061_v23, 2  ;;  %v9160_v35 = vpop.permute.xlu0 %3509 }
 0x4b7   : > { %v9151_v19 = vmul.f32 %v12226_v13, %v12108_v3  ;;  %v3680_v53 = vmul.f32 %v12210_v32, %v12029_v47  ;;  %v3678_v36 = vmul.f32 %v12210_v32, %v6068_v22  ;;  %v743_v39 = vadd.f32 %v739_v46, %v703_v25  ;;  %12229 = vst [vmem:[#allocation222_spill] sm:$0xff] %v9160_v35  ;;  %v12231_v13 = vld [vmem:[#allocation179_spill] sm:$0xff]  ;;  %v12234_v22 = vld [vmem:[#allocation196_spill] sm:$0xff] }
 0x4b8   : > { %3835 = vrot.lane.b32.xlu0 %v3828_v42, %s11814_s25  ;;  %v9147_v28 = vsel %vm1232_vm2, %v12227_v31, %v1559_v1  ;;  %v709_v42 = vmul.f32 %v12187_v2, %v5959_v56  ;;  %v12230_v1 = vld [vmem:[#allocation296_spill] sm:$0xff]  ;;  %v600_v38 = vmul.f32 %v12231_v13, %v5609_v7  ;;  %v3861_v32 = vrot.slane %v3851_v4, 1  ;;  %v12236_v4 = vld [vmem:[#allocation177_spill] sm:$0xff] }
 0x4b9   : > { %12228 = vst [vmem:[#allocation207_spill] sm:$0xff] %v9147_v28  ;;  %v9164_v31 = vmul.f32 %v12230_v1, %v5609_v7  ;;  %v640_v28 = vmul.f32 %v12232_v33, %v5689_v52  ;;  %3691 = vrot.lane.b32.xlu2 %v3680_v53, %s11814_s25  ;;  %3687 = vrot.lane.b32.xlu1 %v3678_v36, %s11814_s25  ;;  %v11476_v46 = vrot.slane %v9133_v62, 1  ;;  %v1210_v25 = vrot.slane %v9120_v58, 1  ;;  %v9188_v58 = vpop.permute.xlu2 %3481 }
 0x4ba   : > { %v871_v2 = vadd.f32 %v9026_v51, %v754_v29  ;;  %v673_v9 = vadd.f32 %v669_v50, %v629_v60  ;;  %v3703_v35 = vmul.f32 %v12230_v1, %v5537_v41  ;;  %v12233_v13 = vrot.slane %v8739_v11, 1  ;;  %v12237_v51 = vld [vmem:[#allocation213_spill] sm:$0xff]  ;;  %v9190_v60 = vpop.permute.xlu1 %3405 }
 0x4bb   : > { %v12235_v56 = vrot.slane %v12234_v22, 1  ;;  %v749_v53 = vmul.f32 %v12216_v45, %v6107_v61  ;;  %v761_v36 = vmul.f32 %v12236_v4, %v12085_v10  ;;  %v680_v29 = vmul.f32 %v12237_v51, %v11930_v30  ;;  %12238 = vst [vmem:[#allocation225_spill] sm:$0xff] %v9190_v60 }
 0x4bc   : > { %v9193_v50 = vadd.f32 %v8932_v16, %v1277_v57  ;;  %v713_v22 = vadd.f32 %v709_v42, %v673_v9  ;;  %v644_v45 = vadd.f32 %v640_v28, %v600_v38  ;;  %v3863_v51 = vsel %vm767_vm1, %v3861_v32, %v11476_v46  ;;  %v12240_v57 = vld [vmem:[#allocation51_spill] sm:$0xff]  ;;  %v12242_v9 = vld [vmem:[#allocation248_spill] sm:$0xff]  ;;  %v12244_v38 = vld [vmem:[#allocation210_spill] sm:$0xff] }
 0x4bd   : > { %v832_v33 = vsel %vm767_vm1, %v12235_v56, %v12233_v13  ;;  %v3718_v56 = vrot.slane %v9164_v31, 1  ;;  %v12239_v13 = vld [vmem:[#allocation218_spill] sm:$0xff]  ;;  %v3855_v60 = vmul.f32 %v9101_v37, %v12095_v48  ;;  %v987_v16 = vadd.f32 %v9036_v18, %v871_v2  ;;  %v12246_v2 = vld [vmem:[#allocation273_spill] sm:$0xff] }
 0x4be   : > { %v841_v11 = vadd.f32 %v832_v33, %v743_v39  ;;  %v720_v4 = vmul.f32 %v12239_v13, %v12029_v47  ;;  %v12241_v39 = vrot.slane %v12240_v57, 1  ;;  %v12243_v42 = vrot.slane %v12242_v9, 1  ;;  %v9218_v18 = vpop.permute.xlu0 %3533 }
 0x4bf   : > { %v878_v28 = vmul.f32 %v12244_v38, %v12095_v48  ;;  %v3713_v33 = vrot.slane %v3703_v35, 1  ;;  %v753_v13 = vadd.f32 %v749_v53, %v713_v22  ;;  %v775_v47 = vrot.slane %v761_v36, 1  ;;  %12245 = vst [vmem:[#allocation292_spill] sm:$0xff] %v9218_v18  ;;  %v12251_v22 = vld [vmem:[#allocation275_spill] sm:$0xff]  ;;  %v12368_v18 = vld [vmem:[#allocation69_spill] sm:$0xff] }
 0x4c0   : > { %v948_v31 = vsel %vm767_vm1, %v12243_v42, %v12241_v39  ;;  %3870 = vrot.lane.b32.xlu0 %v3863_v51, %s11814_s25  ;;  %v684_v32 = vadd.f32 %v680_v29, %v644_v45  ;;  %v9216_v46 = vmul.f32 %v9101_v37, %v5689_v52  ;;  %v12247_v57 = vrot.slane %v12246_v2, 1  ;;  %v12248_v39 = vld [vmem:[#allocation181_spill] sm:$0xff] }
 0x4c1   : > { %v12249_v42 = vrot.slane %v12248_v39, 1  ;;  %v9228_v35 = vmul.f32 %v8799_v14, %v12132_v0  ;;  %v3707_v53 = vmul.f32 %v12230_v1, %v12085_v10  ;;  %v957_v36 = vadd.f32 %v948_v31, %v841_v11 }
 0x4c2   : > { %v3719_v9 = vsel %vm767_vm1, %v12247_v57, %v3718_v56  ;;  %v12250_v29 = vrot.slane %v8750_v5, 1  ;;  %v12252_v45 = vrot.slane %v12251_v22, 1  ;;  %v724_v2 = vadd.f32 %v720_v4, %v684_v32  ;;  %v12254_v57 = vld [vmem:[#allocation278_spill] sm:$0xff]  ;;  %v12257_v5 = vld [vmem:[#allocation215_spill] sm:$0xff] }
 0x4c3   : > { %v3715_v38 = vsel %vm767_vm1, %v3713_v33, %v12249_v42  ;;  %3726 = vrot.lane.b32.xlu2 %v3719_v9, %s11814_s25  ;;  %v3868_v33 = vrot.slane %v3855_v60, 1  ;;  %v12253_v14 = vrot.slane %v8839_v17, 1  ;;  %v12255_v39 = vrot.slane %v12254_v57, 1  ;;  %v12259_v4 = vld [vmem:[#allocation223_spill] sm:$0xff] }
 0x4c4   : > { %v1064_v51 = vsel %vm767_vm1, %v12252_v45, %v12250_v29  ;;  %3722 = vrot.lane.b32.xlu1 %v3715_v38, %s11814_s25  ;;  %v12256_v11 = vrot.slane %v8964_v34, 1  ;;  %v12258_v31 = vrot.slane %v12257_v5, 1  ;;  %v891_v29 = vrot.slane %v878_v28, 1  ;;  %v12261_v38 = vld [vmem:[#allocation282_spill] sm:$0xff]  ;;  %v9259_v34 = vpop.permute.xlu2 %3505 }
 0x4c5   : > { %v1180_v1 = vsel %vm767_vm1, %v12255_v39, %v12253_v14  ;;  %v994_v32 = vmul.f32 %v12259_v4, %v12105_v6  ;;  %v12260_v9 = vrot.slane %v8977_v49, 1  ;;  %v12262_v60 = vrot.slane %v12261_v38, 1  ;;  %v12263_v45 = vld [vmem:[#allocation198_spill] sm:$0xff]  ;;  %12265 = vst [vmem:[#allocation297_spill] sm:$0xff] %v9259_v34  ;;  %v9261_v39 = vpop.permute.xlu1 %3429  ;;  %v12434_v34 = vld [vmem:[#allocation45_spill] sm:$0xff] }
 0x4c6   : > { %v861_v42 = vsel %vm767_vm1, %v12258_v31, %v12256_v11  ;;  %v12264_v57 = vrot.slane %v12263_v45, 1  ;;  %12266 = vst [vmem:[#allocation296_spill] sm:$0xff] %v9261_v39  ;;  %v11477_v28 = vrot.slane %v9216_v46, 1  ;;  %v12267_v11 = vld [vmem:[#allocation227_spill] sm:$0xff]  ;;  %v3753_v49 = vrot.slane %v9228_v35, 1  ;;  %v12376_v39 = vld [vmem:[#allocation81_spill] sm:$0xff] }
 0x4c7   : > { %v977_v17 = vsel %vm767_vm1, %v12262_v60, %v12260_v9  ;;  %v870_v22 = vadd.f32 %v861_v42, %v753_v13  ;;  %v1110_v5 = vmul.f32 %v12267_v11, %v12108_v3  ;;  %v3720_v31 = vrot.slane %v3707_v53, 1  ;;  %v12269_v53 = vld [vmem:[#allocation244_spill] sm:$0xff] }
 0x4c8   : > { %v776_v14 = vsel %vm767_vm1, %v12264_v57, %v775_v47  ;;  %v9268_v4 = vstv %s9196_s16  ;;  %v1073_v13 = vadd.f32 %v1064_v51, %v957_v36  ;;  %v3869_v47 = vsel %vm767_vm1, %v11477_v28, %v3868_v33  ;;  %s5198_s16 = sld [smem:[#allocation2 + $0x89]] }
 0x4c9   : > { %v784_v42 = vadd.f32 %v776_v14, %v724_v2  ;;  %v9277_v9 = vmul.f32 %v9268_v4, %v5689_v52  ;;  %v1103_v38 = vadd.f32 %v9084_v21, %v987_v16  ;;  %v12268_v60 = vrot.slane %v9110_v8, 1  ;;  %3876 = vrot.lane.b32.xlu0 %v3869_v47, %s11814_s25  ;;  %v12272_v14 = vld [vmem:[#allocation283_spill] sm:$0xff]  ;;  %v9296_v16 = vpop.permute.xlu0 %3557 }
 0x4ca   : > { %v12270_v45 = vrot.slane %v12269_v53, 1  ;;  %v1007_v36 = vrot.slane %v994_v32, 1  ;;  %v1189_v51 = vadd.f32 %v1180_v1, %v1073_v13  ;;  %v986_v2 = vadd.f32 %v977_v17, %v870_v22  ;;  %12274 = vst [vmem:[#allocation179_spill] sm:$0xff] %v9296_v16  ;;  %v12277_v13 = vld [vmem:[#allocation197_spill] sm:$0xff] }
 0x4cb   : > { %v1211_v35 = vsel %vm767_vm1, %v12268_v60, %v1210_v25  ;;  %v12271_v33 = vrot.slane %v9004_v55, 1  ;;  %v12273_v11 = vrot.slane %v12272_v14, 1  ;;  %v9294_v21 = vmul.f32 %v9268_v4, %v12153_v26 }
 0x4cc   : > { %v892_v57 = vsel %vm767_vm1, %v12270_v45, %v891_v29  ;;  %v1123_v25 = vrot.slane %v1110_v5, 1  ;;  %v12275_v29 = vrot.slane %v8811_v24, 1  ;;  %v3721_v1 = vsel %vm767_vm1, %v3718_v56, %v3720_v31  ;;  %v12280_v31 = vld [vmem:[#allocation300_spill] sm:$0xff]  ;;  %v12283_v45 = vld [vmem:[#allocation307_spill] sm:$0xff] }
 0x4cd   : > { %v1093_v28 = vsel %vm767_vm1, %v12273_v11, %v12271_v33  ;;  %v9304_v55 = vmul.f32 %v8956_v59, %v12138_v44  ;;  %v1219_v17 = vadd.f32 %v1211_v35, %v1103_v38  ;;  %v12276_v22 = vrot.slane %v8782_v63, 2  ;;  %3728 = vrot.lane.b32.xlu1 %v3721_v1, %s11814_s25  ;;  %v12282_v63 = vld [vmem:[#allocation178_spill] sm:$0xff]  ;;  %v9332_v1 = vpop.permute.xlu1 %3453  ;;  %v12377_v44 = vld [vmem:[#allocation84_spill] sm:$0xff] }
 0x4ce   : > { %v3754_v32 = vsel %vm767_vm1, %v12275_v29, %v3753_v49  ;;  %v12278_v47 = vrot.slane %v12277_v13, 2  ;;  %v900_v5 = vadd.f32 %v892_v57, %v784_v42  ;;  %v11478_v24 = vrot.slane %v9277_v9, 1  ;;  %12287 = vst [vmem:[#allocation196_spill] sm:$0xff] %v9332_v1  ;;  %v12366_v1 = vld [vmem:[#allocation180_spill] sm:$0xff] }
 0x4cf   : > { %3761 = vrot.lane.b32.xlu2 %v3754_v32, %s11814_s25  ;;  %v12279_v56 = vrot.slane %v9110_v8, 1  ;;  %v12281_v53 = vrot.slane %v12280_v31, 1  ;;  %v1226_v35 = vmul.f32 %v12282_v63, %v12085_v10  ;;  %v12284_v33 = vrot.slane %v12283_v45, 1  ;;  %v12285_v8 = vld [vmem:[#allocation221_spill] sm:$0xff]  ;;  %v9330_v32 = vpop.permute.xlu2 %3529  ;;  %v12291_v31 = vld [vmem:[#allocation220_spill] sm:$0xff] }
 0x4d0   : > { %v1297_v60 = vsel %vm1232_vm2, %v12278_v47, %v12276_v22  ;;  %v3777_v57 = vmul.f32 %v8956_v59, %v5537_v41  ;;  %v1102_v11 = vadd.f32 %v1093_v28, %v986_v2  ;;  %v1343_v29 = vmul.f32 %v12285_v8, %v12095_v48  ;;  %12286 = vst [vmem:[#allocation190_spill] sm:$0xff] %v9330_v32  ;;  %v12289_v47 = vld [vmem:[#allocation208_spill] sm:$0xff]  ;;  %v12294_v8 = vld [vmem:[#allocation289_spill] sm:$0xff]  ;;  %v12432_v32 = vld [vmem:[#allocation82_spill] sm:$0xff] }
 0x4d1   : > { %v1209_v38 = vsel %vm767_vm1, %v12281_v53, %v12279_v56  ;;  %v1008_v42 = vsel %vm767_vm1, %v12284_v33, %v1007_v36  ;;  %v1306_v14 = vadd.f32 %v1297_v60, %v1189_v51  ;;  %v11481_v22 = vrot.slane %v9294_v21, 1 }
 0x4d2   : > { %v12288_v13 = vrot.slane %v8796_v20, 2  ;;  %v12290_v36 = vrot.slane %v12289_v47, 2  ;;  %v12292_v53 = vrot.slane %v12291_v31, 1  ;;  %v3788_v28 = vrot.slane %v9304_v55, 1 }
 0x4d3   : > { %v9345_v2 = vstv %s9270_s23  ;;  %v1218_v60 = vadd.f32 %v1209_v38, %v1102_v11  ;;  %v1016_v63 = vadd.f32 %v1008_v42, %v900_v5  ;;  %v3904_v20 = vsel %vm767_vm1, %v11481_v22, %v11478_v24  ;;  %s5199_s23 = sld [smem:[#allocation2 + $0x8d]] }
 0x4d4   : > { %v1413_v56 = vsel %vm1232_vm2, %v12290_v36, %v12288_v13  ;;  %v1124_v51 = vsel %vm767_vm1, %v12292_v53, %v1123_v25  ;;  %v9354_v45 = vmul.f32 %v9345_v2, %v12153_v26  ;;  %v1336_v33 = vadd.f32 %v9095_v27, %v1219_v17  ;;  %3911 = vrot.lane.b32.xlu0 %v3904_v20, %s11814_s25  ;;  %v12296_v27 = vld [vmem:[#allocation235_spill] sm:$0xff] }
 0x4d5   : > { %v12293_v25 = vrot.slane %v9041_v43, 2  ;;  %v12295_v55 = vrot.slane %v12294_v8, 2  ;;  %v1240_v38 = vrot.slane %v1226_v35, 2  ;;  %v3787_v5 = vrot.slane %v3777_v57, 1  ;;  %v9369_v43 = vpop.permute.xlu0 %3581  ;;  %v12303_v8 = vld [vmem:[#allocation274_spill] sm:$0xff] }
 0x4d6   : > { %v1422_v42 = vadd.f32 %v1413_v56, %v1306_v14  ;;  %v1356_v11 = vrot.slane %v1343_v29, 2  ;;  %v1132_v47 = vadd.f32 %v1124_v51, %v1016_v63  ;;  %v9365_v36 = vmul.f32 %v9345_v2, %v12225_v15  ;;  %12297 = vst [vmem:[#allocation177_spill] sm:$0xff] %v9369_v43  ;;  %v12299_v29 = vld [vmem:[#allocation28_spill] sm:$0xff]  ;;  %v12301_v51 = vld [vmem:[#allocation231_spill] sm:$0xff] }
 0x4d7   : > { %v1326_v13 = vsel %vm1232_vm2, %v12295_v55, %v12293_v25  ;;  %v1459_v17 = vmul.f32 %v12296_v27, %v12105_v6  ;;  %v3789_v31 = vsel %vm767_vm1, %v3787_v5, %v3788_v28  ;;  %v12298_v35 = vrot.slane %v8888_v40, 1  ;;  %v12307_v27 = vld [vmem:[#allocation191_spill] sm:$0xff] }
 0x4d8   : > { %v3781_v57 = vmul.f32 %v8956_v59, %v12085_v10  ;;  %v1673_v14 = vrot.slane %v9137_v12, 2  ;;  %v12300_v56 = vrot.slane %v12299_v29, 2  ;;  %v12302_v63 = vrot.slane %v12301_v51, 2  ;;  %3796 = vrot.lane.b32.xlu2 %v3789_v31, %s11814_s25  ;;  %v12305_v59 = vld [vmem:[#allocation293_spill] sm:$0xff]  ;;  %v12325_v43 = vld [vmem:[#allocation207_spill] sm:$0xff] }
 0x4d9   : > { %v3756_v53 = vsel %vm767_vm1, %v3753_v49, %v12298_v35  ;;  %v1335_v25 = vadd.f32 %v1326_v13, %v1218_v60  ;;  %v11479_v40 = vrot.slane %v9354_v45, 1  ;;  %v1675_v49 = vrot.slane %v9151_v19, 2  ;;  %v12309_v60 = vld [vmem:[#allocation290_spill] sm:$0xff]  ;;  %v9403_v19 = vpop.permute.xlu1 %3477 }
 0x4da   : > { %v1529_v20 = vsel %vm1232_vm2, %v12302_v63, %v12300_v56  ;;  %3763 = vrot.lane.b32.xlu1 %v3756_v53, %s11814_s25  ;;  %v12304_v55 = vrot.slane %v12303_v8, 2  ;;  %v12306_v5 = vrot.slane %v12305_v59, 2  ;;  %v12308_v35 = vrot.slane %v12307_v27, 2  ;;  %v12310_v53 = vld [vmem:[#allocation241_spill] sm:$0xff]  ;;  %v9401_v63 = vpop.permute.xlu2 %3535  ;;  %12312 = vst [vmem:[#allocation218_spill] sm:$0xff] %v9403_v19 }
 0x4db   : > { %v9396_v56 = vstv %s9326_s6  ;;  %v1452_v13 = vadd.f32 %v12309_v60, %v1336_v33  ;;  %v1575_v51 = vmul.f32 %v12310_v53, %v12108_v3  ;;  %12311 = vst [vmem:[#allocation213_spill] sm:$0xff] %v9401_v63  ;;  %v11480_v8 = vrot.slane %v9365_v36, 1  ;;  %v12380_v63 = vld [vmem:[#allocation24_spill] sm:$0xff]  ;;  %s5200_s6 = sld [smem:[#allocation2 + $0x82]] }
 0x4dc   : > { %v1442_v12 = vsel %vm1232_vm2, %v12306_v5, %v12304_v55  ;;  %v1241_v29 = vsel %vm1232_vm2, %v12308_v35, %v1240_v38  ;;  %v1538_v59 = vadd.f32 %v1529_v20, %v1422_v42  ;;  %v12313_v55 = vld [vmem:[#allocation258_spill] sm:$0xff]  ;;  %v1472_v38 = vrot.slane %v1459_v17, 2  ;;  %v12315_v42 = vld [vmem:[#allocation228_spill] sm:$0xff] }
 0x4dd   : > { %v1249_v31 = vadd.f32 %v1241_v29, %v1132_v47  ;;  %v12314_v5 = vrot.slane %v12313_v55, 2  ;;  %v3794_v35 = vrot.slane %v3781_v57, 1  ;;  %v1451_v24 = vadd.f32 %v1442_v12, %v1335_v25  ;;  %v12316_v20 = vld [vmem:[#allocation186_spill] sm:$0xff]  ;;  %v12320_v12 = vld [vmem:[#allocation257_spill] sm:$0xff]  ;;  %v9440_v16 = vpop.permute.xlu0 %3587 }
 0x4de   : > { %v3939_v33 = vsel %vm767_vm1, %v11480_v8, %v11479_v40  ;;  %v3962_v47 = vmul.f32 %v9396_v56, %v12224_v54  ;;  %v9418_v29 = vmul.f32 %v9396_v56, %v12225_v15  ;;  %v1539_v60 = vadd.f32 %v12316_v20, %v12315_v42  ;;  %v12318_v57 = vld [vmem:[#allocation30_spill] sm:$0xff] }
 0x4df   : > { %v1357_v27 = vsel %vm1232_vm2, %v12314_v5, %v1356_v11  ;;  %v12317_v11 = vld [vmem:[#allocation265_spill] sm:$0xff]  ;;  %v12319_v25 = vrot.slane %v12318_v57, 2  ;;  %v12321_v53 = vrot.slane %v12320_v12, 2  ;;  %v12322_v5 = vrot.slane %v9061_v23, 2  ;;  %v12323_v40 = vld [vmem:[#allocation298_spill] sm:$0xff]  ;;  %3946 = vrot.lane.b32.xlu0 %v3939_v33, %s11814_s25 }
 0x4e0   : > { %v1509_v17 = vadd.f32 %v12317_v11, %v9193_v50  ;;  %v12324_v8 = vrot.slane %v12323_v40, 2  ;;  %v1568_v19 = vadd.f32 %v12325_v43, %v1452_v13  ;;  %v1676_v42 = vsel %vm1232_vm2, %v1673_v14, %v1675_v49  ;;  %v12326_v11 = vld [vmem:[#allocation264_spill] sm:$0xff]  ;;  %v12332_v43 = vld [vmem:[#allocation271_spill] sm:$0xff] }
 0x4e1   : > { %v1645_v55 = vsel %vm1232_vm2, %v12321_v53, %v12319_v25  ;;  %v1365_v20 = vadd.f32 %v1357_v27, %v1249_v31  ;;  %v1588_v50 = vrot.slane %v1575_v51, 2  ;;  %v12327_v57 = vrot.slane %v12326_v11, 2  ;;  %v12328_v25 = vld [vmem:[#allocation195_spill] sm:$0xff]  ;;  %v12335_v11 = vld [vmem:[#allocation250_spill] sm:$0xff] }
 0x4e2   : > { %v1558_v22 = vsel %vm1232_vm2, %v12324_v8, %v12322_v5  ;;  %v12329_v23 = vrot.slane %v12328_v25, 1  ;;  %v12330_v53 = vld [vmem:[#allocation255_spill] sm:$0xff]  ;;  %v9450_v13 = vmul.f32 %v12332_v43, %v5609_v7  ;;  %v1654_v49 = vadd.f32 %v1645_v55, %v1538_v59  ;;  %v12336_v25 = vld [vmem:[#allocation302_spill] sm:$0xff]  ;;  %v9467_v27 = vpop.permute.xlu2 %3559 }
 0x4e3   : > { %v1473_v12 = vsel %vm1232_vm2, %v12327_v57, %v1472_v38  ;;  %v12331_v8 = vrot.slane %v12330_v53, 1  ;;  %v1567_v31 = vadd.f32 %v1558_v22, %v1451_v24  ;;  %v3972_v51 = vrot.slane %v3962_v47, 1  ;;  %v12333_v38 = vld [vmem:[#allocation288_spill] sm:$0xff]  ;;  %v12334_v5 = vld [vmem:[#allocation31_spill] sm:$0xff]  ;;  %v12338_v24 = vld [vmem:[#allocation246_spill] sm:$0xff]  ;;  %12342 = vst [vmem:[#allocation51_spill] sm:$0xff] %v9467_v27 }
 0x4e4   : > { %v3795_v40 = vsel %vm767_vm1, %v12329_v23, %v3794_v35  ;;  %v1785_v35 = vadd.f32 %v12334_v5, %v12333_v38  ;;  %v1655_v57 = vadd.f32 %v12335_v11, %v1539_v60  ;;  %v3814_v59 = vmul.f32 %v12332_v43, %v5537_v41  ;;  %v12339_v22 = vld [vmem:[#allocation36_spill] sm:$0xff]  ;;  %v9469_v38 = vpop.permute.xlu1 %3483  ;;  %v12343_v60 = vld [vmem:[#allocation39_spill] sm:$0xff] }
 0x4e5   : > { %v3791_v33 = vsel %vm767_vm1, %v3788_v28, %v12331_v8  ;;  %3802 = vrot.lane.b32.xlu2 %v3795_v40, %s11814_s25  ;;  %v12337_v28 = vrot.slane %v12336_v25, 2  ;;  %v1736_v55 = vadd.f32 %v12339_v22, %v12338_v24  ;;  %v12340_v40 = vld [vmem:[#allocation268_spill] sm:$0xff]  ;;  %v1684_v11 = vadd.f32 %v1676_v42, %v1568_v19  ;;  %v12346_v24 = vld [vmem:[#allocation41_spill] sm:$0xff]  ;;  %v12349_v42 = vld [vmem:[#allocation262_spill] sm:$0xff] }
 0x4e6   : > { %3798 = vrot.lane.b32.xlu1 %v3791_v33, %s11814_s25  ;;  %v1625_v53 = vadd.f32 %v12340_v40, %v1509_v17  ;;  %v12341_v47 = vld [vmem:[#allocation44_spill] sm:$0xff]  ;;  %v1481_v33 = vadd.f32 %v1473_v12, %v1365_v20  ;;  %v1762_v5 = vadd.f32 %v12343_v60, %v1655_v57  ;;  %v3829_v0 = vrot.slane %v9450_v13, 1  ;;  %v12348_v57 = vld [vmem:[#allocation42_spill] sm:$0xff] }
 0x4e7   : > { %v1674_v23 = vsel %vm1232_vm2, %v12337_v28, %v1673_v14  ;;  %v1761_v8 = vadd.f32 %v12341_v47, %v1654_v49  ;;  %v12344_v25 = vld [vmem:[#allocation192_spill] sm:$0xff]  ;;  %v12347_v20 = vrot.slane %v9418_v29, 1  ;;  %v3966_v49 = vmul.f32 %v9396_v56, %v12095_v48  ;;  %v12350_v40 = vld [vmem:[#allocation50_spill] sm:$0xff] }
 0x4e8   : > { %v12345_v14 = vrot.slane %v12344_v25, 2  ;;  %v1735_v17 = vadd.f32 %v12346_v24, %v1625_v53  ;;  %v1683_v22 = vadd.f32 %v1674_v23, %v1567_v31  ;;  %v1788_v19 = vadd.f32 %v12348_v57, %v1684_v11  ;;  %v12352_v53 = vld [vmem:[#allocation46_spill] sm:$0xff]  ;;  %v12353_v23 = vld [vmem:[#allocation48_spill] sm:$0xff]  ;;  %v9499_v11 = vpop.permute.xlu0 %3611  ;;  %v12354_v24 = vld [vmem:[#allocation281_spill] sm:$0xff] }
 0x4e9   : > { %v3974_v12 = vsel %vm767_vm1, %v3972_v51, %v12347_v20  ;;  %v1837_v47 = vadd.f32 %v12350_v40, %v12349_v42  ;;  %v3824_v13 = vrot.slane %v3814_v59, 1  ;;  %v9492_v31 = vadd.f32 %v12352_v53, %v1761_v8  ;;  %v12356_v57 = vld [vmem:[#allocation232_spill] sm:$0xff]  ;;  %v12360_v40 = vld [vmem:[#allocation209_spill] sm:$0xff] }
 0x4ea   : > { %v1589_v28 = vsel %vm1232_vm2, %v12345_v14, %v1588_v50  ;;  %v12351_v50 = vld [vmem:[#allocation55_spill] sm:$0xff]  ;;  %3981 = vrot.lane.b32.xlu0 %v3974_v12, %s11814_s25  ;;  %v1787_v25 = vadd.f32 %v12353_v23, %v1683_v22  ;;  %v9497_v14 = vmul.f32 %v9396_v56, %v5689_v52  ;;  %v12355_v20 = vrot.slane %v12354_v24, 1  ;;  %v12359_v22 = vld [vmem:[#allocation58_spill] sm:$0xff]  ;;  %v12362_v23 = vld [vmem:[#allocation240_spill] sm:$0xff] }
 0x4eb   : > { %v9488_v60 = vadd.f32 %v12351_v50, %v1736_v55  ;;  %v1597_v51 = vadd.f32 %v1589_v28, %v1481_v33  ;;  %v12357_v42 = vrot.slane %v12356_v57, 1  ;;  %v3853_v8 = vmul.f32 %v9101_v37, %v12153_v26  ;;  %v12358_v28 = vld [vmem:[#allocation224_spill] sm:$0xff]  ;;  %v12361_v50 = vld [vmem:[#allocation59_spill] sm:$0xff]  ;;  %v12363_v24 = vld [vmem:[#allocation62_spill] sm:$0xff] }
 0x4ec   : > { %v3830_v55 = vsel %vm767_vm1, %v12355_v20, %v3829_v0  ;;  %v3818_v33 = vmul.f32 %v12332_v43, %v12085_v10  ;;  %v9513_v12 = vadd.f32 %v12359_v22, %v12358_v28  ;;  %v1812_v53 = vadd.f32 %v12361_v50, %v12360_v40  ;;  %v12364_v37 = vld [vmem:[#allocation56_spill] sm:$0xff]  ;;  %v12367_v28 = vld [vmem:[#allocation65_spill] sm:$0xff]  ;;  %v12369_v40 = vld [vmem:[#allocation71_spill] sm:$0xff]  ;;  %v9529_v10 = vpop.permute.xlu2 %3583 }
 0x4ed   : > { %v3826_v59 = vsel %vm767_vm1, %v3824_v13, %v12357_v42  ;;  %v1890_v20 = vadd.f32 %v12363_v24, %v12362_v23  ;;  %3837 = vrot.lane.b32.xlu2 %v3830_v55, %s11814_s25  ;;  %v3979_v13 = vrot.slane %v3966_v49, 1  ;;  %v1710_v57 = vadd.f32 %v12364_v37, %v1597_v51  ;;  %v12365_v42 = vld [vmem:[#allocation61_spill] sm:$0xff]  ;;  %12370 = vst [vmem:[#allocation248_spill] sm:$0xff] %v9529_v10  ;;  %v9531_v23 = vpop.permute.xlu1 %3507  ;;  %v12373_v37 = vld [vmem:[#allocation22_spill] sm:$0xff] }
 0x4ee   : > { %3833 = vrot.lane.b32.xlu1 %v3826_v59, %s11814_s25  ;;  %v9523_v43 = vadd.f32 %v12365_v42, %v1787_v25  ;;  %v1863_v22 = vadd.f32 %v12367_v28, %v12366_v1  ;;  %v1866_v7 = vadd.f32 %v12368_v18, %v1762_v5  ;;  %v1839_v50 = vadd.f32 %v12369_v40, %v1735_v17  ;;  %v12371_v1 = vld [vmem:[#allocation21_spill] sm:$0xff]  ;;  %v12372_v5 = vld [vmem:[#allocation72_spill] sm:$0xff]  ;;  %v12374_v42 = vld [vmem:[#allocation74_spill] sm:$0xff] }
 0x4ef   : > { %v11491_v55 = vrot.slane %v9497_v14, 1  ;;  %v3888_v49 = vmul.f32 %v9268_v4, %v12224_v54  ;;  %v3889_v25 = vmul.f32 %v9268_v4, %v12225_v15  ;;  %v3864_v51 = vrot.slane %v3853_v8, 1 }
 0x4f0   : > { %v3831_v59 = vrot.slane %v3818_v33, 1  ;;  %v9539_v24 = vstv %s9476_s7  ;;  %v3925_v18 = vmul.f32 %v9345_v2, %v12224_v54  ;;  %v1838_v17 = vadd.f32 %v12372_v5, %v12371_v1  ;;  %v12375_v33 = vld [vmem:[#allocation77_spill] sm:$0xff]  ;;  %v12378_v5 = vld [vmem:[#allocation86_spill] sm:$0xff]  ;;  %s5201_s7 = sld [smem:[#allocation2 + $0x86]] }
 0x4f1   : > { %v1811_v28 = vadd.f32 %v12374_v42, %v12373_v37  ;;  %v3980_v40 = vsel %vm767_vm1, %v11491_v55, %v3979_v13  ;;  %v9554_v8 = vmul.f32 %v9539_v24, %v11930_v30  ;;  %v1889_v15 = vadd.f32 %v12375_v33, %v1785_v35  ;;  %v12379_v42 = vld [vmem:[#allocation53_spill] sm:$0xff]  ;;  %v12381_v35 = vld [vmem:[#allocation87_spill] sm:$0xff] }
 0x4f2   : > { %v1814_v41 = vadd.f32 %v12376_v39, %v1710_v57  ;;  %v1892_v54 = vadd.f32 %v12377_v44, %v1788_v19  ;;  %3987 = vrot.lane.b32.xlu0 %v3980_v40, %s11814_s25  ;;  %v9562_v1 = vmul.f32 %v9345_v2, %v5689_v52  ;;  %v9567_v13 = vmul.f32 %v9539_v24, %v12379_v42  ;;  %v9571_v39 = vpop.permute.xlu0 %3635  ;;  %v12384_v52 = vld [vmem:[#allocation89_spill] sm:$0xff] }
 0x4f3   : > { %v1915_v37 = vadd.f32 %v12378_v5, %v1811_v28  ;;  %v3898_v55 = vrot.slane %v3888_v49, 1  ;;  %v3899_v27 = vrot.slane %v3889_v25, 1  ;;  %v1864_v33 = vadd.f32 %v12381_v35, %v12380_v63  ;;  %12382 = vst [vmem:[#allocation210_spill] sm:$0xff] %v9571_v39  ;;  %v12385_v5 = vld [vmem:[#allocation91_spill] sm:$0xff] }
 0x4f4   : > { %v12383_v44 = vrot.slane %v9133_v62, 1  ;;  %v3832_v57 = vsel %vm767_vm1, %v3829_v0, %v3831_v59  ;;  %v3935_v40 = vrot.slane %v3925_v18, 1  ;;  %v1993_v28 = vadd.f32 %v12384_v52, %v1889_v15  ;;  %v12386_v62 = vld [vmem:[#allocation92_spill] sm:$0xff]  ;;  %v12387_v35 = vld [vmem:[#allocation95_spill] sm:$0xff]  ;;  %v12389_v15 = vld [vmem:[#allocation98_spill] sm:$0xff]  ;;  %v9593_v18 = vpop.permute.xlu2 %3607 }
 0x4f5   : > { %v1941_v10 = vadd.f32 %v12385_v5, %v1837_v47  ;;  %v11494_v63 = vrot.slane %v9554_v8, 1  ;;  %v3964_v49 = vmul.f32 %v9396_v56, %v12153_v26  ;;  %v1968_v25 = vadd.f32 %v12386_v62, %v1864_v33  ;;  %v12388_v0 = vld [vmem:[#allocation96_spill] sm:$0xff]  ;;  %12390 = vst [vmem:[#allocation273_spill] sm:$0xff] %v9593_v18  ;;  %v12403_v26 = vld [vmem:[#allocation121_spill] sm:$0xff] }
 0x4f6   : > { %v3865_v19 = vsel %vm767_vm1, %v12383_v44, %v3864_v51  ;;  %3839 = vrot.lane.b32.xlu1 %v3832_v57, %s11814_s25  ;;  %v1916_v44 = vadd.f32 %v12387_v35, %v1812_v53  ;;  %v1943_v59 = vadd.f32 %v12388_v0, %v1839_v50  ;;  %v11497_v52 = vrot.slane %v9562_v1, 1  ;;  %v12393_v50 = vld [vmem:[#allocation104_spill] sm:$0xff] }
 0x4f7   : > { %3872 = vrot.lane.b32.xlu2 %v3865_v19, %s11814_s25  ;;  %v9591_v47 = vadd.f32 %v12389_v15, %v1890_v20  ;;  %v9595_v19 = vpop.permute.xlu1 %3531  ;;  %v11495_v57 = vrot.slane %v9567_v13, 1  ;;  %v3900_v56 = vsel %vm767_vm1, %v3898_v55, %v3899_v27  ;;  %v12392_v33 = vrot.slane %v9294_v21, 1  ;;  %v12396_v55 = vld [vmem:[#allocation106_spill] sm:$0xff] }
 0x4f8   : > { %12391 = vst [vmem:[#allocation181_spill] sm:$0xff] %v9595_v19  ;;  %v9606_v5 = vadd.f32 %v12393_v50, %v9492_v31  ;;  %v12394_v20 = vrot.slane %v9216_v46, 1  ;;  %v9612_v35 = vstv %s9541_s8  ;;  %v12395_v0 = vrot.slane %v9365_v36, 1  ;;  %v12398_v50 = vld [vmem:[#allocation107_spill] sm:$0xff]  ;;  %v12433_v19 = vld [vmem:[#allocation32_spill] sm:$0xff]  ;;  %s5202_s8 = sld [smem:[#allocation2 + $0x8a]] }
 0x4f9   : > { %v9602_v53 = vsel %vm767_vm1, %v3899_v27, %v12392_v33  ;;  %v1967_v21 = vadd.f32 %v12396_v55, %v1863_v22  ;;  %v4015_v27 = vsel %vm767_vm1, %v11495_v57, %v11494_v63  ;;  %v9627_v46 = vmul.f32 %v9612_v35, %v12379_v42  ;;  %v12401_v55 = vld [vmem:[#allocation108_spill] sm:$0xff]  ;;  %v12402_v57 = vld [vmem:[#allocation118_spill] sm:$0xff] }
 0x4fa   : > { %v3867_v62 = vsel %vm767_vm1, %v3864_v51, %v12394_v20  ;;  %v9617_v15 = vsel %vm767_vm1, %v3935_v40, %v12395_v0  ;;  %v3975_v31 = vrot.slane %v3964_v49, 1  ;;  %v12397_v51 = vld [vmem:[#allocation105_spill] sm:$0xff]  ;;  %v2019_v36 = vadd.f32 %v12398_v50, %v1915_v37  ;;  %v12399_v20 = vld [vmem:[#allocation127_spill] sm:$0xff]  ;;  %4022 = vrot.lane.b32.xlu0 %v4015_v27, %s11814_s25 }
 0x4fb   : > { %v1918_v33 = vadd.f32 %v12397_v51, %v1814_v41  ;;  %v1970_v40 = vadd.f32 %v12399_v20, %v1866_v7  ;;  %v12400_v22 = vrot.slane %v9354_v45, 1  ;;  %v1996_v63 = vadd.f32 %v12401_v55, %v1892_v54  ;;  %v12404_v51 = vld [vmem:[#allocation47_spill] sm:$0xff]  ;;  %v12405_v37 = vld [vmem:[#allocation109_spill] sm:$0xff]  ;;  %v9651_v20 = vpop.permute.xlu0 %3659  ;;  %v12411_v55 = vld [vmem:[#allocation34_spill] sm:$0xff] }
 0x4fc   : > { %v1995_v49 = vadd.f32 %v12402_v57, %v9523_v43  ;;  %v2045_v41 = vadd.f32 %v12403_v26, %v1941_v10  ;;  %v9646_v7 = vmul.f32 %v9612_v35, %v12404_v51  ;;  %v1942_v27 = vadd.f32 %v12405_v37, %v1838_v17  ;;  %v12406_v50 = vld [vmem:[#allocation115_spill] sm:$0xff]  ;;  %12407 = vst [vmem:[#allocation275_spill] sm:$0xff] %v9651_v20  ;;  %v9682_v18 = vpop.permute.xlu2 %3613 }
 0x4fd   : > { %v9638_v0 = vsel %vm767_vm1, %v12400_v22, %v11497_v52  ;;  %v1917_v45 = vadd.f32 %v12406_v50, %v9513_v12  ;;  %v3892_v54 = vmul.f32 %v9268_v4, %v12095_v48  ;;  %v3929_v43 = vmul.f32 %v9345_v2, %v12095_v48  ;;  %v12408_v57 = vld [vmem:[#allocation99_spill] sm:$0xff]  ;;  %12417 = vst [vmem:[#allocation278_spill] sm:$0xff] %v9682_v18 }
 0x4fe   : > { %v2071_v10 = vadd.f32 %v12408_v57, %v1967_v21  ;;  %3874 = vrot.lane.b32.xlu1 %v3867_v62, %s11814_s25  ;;  %v12409_v17 = vrot.slane %v9418_v29, 1  ;;  %v12410_v22 = vrot.slane %v9497_v14, 1  ;;  %v9672_v2 = vadd.f32 %v12411_v55, %v2019_v36  ;;  %v12412_v21 = vld [vmem:[#allocation123_spill] sm:$0xff]  ;;  %v12414_v57 = vld [vmem:[#allocation120_spill] sm:$0xff]  ;;  %v12420_v55 = vld [vmem:[#allocation117_spill] sm:$0xff] }
 0x4ff   : > { %3907 = vrot.lane.b32.xlu2 %v3900_v56, %s11814_s25  ;;  %v2074_v37 = vadd.f32 %v12412_v21, %v1970_v40  ;;  %v12413_v56 = vld [vmem:[#allocation131_spill] sm:$0xff]  ;;  %v9677_v62 = vstv %s9587_s0  ;;  %v2099_v52 = vadd.f32 %v12414_v57, %v1995_v49  ;;  %v9684_v14 = vpop.permute.xlu1 %3555  ;;  %v2021_v40 = vadd.f32 %v12420_v55, %v1917_v45  ;;  %s5203_s0 = sld [smem:[#allocation2 + $0x8e]] }
 0x500   : > { %v9664_v12 = vsel %vm767_vm1, %v12409_v17, %v3975_v31  ;;  %v9669_v4 = vsel %vm767_vm1, %v3975_v31, %v12410_v22  ;;  %v2100_v50 = vadd.f32 %v12413_v56, %v1996_v63  ;;  %v12415_v29 = vld [vmem:[#allocation27_spill] sm:$0xff]  ;;  %v12416_v17 = vld [vmem:[#allocation130_spill] sm:$0xff]  ;;  %12418 = vst [vmem:[#allocation215_spill] sm:$0xff] %v9684_v14  ;;  %v11499_v31 = vrot.slane %v9646_v7, 1 }
 0x501   : > { %v2171_v26 = vadd.f32 %v12415_v29, %v2045_v41  ;;  %v2020_v48 = vadd.f32 %v12416_v17, %v1916_v44  ;;  %v12419_v36 = vld [vmem:[#allocation111_spill] sm:$0xff]  ;;  %v3905_v21 = vrot.slane %v3892_v54, 1  ;;  %v3942_v63 = vrot.slane %v3929_v43, 1  ;;  %v12421_v56 = vld [vmem:[#allocation110_spill] sm:$0xff]  ;;  %v12426_v54 = vld [vmem:[#allocation29_spill] sm:$0xff] }
 0x502   : > { %v2046_v22 = vadd.f32 %v12419_v36, %v1942_v27  ;;  %v9690_v20 = vadd.f32 %v12421_v56, %v1993_v28  ;;  %v12423_v49 = vrot.slane %v9627_v46, 1  ;;  %v12424_v41 = vld [vmem:[#allocation35_spill] sm:$0xff]  ;;  %v9701_v29 = vmul.f32 %v9677_v62, %v12404_v51  ;;  %v12425_v27 = vld [vmem:[#allocation116_spill] sm:$0xff]  ;;  %v12427_v17 = vld [vmem:[#allocation54_spill] sm:$0xff] }
 0x503   : > { %v4073_v57 = vmul.f32 %v9677_v62, %v12424_v41  ;;  %v2072_v45 = vadd.f32 %v12425_v27, %v1968_v25  ;;  %v2208_v43 = vadd.f32 %v12426_v54, %v2071_v10  ;;  %v2211_v28 = vadd.f32 %v12427_v17, %v2074_v37  ;;  %v12428_v36 = vld [vmem:[#allocation67_spill] sm:$0xff]  ;;  %v12429_v56 = vld [vmem:[#allocation49_spill] sm:$0xff]  ;;  %v9714_v27 = vpop.permute.xlu0 %3665 }
 0x504   : > { %12422 = vst [vmem:[#allocation223_spill] sm:$0xff] %v9690_v20  ;;  %v4050_v44 = vsel %vm767_vm1, %v11499_v31, %v12423_v49  ;;  %v2248_v55 = vadd.f32 %v12428_v36, %v2100_v50  ;;  %v2247_v18 = vadd.f32 %v12429_v56, %v2099_v52  ;;  %v12430_v49 = vld [vmem:[#allocation125_spill] sm:$0xff]  ;;  %v2319_v39 = vadd.f32 %v12432_v32, %v2171_v26  ;;  %v12441_v26 = vld [vmem:[#allocation100_spill] sm:$0xff]  ;;  %v12446_v36 = vld [vmem:[#allocation78_spill] sm:$0xff] }
 0x505   : > { %4057 = vrot.lane.b32.xlu0 %v4050_v44, %s11814_s25  ;;  %v2047_v31 = vadd.f32 %v12430_v49, %v1943_v59  ;;  %v12431_v20 = vld [vmem:[#allocation33_spill] sm:$0xff]  ;;  %v2172_v3 = vadd.f32 %v12433_v19, %v2046_v22  ;;  %v2136_v25 = vadd.f32 %v12434_v34, %v2021_v40  ;;  %12435 = vst [vmem:[#allocation282_spill] sm:$0xff] %v9714_v27  ;;  %v12436_v10 = vrot.slane %v9277_v9, 1  ;;  %v12439_v59 = vld [vmem:[#allocation128_spill] sm:$0xff]  ;;  %v12442_v40 = vld [vmem:[#allocation103_spill] sm:$0xff]  ;;  %v9745_v49 = vpop.permute.xlu2 %3637 }
 0x506   : > { %v2135_v14 = vadd.f32 %v12431_v20, %v2020_v48  ;;  %v12437_v50 = vrot.slane %v9562_v1, 1  ;;  %v12438_v48 = vld [vmem:[#allocation113_spill] sm:$0xff]  ;;  %v2022_v19 = vadd.f32 %v12439_v59, %v1918_v33  ;;  %3909 = vrot.lane.b32.xlu1 %v9602_v53, %s11814_s25  ;;  %v4083_v34 = vrot.slane %v4073_v57, 1  ;;  %v12440_v20 = vld [vmem:[#allocation52_spill] sm:$0xff]  ;;  %v12445_v33 = vld [vmem:[#allocation94_spill] sm:$0xff]  ;;  %12448 = vst [vmem:[#allocation198_spill] sm:$0xff] %v9745_v49 }
 0x507   : > { %v3906_v37 = vsel %vm767_vm1, %v12436_v10, %v3905_v21  ;;  %v1944_v32 = vadd.f32 %v12438_v48, %v9488_v60  ;;  %v11501_v9 = vrot.slane %v9701_v29, 1  ;;  %v9734_v1 = vadd.f32 %v12440_v20, %v2072_v45  ;;  %v12444_v60 = vld [vmem:[#allocation60_spill] sm:$0xff]  ;;  %v9747_v10 = vpop.permute.xlu1 %3561  ;;  %v12449_v45 = vld [vmem:[#allocation126_spill] sm:$0xff]  ;;  %v12453_v59 = vld [vmem:[#allocation63_spill] sm:$0xff] }
 0x508   : > { %v9722_v52 = vsel %vm767_vm1, %v12437_v50, %v3942_v63  ;;  %3913 = vrot.lane.b32.xlu2 %v3906_v37, %s11814_s25  ;;  %v2356_v22 = vadd.f32 %v12441_v26, %v2208_v43  ;;  %v2359_v21 = vadd.f32 %v12442_v40, %v2211_v28  ;;  %v12443_v63 = vld [vmem:[#allocation83_spill] sm:$0xff]  ;;  %v9740_v54 = vadd.f32 %v12444_v60, %v2047_v31  ;;  %v12447_v53 = vld [vmem:[#allocation112_spill] sm:$0xff]  ;;  %v12450_v43 = vld [vmem:[#allocation133_spill] sm:$0xff] }
 0x509   : > { %v2396_v44 = vadd.f32 %v12443_v63, %v2248_v55  ;;  %v2395_v17 = vadd.f32 %v12445_v33, %v2247_v18  ;;  %v2283_v56 = vadd.f32 %v12446_v36, %v2135_v14  ;;  %v2467_v57 = vadd.f32 %v12447_v53, %v2319_v39  ;;  %v12451_v55 = vld [vmem:[#allocation140_spill] sm:$0xff]  ;;  %v12452_v31 = vld [vmem:[#allocation90_spill] sm:$0xff]  ;;  %v12454_v14 = vld [vmem:[#allocation97_spill] sm:$0xff] }
 0x50a   : > { %v9750_v37 = vadd.f32 %v12449_v45, %v2356_v22  ;;  %v2098_v28 = vadd.f32 %v12450_v43, %v9591_v47  ;;  %v2284_v48 = vadd.f32 %v12452_v31, %v2136_v25  ;;  %v9757_v18 = vadd.f32 %v12453_v59, %v2022_v19  ;;  %v12455_v22 = vld [vmem:[#allocation129_spill] sm:$0xff]  ;;  %v12456_v47 = vld [vmem:[#allocation136_spill] sm:$0xff]  ;;  %v12457_v25 = vld [vmem:[#allocation167_spill] sm:$0xff] }
 0x50b   : > { %v2544_v50 = vadd.f32 %v12451_v55, %v2396_v44  ;;  %v2320_v20 = vadd.f32 %v12454_v14, %v2172_v3  ;;  %v4085_v39 = vsel %vm767_vm1, %v4083_v34, %v11501_v9  ;;  %v4077_v26 = vmul.f32 %v9677_v62, %v12105_v6  ;;  %v12458_v19 = vld [vmem:[#allocation124_spill] sm:$0xff]  ;;  %v12460_v53 = vld [vmem:[#allocation37_spill] sm:$0xff]  ;;  %v12461_v43 = vld [vmem:[#allocation114_spill] sm:$0xff] }
 0x50c   : > { %v9766_v40 = vadd.f32 %v12455_v22, %v2359_v21  ;;  %v2073_v63 = vadd.f32 %v12456_v47, %v9606_v5  ;;  %v3999_v3 = vmul.f32 %v9539_v24, %v12424_v41  ;;  %v2431_v60 = vadd.f32 %v12458_v19, %v2283_v56  ;;  %v12459_v5 = vld [vmem:[#allocation132_spill] sm:$0xff]  ;;  %v12462_v56 = vld [vmem:[#allocation135_spill] sm:$0xff]  ;;  %v12463_v14 = vld [vmem:[#allocation102_spill] sm:$0xff] }
 0x50d   : > { %v2692_v44 = vadd.f32 %v12457_v25, %v2544_v50  ;;  %4092 = vrot.lane.b32.xlu0 %v4085_v39, %s11814_s25  ;;  %v9777_v34 = vmul.f32 %v9677_v62, %v11930_v30  ;;  %v4000_v21 = vmul.f32 %v9539_v24, %v12404_v51  ;;  %v4036_v33 = vmul.f32 %v9612_v35, %v12424_v41  ;;  %v9786_v50 = vpop.permute.xlu0 %3689  ;;  %v12466_v47 = vld [vmem:[#allocation139_spill] sm:$0xff]  ;;  %v12467_v19 = vld [vmem:[#allocation165_spill] sm:$0xff]  ;;  %v12476_v9 = vld [vmem:[#allocation170_spill] sm:$0xff] }
 0x50e   : > { %v2543_v36 = vadd.f32 %v12459_v5, %v2395_v17  ;;  %v2246_v45 = vadd.f32 %v12460_v53, %v2098_v28  ;;  %v2432_v55 = vadd.f32 %v12461_v43, %v2284_v48  ;;  %v9789_v31 = vstv %s9724_s13  ;;  %3944 = vrot.lane.b32.xlu1 %v9617_v15, %s11814_s25  ;;  %v12465_v28 = vld [vmem:[#allocation40_spill] sm:$0xff]  ;;  %v9804_v53 = vpop.permute.xlu2 %3661  ;;  %v12513_v27 = vld [vmem:[#allocation185_spill] sm:$0xff]  ;;  %s5204_s13 = sld [smem:[#allocation2 + $0x83]] }
 0x50f   : > { %v2579_v59 = vadd.f32 %v12462_v56, %v2431_v60  ;;  %v2468_v39 = vadd.f32 %v12463_v14, %v2320_v20  ;;  %v4090_v22 = vrot.slane %v4077_v26, 1  ;;  %v9799_v17 = vmul.f32 %v9789_v31, %v12379_v42  ;;  %12468 = vst [vmem:[#allocation244_spill] sm:$0xff] %v9804_v53  ;;  %v9806_v20 = vpop.permute.xlu1 %3585 }
 0x510   : > { %3948 = vrot.lane.b32.xlu2 %v9638_v0, %s11814_s25  ;;  %v2210_v48 = vadd.f32 %v12465_v28, %v2073_v63  ;;  %v2048_v25 = vadd.f32 %v12466_v47, %v1944_v32  ;;  %v2840_v5 = vadd.f32 %v12467_v19, %v2692_v44  ;;  %v4009_v60 = vrot.slane %v3999_v3, 1  ;;  %v12469_v63 = vld [vmem:[#allocation143_spill] sm:$0xff]  ;;  %v12470_v32 = vld [vmem:[#allocation236_spill] sm:$0xff]  ;;  %v12472_v28 = vld [vmem:[#allocation154_spill] sm:$0xff] }
 0x511   : > { %12464 = vst [vmem:[#allocation227_spill] sm:$0xff] %v9799_v17  ;;  %v11505_v0 = vrot.slane %v9777_v34, 1  ;;  %v4010_v43 = vrot.slane %v4000_v21, 1  ;;  %v4046_v15 = vrot.slane %v4036_v33, 1  ;;  %v9813_v26 = vmul.f32 %v9677_v62, %v12379_v42  ;;  %v12471_v21 = vld [vmem:[#allocation70_spill] sm:$0xff]  ;;  %v12474_v19 = vld [vmem:[#allocation43_spill] sm:$0xff] }
 0x512   : > { %v2580_v56 = vadd.f32 %v12469_v63, %v2432_v55  ;;  %v2988_v14 = vadd.f32 %v12470_v32, %v2840_v5  ;;  %v9821_v44 = vmul.f32 %v9789_v31, %v12424_v41  ;;  %v9825_v3 = vmul.f32 %v9789_v31, %v12404_v51  ;;  %v12475_v63 = vld [vmem:[#allocation85_spill] sm:$0xff]  ;;  %v12477_v51 = vld [vmem:[#allocation304_spill] sm:$0xff] }
 0x513   : > { %v2282_v33 = vadd.f32 %v12471_v21, %v9672_v2  ;;  %v2691_v62 = vadd.f32 %v12472_v28, %v2543_v36  ;;  %v4091_v55 = vsel %vm767_vm1, %v11505_v0, %v4090_v22  ;;  %v9835_v47 = vmul.f32 %v9789_v31, %v11930_v30  ;;  %v12478_v2 = vld [vmem:[#allocation138_spill] sm:$0xff]  ;;  %v12479_v21 = vld [vmem:[#allocation75_spill] sm:$0xff]  ;;  %v12480_v22 = vld [vmem:[#allocation201_spill] sm:$0xff] }
 0x514   : > { %v2174_v5 = vadd.f32 %v12474_v19, %v2048_v25  ;;  %v2394_v32 = vadd.f32 %v12475_v63, %v2246_v45  ;;  %v2728_v41 = vadd.f32 %v12476_v9, %v2580_v56  ;;  %v3136_v42 = vadd.f32 %v12477_v51, %v2988_v14  ;;  %v12483_v56 = vld [vmem:[#allocation101_spill] sm:$0xff] }
 0x515   : > { %12473 = vst [vmem:[#allocation283_spill] sm:$0xff] %v9835_v47  ;;  %4098 = vrot.lane.b32.xlu0 %v4091_v55, %s11814_s25  ;;  %v9843_v36 = vadd.f32 %v12478_v2, %v2467_v57  ;;  %v9846_v28 = vadd.f32 %v12479_v21, %v2210_v48  ;;  %v2839_v0 = vadd.f32 %v12480_v22, %v2691_v62  ;;  %v11508_v53 = vrot.slane %v9799_v17, 1  ;;  %v9850_v49 = vpop.permute.xlu0 %3724  ;;  %v12485_v62 = vld [vmem:[#allocation79_spill] sm:$0xff]  ;;  %v12486_v55 = vld [vmem:[#allocation168_spill] sm:$0xff]  ;;  %v12487_v63 = vld [vmem:[#allocation301_spill] sm:$0xff] }
 0x516   : > { %v4011_v45 = vsel %vm767_vm1, %v4009_v60, %v4010_v43  ;;  %v12481_v9 = vrot.slane %v9567_v13, 1  ;;  %v12482_v25 = vrot.slane %v9646_v7, 1  ;;  %v9865_v14 = vadd.f32 %v12483_v56, %v2282_v33  ;;  %3950 = vrot.lane.b32.xlu1 %v9722_v52, %s11814_s25  ;;  %v12488_v2 = vld [vmem:[#allocation146_spill] sm:$0xff] }
 0x517   : > { %v11507_v13 = vrot.slane %v9835_v47, 1  ;;  %v2285_v33 = vadd.f32 %v12485_v62, %v9757_v18  ;;  %v2876_v19 = vadd.f32 %v12486_v55, %v2728_v41  ;;  %v2616_v21 = vadd.f32 %v12488_v2, %v2468_v39  ;;  %v12489_v52 = vld [vmem:[#allocation194_spill] sm:$0xff]  ;;  %v12491_v18 = vld [vmem:[#allocation251_spill] sm:$0xff] }
 0x518   : > { %v9856_v51 = vsel %vm767_vm1, %v4010_v43, %v12481_v9  ;;  %v9861_v57 = vsel %vm767_vm1, %v4046_v15, %v12482_v25  ;;  %3983 = vrot.lane.b32.xlu2 %v9664_v12, %s11814_s25  ;;  %v12484_v43 = vld [vmem:[#allocation88_spill] sm:$0xff]  ;;  %v3284_v12 = vadd.f32 %v12487_v63, %v3136_v42  ;;  %v2987_v22 = vadd.f32 %v12489_v52, %v2839_v0  ;;  %v9881_v9 = vpop.permute.xlu2 %3685  ;;  %v9883_v25 = vpop.permute.xlu1 %3609  ;;  %v12492_v41 = vld [vmem:[#allocation242_spill] sm:$0xff]  ;;  %v12494_v0 = vld [vmem:[#allocation157_spill] sm:$0xff] }
 0x519   : > { %v2322_v15 = vadd.f32 %v12484_v43, %v2174_v5  ;;  %12490 = vst [vmem:[#allocation197_spill] sm:$0xff] %v9881_v9  ;;  %v4003_v56 = vmul.f32 %v9539_v24, %v12105_v6  ;;  %v9889_v5 = vmul.f32 %v9612_v35, %v11930_v30  ;;  %v3024_v43 = vadd.f32 %v12491_v18, %v2876_v19  ;;  %v12495_v63 = vld [vmem:[#allocation203_spill] sm:$0xff]  ;;  %v12496_v19 = vld [vmem:[#allocation142_spill] sm:$0xff]  ;;  %v12497_v18 = vld [vmem:[#allocation173_spill] sm:$0xff] }
 0x51a   : > { %v3388_v62 = vadd.f32 %v12492_v41, %v3284_v12  ;;  %v9894_v42 = vstv %s9809_s9  ;;  %v9897_v39 = vstv %s9817_s30  ;;  %v2727_v55 = vadd.f32 %v12494_v0, %v2579_v59  ;;  %v12498_v7 = vld [vmem:[#allocation306_spill] sm:$0xff]  ;;  %v12501_v30 = vld [vmem:[#allocation68_spill] sm:$0xff]  ;;  %s5205_s9 = sld [smem:[#allocation2 + $0x87]] }
 0x51b   : > { %12493 = vst [vmem:[#allocation300_spill] sm:$0xff] %v9894_v42  ;;  %v3135_v2 = vadd.f32 %v12495_v63, %v2987_v22  ;;  %v4126_v24 = vsel %vm767_vm1, %v11508_v53, %v11507_v13  ;;  %v9908_v52 = vmul.f32 %v9894_v42, %v6107_v61  ;;  %v2470_v12 = vadd.f32 %v12496_v19, %v2322_v15  ;;  %v12499_v22 = vld [vmem:[#allocation217_spill] sm:$0xff]  ;;  %v12500_v63 = vld [vmem:[#allocation219_spill] sm:$0xff]  ;;  %s5206_s30 = sld [smem:[#allocation2 + $0x8b]] }
 0x51c   : > { %v2764_v41 = vadd.f32 %v12497_v18, %v2616_v21  ;;  %v3172_v60 = vadd.f32 %v12498_v7, %v3024_v43  ;;  %v3492_v59 = vadd.f32 %v9469_v38, %v3388_v62  ;;  %v2875_v0 = vadd.f32 %v12499_v22, %v2727_v55  ;;  %v12502_v53 = vld [vmem:[#allocation57_spill] sm:$0xff]  ;;  %v12503_v15 = vld [vmem:[#allocation119_spill] sm:$0xff]  ;;  %v12512_v22 = vld [vmem:[#allocation260_spill] sm:$0xff] }
 0x51d   : > { %4133 = vrot.lane.b32.xlu0 %v4126_v24, %s11814_s25  ;;  %v3283_v48 = vadd.f32 %v12500_v63, %v3135_v2  ;;  %v9919_v13 = vmul.f32 %v9894_v42, %v12501_v30  ;;  %v4184_v9 = vmul.f32 %v9897_v39, %v12502_v53  ;;  %v9924_v19 = vadd.f32 %v12503_v15, %v2285_v33  ;;  %v9926_v21 = vpop.permute.xlu0 %3759  ;;  %v12506_v2 = vld [vmem:[#allocation148_spill] sm:$0xff]  ;;  %v12508_v15 = vld [vmem:[#allocation171_spill] sm:$0xff] }
 0x51e   : > { %v9930_v38 = vmul.f32 %v9897_v39, %v12501_v30  ;;  %v12504_v7 = vrot.slane %v9813_v26, 1  ;;  %v12505_v43 = vrot.slane %v9701_v29, 1  ;;  %v9941_v55 = vmul.f32 %v9612_v35, %v12105_v6  ;;  %3985 = vrot.lane.b32.xlu1 %v9669_v4, %s11814_s25  ;;  %v12507_v29 = vld [vmem:[#allocation149_spill] sm:$0xff] }
 0x51f   : > { %v2542_v33 = vadd.f32 %v12506_v2, %v2394_v32  ;;  %v4016_v18 = vrot.slane %v4003_v56, 1  ;;  %v2652_v63 = vadd.f32 %v12507_v29, %v9750_v37  ;;  %v3596_v47 = vadd.f32 %v9440_v16, %v3492_v59  ;;  %v12510_v32 = vld [vmem:[#allocation205_spill] sm:$0xff]  ;;  %v12514_v16 = vld [vmem:[#allocation160_spill] sm:$0xff]  ;;  %v12515_v59 = vld [vmem:[#allocation211_spill] sm:$0xff] }
 0x520   : > { %v9937_v62 = vsel %vm767_vm1, %v12505_v43, %v12504_v7  ;;  %4018 = vrot.lane.b32.xlu2 %v4011_v45, %s11814_s25  ;;  %v2912_v7 = vadd.f32 %v12508_v15, %v2764_v41  ;;  %v12509_v43 = vld [vmem:[#allocation305_spill] sm:$0xff]  ;;  %v3023_v2 = vadd.f32 %v12510_v32, %v2875_v0  ;;  %v12511_v45 = vld [vmem:[#allocation26_spill] sm:$0xff]  ;;  %v3692_v42 = vpop.permute.xlu2 %3691  ;;  %v9956_v4 = vpop.permute.xlu1 %3633  ;;  %v4158_v56 = vrot.slane %v9919_v13, 1 }
 0x521   : > { %v3309_v35 = vadd.f32 %v12509_v43, %v3172_v60  ;;  %v3387_v53 = vadd.f32 %v12511_v45, %v3283_v48  ;;  %v4194_v24 = vrot.slane %v4184_v9, 1  ;;  %v9961_v29 = vadd.f32 %v3692_v42, %v3596_v47 }
 0x522   : > { %v3060_v17 = vadd.f32 %v12512_v22, %v2912_v7  ;;  %v11513_v60 = vrot.slane %v9930_v38, 1  ;;  %v2763_v41 = vadd.f32 %v12514_v16, %v9843_v36  ;;  %v3171_v0 = vadd.f32 %v12515_v59, %v3023_v2  ;;  %v12517_v22 = vld [vmem:[#allocation176_spill] sm:$0xff] }
 0x523   : > { %v3413_v37 = vadd.f32 %v12513_v27, %v3309_v35  ;;  %v3491_v48 = vadd.f32 %v9188_v58, %v3387_v53  ;;  %v12516_v15 = vrot.slane %v9908_v52, 1  ;;  %v2800_v7 = vadd.f32 %v12517_v22, %v2652_v63  ;;  %v12518_v27 = vld [vmem:[#allocation199_spill] sm:$0xff]  ;;  %v12520_v58 = vld [vmem:[#allocation141_spill] sm:$0xff]  ;;  %v12522_v2 = vld [vmem:[#allocation212_spill] sm:$0xff] }
 0x524   : > { %v3208_v47 = vadd.f32 %v12518_v27, %v3060_v17  ;;  %v12519_v36 = vrot.slane %v9554_v8, 1  ;;  %v2618_v53 = vadd.f32 %v12520_v58, %v2470_v12  ;;  %v12521_v35 = vld [vmem:[#allocation237_spill] sm:$0xff]  ;;  %v3308_v45 = vadd.f32 %v12522_v2, %v3171_v0  ;;  %v12527_v0 = vld [vmem:[#allocation151_spill] sm:$0xff] }
 0x525   : > { %v4161_v9 = vsel %vm767_vm1, %v4158_v56, %v12516_v15  ;;  %v3517_v42 = vadd.f32 %v9531_v23, %v3413_v37  ;;  %v2911_v32 = vadd.f32 %v12521_v35, %v2763_v41  ;;  %v3595_v63 = vadd.f32 %v9806_v20, %v3491_v48  ;;  %v12523_v17 = vld [vmem:[#allocation145_spill] sm:$0xff]  ;;  %v12524_v23 = vld [vmem:[#allocation147_spill] sm:$0xff]  ;;  %v9989_v59 = vpop.permute.xlu0 %3765  ;;  %v12528_v48 = vld [vmem:[#allocation152_spill] sm:$0xff] }
 0x526   : > { %4168 = vrot.lane.b32.xlu0 %v4161_v9, %s11814_s25  ;;  %v4017_v43 = vsel %vm767_vm1, %v12519_v36, %v4016_v18  ;;  %v2506_v16 = vadd.f32 %v12523_v17, %v9846_v28  ;;  %v2690_v37 = vadd.f32 %v12524_v23, %v2542_v33  ;;  %v4196_v8 = vsel %vm767_vm1, %v4194_v24, %v11513_v60  ;;  %v12529_v15 = vld [vmem:[#allocation163_spill] sm:$0xff]  ;;  %v12530_v9 = vld [vmem:[#allocation169_spill] sm:$0xff]  ;;  %v12535_v23 = vld [vmem:[#allocation80_spill] sm:$0xff] }
 0x527   : > { %v12525_v18 = vrot.slane %v9889_v5, 1  ;;  %v12526_v12 = vrot.slane %v9627_v46, 1  ;;  %v2578_v20 = vadd.f32 %v12527_v0, %v9865_v14  ;;  %v2655_v28 = vadd.f32 %v12528_v48, %v9766_v40  ;;  %4020 = vrot.lane.b32.xlu1 %v9856_v51, %s11814_s25  ;;  %v12531_v46 = vld [vmem:[#allocation174_spill] sm:$0xff]  ;;  %v12532_v36 = vld [vmem:[#allocation189_spill] sm:$0xff]  ;;  %v12534_v40 = vld [vmem:[#allocation267_spill] sm:$0xff] }
 0x528   : > { %v2766_v33 = vadd.f32 %v12529_v15, %v2618_v53  ;;  %4024 = vrot.lane.b32.xlu2 %v4017_v43, %s11814_s25  ;;  %v4053_v24 = vrot.slane %v9941_v55, 1  ;;  %v2838_v22 = vadd.f32 %v12530_v9, %v2690_v37  ;;  %v2948_v27 = vadd.f32 %v12531_v46, %v2800_v7  ;;  %v12533_v35 = vld [vmem:[#allocation229_spill] sm:$0xff]  ;;  %v3727_v53 = vpop.permute.xlu2 %3726  ;;  %v10014_v43 = vpop.permute.xlu1 %3639  ;;  %v12540_v48 = vld [vmem:[#allocation284_spill] sm:$0xff]  ;;  %v12577_v55 = vld [vmem:[#allocation214_spill] sm:$0xff] }
 0x529   : > { %v4052_v41 = vsel %vm767_vm1, %v12526_v12, %v12525_v18  ;;  %v3334_v58 = vadd.f32 %v12532_v36, %v3208_v47  ;;  %v3621_v14 = vadd.f32 %v9499_v11, %v3517_v42  ;;  %v3059_v2 = vadd.f32 %v12533_v35, %v2911_v32  ;;  %v12536_v7 = vld [vmem:[#allocation269_spill] sm:$0xff]  ;;  %v12537_v47 = vld [vmem:[#allocation270_spill] sm:$0xff] }
 0x52a   : > { %v3412_v17 = vadd.f32 %v12534_v40, %v3308_v45  ;;  %v10018_v51 = vmul.f32 %v9897_v39, %v12535_v23  ;;  %v10021_v37 = vadd.f32 %v9786_v50, %v3595_v63  ;;  %v3096_v18 = vadd.f32 %v12536_v7, %v2948_v27  ;;  %v12538_v11 = vld [vmem:[#allocation193_spill] sm:$0xff]  ;;  %v12539_v45 = vld [vmem:[#allocation188_spill] sm:$0xff]  ;;  %v12543_v50 = vld [vmem:[#allocation66_spill] sm:$0xff] }
 0x52b   : > { %v2986_v12 = vadd.f32 %v12537_v47, %v2838_v22  ;;  %v3438_v42 = vadd.f32 %v12538_v11, %v3334_v58  ;;  %v10026_v32 = vadd.f32 %v3727_v53, %v3621_v14  ;;  %v2803_v0 = vadd.f32 %v12539_v45, %v2655_v28  ;;  %v12541_v9 = vld [vmem:[#allocation297_spill] sm:$0xff]  ;;  %v12544_v40 = vld [vmem:[#allocation308_spill] sm:$0xff]  ;;  %v12549_v45 = vld [vmem:[#allocation155_spill] sm:$0xff] }
 0x52c   : > { %v3207_v15 = vadd.f32 %v12540_v48, %v3059_v2  ;;  %v3516_v46 = vadd.f32 %v12541_v9, %v3412_v17  ;;  %v12542_v36 = vld [vmem:[#allocation93_spill] sm:$0xff]  ;;  %v2321_v63 = vadd.f32 %v12543_v50, %v9740_v54  ;;  %v3244_v27 = vadd.f32 %v12544_v40, %v3096_v18  ;;  %v12546_v14 = vld [vmem:[#allocation144_spill] sm:$0xff]  ;;  %v12550_v54 = vld [vmem:[#allocation150_spill] sm:$0xff] }
 0x52d   : > { %v4188_v35 = vmul.f32 %v9897_v39, %v12542_v36  ;;  %v12545_v7 = vld [vmem:[#allocation181_spill] sm:$0xff]  ;;  %v10039_v58 = vstv %s9980_s1  ;;  %v2654_v28 = vadd.f32 %v12546_v14, %v2506_v16  ;;  %v12547_v53 = vld [vmem:[#allocation252_spill] sm:$0xff]  ;;  %v2581_v48 = vadd.f32 %v12549_v45, %v9924_v19  ;;  %v12551_v18 = vld [vmem:[#allocation266_spill] sm:$0xff]  ;;  %s5207_s1 = sld [smem:[#allocation2 + $0x8f]] }
 0x52e   : > { %v3542_v22 = vadd.f32 %v12545_v7, %v3438_v42  ;;  %4203 = vrot.lane.b32.xlu0 %v4196_v8, %s11814_s25  ;;  %v2914_v2 = vadd.f32 %v12547_v53, %v2766_v33  ;;  %v12548_v47 = vld [vmem:[#allocation249_spill] sm:$0xff]  ;;  %v3620_v11 = vadd.f32 %v9883_v25, %v3516_v46  ;;  %v2726_v9 = vadd.f32 %v12550_v54, %v2578_v20  ;;  %v10049_v42 = vpop.permute.xlu0 %3800  ;;  %v12552_v16 = vld [vmem:[#allocation166_spill] sm:$0xff]  ;;  %v12554_v20 = vld [vmem:[#allocation172_spill] sm:$0xff] }
 0x52f   : > { %v3333_v17 = vadd.f32 %v12548_v47, %v3207_v15  ;;  %v3134_v50 = vadd.f32 %v12551_v18, %v2986_v12  ;;  %v10053_v8 = vmul.f32 %v10039_v58, %v6107_v61  ;;  %v2802_v33 = vadd.f32 %v12552_v16, %v2654_v28  ;;  %v12553_v15 = vld [vmem:[#allocation182_spill] sm:$0xff]  ;;  %4055 = vrot.lane.b32.xlu1 %v9861_v57, %s11814_s25  ;;  %v12555_v46 = vld [vmem:[#allocation253_spill] sm:$0xff]  ;;  %v12556_v14 = vld [vmem:[#allocation263_spill] sm:$0xff] }
 0x530   : > { %v2951_v40 = vadd.f32 %v12553_v15, %v2803_v0  ;;  %4059 = vrot.lane.b32.xlu2 %v4052_v41, %s11814_s25  ;;  %v11518_v25 = vrot.slane %v10018_v51, 1  ;;  %v4201_v19 = vrot.slane %v4188_v35, 1  ;;  %v2874_v12 = vadd.f32 %v12554_v20, %v2726_v9  ;;  %v12557_v47 = vld [vmem:[#allocation210_spill] sm:$0xff]  ;;  %v12558_v54 = vld [vmem:[#allocation276_spill] sm:$0xff]  ;;  %v12559_v18 = vld [vmem:[#allocation247_spill] sm:$0xff]  ;;  %v3762_v15 = vpop.permute.xlu2 %3761  ;;  %v10070_v60 = vpop.permute.xlu1 %3663 }
 0x531   : > { %v3282_v7 = vadd.f32 %v12555_v46, %v3134_v50  ;;  %v3359_v53 = vadd.f32 %v12556_v14, %v3244_v27  ;;  %v3646_v45 = vadd.f32 %v12557_v47, %v3542_v22  ;;  %v3062_v0 = vadd.f32 %v12559_v18, %v2914_v2  ;;  %v12560_v16 = vld [vmem:[#allocation243_spill] sm:$0xff]  ;;  %v12561_v35 = vld [vmem:[#allocation277_spill] sm:$0xff]  ;;  %v12562_v20 = vld [vmem:[#allocation254_spill] sm:$0xff] }
 0x532   : > { %v3099_v28 = vadd.f32 %v12558_v54, %v2951_v40  ;;  %v3437_v41 = vadd.f32 %v12560_v16, %v3333_v17  ;;  %v10073_v57 = vadd.f32 %v9850_v49, %v3620_v11  ;;  %v3022_v9 = vadd.f32 %v12561_v35, %v2874_v12  ;;  %v12563_v46 = vld [vmem:[#allocation299_spill] sm:$0xff]  ;;  %v12564_v22 = vld [vmem:[#allocation294_spill] sm:$0xff]  ;;  %v12570_v16 = vld [vmem:[#allocation261_spill] sm:$0xff] }
 0x533   : > { %v3463_v50 = vadd.f32 %v12562_v20, %v3359_v53  ;;  %v3386_v27 = vadd.f32 %v12563_v46, %v3282_v7  ;;  %v10078_v14 = vadd.f32 %v3762_v15, %v3646_v45  ;;  %v3210_v40 = vadd.f32 %v12564_v22, %v3062_v0  ;;  %v12565_v47 = vld [vmem:[#allocation190_spill] sm:$0xff]  ;;  %v12568_v7 = vld [vmem:[#allocation215_spill] sm:$0xff]  ;;  %v12572_v20 = vld [vmem:[#allocation272_spill] sm:$0xff] }
 0x534   : > { %v3541_v2 = vadd.f32 %v12565_v47, %v3437_v41  ;;  %v4202_v17 = vsel %vm767_vm1, %v11518_v25, %v4201_v19  ;;  %v10087_v49 = vmul.f32 %v10039_v58, %v12535_v23  ;;  %v12566_v11 = vld [vmem:[#allocation122_spill] sm:$0xff]  ;;  %v10095_v18 = vmul.f32 %v9789_v31, %v12105_v6  ;;  %v12569_v19 = vld [vmem:[#allocation153_spill] sm:$0xff]  ;;  %v12571_v15 = vld [vmem:[#allocation239_spill] sm:$0xff] }
 0x535   : > { %v2469_v12 = vadd.f32 %v12566_v11, %v2321_v63  ;;  %v12567_v53 = vld [vmem:[#allocation202_spill] sm:$0xff]  ;;  %v3567_v45 = vadd.f32 %v12568_v7, %v3463_v50  ;;  %v2729_v0 = vadd.f32 %v12569_v19, %v2581_v48  ;;  %v2950_v41 = vadd.f32 %v12570_v16, %v2802_v33  ;;  %v12573_v46 = vld [vmem:[#allocation280_spill] sm:$0xff]  ;;  %v12576_v11 = vld [vmem:[#allocation175_spill] sm:$0xff] }
 0x536   : > { %v3247_v54 = vadd.f32 %v12567_v53, %v3099_v28  ;;  %4209 = vrot.lane.b32.xlu0 %v4202_v17, %s11814_s25  ;;  %v3336_v35 = vadd.f32 %v12571_v15, %v3210_v40  ;;  %v3645_v63 = vadd.f32 %v9956_v4, %v3541_v2  ;;  %v3170_v28 = vadd.f32 %v12572_v20, %v3022_v9  ;;  %v10105_v22 = vpop.permute.xlu0 %3835  ;;  %v12575_v48 = vld [vmem:[#allocation158_spill] sm:$0xff]  ;;  %v12580_v7 = vld [vmem:[#allocation275_spill] sm:$0xff]  ;;  %v12583_v20 = vld [vmem:[#allocation256_spill] sm:$0xff] }
 0x537   : > { %v3490_v50 = vadd.f32 %v12573_v46, %v3386_v27  ;;  %v12574_v31 = vrot.slane %v9889_v5, 1  ;;  %v10113_v17 = vstv %s10055_s10  ;;  %v2617_v33 = vadd.f32 %v12575_v48, %v2469_v12  ;;  %v12578_v5 = vld [vmem:[#allocation286_spill] sm:$0xff]  ;;  %v12628_v25 = vld [vmem:[#allocation296_spill] sm:$0xff]  ;;  %s243_s10 = sand.u32 1, %s5380_s19  }
 0x538   : > { %v2877_v40 = vadd.f32 %v12576_v11, %v2729_v0  ;;  %4094 = vrot.lane.b32.xlu2 %v9937_v62, %s11814_s25  ;;  %v11516_v4 = vrot.slane %v10053_v8, 1  ;;  %v11517_v9 = vrot.slane %v10087_v49, 1  ;;  %v3307_v27 = vadd.f32 %v12577_v55, %v3170_v28  ;;  %v12581_v12 = vld [vmem:[#allocation206_spill] sm:$0xff]  ;;  %v12582_v0 = vld [vmem:[#allocation259_spill] sm:$0xff]  ;;  %v3797_v46 = vpop.permute.xlu2 %3796  ;;  %v12585_v11 = vld [vmem:[#allocation184_spill] sm:$0xff] }
 0x539   : > { %v4054_v47 = vsel %vm767_vm1, %v12574_v31, %v4053_v24  ;;  %v3362_v2 = vadd.f32 %v12578_v5, %v3247_v54  ;;  %v12579_v24 = vld [vmem:[#allocation248_spill] sm:$0xff]  ;;  %v3671_v19 = vadd.f32 %v12580_v7, %v3567_v45  ;;  %v3098_v15 = vadd.f32 %v12582_v0, %v2950_v41  ;;  %v3688_v31 = vpop.permute.xlu1 %3687  ;;  %v12584_v48 = vld [vmem:[#allocation230_spill] sm:$0xff]  ;;  %v12586_v45 = vld [vmem:[#allocation303_spill] sm:$0xff] }
 0x53a   : > { %4061 = vrot.lane.b32.xlu1 %v4054_v47, %s11814_s25  ;;  %v3594_v53 = vadd.f32 %v12579_v24, %v3490_v50  ;;  %v3025_v16 = vadd.f32 %v12581_v12, %v2877_v40  ;;  %v3440_v62 = vadd.f32 %v12583_v20, %v3336_v35  ;;  %v10130_v47 = vadd.f32 %v9926_v21, %v3645_v63  ;;  %v12587_v5 = vld [vmem:[#allocation213_spill] sm:$0xff] }
 0x53b   : > { %v3466_v28 = vadd.f32 %v12584_v48, %v3362_v2  ;;  %v3411_v54 = vadd.f32 %v12585_v11, %v3307_v27  ;;  %v10134_v55 = vadd.f32 %v3797_v46, %v3671_v19  ;;  %v3246_v40 = vadd.f32 %v12586_v45, %v3098_v15  ;;  %v12588_v63 = vld [vmem:[#allocation73_spill] sm:$0xff]  ;;  %v12597_v45 = vld [vmem:[#allocation223_spill] sm:$0xff] }
 0x53c   : > { %v10136_v50 = vadd.f32 %v3688_v31, %v3594_v53  ;;  %v3544_v41 = vadd.f32 %v12587_v5, %v3440_v62  ;;  %v4237_v35 = vsel %vm767_vm1, %v11516_v4, %v11517_v9  ;;  %v10147_v21 = vmul.f32 %v10113_v17, %v6107_v61  ;;  %v12589_v53 = vld [vmem:[#allocation234_spill] sm:$0xff]  ;;  %v12593_v62 = vld [vmem:[#allocation204_spill] sm:$0xff]  ;;  %v12594_v31 = vld [vmem:[#allocation287_spill] sm:$0xff] }
 0x53d   : > { %v2357_v27 = vadd.f32 %v12588_v63, %v9734_v1  ;;  %v3570_v2 = vadd.f32 %v9747_v10, %v3466_v28  ;;  %v10154_v24 = vstv %s10097_s11  ;;  %v3361_v7 = vadd.f32 %v12589_v53, %v3246_v40  ;;  %v12592_v1 = vld [vmem:[#allocation156_spill] sm:$0xff]  ;;  %v12598_v40 = vld [vmem:[#allocation38_spill] sm:$0xff]  ;;  %s5034_s11 = sshll.u32 %s243_s10, 7 }
 0x53e   : > { %4244 = vrot.lane.b32.xlu0 %v4237_v35, %s11814_s25  ;;  %v3648_v19 = vadd.f32 %v10014_v43, %v3544_v41  ;;  %v12590_v12 = vrot.slane %v9825_v3, 1  ;;  %v12591_v0 = vrot.slane %v9821_v44, 1  ;;  %v10165_v20 = vmul.f32 %v10113_v17, %v12501_v30  ;;  %v10170_v28 = vpop.permute.xlu0 %3870  ;;  %v12599_v41 = vld [vmem:[#allocation134_spill] sm:$0xff]  ;;  %v12626_v4 = vld [vmem:[#allocation164_spill] sm:$0xff] }
 0x53f   : > { %v2765_v10 = vadd.f32 %v12592_v1, %v2617_v33  ;;  %v3173_v46 = vadd.f32 %v12593_v62, %v3025_v16  ;;  %v3515_v48 = vadd.f32 %v12594_v31, %v3411_v54  ;;  %v12595_v43 = vrot.slane %v9777_v34, 1  ;;  %v12600_v54 = vld [vmem:[#allocation187_spill] sm:$0xff]  ;;  %v12601_v34 = vld [vmem:[#allocation25_spill] sm:$0xff] }
 0x540   : > { %v4122_v15 = vsel %vm767_vm1, %v12591_v0, %v12590_v12  ;;  %v12596_v11 = vrot.slane %v9813_v26, 1  ;;  %v2245_v5 = vadd.f32 %v12598_v40, %v12597_v45  ;;  %v2505_v35 = vadd.f32 %v12599_v41, %v2357_v27  ;;  %v12602_v26 = vld [vmem:[#allocation273_spill] sm:$0xff]  ;;  %v12603_v0 = vld [vmem:[#allocation282_spill] sm:$0xff] }
 0x541   : > { %4129 = vrot.lane.b32.xlu2 %v4122_v15, %s11814_s25  ;;  %v11515_v33 = vrot.slane %v10147_v21, 1  ;;  %v4127_v16 = vrot.slane %v10095_v18, 1  ;;  %v2913_v63 = vadd.f32 %v12600_v54, %v2765_v10  ;;  %v3310_v53 = vadd.f32 %v12601_v34, %v3173_v46  ;;  %v12604_v62 = vld [vmem:[#allocation161_spill] sm:$0xff]  ;;  %v3723_v15 = vpop.permute.xlu1 %3722  ;;  %v12611_v34 = vld [vmem:[#allocation11_spill] sm:$0xff] }
 0x542   : > { %v4089_v44 = vsel %vm767_vm1, %v12596_v11, %v12595_v43  ;;  %v3619_v12 = vadd.f32 %v12602_v26, %v3515_v48  ;;  %v3674_v1 = vadd.f32 %v12603_v0, %v3570_v2  ;;  %v2653_v31 = vadd.f32 %v12604_v62, %v2505_v35  ;;  %v12605_v43 = vld [vmem:[#allocation245_spill] sm:$0xff]  ;;  %v3803_v11 = vpop.permute.xlu2 %3802  ;;  %v12608_v2 = vld [vmem:[#allocation51_spill] sm:$0xff]  ;;  %v12609_v35 = vld [vmem:[#allocation12_spill] sm:$0xff] }
 0x543   : > { %4096 = vrot.lane.b32.xlu1 %v4089_v44, %s11814_s25  ;;  %v3465_v27 = vadd.f32 %v12605_v43, %v3361_v7  ;;  %v11514_v44 = vrot.slane %v10165_v20, 1  ;;  %v10192_v45 = vadd.f32 %v9989_v59, %v3648_v19  ;;  %v12606_v18 = vld [vmem:[#allocation233_spill] sm:$0xff]  ;;  %v10208_v59 = vmul.f32 %v10154_v24, %v12609_v35  ;;  %v12610_v19 = vld [vmem:[#allocation76_spill] sm:$0xff] }
 0x544   : > { %v3061_v40 = vadd.f32 %v12606_v18, %v2913_v63  ;;  %v12607_v10 = vld [vmem:[#allocation225_spill] sm:$0xff]  ;;  %v10196_v46 = vadd.f32 %v3803_v11, %v3674_v1  ;;  %v10198_v48 = vadd.f32 %v3723_v15, %v3619_v12  ;;  %v2393_v63 = vadd.f32 %v12610_v19, %v2245_v5  ;;  %v12612_v12 = vld [vmem:[#allocation227_spill] sm:$0xff]  ;;  %v12615_v43 = vld [vmem:[#allocation300_spill] sm:$0xff] }
 0x545   : > { %v3414_v41 = vadd.f32 %v12607_v10, %v3310_v53  ;;  %v3569_v54 = vadd.f32 %v12608_v2, %v3465_v27  ;;  %v4272_v7 = vsel %vm767_vm1, %v11514_v44, %v11515_v33  ;;  %v4295_v53 = vmul.f32 %v10154_v24, %v12611_v34  ;;  %v12616_v11 = vld [vmem:[#allocation57_spill] sm:$0xff]  ;;  %v12617_v15 = vld [vmem:[#allocation159_spill] sm:$0xff]  ;;  %v12618_v10 = vld [vmem:[#allocation238_spill] sm:$0xff] }
 0x546   : > { %4279 = vrot.lane.b32.xlu0 %v4272_v7, %s11814_s25  ;;  %v12613_v0 = vrot.slane %v12612_v12, 1  ;;  %v12614_v1 = vrot.slane %v9825_v3, 1  ;;  %v10222_v27 = vmul.f32 %v12615_v43, %v12535_v23  ;;  %v4147_v5 = vmul.f32 %v12615_v43, %v12616_v11  ;;  %v12619_v7 = vld [vmem:[#allocation222_spill] sm:$0xff]  ;;  %v12623_v33 = vld [vmem:[#allocation200_spill] sm:$0xff] }
 0x547   : > { %v3673_v26 = vadd.f32 %v10070_v60, %v3569_v54  ;;  %v2801_v18 = vadd.f32 %v12617_v15, %v2653_v31  ;;  %v3209_v2 = vadd.f32 %v12618_v10, %v3061_v40  ;;  %v3518_v19 = vadd.f32 %v12619_v7, %v3414_v41  ;;  %v10229_v60 = vpop.permute.xlu0 %3876  ;;  %v12620_v54 = vld [vmem:[#allocation283_spill] sm:$0xff]  ;;  %v12625_v10 = vld [vmem:[#allocation278_spill] sm:$0xff] }
 0x548   : > { %v4124_v62 = vsel %vm767_vm1, %v12614_v1, %v12613_v0  ;;  %v12621_v12 = vrot.slane %v12620_v54, 1  ;;  %v12622_v0 = vld [vmem:[#allocation137_spill] sm:$0xff]  ;;  %v4306_v44 = vrot.slane %v10208_v59, 2  ;;  %v12624_v15 = vld [vmem:[#allocation183_spill] sm:$0xff]  ;;  %v4305_v7 = vrot.slane %v4295_v53, 2 }
 0x549   : > { %v2541_v1 = vadd.f32 %v12622_v0, %v2393_v63  ;;  %v2949_v31 = vadd.f32 %v12623_v33, %v2801_v18  ;;  %v3335_v40 = vadd.f32 %v12624_v15, %v3209_v2  ;;  %v3622_v41 = vadd.f32 %v12625_v10, %v3518_v19  ;;  %v12629_v53 = vld [vmem:[#allocation15_spill] sm:$0xff]  ;;  %v12633_v15 = vld [vmem:[#allocation292_spill] sm:$0xff] }
 0x54a   : > { %v4128_v3 = vsel %vm767_vm1, %v12621_v12, %v4127_v16  ;;  %v3838_v9 = vpop.permute.xlu2 %3837  ;;  %v3729_v16 = vpop.permute.xlu1 %3728  ;;  %v4162_v63 = vrot.slane %v10222_v27, 1  ;;  %v4157_v12 = vrot.slane %v4147_v5, 1  ;;  %v4299_v27 = vmul.f32 %v10154_v24, %v12629_v53  ;;  %v12631_v5 = vld [vmem:[#allocation162_spill] sm:$0xff] }
 0x54b   : > { %4135 = vrot.lane.b32.xlu2 %v4128_v3, %s11814_s25  ;;  %4131 = vrot.lane.b32.xlu1 %v4124_v62, %s11814_s25  ;;  %v2689_v54 = vadd.f32 %v12626_v4, %v2541_v1  ;;  %v10244_v3 = vadd.f32 %v10049_v42, %v3673_v26  ;;  %v12627_v62 = vld [vmem:[#allocation285_spill] sm:$0xff]  ;;  %v3439_v33 = vadd.f32 %v12628_v25, %v3335_v40  ;;  %v12630_v26 = vld [vmem:[#allocation14_spill] sm:$0xff]  ;;  %v12632_v1 = vld [vmem:[#allocation20_spill] sm:$0xff]  ;;  %v12634_v13 = vrot.slane %v9908_v52, 1 }
 0x54c   : > { %v3097_v0 = vadd.f32 %v12627_v62, %v2949_v31  ;;  %v10249_v18 = vadd.f32 %v3838_v9, %v10021_v37  ;;  %v10251_v2 = vadd.f32 %v3729_v16, %v3622_v41  ;;  %v4307_v4 = vsel %vm1232_vm2, %v4305_v7, %v4306_v44  ;;  %v12635_v41 = vld [vmem:[#allocation216_spill] sm:$0xff] }
 0x54d   : > { %v4159_v42 = vsel %vm767_vm1, %v4157_v12, %v4158_v56  ;;  %v10264_v25 = vmul.f32 %v10154_v24, %v12630_v26  ;;  %v4186_v37 = vmul.f32 %v9897_v39, %v6107_v61  ;;  %v4151_v9 = vmul.f32 %v12615_v43, %v12542_v36  ;;  %v12636_v43 = vld [vmem:[#allocation279_spill] sm:$0xff] }
 0x54e   : > { %4314 = vrot.lane.b32.xlu0 %v4307_v4, %s11814_s25  ;;  %v2837_v19 = vadd.f32 %v12631_v5, %v2689_v54  ;;  %v3245_v31 = vadd.f32 %v12632_v1, %v3097_v0  ;;  %v3543_v40 = vadd.f32 %v12633_v15, %v3439_v33  ;;  %v4163_v56 = vsel %vm767_vm1, %v12634_v13, %v4162_v63  ;;  %v12637_v54 = vld [vmem:[#allocation198_spill] sm:$0xff] }
 0x54f   : > { %v10273_v10 = vpop.permute.xlu0 %3911  ;;  %v4312_v39 = vrot.slane %v4299_v27, 2  ;;  %v10283_v62 = vstv %s5193_s12  ;;  %v4310_v4 = vrot.slane %v10264_v25, 2  ;;  %v4197_v52 = vrot.slane %v4186_v37, 1  ;;  %v12638_v27 = vld [vmem:[#allocation295_spill] sm:$0xff]  ;;  %s11100_s12 = scalar_lea.vmem [#allocation7], %s5034_s11 }
 0x550   : > { %v2985_v7 = vadd.f32 %v12635_v41, %v2837_v19  ;;  %v3360_v16 = vadd.f32 %v12636_v43, %v3245_v31  ;;  %v3647_v12 = vadd.f32 %v12637_v54, %v3543_v40  ;;  %v4164_v5 = vrot.slane %v4151_v9, 1  ;;  %v12639_v19 = vld [vmem:[#allocation196_spill] sm:$0xff] }
 0x551   : > { %v10288_v1 = vadd.f32 %v10105_v22, %v10136_v50  ;;  %v4313_v13 = vsel %vm1232_vm2, %v4310_v4, %v4312_v39  ;;  %v10302_v37 = vmul.f32 %v10283_v62, %v12630_v26  ;;  %v12640_v22 = vld [vmem:[#allocation13_spill] sm:$0xff]  ;;  %v4222_v9 = vmul.f32 %v10039_v58, %v12501_v30 }
 0x552   : > { %v3873_v0 = vpop.permute.xlu2 %3872  ;;  %v3764_v33 = vpop.permute.xlu1 %3763  ;;  %v3464_v15 = vadd.f32 %v12639_v19, %v3360_v16  ;;  %v10307_v50 = vmul.f32 %v10283_v62, %v12640_v22  ;;  %v12643_v16 = vrot.slane %v9930_v38, 1  ;;  %v12645_v19 = vld [vmem:[#allocation244_spill] sm:$0xff]  ;;  %v10327_v38 = vstv %s5194_s14  ;;  %s5208_s14 = sld [smem:[#allocation5 + $0x1]] }
 0x553   : > { %4170 = vrot.lane.b32.xlu2 %v4163_v56, %s11814_s25  ;;  %4166 = vrot.lane.b32.xlu1 %v4159_v42, %s11814_s25  ;;  %v3133_v42 = vadd.f32 %v12638_v27, %v2985_v7  ;;  %v10293_v31 = vadd.f32 %v3873_v0, %v10073_v57  ;;  %v10295_v40 = vadd.f32 %v3764_v33, %v3647_v12  ;;  %v12641_v56 = vld [vmem:[#allocation291_spill] sm:$0xff]  ;;  %v4347_v0 = vrot.slane %v10302_v37, 2  ;;  %v12644_v33 = vld [vmem:[#allocation226_spill] sm:$0xff] }
 0x554   : > { %v4221_v57 = vmul.f32 %v10039_v58, %v12616_v11  ;;  %v12642_v7 = vld [vmem:[#allocation179_spill] sm:$0xff]  ;;  %v4198_v54 = vsel %vm767_vm1, %v12643_v16, %v4197_v52  ;;  %v4165_v12 = vsel %vm767_vm1, %v4162_v63, %v4164_v5  ;;  %v10331_v63 = vadd.f32 %v10170_v28, %v10198_v48  ;;  %v12646_v5 = vld [vmem:[#allocation218_spill] sm:$0xff] }
 0x555   : > { %v3281_v41 = vadd.f32 %v12641_v56, %v3133_v42  ;;  %v3568_v39 = vadd.f32 %v12642_v7, %v3464_v15  ;;  %v4345_v56 = vrot.slane %v10307_v50, 2  ;;  %v10349_v28 = vmul.f32 %v10327_v38, %v12609_v35 }
 0x556   : > { %4320 = vrot.lane.b32.xlu0 %v4313_v13, %s11814_s25  ;;  %v4231_v7 = vrot.slane %v4221_v57, 1 }
 0x557   : > { %v10315_v43 = vpop.permute.xlu0 %3946  ;;  %v3385_v27 = vadd.f32 %v12644_v33, %v3281_v41  ;;  %v3672_v42 = vadd.f32 %v12645_v19, %v3568_v39  ;;  %v4232_v41 = vrot.slane %v4222_v9, 1  ;;  %v4348_v57 = vsel %vm1232_vm2, %v4345_v56, %v4347_v0 }
 0x558   : > { %v10344_v39 = vmul.f32 %v10327_v38, %v12640_v22 }
 0x559   : > { %v3489_v16 = vadd.f32 %v12646_v5, %v3385_v27  ;;  %v4233_v33 = vsel %vm767_vm1, %v4231_v7, %v4232_v41  ;;  %v12648_v27 = vrot.slane %v10018_v51, 1  ;;  %v10367_v51 = vadd.f32 %v10229_v60, %v10251_v2 }
 0x55a   : > { %v3908_v13 = vpop.permute.xlu2 %3907  ;;  %v3799_v15 = vpop.permute.xlu1 %3798  ;;  %v12650_v2 = vrot.slane %v10087_v49, 1 }
 0x55b   : > { %4205 = vrot.lane.b32.xlu2 %v4198_v54, %s11814_s25  ;;  %4172 = vrot.lane.b32.xlu1 %v4165_v12, %s11814_s25  ;;  %v10335_v54 = vadd.f32 %v3908_v13, %v10130_v47  ;;  %v3809_v12 = vadd.f32 %v3799_v15, %v3672_v42  ;;  %v12647_v47 = vld [vmem:[#allocation177_spill] sm:$0xff]  ;;  %v4200_v19 = vsel %vm767_vm1, %v4197_v52, %v12648_v27  ;;  %v11524_v13 = vrot.slane %v10344_v39, 2 }
 0x55c   : > { %v3593_v48 = vadd.f32 %v12647_v47, %v3489_v16  ;;  %v4225_v42 = vmul.f32 %v10039_v58, %v12542_v36  ;;  %v12649_v15 = vld [vmem:[#allocation197_spill] sm:$0xff]  ;;  %v11519_v47 = vrot.slane %v10349_v28, 2 }
 0x55e   : > { %4355 = vrot.lane.b32.xlu0 %v4348_v57, %s11814_s25  ;;  %v3697_v5 = vadd.f32 %v12649_v15, %v3593_v48  ;;  %v4238_v7 = vrot.slane %v4225_v42, 1  ;;  %v4383_v48 = vsel %vm1232_vm2, %v11519_v47, %v11524_v13  ;;  %v12651_v42 = vrot.slane %v10053_v8, 1 }
 0x55f   : > { %v10352_v9 = vpop.permute.xlu0 %3981  ;;  %v10403_v8 = vadd.f32 %v10273_v10, %v10295_v40  ;;  %v12652_v40 = vrot.slane %v10147_v21, 1  ;;  %v10437_v21 = vadd.f32 %v10315_v43, %v3809_v12  ;;  %v12655_v43 = vld [vmem:[#allocation16_spill] sm:$0xff] }
 0x560   : > { %v4235_v15 = vsel %vm767_vm1, %v4232_v41, %v12651_v42 }
 0x562   : > { %v3914_v16 = vpop.permute.xlu2 %3913  ;;  %v3834_v57 = vpop.permute.xlu1 %3833 }
 0x563   : > { %4240 = vrot.lane.b32.xlu2 %v4233_v33, %s11814_s25  ;;  %4207 = vrot.lane.b32.xlu1 %v4200_v19, %s11814_s25  ;;  %v10370_v52 = vadd.f32 %v3914_v16, %v10192_v45  ;;  %v3845_v58 = vadd.f32 %v3834_v57, %v3697_v5  ;;  %v10372_v33 = vstv %s5195_s15  ;;  %v4239_v19 = vsel %vm767_vm1, %v12650_v2, %v4238_v7  ;;  %s5209_s15 = sld [smem:[#allocation5 + $0x2]] }
 0x564   : > { %v10381_v27 = vmul.f32 %v10372_v33, %v12609_v35  ;;  %v4406_v45 = vmul.f32 %v10372_v33, %v12611_v34  ;;  %v4261_v5 = vmul.f32 %v10113_v17, %v12535_v23  ;;  %v4258_v16 = vmul.f32 %v10113_v17, %v12616_v11 }
 0x565   : > { %v10419_v10 = vmul.f32 %v10372_v33, %v12630_v26 }
 0x566   : > { %4390 = vrot.lane.b32.xlu0 %v4383_v48, %s11814_s25  ;;  %v11520_v57 = vrot.slane %v10381_v27, 2  ;;  %v4416_v47 = vrot.slane %v4406_v45, 2  ;;  %v4273_v2 = vrot.slane %v4261_v5, 1  ;;  %v4268_v42 = vrot.slane %v4258_v16, 1 }
 0x567   : > { %v10386_v60 = vpop.permute.xlu0 %3987  ;;  %v4410_v45 = vmul.f32 %v10372_v33, %v12629_v53  ;;  %v4262_v16 = vmul.f32 %v10113_v17, %v12542_v36  ;;  %v10443_v17 = vstv %s5196_s26  ;;  %s5210_s26 = sld [smem:[#allocation5 + $0x3]] }
 0x56a   : > { %v3949_v48 = vpop.permute.xlu2 %3948  ;;  %v3840_v49 = vpop.permute.xlu1 %3839 }
 0x56b   : > { %4246 = vrot.lane.b32.xlu2 %v4239_v19, %s11814_s25  ;;  %4242 = vrot.lane.b32.xlu1 %v4235_v15, %s11814_s25  ;;  %v10406_v41 = vadd.f32 %v3949_v48, %v10244_v3  ;;  %v10409_v7 = vadd.f32 %v3840_v49, %v9961_v29  ;;  %v4418_v19 = vsel %vm1232_vm2, %v4416_v47, %v11520_v57  ;;  %v12653_v47 = vrot.slane %v10165_v20, 1 }
 0x56c   : > { %v4297_v29 = vmul.f32 %v10154_v24, %v12640_v22  ;;  %v4274_v15 = vsel %vm767_vm1, %v12652_v40, %v4273_v2  ;;  %v4423_v48 = vrot.slane %v4410_v45, 2  ;;  %v4275_v40 = vrot.slane %v4262_v16, 1 }
 0x56d   : > { %v4270_v5 = vsel %vm767_vm1, %v4268_v42, %v12653_v47  ;;  %v10510_v25 = vadd.f32 %v10386_v60, %v10409_v7  ;;  %v4372_v7 = vmul.f32 %v10327_v38, %v12630_v26 }
 0x56e   : > { %4425 = vrot.lane.b32.xlu0 %v4418_v19, %s11814_s25  ;;  %v11523_v19 = vrot.slane %v10419_v10, 2  ;;  %v4308_v57 = vrot.slane %v4297_v29, 2  ;;  %v4276_v29 = vsel %vm767_vm1, %v4273_v2, %v4275_v40 }
 0x56f   : > { %v10423_v3 = vpop.permute.xlu0 %4022 }
 0x570   : > { %v4424_v45 = vsel %vm1232_vm2, %v11523_v19, %v4423_v48  ;;  %v4332_v48 = vmul.f32 %v10283_v62, %v12611_v34 }
 0x572   : > { %v3984_v49 = vpop.permute.xlu2 %3983  ;;  %v3875_v24 = vpop.permute.xlu1 %3874 }
 0x573   : > { %4281 = vrot.lane.b32.xlu2 %v4274_v15, %s11814_s25  ;;  %4277 = vrot.lane.b32.xlu1 %v4270_v5, %s11814_s25  ;;  %v10440_v20 = vadd.f32 %v3984_v49, %v10288_v1  ;;  %v3884_v42 = vadd.f32 %v3875_v24, %v10026_v32  ;;  %v12654_v15 = vld [vmem:[#allocation18_spill] sm:$0xff]  ;;  %v10455_v1 = vmul.f32 %v10443_v17, %v12655_v43 }
 0x574   : > { %v10450_v47 = vmul.f32 %v10443_v17, %v12654_v15  ;;  %v4309_v32 = vsel %vm1232_vm2, %v4306_v44, %v4308_v57  ;;  %v4333_v5 = vmul.f32 %v10283_v62, %v12609_v35  ;;  %v10472_v44 = vadd.f32 %v10352_v9, %v3845_v58 }
 0x575   : > { %v11521_v59 = vrot.slane %v10455_v1, 2  ;;  %v4342_v9 = vrot.slane %v4332_v48, 2 }
 0x576   : > { %4431 = vrot.lane.b32.xlu0 %v4424_v45, %s11814_s25  ;;  %v11522_v16 = vrot.slane %v10450_v47, 2  ;;  %v4343_v40 = vrot.slane %v4333_v5, 2  ;;  %v10478_v45 = vstv %s5197_s17  ;;  %s5216_s17 = sshll.u32 %s5447_s22, 7  ;;  %s4927_s22 = scalar_lea.sflag [#allocation3], %s243_s10 }
 0x577   : > { %v10457_v12 = vpop.permute.xlu0 %4057 }
 0x578   : > { %v4344_v5 = vsel %vm1232_vm2, %v4342_v9, %v4343_v40  ;;  %v4346_v60 = vsel %vm1232_vm2, %v4343_v40, %v4345_v56  ;;  %v4384_v56 = vrot.slane %v4372_v7, 2 }
 0x57a   : > { %v4019_v49 = vpop.permute.xlu2 %4018  ;;  %v3910_v24 = vpop.permute.xlu1 %3909 }
 0x57b   : > { %4316 = vrot.lane.b32.xlu2 %v4309_v32, %s11814_s25  ;;  %4283 = vrot.lane.b32.xlu1 %v4276_v29, %s11814_s25  ;;  %v10475_v2 = vadd.f32 %v4019_v49, %v10331_v63  ;;  %v3920_v35 = vadd.f32 %v3910_v24, %v10078_v14  ;;  %v4459_v32 = vsel %vm1232_vm2, %v11521_v59, %v11522_v16  ;;  %v12656_v63 = vld [vmem:[#allocation19_spill] sm:$0xff] }
 0x57c   : > { %v10487_v29 = vmul.f32 %v10478_v45, %v12655_v43  ;;  %v10492_v58 = vmul.f32 %v10478_v45, %v12656_v63  ;;  %v4311_v49 = vsel %vm1232_vm2, %v4308_v57, %v4310_v4  ;;  %v4336_v24 = vmul.f32 %v10283_v62, %v12629_v53 }
 0x57e   : > { %4466 = vrot.lane.b32.xlu0 %v4459_v32, %s11814_s25  ;;  %v4493_v48 = vrot.slane %v10487_v29, 2  ;;  %v10505_v32 = vstv %s5198_s16  ;;  %v4491_v19 = vrot.slane %v10492_v58, 2  ;;  %v4349_v57 = vrot.slane %v4336_v24, 2 }
 0x57f   : > { %v10494_v14 = vpop.permute.xlu0 %4092  ;;  %v10525_v13 = vmul.f32 %v10505_v32, %v12656_v63  ;;  %v4369_v24 = vmul.f32 %v10327_v38, %v12611_v34 }
 0x580   : > { %v4494_v9 = vsel %vm1232_vm2, %v4491_v19, %v4493_v48 }
 0x582   : > { %v4025_v59 = vpop.permute.xlu2 %4024  ;;  %v3945_v16 = vpop.permute.xlu1 %3944 }
 0x583   : > { %4351 = vrot.lane.b32.xlu2 %v4344_v5, %s11814_s25  ;;  %4318 = vrot.lane.b32.xlu1 %v4311_v49, %s11814_s25  ;;  %v10513_v4 = vadd.f32 %v4025_v59, %v10367_v51  ;;  %v3956_v62 = vadd.f32 %v3945_v16, %v10134_v55  ;;  %v12657_v5 = vld [vmem:[#allocation17_spill] sm:$0xff]  ;;  %v4350_v55 = vsel %vm1232_vm2, %v4347_v0, %v4349_v57  ;;  %v11528_v59 = vrot.slane %v10525_v13, 2  ;;  %v12658_v57 = vld [vmem:[#allocation23_spill] sm:$0xff] }
 0x584   : > { %v4517_v49 = vmul.f32 %v10505_v32, %v12657_v5  ;;  %v10544_v0 = vadd.f32 %v10423_v3, %v3884_v42  ;;  %v4521_v34 = vmul.f32 %v10505_v32, %v12658_v57  ;;  %v10560_v3 = vmul.f32 %v10505_v32, %v12654_v15 }
 0x585   : > { %v12659_v42 = vrot.slane %v10344_v39, 2  ;;  %v10578_v39 = vadd.f32 %v10457_v12, %v3920_v35  ;;  %v12661_v35 = vrot.slane %v10381_v27, 2  ;;  %v10613_v27 = vadd.f32 %v10494_v14, %v3956_v62  ;;  %v12663_v14 = vld [vmem:[#allocation47_spill] sm:$0xff] }
 0x586   : > { %4501 = vrot.lane.b32.xlu0 %v4494_v9, %s11814_s25  ;;  %v4527_v16 = vrot.slane %v4517_v49, 2  ;;  %v4379_v49 = vrot.slane %v4369_v24, 2  ;;  %v4534_v24 = vrot.slane %v4521_v34, 2 }
 0x587   : > { %v10528_v51 = vpop.permute.xlu0 %4098 }
 0x588   : > { %v4529_v40 = vsel %vm1232_vm2, %v4527_v16, %v11528_v59  ;;  %v4373_v16 = vmul.f32 %v10327_v38, %v12629_v53  ;;  %v10584_v53 = vstv %s5199_s23 }
 0x589   : > { %v10591_v34 = vmul.f32 %v10584_v53, %v12654_v15 }
 0x58a   : > { %v4060_v37 = vpop.permute.xlu2 %4059  ;;  %v3951_v9 = vpop.permute.xlu1 %3950 }
 0x58b   : > { %4357 = vrot.lane.b32.xlu2 %v4350_v55, %s11814_s25  ;;  %4353 = vrot.lane.b32.xlu1 %v4346_v60, %s11814_s25  ;;  %v10547_v50 = vadd.f32 %v4060_v37, %v10403_v8  ;;  %v10550_v26 = vadd.f32 %v3951_v9, %v10196_v46  ;;  %v4408_v46 = vmul.f32 %v10372_v33, %v12640_v22  ;;  %v12660_v60 = vrot.slane %v10349_v28, 2 }
 0x58c   : > { %v4385_v55 = vsel %vm1232_vm2, %v12659_v42, %v4384_v56  ;;  %v11527_v33 = vrot.slane %v10560_v3, 2 }
 0x58d   : > { %v4381_v7 = vsel %vm1232_vm2, %v4379_v49, %v12660_v60  ;;  %v4419_v9 = vrot.slane %v4408_v46, 2  ;;  %v4386_v49 = vrot.slane %v4373_v16, 2  ;;  %v11526_v60 = vrot.slane %v10591_v34, 2 }
 0x58e   : > { %4536 = vrot.lane.b32.xlu0 %v4529_v40, %s11814_s25  ;;  %v4535_v38 = vsel %vm1232_vm2, %v11527_v33, %v4534_v24 }
 0x58f   : > { %v10564_v8 = vpop.permute.xlu0 %4133  ;;  %v4420_v46 = vsel %vm1232_vm2, %v12661_v35, %v4419_v9  ;;  %v4387_v42 = vsel %vm1232_vm2, %v4384_v56, %v4386_v49 }
 0x592   : > { %v4095_v37 = vpop.permute.xlu2 %4094  ;;  %v3986_v22 = vpop.permute.xlu1 %3985 }
 0x593   : > { %4392 = vrot.lane.b32.xlu2 %v4385_v55, %s11814_s25  ;;  %4388 = vrot.lane.b32.xlu1 %v4381_v7, %s11814_s25  ;;  %v10581_v28 = vadd.f32 %v4095_v37, %v10437_v21  ;;  %v3995_v40 = vadd.f32 %v3986_v22, %v10249_v18  ;;  %v10596_v21 = vmul.f32 %v10584_v53, %v12655_v43 }
 0x594   : > { %v4443_v18 = vmul.f32 %v10443_v17, %v12657_v5  ;;  %v4444_v55 = vmul.f32 %v10443_v17, %v12656_v63 }
 0x595   : > { %v11525_v24 = vrot.slane %v10596_v21, 2 }
 0x596   : > { %4542 = vrot.lane.b32.xlu0 %v4535_v38, %s11814_s25  ;;  %v4453_v37 = vrot.slane %v4443_v18, 2  ;;  %v4454_v49 = vrot.slane %v4444_v55, 2  ;;  %v10619_v38 = vstv %s5200_s6  ;;  %s4938_s6 = scalar_lea.hbm %s11198_s5, %s5216_s17 }
 0x597   : > { %v4570_v35 = vsel %vm1232_vm2, %v11525_v24, %v11526_v60 }
 0x598   : > { %v10600_v12 = vpop.permute.xlu0 %4168  ;;  %v4455_v62 = vsel %vm1232_vm2, %v4453_v37, %v4454_v49 }
 0x59a   : > { %v4021_v16 = vpop.permute.xlu1 %4020 }
 0x59b   : > { %4427 = vrot.lane.b32.xlu2 %v4420_v46, %s11814_s25  ;;  %4394 = vrot.lane.b32.xlu1 %v4387_v42, %s11814_s25  ;;  %v4130_v7 = vpop.permute.xlu2 %4129  ;;  %v4031_v22 = vadd.f32 %v4021_v16, %v10293_v31  ;;  %v12662_v46 = vld [vmem:[#allocation53_spill] sm:$0xff]  ;;  %v12664_v42 = vrot.slane %v10419_v10, 2  ;;  %v10651_v10 = vadd.f32 %v10528_v51, %v10550_v26  ;;  %v12667_v26 = vrot.slane %v10455_v1, 2 }
 0x59c   : > { %v10616_v56 = vadd.f32 %v4130_v7, %v10472_v44  ;;  %v10628_v18 = vmul.f32 %v10619_v38, %v12662_v46  ;;  %v10633_v44 = vmul.f32 %v10619_v38, %v12663_v14  ;;  %v4447_v7 = vmul.f32 %v10443_v17, %v12658_v57 }
 0x59d   : > { %v4422_v55 = vsel %vm1232_vm2, %v4419_v9, %v12664_v42  ;;  %v12665_v42 = vld [vmem:[#allocation35_spill] sm:$0xff]  ;;  %v10719_v29 = vadd.f32 %v10600_v12, %v4031_v22  ;;  %v12669_v22 = vrot.slane %v10525_v13, 2 }
 0x59e   : > { %4577 = vrot.lane.b32.xlu0 %v4570_v35, %s11814_s25  ;;  %v11530_v16 = vrot.slane %v10628_v18, 2  ;;  %v10646_v35 = vstv %s5201_s7  ;;  %v11529_v33 = vrot.slane %v10633_v44, 2  ;;  %v4460_v37 = vrot.slane %v4447_v7, 2  ;;  %s4939_s7 = sshll.u32 %s11100_s12, 4  ;;  %s4940_s7 = int_to_ptr.vmem [resolvable:$true] %s4939_s7 }
 0x59f   : > { %v10666_v59 = vmul.f32 %v10646_v35, %v12663_v14  ;;  %v4480_v7 = vmul.f32 %v10478_v45, %v12657_v5 }
 0x5a0   : > { %v10635_v31 = vpop.permute.xlu0 %4203 }
 0x5a2   : > { %v4056_v60 = vpop.permute.xlu1 %4055 }
 0x5a3   : > { %4462 = vrot.lane.b32.xlu2 %v4455_v62, %s11814_s25  ;;  %4429 = vrot.lane.b32.xlu1 %v4422_v55, %s11814_s25  ;;  %v4067_v17 = vadd.f32 %v4056_v60, %v10335_v54  ;;  %v4605_v62 = vsel %vm1232_vm2, %v11529_v33, %v11530_v16  ;;  %v4628_v55 = vmul.f32 %v10646_v35, %v12665_v42  ;;  %v12666_v54 = vrot.slane %v10450_v47, 2 }
 0x5a4   : > { %v4457_v60 = vsel %vm1232_vm2, %v4454_v49, %v12667_v26  ;;  %v4639_v33 = vrot.slane %v10666_v59, 2 }
 0x5a5   : > { %v4136_v24 = vpop.permute.xlu2 %4135  ;;  %v4461_v51 = vsel %vm1232_vm2, %v12666_v54, %v4460_v37  ;;  %v10685_v37 = vadd.f32 %v10564_v8, %v3995_v40  ;;  %v4490_v54 = vrot.slane %v4480_v7, 2  ;;  %v12668_v8 = vld [vmem:[#allocation64_spill] sm:$0xff]  ;;  %v10754_v13 = vadd.f32 %v10635_v31, %v4067_v17 }
 0x5a6   : > { %v10654_v9 = vadd.f32 %v4136_v24, %v10510_v25  ;;  %4612 = vrot.lane.b32.xlu0 %v4605_v62, %s11814_s25  ;;  %v4483_v24 = vmul.f32 %v10478_v45, %v12654_v15  ;;  %v4638_v62 = vrot.slane %v4628_v55, 2  ;;  %v10701_v40 = vmul.f32 %v10646_v35, %v12668_v8 }
 0x5a7   : > { %v4492_v26 = vsel %vm1232_vm2, %v4490_v54, %v4491_v19  ;;  %v12670_v17 = vrot.slane %v10560_v3, 2 }
 0x5a8   : > { %v10669_v25 = vpop.permute.xlu0 %4209  ;;  %v4495_v49 = vrot.slane %v4483_v24, 2  ;;  %v4640_v55 = vsel %vm1232_vm2, %v4638_v62, %v4639_v33 }
 0x5ab   : > { %4468 = vrot.lane.b32.xlu2 %v4461_v51, %s11814_s25  ;;  %4464 = vrot.lane.b32.xlu1 %v4457_v60, %s11814_s25  ;;  %v4632_v51 = vmul.f32 %v10646_v35, %v12105_v6  ;;  %v4484_v60 = vmul.f32 %v10478_v45, %v12658_v57  ;;  %v10725_v45 = vstv %s5202_s8  ;;  %s4941_s8 = sshll.u32 %s4938_s6, 4  ;;  %s4942_s8 = int_to_ptr.hbm [resolvable:$true] %s4941_s8 }
 0x5ac   : > { %v4062_v16 = vpop.permute.xlu1 %4061  ;;  %v10732_v54 = vmul.f32 %v10725_v45, %v12668_v8 }
 0x5ad   : > { %v4171_v47 = vpop.permute.xlu2 %4170  ;;  %v10691_v15 = vadd.f32 %v4062_v16, %v10370_v52  ;;  %v4519_v52 = vmul.f32 %v10505_v32, %v12655_v43  ;;  %v4496_v16 = vsel %vm1232_vm2, %v4493_v48, %v4495_v49  ;;  %v4645_v24 = vrot.slane %v4632_v51, 2 }
 0x5ae   : > { %v10688_v1 = vadd.f32 %v4171_v47, %v10544_v0  ;;  %4647 = vrot.lane.b32.xlu0 %v4640_v55, %s11814_s25  ;;  %v4643_v32 = vrot.slane %v10701_v40, 2  ;;  %v4497_v48 = vrot.slane %v4484_v60, 2 }
 0x5af   : > { %v4530_v62 = vrot.slane %v4519_v52, 2  ;;  %v4555_v52 = vmul.f32 %v10584_v53, %v12656_v63  ;;  %v10792_v3 = vadd.f32 %v10669_v25, %v10691_v15  ;;  %v12672_v15 = vrot.slane %v10596_v21, 2 }
 0x5b0   : > { %v10705_v0 = vpop.permute.xlu0 %4244  ;;  %v4646_v47 = vsel %vm1232_vm2, %v4643_v32, %v4645_v24  ;;  %v4498_v51 = vsel %vm1232_vm2, %v4495_v49, %v4497_v48 }
 0x5b1   : > { %v4531_v55 = vsel %vm1232_vm2, %v12669_v22, %v4530_v62  ;;  %v4558_v22 = vmul.f32 %v10584_v53, %v12658_v57 }
 0x5b3   : > { %4503 = vrot.lane.b32.xlu2 %v4496_v16, %s11814_s25  ;;  %4499 = vrot.lane.b32.xlu1 %v4492_v26, %s11814_s25  ;;  %v4680_v16 = vrot.slane %v10732_v54, 2 }
 0x5b5   : > { %v4206_v7 = vpop.permute.xlu2 %4205  ;;  %v4097_v43 = vpop.permute.xlu1 %4096 }
 0x5b6   : > { %v10722_v58 = vadd.f32 %v4206_v7, %v10578_v39  ;;  %v4106_v19 = vadd.f32 %v4097_v43, %v10406_v41  ;;  %4653 = vrot.lane.b32.xlu0 %v4646_v47, %s11814_s25  ;;  %v10737_v39 = vmul.f32 %v10725_v45, %v12662_v46  ;;  %v4554_v41 = vmul.f32 %v10584_v53, %v12657_v5 }
 0x5b7   : > { %v4565_v7 = vrot.slane %v4555_v52, 2  ;;  %v10760_v43 = vstv %s5203_s0  ;;  %v4571_v53 = vrot.slane %v4558_v22, 2  ;;  %v4591_v22 = vmul.f32 %v10619_v38, %v12665_v42  ;;  %s5332_s0 = sshra.s32 %s4942_s8, 4  ;;  %s5333_s0 = int_to_ptr.hbm [resolvable:$true] %s5332_s0 }
 0x5b8   : > { %v10741_v12 = vpop.permute.xlu0 %4279  ;;  %v4678_v60 = vrot.slane %v10737_v39, 2  ;;  %v4564_v24 = vrot.slane %v4554_v41, 2  ;;  %v10769_v47 = vmul.f32 %v10760_v43, %v12662_v46  ;;  %v4533_v41 = vsel %vm1232_vm2, %v4530_v62, %v12670_v17  ;;  %p5339_p3 = scmp.lt.s32.totalorder %s5333_s0, %s11198_s5 }
 0x5b9   : > { %v4568_v17 = vsel %vm1232_vm2, %v4565_v7, %v12672_v15  ;;  %v4601_v15 = vrot.slane %v4591_v22, 2 }
 0x5ba   : > { %v4681_v48 = vsel %vm1232_vm2, %v4678_v60, %v4680_v16  ;;  %v4566_v31 = vsel %vm1232_vm2, %v4564_v24, %v4565_v7 }
 0x5bb   : > { %4538 = vrot.lane.b32.xlu2 %v4531_v55, %s11814_s25  ;;  %4505 = vrot.lane.b32.xlu1 %v4498_v51, %s11814_s25  ;;  %v4715_v55 = vrot.slane %v10769_v47, 2  ;;  %v10787_v51 = vstv %s5204_s13  ;;  %s5334_s13 = scalar_lea.hbm %s5333_s0, 128 }
 0x5bc   : > { %p5335_p0 = scmp.ne.s32.totalorder %s5333_s0, %s5334_s13 }
 0x5bd   : > { %v4241_v26 = vpop.permute.xlu2 %4240  ;;  %v4132_v5 = vpop.permute.xlu1 %4131 }
 0x5be   : > { %v10757_v49 = vadd.f32 %v4241_v26, %v10613_v27  ;;  %v4142_v63 = vadd.f32 %v4132_v5, %v10440_v20  ;;  %4688 = vrot.lane.b32.xlu0 %v4681_v48, %s11814_s25  ;;  %v10774_v27 = vmul.f32 %v10760_v43, %v12663_v14  ;;  %v4739_v48 = vmul.f32 %v10787_v51, %v12616_v11  ;;  %p5336_p1 = pnand %p5335_p0, %p5464_p5 }
 0x5c0   : > { %v10776_v20 = vpop.permute.xlu0 %4314  ;;  %v4713_v5 = vrot.slane %v10774_v27, 2  ;;  %p5337_p2 = pneg %p5336_p1 }
 0x5c2   : > { %v4716_v24 = vsel %vm1232_vm2, %v4713_v5, %v4715_v55 }
 0x5c3   : > { %4573 = vrot.lane.b32.xlu2 %v4566_v31, %s11814_s25  ;;  %4540 = vrot.lane.b32.xlu1 %v4533_v41, %s11814_s25  ;;  %v10807_v31 = vmul.f32 %v10787_v51, %v12501_v30  ;;  %v4594_v41 = vmul.f32 %v10619_v38, %v12668_v8 }
 0x5c5   : > { %v4247_v52 = vpop.permute.xlu2 %4246  ;;  %v4167_v26 = vpop.permute.xlu1 %4166 }
 0x5c6   : > { %v10795_v62 = vadd.f32 %v4247_v52, %v10651_v10  ;;  %v4178_v57 = vadd.f32 %v4167_v26, %v10475_v2  ;;  %4723 = vrot.lane.b32.xlu0 %v4716_v24, %s11814_s25  ;;  %v12671_v2 = vrot.slane %v10591_v34, 2  ;;  %v4749_v52 = vrot.slane %v4739_v48, 2 }
 0x5c7   : > { %v4750_v26 = vrot.slane %v10807_v31, 2 }
 0x5c8   : > { %v10810_v10 = vpop.permute.xlu0 %4320  ;;  %v4572_v25 = vsel %vm1232_vm2, %v12671_v2, %v4571_v53  ;;  %v10826_v53 = vadd.f32 %v10705_v0, %v4106_v19  ;;  %v4606_v2 = vrot.slane %v4594_v41, 2  ;;  %v10842_v0 = vmul.f32 %v10787_v51, %v12535_v23 }
 0x5c9   : > { %v4751_v48 = vsel %vm1232_vm2, %v4749_v52, %v4750_v26  ;;  %v12673_v19 = vrot.slane %v10628_v18, 2  ;;  %v12674_v41 = vrot.slane %v10633_v44, 2  ;;  %v4595_v52 = vmul.f32 %v10619_v38, %v12105_v6 }
 0x5ca   : > { %v10860_v18 = vadd.f32 %v10741_v12, %v4142_v63  ;;  %v10866_v38 = vstv %s5205_s9  ;;  %v10895_v59 = vadd.f32 %v10776_v20, %v4178_v57 }
 0x5cb   : > { %4579 = vrot.lane.b32.xlu2 %v4572_v25, %s11814_s25  ;;  %4575 = vrot.lane.b32.xlu1 %v4568_v17, %s11814_s25  ;;  %v4743_v25 = vmul.f32 %v10787_v51, %v12542_v36  ;;  %v4607_v17 = vsel %vm1232_vm2, %v12673_v19, %v4606_v2  ;;  %v4603_v22 = vsel %vm1232_vm2, %v4601_v15, %v12674_v41  ;;  %v4608_v19 = vrot.slane %v4595_v52, 2 }
 0x5cc   : > { %v4666_v41 = vmul.f32 %v10725_v45, %v12663_v14 }
 0x5cd   : > { %v4282_v34 = vpop.permute.xlu2 %4281  ;;  %v4173_v24 = vpop.permute.xlu1 %4172 }
 0x5ce   : > { %v10829_v21 = vadd.f32 %v4282_v34, %v10685_v37  ;;  %v10832_v7 = vadd.f32 %v4173_v24, %v10513_v4  ;;  %4758 = vrot.lane.b32.xlu0 %v4751_v48, %s11814_s25  ;;  %v4630_v4 = vmul.f32 %v10646_v35, %v12662_v46  ;;  %v4756_v34 = vrot.slane %v4743_v25, 2 }
 0x5cf   : > { %v4754_v35 = vrot.slane %v10842_v0, 2 }
 0x5d0   : > { %v10846_v37 = vpop.permute.xlu0 %4355  ;;  %v4641_v48 = vrot.slane %v4630_v4, 2  ;;  %v4609_v4 = vsel %vm1232_vm2, %v4606_v2, %v4608_v19  ;;  %v4676_v2 = vrot.slane %v4666_v41, 2  ;;  %v10901_v19 = vstv %s5206_s30 }
 0x5d1   : > { %v4757_v25 = vsel %vm1232_vm2, %v4754_v35, %v4756_v34  ;;  %v10928_v41 = vstv %s5207_s1  ;;  %v10933_v40 = vadd.f32 %v10810_v10, %v10832_v7  ;;  %v4705_v7 = vmul.f32 %v10760_v43, %v12668_v8  ;;  %s5338_s1 = scalar_lea.hbm %s11198_s5, 256 }
 0x5d2   : > { %v4642_v63 = vsel %vm1232_vm2, %v4639_v33, %v4641_v48  ;;  %v4644_v57 = vsel %vm1232_vm2, %v4641_v48, %v4643_v32  ;;  %v4679_v10 = vsel %vm1232_vm2, %v4676_v2, %v4678_v60  ;;  %p5340_p4 = scmp.lt.s32.totalorder %s5338_s1, %s5334_s13 }
 0x5d3   : > { %4614 = vrot.lane.b32.xlu2 %v4607_v17, %s11814_s25  ;;  %4610 = vrot.lane.b32.xlu1 %v4603_v22, %s11814_s25  ;;  %v10873_v17 = vmul.f32 %v10866_v38, %v12535_v23  ;;  %v4717_v60 = vrot.slane %v4705_v7, 2 }
 0x5d4   : > { %p5341_p7 = por %p5340_p4, %p5339_p3 }
 0x5d5   : > { %v4317_v24 = vpop.permute.xlu2 %4316  ;;  %v4208_v46 = vpop.permute.xlu1 %4207  ;;  %v4791_v22 = vrot.slane %v10873_v17, 2 }
 0x5d6   : > { %v10863_v44 = vadd.f32 %v4317_v24, %v10719_v29  ;;  %v4217_v15 = vadd.f32 %v4208_v46, %v10547_v50  ;;  %4764 = vrot.lane.b32.xlu0 %v4757_v25, %s11814_s25  ;;  %v10878_v29 = vmul.f32 %v10866_v38, %v6107_v61  ;;  %v4665_v50 = vmul.f32 %v10725_v45, %v12665_v42  ;;  %p5342_p8 = pnand %p5341_p7, %p5337_p2 }
 0x5d8   : > { %v10882_v12 = vpop.permute.xlu0 %4390  ;;  %v4789_v24 = vrot.slane %v10878_v29, 2  ;;  %v4675_v46 = vrot.slane %v4665_v50, 2  ;;  %v10910_v50 = vmul.f32 %v10901_v19, %v6107_v61 }
 0x5da   : > { %v4792_v25 = vsel %vm1232_vm2, %v4789_v24, %v4791_v22  ;;  %v4677_v20 = vsel %vm1232_vm2, %v4675_v46, %v4676_v2 }
 0x5db   : > { %4649 = vrot.lane.b32.xlu2 %v4642_v63, %s11814_s25  ;;  %4616 = vrot.lane.b32.xlu1 %v4609_v4, %s11814_s25  ;;  %v4669_v63 = vmul.f32 %v10725_v45, %v12105_v6  ;;  %v4826_v4 = vrot.slane %v10910_v50, 2 }
 0x5dd   : > { %v4352_v52 = vpop.permute.xlu2 %4351  ;;  %v4243_v34 = vpop.permute.xlu1 %4242  ;;  %v4682_v48 = vrot.slane %v4669_v63, 2  ;;  %v4702_v63 = vmul.f32 %v10760_v43, %v12665_v42 }
 0x5de   : > { %v10898_v33 = vadd.f32 %v4352_v52, %v10754_v13  ;;  %v4253_v14 = vadd.f32 %v4243_v34, %v10581_v28  ;;  %4799 = vrot.lane.b32.xlu0 %v4792_v25, %s11814_s25  ;;  %v10915_v13 = vmul.f32 %v10901_v19, %v12501_v30 }
 0x5df   : > { %v4712_v2 = vrot.slane %v4702_v63, 2 }
 0x5e0   : > { %v10917_v28 = vpop.permute.xlu0 %4425  ;;  %v4824_v25 = vrot.slane %v10915_v13, 2 }
 0x5e2   : > { %v4827_v46 = vsel %vm1232_vm2, %v4824_v25, %v4826_v4 }
 0x5e3   : > { %4684 = vrot.lane.b32.xlu2 %v4677_v20, %s11814_s25  ;;  %4651 = vrot.lane.b32.xlu1 %v4644_v57, %s11814_s25  ;;  %v4850_v20 = vmul.f32 %v10928_v41, %v12616_v11  ;;  %v10948_v57 = vmul.f32 %v10928_v41, %v12501_v30 }
 0x5e5   : > { %v4358_v52 = vpop.permute.xlu2 %4357  ;;  %v4278_v34 = vpop.permute.xlu1 %4277 }
 0x5e6   : > { %v10936_v32 = vadd.f32 %v4358_v52, %v10792_v3  ;;  %v4289_v45 = vadd.f32 %v4278_v34, %v10616_v56  ;;  %4834 = vrot.lane.b32.xlu0 %v4827_v46, %s11814_s25  ;;  %v4683_v56 = vsel %vm1232_vm2, %v4680_v16, %v4682_v48  ;;  %v4860_v52 = vrot.slane %v4850_v20, 2 }
 0x5e7   : > { %v4861_v34 = vrot.slane %v10948_v57, 2  ;;  %v10965_v16 = vadd.f32 %v10846_v37, %v4217_v15  ;;  %v4854_v48 = vmul.f32 %v10928_v41, %v12542_v36  ;;  %v10979_v37 = vmul.f32 %v10928_v41, %v12535_v23 }
 0x5e8   : > { %v4432_v3 = vpop.permute.xlu0 %4431  ;;  %v4741_v20 = vmul.f32 %v10787_v51, %v6107_v61 }
 0x5e9   : > { %v4862_v42 = vsel %vm1232_vm2, %v4860_v52, %v4861_v34  ;;  %v4865_v47 = vrot.slane %v10979_v37, 2 }
 0x5ea   : > { %v4752_v51 = vrot.slane %v4741_v20, 2 }
 0x5eb   : > { %4690 = vrot.lane.b32.xlu2 %v4683_v56, %s11814_s25  ;;  %4686 = vrot.lane.b32.xlu1 %v4679_v10, %s11814_s25  ;;  %v4706_v56 = vmul.f32 %v10760_v43, %v12105_v6  ;;  %v4867_v10 = vrot.slane %v4854_v48, 2 }
 0x5ed   : > { %v4393_v54 = vpop.permute.xlu2 %4392  ;;  %v4284_v46 = vpop.permute.xlu1 %4283  ;;  %v4719_v52 = vrot.slane %v4706_v56, 2  ;;  %v4868_v6 = vsel %vm1232_vm2, %v4865_v47, %v4867_v10 }
 0x5ee   : > { %v10968_v39 = vadd.f32 %v4393_v54, %v10826_v53  ;;  %v4292_v8 = vadd.f32 %v4284_v46, %v10654_v9  ;;  %4869 = vrot.lane.b32.xlu0 %v4862_v42, %s11814_s25  ;;  %v4718_v9 = vsel %vm1232_vm2, %v4715_v55, %v4717_v60  ;;  %v4714_v53 = vsel %vm1232_vm2, %v4712_v2, %v4713_v5 }
 0x5ef   : > { %v4401_v55 = vadd.f32 %v10882_v12, %v4253_v14  ;;  %v4753_v54 = vsel %vm1232_vm2, %v4750_v26, %v4752_v51  ;;  %v4720_v12 = vsel %vm1232_vm2, %v4717_v60, %v4719_v52  ;;  %v4437_v2 = vadd.f32 %v10917_v28, %v4289_v45 }
 0x5f0   : > { %v4467_v15 = vpop.permute.xlu0 %4466  ;;  %v4440_v45 = vadd.f32 %v4432_v3, %v4292_v8  ;;  %v4813_v3 = vmul.f32 %v10901_v19, %v12616_v11 }
 0x5f3   : > { %4725 = vrot.lane.b32.xlu2 %v4718_v9, %s11814_s25  ;;  %4721 = vrot.lane.b32.xlu1 %v4714_v53, %s11814_s25  ;;  %v4780_v53 = vmul.f32 %v10866_v38, %v12542_v36 }
 0x5f5   : > { %v4428_v7 = vpop.permute.xlu2 %4427  ;;  %v4319_v63 = vpop.permute.xlu1 %4318  ;;  %v4793_v56 = vrot.slane %v4780_v53, 2 }
 0x5f6   : > { %v10996_v27 = vadd.f32 %v4428_v7, %v10860_v18  ;;  %v4328_v5 = vadd.f32 %v4319_v63, %v10688_v1  ;;  %4875 = vrot.lane.b32.xlu0 %v4868_v6, %s11814_s25  ;;  %v4776_v18 = vmul.f32 %v10866_v38, %v12616_v11  ;;  %v4777_v1 = vmul.f32 %v10866_v38, %v12501_v30 }
 0x5f7   : > { %v4755_v30 = vsel %vm1232_vm2, %v4752_v51, %v4754_v35  ;;  %v4794_v0 = vsel %vm1232_vm2, %v4791_v22, %v4793_v56  ;;  %v4816_v38 = vmul.f32 %v10901_v19, %v12535_v23  ;;  %v4852_v63 = vmul.f32 %v10928_v41, %v6107_v61 }
 0x5f8   : > { %v4502_v43 = vpop.permute.xlu0 %4501  ;;  %v4786_v60 = vrot.slane %v4776_v18, 2  ;;  %v4787_v42 = vrot.slane %v4777_v1, 2  ;;  %v4476_v8 = vadd.f32 %v4467_v15, %v4328_v5 }
 0x5f9   : > { %v4828_v22 = vrot.slane %v4816_v38, 2  ;;  %v4863_v13 = vrot.slane %v4852_v63, 2  ;;  %v4892_v63 = vstv %s5208_s14 }
 0x5fa   : > { %v4788_v9 = vsel %vm1232_vm2, %v4786_v60, %v4787_v42  ;;  %v4790_v35 = vsel %vm1232_vm2, %v4787_v42, %v4789_v24  ;;  %v4823_v24 = vrot.slane %v4813_v3, 2 }
 0x5fb   : > { %4760 = vrot.lane.b32.xlu2 %v4753_v54, %s11814_s25  ;;  %4727 = vrot.lane.b32.xlu1 %v4720_v12, %s11814_s25  ;;  %v4829_v23 = vsel %vm1232_vm2, %v4826_v4, %v4828_v22  ;;  %v4864_v61 = vsel %vm1232_vm2, %v4861_v34, %v4863_v13 }
 0x5fc   : > { %v4825_v11 = vsel %vm1232_vm2, %v4823_v24, %v4824_v25 }
 0x5fd   : > { %v4463_v14 = vpop.permute.xlu2 %4462  ;;  %v4354_v46 = vpop.permute.xlu1 %4353 }
 0x5fe   : > { %v11015_v31 = vadd.f32 %v4463_v14, %v10895_v59  ;;  %v4364_v26 = vadd.f32 %v4354_v46, %v10722_v58 }
 0x600   : > { %v4537_v48 = vpop.permute.xlu0 %4536  ;;  %v4512_v5 = vadd.f32 %v4502_v43, %v4364_v26 }
 0x603   : > { %4795 = vrot.lane.b32.xlu2 %v4788_v9, %s11814_s25  ;;  %4762 = vrot.lane.b32.xlu1 %v4755_v30, %s11814_s25 }
 0x605   : > { %v4469_v59 = vpop.permute.xlu2 %4468  ;;  %v4389_v28 = vpop.permute.xlu1 %4388 }
 0x606   : > { %v11027_v58 = vadd.f32 %v4469_v59, %v10933_v40  ;;  %v4400_v20 = vadd.f32 %v4389_v28, %v10757_v49 }
 0x608   : > { %v4543_v10 = vpop.permute.xlu0 %4542  ;;  %v4548_v52 = vadd.f32 %v4537_v48, %v4400_v20 }
 0x60b   : > { %4801 = vrot.lane.b32.xlu2 %v4794_v0, %s11814_s25  ;;  %4797 = vrot.lane.b32.xlu1 %v4790_v35, %s11814_s25 }
 0x60d   : > { %v4504_v49 = vpop.permute.xlu2 %4503  ;;  %v4395_v40 = vpop.permute.xlu1 %4394 }
 0x60e   : > { %v11043_v17 = vadd.f32 %v4504_v49, %v10965_v16  ;;  %v4403_v29 = vadd.f32 %v4395_v40, %v10795_v62  ;;  %v4817_v16 = vmul.f32 %v10901_v19, %v12542_v36 }
 0x610   : > { %v4578_v7 = vpop.permute.xlu0 %4577  ;;  %v4830_v51 = vrot.slane %v4817_v16, 2  ;;  %v4551_v43 = vadd.f32 %v4543_v10, %v4403_v29 }
 0x612   : > { %v4831_v36 = vsel %vm1232_vm2, %v4828_v22, %v4830_v51 }
 0x613   : > { %4836 = vrot.lane.b32.xlu2 %v4829_v23, %s11814_s25  ;;  %4832 = vrot.lane.b32.xlu1 %v4825_v11, %s11814_s25 }
 0x615   : > { %v4539_v62 = vpop.permute.xlu2 %4538  ;;  %v4430_v15 = vpop.permute.xlu1 %4429 }
 0x616   : > { %v11058_v50 = vadd.f32 %v4539_v62, %v4401_v55  ;;  %v4439_v4 = vadd.f32 %v4430_v15, %v10829_v21  ;;  %v4866_v21 = vsel %vm1232_vm2, %v4863_v13, %v4865_v47 }
 0x618   : > { %v4613_v25 = vpop.permute.xlu0 %4612  ;;  %v4587_v14 = vadd.f32 %v4578_v7, %v4439_v4 }
 0x61b   : > { %4871 = vrot.lane.b32.xlu2 %v4864_v61, %s11814_s25  ;;  %4838 = vrot.lane.b32.xlu1 %v4831_v36, %s11814_s25 }
 0x61d   : > { %v4574_v19 = vpop.permute.xlu2 %4573  ;;  %v4465_v41 = vpop.permute.xlu1 %4464 }
 0x61e   : > { %v11067_v55 = vadd.f32 %v4574_v19, %v4437_v2 }
 0x620   : > { %v4648_v6 = vpop.permute.xlu0 %4647 }
 0x623   : > { %4873 = vrot.lane.b32.xlu1 %v4866_v21, %s11814_s25  ;;  %s4885_s25 = sld [smem:[#allocation5]] }
 0x625   : > { %v4580_v57 = vpop.permute.xlu2 %4579  ;;  %v4500_v34 = vpop.permute.xlu1 %4499 }
 0x626   : > { %v11073_v54 = vadd.f32 %v4580_v57, %v4440_v45 }
 0x628   : > { %v11075_v12 = vpop.permute.xlu0 %4653 }
 0x629   : > { %v11097_v20 = vstv %s4885_s25 }
 0x62d   : > { %v4615_v18 = vpop.permute.xlu2 %4614  ;;  %v4506_v1 = vpop.permute.xlu1 %4505 }
 0x62e   : > { %v11077_v46 = vadd.f32 %v4615_v18, %v4476_v8 }
 0x630   : > { %v11079_v2 = vpop.permute.xlu0 %4688 }
 0x635   : > { %v4650_v37 = vpop.permute.xlu2 %4649  ;;  %v11081_v47 = vpop.permute.xlu1 %4540 }
 0x636   : > { %v11083_v26 = vadd.f32 %v4650_v37, %v4512_v5 }
 0x638   : > { %v11085_v60 = vpop.permute.xlu0 %4723 }
 0x63d   : > { %v4685_v42 = vpop.permute.xlu2 %4684  ;;  %v11087_v48 = vpop.permute.xlu1 %4575 }
 0x63e   : > { %v11089_v9 = vadd.f32 %v4685_v42, %v4548_v52 }
 0x640   : > { %v4759_v30 = vpop.permute.xlu0 %4758 }
 0x645   : > { %v4691_v53 = vpop.permute.xlu2 %4690  ;;  %v4611_v59 = vpop.permute.xlu1 %4610 }
 0x646   : > { %v11092_v28 = vadd.f32 %v4691_v53, %v4551_v43  ;;  %v4622_v45 = vadd.f32 %v4611_v59, %v11015_v31  ;;  %v4475_v31 = vadd.f32 %v4465_v41, %v10863_v44 }
 0x648   : > { %v4770_v56 = vadd.f32 %v4759_v30, %v4622_v45  ;;  %v4765_v0 = vpop.permute.xlu0 %4764  ;;  %v4623_v22 = vadd.f32 %v4613_v25, %v4475_v31  ;;  %v4898_v25 = vstv %s5209_s15 }
 0x64a   : > { %v4887_v10 = vadd.f32 %v11097_v20, %v4770_v56 }
 0x64c   : > { %4910 = vst.msk [vmem:[%s11100_s12] sm:$0xff] %vm4909_vm3, %v4887_v10 }
 0x64d   : > { %v4726_v35 = vpop.permute.xlu2 %4725  ;;  %v4617_v38 = vpop.permute.xlu1 %4616 }
 0x64e   : > { %v11104_v3 = vadd.f32 %v4726_v35, %v4587_v14  ;;  %v4625_v49 = vadd.f32 %v4617_v38, %v11027_v58  ;;  %v4511_v58 = vadd.f32 %v4500_v34, %v10898_v33  ;;  %v4514_v33 = vadd.f32 %v4506_v1, %v10936_v32 }
 0x64f   : > { %v4904_v34 = vstv %s5210_s26  ;;  %v4550_v32 = vadd.f32 %v11081_v47, %v10968_v39  ;;  %v4586_v39 = vadd.f32 %v11087_v48, %v10996_v27 }
 0x650   : > { %v4773_v40 = vadd.f32 %v4765_v0, %v4625_v49  ;;  %v4800_v29 = vpop.permute.xlu0 %4799  ;;  %v4659_v5 = vadd.f32 %v4648_v6, %v4511_v58  ;;  %v4662_v52 = vadd.f32 %v11075_v12, %v4514_v33 }
 0x651   : > { %v4698_v12 = vadd.f32 %v11079_v2, %v4550_v32  ;;  %v4734_v2 = vadd.f32 %v11085_v60, %v4586_v39 }
 0x652   : > { %v4890_v8 = vadd.f32 %v11097_v20, %v4773_v40 }
 0x654   : > { %4913 = vst.msk [vmem:[%s11100_s12 + $0x18] sm:$0xff] %vm4909_vm3, %v4890_v8 }
 0x655   : > { %v4761_v24 = vpop.permute.xlu2 %4760  ;;  %v4652_v7 = vpop.permute.xlu1 %4651 }
 0x656   : > { %v4771_v23 = vadd.f32 %v4761_v24, %v4623_v22  ;;  %v4661_v11 = vadd.f32 %v4652_v7, %v11043_v17 }
 0x658   : > { %v4888_v16 = vadd.f32 %v11097_v20, %v4771_v23  ;;  %v4809_v44 = vadd.f32 %v4800_v29, %v4661_v11  ;;  %v4835_v15 = vpop.permute.xlu0 %4834 }
 0x65a   : > { %4911 = vst.msk [vmem:[%s11100_s12 + $0x8] sm:$0xff] %vm4909_vm3, %v4888_v16  ;;  %v4895_v62 = vadd.f32 %v4892_v63, %v4809_v44 }
 0x65c   : > { %4916 = vst.msk [vmem:[%s11100_s12 + $0x30] sm:$0xff] %vm4909_vm3, %v4895_v62 }
 0x65d   : > { %v4796_v4 = vpop.permute.xlu2 %4795  ;;  %v4687_v13 = vpop.permute.xlu1 %4686 }
 0x65e   : > { %v4807_v51 = vadd.f32 %v4796_v4, %v4659_v5  ;;  %v4697_v17 = vadd.f32 %v4687_v13, %v11058_v50 }
 0x660   : > { %v4893_v61 = vadd.f32 %v4892_v63, %v4807_v51  ;;  %v4845_v36 = vadd.f32 %v4835_v15, %v4697_v17  ;;  %v4870_v41 = vpop.permute.xlu0 %4869 }
 0x662   : > { %4914 = vst.msk [vmem:[%s11100_s12 + $0x20] sm:$0xff] %vm4909_vm3, %v4893_v61  ;;  %v4900_v19 = vadd.f32 %v4898_v25, %v4845_v36 }
 0x664   : > { %4919 = vst.msk [vmem:[%s11100_s12 + $0x48] sm:$0xff] %vm4909_vm3, %v4900_v19 }
 0x665   : > { %v4802_v6 = vpop.permute.xlu2 %4801  ;;  %v4722_v21 = vpop.permute.xlu1 %4721 }
 0x666   : > { %v4810_v57 = vadd.f32 %v4802_v6, %v4662_v52  ;;  %v4733_v50 = vadd.f32 %v4722_v21, %v11067_v55 }
 0x668   : > { %v4896_v43 = vadd.f32 %v4892_v63, %v4810_v57  ;;  %v4881_v18 = vadd.f32 %v4870_v41, %v4733_v50  ;;  %v4876_v30 = vpop.permute.xlu0 %4875 }
 0x66a   : > { %4917 = vst.msk [vmem:[%s11100_s12 + $0x38] sm:$0xff] %vm4909_vm3, %v4896_v43  ;;  %v4905_v1 = vadd.f32 %v4904_v34, %v4881_v18 }
 0x66c   : > { %4922 = vst.msk [vmem:[%s11100_s12 + $0x60] sm:$0xff] %vm4909_vm3, %v4905_v1 }
 0x66d   : > { %v4837_v14 = vpop.permute.xlu2 %4836  ;;  %v4728_v37 = vpop.permute.xlu1 %4727 }
 0x66e   : > { %v4846_v42 = vadd.f32 %v4837_v14, %v4698_v12  ;;  %v4736_v55 = vadd.f32 %v4728_v37, %v11073_v54 }
 0x670   : > { %v4901_v47 = vadd.f32 %v4898_v25, %v4846_v42  ;;  %v4884_v53 = vadd.f32 %v4876_v30, %v4736_v55 }
 0x672   : > { %4920 = vst.msk [vmem:[%s11100_s12 + $0x50] sm:$0xff] %vm4909_vm3, %v4901_v47  ;;  %v4908_v59 = vadd.f32 %v4904_v34, %v4884_v53 }
 0x674   : > { %4925 = vst.msk [vmem:[%s11100_s12 + $0x78] sm:$0xff] %vm4909_vm3, %v4908_v59 }
 0x675   : > { %v4872_v45 = vpop.permute.xlu2 %4871  ;;  %v4763_v56 = vpop.permute.xlu1 %4762 }
 0x676   : > { %v4882_v10 = vadd.f32 %v4872_v45, %v4734_v2  ;;  %v4772_v54 = vadd.f32 %v4763_v56, %v11077_v46 }
 0x678   : > { %v4906_v0 = vadd.f32 %v4904_v34, %v4882_v10  ;;  %v4889_v27 = vadd.f32 %v11097_v20, %v4772_v54 }
 0x67a   : > { %4923 = vst.msk [vmem:[%s11100_s12 + $0x68] sm:$0xff] %vm4909_vm3, %v4906_v0 }
 0x67b   : > { %4912 = vst.msk [vmem:[%s11100_s12 + $0x10] sm:$0xff] %vm4909_vm3, %v4889_v27 }
 0x67d   : > { %v4798_v48 = vpop.permute.xlu1 %4797 }
 0x67e   : > { %v4808_v35 = vadd.f32 %v4798_v48, %v11083_v26 }
 0x680   : > { %v4894_v60 = vadd.f32 %v4892_v63, %v4808_v35 }
 0x682   : > { %4915 = vst.msk [vmem:[%s11100_s12 + $0x28] sm:$0xff] %vm4909_vm3, %v4894_v60 }
 0x685   : > { %v4833_v38 = vpop.permute.xlu1 %4832 }
 0x686   : > { %v4844_v49 = vadd.f32 %v4833_v38, %v11089_v9 }
 0x688   : > { %v4899_v46 = vadd.f32 %v4898_v25, %v4844_v49 }
 0x68a   : > { %4918 = vst.msk [vmem:[%s11100_s12 + $0x40] sm:$0xff] %vm4909_vm3, %v4899_v46 }
 0x68d   : > { %v4839_v20 = vpop.permute.xlu1 %4838 }
 0x68e   : > { %v4847_v31 = vadd.f32 %v4839_v20, %v11092_v28 }
 0x690   : > { %v4902_v40 = vadd.f32 %v4898_v25, %v4847_v31 }
 0x692   : > { %4921 = vst.msk [vmem:[%s11100_s12 + $0x58] sm:$0xff] %vm4909_vm3, %v4902_v40 }
 0x695   : > { %v4874_v26 = vpop.permute.xlu1 %4873 }
 0x696   : > { %v4883_v9 = vadd.f32 %v4874_v26, %v11104_v3 }
 0x698   : > { %v4907_v8 = vadd.f32 %v4904_v34, %v4883_v9 }
 0x69a   : > { %4924 = vst.msk [vmem:[%s11100_s12 + $0x70] sm:$0xff] %vm4909_vm3, %v4907_v8 }
 0x69b   : > { %5345 = shalt.err (!%p5342_p8)
}
 0x69c   : > { %s5394_s10 = smov 128   ;;  %s5395_s12 = smov 8  }
 0x69d   : > { %5231 = dma.vmem_to_hbm [thread:$0]  (%p5464_p5), %s4940_s7, 2048, %s4942_s8, %s4927_s22, %s5394_s10, %s5394_s10, %s5395_s12  }
 0x69e PF: > { %p5248_p9 = scmp.ge.s32.totalorder %s5388_s21, 2  ;;  %s4956_s14 = sand.u32 1, %s5376_s18  }
 0x69f   : > { %s4957_s15 = scalar_lea.sflag [#allocation3], %s4956_s14 }
 0x6a0   : > { %p5241_p10 = pnand %p5248_p9, %p5468_p6 }
 0x6a2   : > { %p5242_p11 = pneg %p5241_p10 }
 0x6a4   : > { %5371 = dma.done.wait (%p5242_p11), %s4957_s15, 2048  }
 0x6a5   : > { %5373 = vsyncadd (%p5242_p11), %s4957_s15, 4294965248  ;;  %p17_p12 = scmp.ge.s32.totalorder %s5451_s24, 4   ;;  %s12675_s18 = smov %s5380_s19 }
 0x6a6   : > { %s12676_s19 = smov %s5384_s20  ;;  %s12677_s20 = smov %s5462_s27 }
 0x6a7   : > { %s12678_s21 = smov %s5451_s24  ;;  %19 = sbr.rel (!%p17_p12) target bundleno = 8 (0x8), region = 84 }
 0x6ac   :  { %4963 = vsyncpa [#allocation3], 1 }
 0x6ad   :  { %4965 = vsyncpa [#allocation3 + $0x1], 1 }
 0x6ae   :  { %4966 = vsyncpa [#allocation4], 1 }
 0x6af   :  { %4968 = vsyncpa [#allocation4 + $0x1], 1 }
 0x6b0   :  { %4969 = vsyncpa [#allocation6], 1 }

</bundles_post_ra>
